<compile_context>
chip_gen: v7x
topology: tpu7x:2x2x1
jax: 0.10.0
libtpu: 0.0.40
codegen_flags: <defaults>
</compile_context>

<pallas_src>
import functools

import numpy as np
import jax
import jax.numpy as jnp
from jax.experimental import pallas as pl
from jax.experimental.pallas import tpu as pltpu


def _round_up(x, m):
    return ((x + m - 1) // m) * m


# --------------------------------------------------------------------------------------
# 1x1 conv (+ folded BN, optional ReLU) as a row-tiled matmul
# --------------------------------------------------------------------------------------

def _matmul_bn_act_kernel(x_ref, w_ref, scale_ref, bias_ref, o_ref, *, relu):
    y = jnp.dot(x_ref[...].astype(jnp.bfloat16), w_ref[...],
                preferred_element_type=jnp.float32)
    y = y * scale_ref[...] + bias_ref[...]
    if relu:
        y = jnp.maximum(y, 0.0)
    o_ref[...] = y.astype(o_ref.dtype)


def matmul_bn_act(x, w_bf16, scale, bias, *, relu, out_dtype=jnp.float32, row_tile=512):
    # row_tile: 512-1024 is good for v5e/v6e; 256-512 for v7x (64 MiB VMEM). 512 is a safe middle.
    rows, cin = x.shape
    cout = w_bf16.shape[1]
    tile = row_tile if rows >= row_tile else _round_up(rows, 16)
    rows_p = _round_up(rows, tile)
    if rows_p != rows:
        x = jnp.pad(x, ((0, rows_p - rows), (0, 0)))
    out = pl.pallas_call(
        functools.partial(_matmul_bn_act_kernel, relu=relu),
        out_shape=jax.ShapeDtypeStruct((rows_p, cout), out_dtype),
        grid=(rows_p // tile,),
        in_specs=[
            pl.BlockSpec((tile, cin), lambda i: (i, 0)),
            pl.BlockSpec((cin, cout), lambda i: (0, 0)),
            pl.BlockSpec((1, cout), lambda i: (0, 0)),
            pl.BlockSpec((1, cout), lambda i: (0, 0)),
        ],
        out_specs=pl.BlockSpec((tile, cout), lambda i: (i, 0)),
        compiler_params=pltpu.CompilerParams(dimension_semantics=("parallel",)),
    )(x, w_bf16, scale.reshape(1, cout), bias.reshape(1, cout))
    return out[:rows] if rows_p != rows else out


# --------------------------------------------------------------------------------------
# Fused conv3 (1x1 + BN) + residual add + final BN + ReLU
# --------------------------------------------------------------------------------------

def _matmul_bn_add_bn_relu_kernel(x_ref, w_ref, s1_ref, b1_ref, s2_ref, b2_ref, o_ref):
    x = x_ref[...]                                                    # also the residual (fp32)
    y = jnp.dot(x.astype(jnp.bfloat16), w_ref[...],
                preferred_element_type=jnp.float32)
    y = y * s1_ref[...] + b1_ref[...]          # conv3 BN
    y = (y + x) * s2_ref[...] + b2_ref[...]    # + residual, then norm BN
    o_ref[...] = jnp.maximum(y, 0.0)           # final ReLU


def matmul_bn_add_bn_relu(x, w_bf16, s1, b1, s2, b2, *, row_tile=512):
    rows, cin = x.shape
    cout = w_bf16.shape[1]
    assert cin == cout, "conv3 output must match residual channels"
    tile = row_tile if rows >= row_tile else _round_up(rows, 16)
    rows_p = _round_up(rows, tile)
    if rows_p != rows:
        x = jnp.pad(x, ((0, rows_p - rows), (0, 0)))
    out = pl.pallas_call(
        _matmul_bn_add_bn_relu_kernel,
        out_shape=jax.ShapeDtypeStruct((rows_p, cout), jnp.float32),
        grid=(rows_p // tile,),
        in_specs=[
            pl.BlockSpec((tile, cin), lambda i: (i, 0)),
            pl.BlockSpec((cin, cout), lambda i: (0, 0)),
            pl.BlockSpec((1, cout), lambda i: (0, 0)),
            pl.BlockSpec((1, cout), lambda i: (0, 0)),
            pl.BlockSpec((1, cout), lambda i: (0, 0)),
            pl.BlockSpec((1, cout), lambda i: (0, 0)),
        ],
        out_specs=pl.BlockSpec((tile, cout), lambda i: (i, 0)),
        compiler_params=pltpu.CompilerParams(dimension_semantics=("parallel",)),
    )(x, w_bf16, s1.reshape(1, cout), b1.reshape(1, cout),
      s2.reshape(1, cout), b2.reshape(1, cout))
    return out[:rows] if rows_p != rows else out


# --------------------------------------------------------------------------------------
# Fused SKConv: per image, compute all M grouped dilated 3x3 convs (+BN+ReLU) as im2col
# matmuls, GAP, fc->fcs channel-attention logits, per-row frequency logits, both
# softmax-over-branches attentions, and the weighted combine — all without leaving VMEM.
# --------------------------------------------------------------------------------------

def _skconv_fused_kernel(xpad_ref, *refs, M, H, W, CIN, Dmax):
    wb = refs[0:M]                        # M x (9*CIN, C) bf16 (block-diag grouped weights)
    sb = refs[M:2 * M]                    # M x (1, C) folded-BN scale
    bb = refs[2 * M:3 * M]                # M x (1, C) folded-BN bias
    wfc_ref, sfc_ref, bfc_ref, wfcs_ref, bfcs_ref = refs[3 * M:3 * M + 5]
    o_ref = refs[3 * M + 5]               # (1, H, W, C) fp32

    xp = xpad_ref[0]                      # (Hp, Wp, CIN) bf16, padded with Dmax on H/W

    # --- M branch convs (im2col matmul per dilation) ---
    ys = []                               # each (H*W, C) fp32
    for m in range(M):
        D = 1 + m
        OFF = Dmax - D
        patches = [xp[OFF + ky * D: OFF + ky * D + H,
                      OFF + kx * D: OFF + kx * D + W, :]
                   for ky in range(3) for kx in range(3)]             # 9 x (H, W, CIN)
        col = jnp.concatenate(patches, axis=-1).reshape(H * W, 9 * CIN)
        y = jnp.dot(col, wb[m][...], preferred_element_type=jnp.float32)
        y = jnp.maximum(y * sb[m][...] + bb[m][...], 0.0)
        ys.append(y)
    C = ys[0].shape[-1]

    # --- channel attention: GAP(sum of branches) -> fc -> fcs -> softmax over M ---
    gap = jnp.sum(ys[0], axis=0, keepdims=True)
    for m in range(1, M):
        gap = gap + jnp.sum(ys[m], axis=0, keepdims=True)
    gap = gap * (1.0 / float(H * W))                                  # (1, C)
    z = jnp.dot(gap.astype(jnp.bfloat16), wfc_ref[...],
                preferred_element_type=jnp.float32)
    z = jnp.maximum(z * sfc_ref[...] + bfc_ref[...], 0.0)             # (1, d)
    logits = jnp.dot(z.astype(jnp.bfloat16), wfcs_ref[...],
                     preferred_element_type=jnp.float32) + bfcs_ref[...]   # (1, M*C)
    ch = [logits[:, m * C:(m + 1) * C] for m in range(M)]
    cmax = ch[0]
    for m in range(1, M):
        cmax = jnp.maximum(cmax, ch[m])
    ce = [jnp.exp(c - cmax) for c in ch]
    cden = ce[0]
    for m in range(1, M):
        cden = cden + ce[m]
    cinv = pl.reciprocal(cden, approx=True)

    # --- frequency attention: sum over C, mean over W, softmax over M (per row) ---
    y3s = [y.reshape(H, W, C) for y in ys]
    frs = [jnp.sum(jnp.sum(y3, axis=2), axis=1, keepdims=True) * (1.0 / float(W))
           for y3 in y3s]                                             # M x (H, 1)
    fmax = frs[0]
    for m in range(1, M):
        fmax = jnp.maximum(fmax, frs[m])
    fe = [jnp.exp(f - fmax) for f in frs]
    fden = fe[0]
    for m in range(1, M):
        fden = fden + fe[m]
    finv = pl.reciprocal(fden, approx=True)

    # --- weighted combine: sum_m feats_m * (a_channel_m + a_frequency_m) ---
    acc = None
    for m in range(M):
        a_ch = (ce[m] * cinv).reshape(1, 1, C)
        a_fr = (fe[m] * finv).reshape(H, 1, 1)
        term = y3s[m] * (a_ch + a_fr)
        acc = term if acc is None else acc + term
    o_ref[...] = acc.reshape(1, H, W, C)


def skconv_fused(xpad, wb_list, sb_list, bb_list, wfc, sfc, bfc, wfcs_cat, bfcs_cat,
                 *, H, W, M, Dmax):
    B, Hp, Wp, cin = xpad.shape
    C = wb_list[0].shape[1]
    d = wfc.shape[1]
    kern = functools.partial(_skconv_fused_kernel, M=M, H=H, W=W, CIN=cin, Dmax=Dmax)
    in_specs = (
        [pl.BlockSpec((1, Hp, Wp, cin), lambda b: (b, 0, 0, 0))]
        + [pl.BlockSpec((9 * cin, C), lambda b: (0, 0))] * M
        + [pl.BlockSpec((1, C), lambda b: (0, 0))] * (2 * M)
        + [pl.BlockSpec((cin, d), lambda b: (0, 0)),
           pl.BlockSpec((1, d), lambda b: (0, 0)),
           pl.BlockSpec((1, d), lambda b: (0, 0)),
           pl.BlockSpec((d, M * C), lambda b: (0, 0)),
           pl.BlockSpec((1, M * C), lambda b: (0, 0))]
    )
    return pl.pallas_call(
        kern,
        out_shape=jax.ShapeDtypeStruct((B, H, W, C), jnp.float32),
        grid=(B,),
        in_specs=in_specs,
        out_specs=pl.BlockSpec((1, H, W, C), lambda b: (b, 0, 0, 0)),
        compiler_params=pltpu.CompilerParams(dimension_semantics=("parallel",)),
    )(xpad, *wb_list,
      *[s.reshape(1, C) for s in sb_list],
      *[b.reshape(1, C) for b in bb_list],
      wfc, sfc.reshape(1, d), bfc.reshape(1, d),
      wfcs_cat, bfcs_cat.reshape(1, M * C))


# --------------------------------------------------------------------------------------
# Parameter construction (deterministic, synthetic; BN folded to inference scale/bias)
# --------------------------------------------------------------------------------------

def _bn_fold(gamma, beta, mean, var, eps=1e-5):
    scale = gamma / jnp.sqrt(var + eps)
    bias = beta - mean * scale
    return scale, bias


def _grouped3x3_to_im2col(wg, G):
    """PyTorch grouped-conv weight (Cout, Cin//G, 3, 3) -> (9*Cin, Cout), block-diagonal per tap,
    matching the in-kernel im2col column order (tap-major, then input channel)."""
    wg = np.asarray(wg)
    cout, cpg, _, _ = wg.shape
    cin = cpg * G
    out_per_g = cout // G
    dense = np.zeros((9, cin, cout), np.float32)
    for co in range(cout):
        g = co // out_per_g
        for cil in range(cpg):
            ci = g * cpg + cil
            for k in range(9):
                dense[k, ci, co] = wg[co, cil, k // 3, k % 3]
    return dense.reshape(9 * cin, cout)


def init_params(key, in_f, mid_f, out_f, *, M=2, G=32, r=16, L=32):
    assert mid_f == out_f, "SKUnit.forward adds conv3(out) + residual -> requires mid == out"
    assert mid_f % G == 0
    d = max(int(mid_f / r), L)
    keys = iter(jax.random.split(key, 64))

    def nrm(shape, std=0.1):
        return std * jax.random.normal(next(keys), shape, jnp.float32)

    def bn_params(c):
        gamma = 1.0 + 0.1 * jax.random.normal(next(keys), (c,), jnp.float32)
        beta = 0.1 * jax.random.normal(next(keys), (c,), jnp.float32)
        mean = 0.1 * jax.random.normal(next(keys), (c,), jnp.float32)
        var = 1.0 + 0.1 * jax.random.uniform(next(keys), (c,), jnp.float32)
        return _bn_fold(gamma, beta, mean, var)

    p = {"M": M, "d": d}

    # conv1: 1x1 in_f -> mid_f (no bias) + BN + ReLU
    p["w1"] = nrm((in_f, mid_f)).astype(jnp.bfloat16)
    p["s1"], p["b1"] = bn_params(mid_f)

    # SKConv branch convs: grouped 3x3, dilation 1+m, + BN + ReLU (im2col weights, bf16)
    p["wb"], p["sb"], p["bb"] = [], [], []
    for _ in range(M):
        wg = nrm((mid_f, mid_f // G, 3, 3))
        p["wb"].append(jnp.asarray(_grouped3x3_to_im2col(np.asarray(wg), G),
                                   dtype=jnp.bfloat16))
        s, b = bn_params(mid_f)
        p["sb"].append(s)
        p["bb"].append(b)

    # SKConv fc: 1x1 mid_f -> d (no bias) + BN + ReLU
    p["wfc"] = nrm((mid_f, d)).astype(jnp.bfloat16)
    p["sfc"], p["bfc"] = bn_params(d)

    # SKConv fcs[m]: 1x1 d -> mid_f with bias; fused into one (d, M*mid) projection
    wfcs = [nrm((d, mid_f)) for _ in range(M)]
    bfcs = [nrm((mid_f,)) for _ in range(M)]
    p["wfcs_cat"] = jnp.concatenate(wfcs, axis=1).astype(jnp.bfloat16)
    p["bfcs_cat"] = jnp.concatenate(bfcs, axis=0)

    # conv3: 1x1 mid_f -> out_f (no bias) + BN (no ReLU)
    p["w3"] = nrm((mid_f, out_f)).astype(jnp.bfloat16)
    p["s3"], p["b3"] = bn_params(out_f)

    # final norm BN
    p["sn"], p["bn"] = bn_params(out_f)
    return p


# --------------------------------------------------------------------------------------
# Forward pass
# --------------------------------------------------------------------------------------

def sk_unit_forward(x_nchw, p):
    M = p["M"]
    # TODO(synk): if the surrounding network is NHWC/Pallas, drop these boundary transposes
    # (or fold them into the first/last kernel's index_map) to save two HBM passes.
    x = jnp.transpose(x_nchw, (0, 2, 3, 1)).astype(jnp.float32)       # NCHW -> NHWC
    B, H, W, cin = x.shape
    mid = p["w1"].shape[1]
    out_f = p["w3"].shape[1]

    # conv1: 1x1 conv + BN + ReLU. Output in bf16 (the branch-conv MXU operands are bf16
    # anyway), halving the HBM traffic into the SKConv kernel.
    h1 = matmul_bn_act(x.reshape(B * H * W, cin), p["w1"], p["s1"], p["b1"],
                       relu=True, out_dtype=jnp.bfloat16)
    h1 = h1.reshape(B, H, W, mid)

    # Pad ONCE with D_max (shared by all dilations), still bf16.
    Dmax = M
    xpad = jnp.pad(h1, ((0, 0), (Dmax, Dmax), (Dmax, Dmax), (0, 0)))

    # Entire SKConv (branch convs + channel & frequency attention + combine) fused per image.
    sk = skconv_fused(xpad, p["wb"], p["sb"], p["bb"],
                      p["wfc"], p["sfc"], p["bfc"], p["wfcs_cat"], p["bfcs_cat"],
                      H=H, W=W, M=M, Dmax=Dmax)                       # (B, H, W, mid) fp32

    # conv3 (1x1 + BN) + residual + norm BN + ReLU, fused
    y = matmul_bn_add_bn_relu(sk.reshape(B * H * W, mid), p["w3"],
                              p["s3"], p["b3"], p["sn"], p["bn"])
    y = y.reshape(B, H, W, out_f)
    return jnp.transpose(y, (0, 3, 1, 2))                             # NHWC -> NCHW


# --------------------------------------------------------------------------------------

if __name__ == "__main__":
    B = 2
    IN_F = MID_F = OUT_F = 64
    H = W = 16
    M, G, r, L = 2, 32, 16, 32

    key = jax.random.PRNGKey(0)
    kx, kp = jax.random.split(key)
    x = jax.random.normal(kx, (B, IN_F, H, W), jnp.float32)           # NCHW, like PyTorch
    params = init_params(kp, IN_F, MID_F, OUT_F, M=M, G=G, r=r, L=L)

    fwd = jax.jit(lambda inp: sk_unit_forward(inp, params))
    out = jax.block_until_ready(fwd(x))

    assert out.shape == (B, OUT_F, H, W), out.shape
    assert bool(jnp.all(jnp.isfinite(out)))
    assert bool(jnp.all(out >= 0.0))   # final ReLU
    print("KERNEL_OK")
</pallas_src>

<mosaic_0001>
module attributes {stable_mosaic.version = 11 : i64} {
  func.func @_skconv_fused_kernel(%arg0: i32, %arg1: memref<1x20x20x64xbf16, #tpu.memory_space<vmem>>, %arg2: memref<576x64xbf16, #tpu.memory_space<vmem>>, %arg3: memref<576x64xbf16, #tpu.memory_space<vmem>>, %arg4: memref<1x64xf32, #tpu.memory_space<vmem>>, %arg5: memref<1x64xf32, #tpu.memory_space<vmem>>, %arg6: memref<1x64xf32, #tpu.memory_space<vmem>>, %arg7: memref<1x64xf32, #tpu.memory_space<vmem>>, %arg8: memref<64x32xbf16, #tpu.memory_space<vmem>>, %arg9: memref<1x32xf32, #tpu.memory_space<vmem>>, %arg10: memref<1x32xf32, #tpu.memory_space<vmem>>, %arg11: memref<32x128xbf16, #tpu.memory_space<vmem>>, %arg12: memref<1x128xf32, #tpu.memory_space<vmem>>, %arg13: memref<1x16x16x64xf32, #tpu.memory_space<vmem>>) attributes {dimension_semantics = [#tpu.dimension_semantics<parallel>], iteration_bounds = array<i64: 2>, scalar_prefetch = 0 : i64, scratch_operands = 0 : i64, tpu.core_type = #tpu.core_type<tc>, window_params = [{transform_indices = @transform_0, window_bounds = array<i64: 1, 20, 20, 64>}, {pipeline_mode = #tpu.pipeline_mode<synchronous>, transform_indices = @transform_1, window_bounds = array<i64: 576, 64>}, {pipeline_mode = #tpu.pipeline_mode<synchronous>, transform_indices = @transform_2, window_bounds = array<i64: 576, 64>}, {pipeline_mode = #tpu.pipeline_mode<synchronous>, transform_indices = @transform_3, window_bounds = array<i64: 1, 64>}, {pipeline_mode = #tpu.pipeline_mode<synchronous>, transform_indices = @transform_4, window_bounds = array<i64: 1, 64>}, {pipeline_mode = #tpu.pipeline_mode<synchronous>, transform_indices = @transform_5, window_bounds = array<i64: 1, 64>}, {pipeline_mode = #tpu.pipeline_mode<synchronous>, transform_indices = @transform_6, window_bounds = array<i64: 1, 64>}, {pipeline_mode = #tpu.pipeline_mode<synchronous>, transform_indices = @transform_7, window_bounds = array<i64: 64, 32>}, {pipeline_mode = #tpu.pipeline_mode<synchronous>, transform_indices = @transform_8, window_bounds = array<i64: 1, 32>}, {pipeline_mode = #tpu.pipeline_mode<synchronous>, transform_indices = @transform_9, window_bounds = array<i64: 1, 32>}, {pipeline_mode = #tpu.pipeline_mode<synchronous>, transform_indices = @transform_10, window_bounds = array<i64: 32, 128>}, {pipeline_mode = #tpu.pipeline_mode<synchronous>, transform_indices = @transform_11, window_bounds = array<i64: 1, 128>}, {transform_indices = @transform_12, window_bounds = array<i64: 1, 16, 16, 64>}]} {
    %c0 = arith.constant 0 : index
    %c0_0 = arith.constant 0 : index
    %c0_1 = arith.constant 0 : index
    %c0_2 = arith.constant 0 : index
    %0 = vector.load %arg1[%c0, %c0_0, %c0_1, %c0_2] : memref<1x20x20x64xbf16, #tpu.memory_space<vmem>>, vector<1x20x20x64xbf16>
    %1 = vector.shape_cast %0 : vector<1x20x20x64xbf16> to vector<20x20x64xbf16>
    %2 = vector.extract_strided_slice %1 {offsets = [1, 1, 0], sizes = [16, 16, 64], strides = [1, 1, 1]} : vector<20x20x64xbf16> to vector<16x16x64xbf16>
    %3 = vector.extract_strided_slice %1 {offsets = [1, 2, 0], sizes = [16, 16, 64], strides = [1, 1, 1]} : vector<20x20x64xbf16> to vector<16x16x64xbf16>
    %4 = vector.extract_strided_slice %1 {offsets = [1, 3, 0], sizes = [16, 16, 64], strides = [1, 1, 1]} : vector<20x20x64xbf16> to vector<16x16x64xbf16>
    %5 = vector.extract_strided_slice %1 {offsets = [2, 1, 0], sizes = [16, 16, 64], strides = [1, 1, 1]} : vector<20x20x64xbf16> to vector<16x16x64xbf16>
    %6 = vector.extract_strided_slice %1 {offsets = [2, 2, 0], sizes = [16, 16, 64], strides = [1, 1, 1]} : vector<20x20x64xbf16> to vector<16x16x64xbf16>
    %7 = vector.extract_strided_slice %1 {offsets = [2, 3, 0], sizes = [16, 16, 64], strides = [1, 1, 1]} : vector<20x20x64xbf16> to vector<16x16x64xbf16>
    %8 = vector.extract_strided_slice %1 {offsets = [3, 1, 0], sizes = [16, 16, 64], strides = [1, 1, 1]} : vector<20x20x64xbf16> to vector<16x16x64xbf16>
    %9 = vector.extract_strided_slice %1 {offsets = [3, 2, 0], sizes = [16, 16, 64], strides = [1, 1, 1]} : vector<20x20x64xbf16> to vector<16x16x64xbf16>
    %10 = vector.extract_strided_slice %1 {offsets = [3, 3, 0], sizes = [16, 16, 64], strides = [1, 1, 1]} : vector<20x20x64xbf16> to vector<16x16x64xbf16>
    %11 = tpu.concatenate %2, %3, %4, %5, %6, %7, %8, %9, %10 in 2 : vector<16x16x64xbf16>, vector<16x16x64xbf16>, vector<16x16x64xbf16>, vector<16x16x64xbf16>, vector<16x16x64xbf16>, vector<16x16x64xbf16>, vector<16x16x64xbf16>, vector<16x16x64xbf16>, vector<16x16x64xbf16> -> vector<16x16x576xbf16>
    %12 = vector.shape_cast %11 : vector<16x16x576xbf16> to vector<256x576xbf16>
    %c0_3 = arith.constant 0 : index
    %c0_4 = arith.constant 0 : index
    %13 = vector.load %arg2[%c0_3, %c0_4] : memref<576x64xbf16, #tpu.memory_space<vmem>>, vector<576x64xbf16>
    %cst = arith.constant dense<0.000000e+00> : vector<256x64xf32>
    %14 = tpu.matmul %12, %13, %cst {dimension_numbers = #tpu.dot_dimension_numbers<[1], [0], [0], [1], [0, 0, 1, 1], [], []>} : vector<256x576xbf16>, vector<576x64xbf16>, vector<256x64xf32> -> vector<256x64xf32>
    %c0_5 = arith.constant 0 : index
    %c0_6 = arith.constant 0 : index
    %15 = vector.load %arg4[%c0_5, %c0_6] : memref<1x64xf32, #tpu.memory_space<vmem>>, vector<1x64xf32>
    %16 = vector.broadcast %15 : vector<1x64xf32> to vector<256x64xf32>
    %17 = arith.mulf %14, %16 : vector<256x64xf32>
    %c0_7 = arith.constant 0 : index
    %c0_8 = arith.constant 0 : index
    %18 = vector.load %arg6[%c0_7, %c0_8] : memref<1x64xf32, #tpu.memory_space<vmem>>, vector<1x64xf32>
    %19 = vector.broadcast %18 : vector<1x64xf32> to vector<256x64xf32>
    %20 = arith.addf %17, %19 : vector<256x64xf32>
    %cst_9 = arith.constant 0.000000e+00 : f32
    %21 = vector.broadcast %cst_9 : f32 to vector<256x64xf32>
    %22 = arith.maximumf %20, %21 : vector<256x64xf32>
    %23 = vector.extract_strided_slice %1 {offsets = [0, 0, 0], sizes = [16, 16, 64], strides = [1, 1, 1]} : vector<20x20x64xbf16> to vector<16x16x64xbf16>
    %24 = vector.extract_strided_slice %1 {offsets = [0, 2, 0], sizes = [16, 16, 64], strides = [1, 1, 1]} : vector<20x20x64xbf16> to vector<16x16x64xbf16>
    %25 = vector.extract_strided_slice %1 {offsets = [0, 4, 0], sizes = [16, 16, 64], strides = [1, 1, 1]} : vector<20x20x64xbf16> to vector<16x16x64xbf16>
    %26 = vector.extract_strided_slice %1 {offsets = [2, 0, 0], sizes = [16, 16, 64], strides = [1, 1, 1]} : vector<20x20x64xbf16> to vector<16x16x64xbf16>
    %27 = vector.extract_strided_slice %1 {offsets = [2, 2, 0], sizes = [16, 16, 64], strides = [1, 1, 1]} : vector<20x20x64xbf16> to vector<16x16x64xbf16>
    %28 = vector.extract_strided_slice %1 {offsets = [2, 4, 0], sizes = [16, 16, 64], strides = [1, 1, 1]} : vector<20x20x64xbf16> to vector<16x16x64xbf16>
    %29 = vector.extract_strided_slice %1 {offsets = [4, 0, 0], sizes = [16, 16, 64], strides = [1, 1, 1]} : vector<20x20x64xbf16> to vector<16x16x64xbf16>
    %30 = vector.extract_strided_slice %1 {offsets = [4, 2, 0], sizes = [16, 16, 64], strides = [1, 1, 1]} : vector<20x20x64xbf16> to vector<16x16x64xbf16>
    %31 = vector.extract_strided_slice %1 {offsets = [4, 4, 0], sizes = [16, 16, 64], strides = [1, 1, 1]} : vector<20x20x64xbf16> to vector<16x16x64xbf16>
    %32 = tpu.concatenate %23, %24, %25, %26, %27, %28, %29, %30, %31 in 2 : vector<16x16x64xbf16>, vector<16x16x64xbf16>, vector<16x16x64xbf16>, vector<16x16x64xbf16>, vector<16x16x64xbf16>, vector<16x16x64xbf16>, vector<16x16x64xbf16>, vector<16x16x64xbf16>, vector<16x16x64xbf16> -> vector<16x16x576xbf16>
    %33 = vector.shape_cast %32 : vector<16x16x576xbf16> to vector<256x576xbf16>
    %c0_10 = arith.constant 0 : index
    %c0_11 = arith.constant 0 : index
    %34 = vector.load %arg3[%c0_10, %c0_11] : memref<576x64xbf16, #tpu.memory_space<vmem>>, vector<576x64xbf16>
    %cst_12 = arith.constant dense<0.000000e+00> : vector<256x64xf32>
    %35 = tpu.matmul %33, %34, %cst_12 {dimension_numbers = #tpu.dot_dimension_numbers<[1], [0], [0], [1], [0, 0, 1, 1], [], []>} : vector<256x576xbf16>, vector<576x64xbf16>, vector<256x64xf32> -> vector<256x64xf32>
    %c0_13 = arith.constant 0 : index
    %c0_14 = arith.constant 0 : index
    %36 = vector.load %arg5[%c0_13, %c0_14] : memref<1x64xf32, #tpu.memory_space<vmem>>, vector<1x64xf32>
    %37 = vector.broadcast %36 : vector<1x64xf32> to vector<256x64xf32>
    %38 = arith.mulf %35, %37 : vector<256x64xf32>
    %c0_15 = arith.constant 0 : index
    %c0_16 = arith.constant 0 : index
    %39 = vector.load %arg7[%c0_15, %c0_16] : memref<1x64xf32, #tpu.memory_space<vmem>>, vector<1x64xf32>
    %40 = vector.broadcast %39 : vector<1x64xf32> to vector<256x64xf32>
    %41 = arith.addf %38, %40 : vector<256x64xf32>
    %cst_17 = arith.constant 0.000000e+00 : f32
    %42 = vector.broadcast %cst_17 : f32 to vector<256x64xf32>
    %43 = arith.maximumf %41, %42 : vector<256x64xf32>
    %cst_18 = arith.constant dense<0.000000e+00> : vector<64xf32>
    %44 = vector.multi_reduction <add>, %22, %cst_18 [0] : vector<256x64xf32> to vector<64xf32>
    %45 = vector.shape_cast %44 : vector<64xf32> to vector<1x64xf32>
    %cst_19 = arith.constant dense<0.000000e+00> : vector<64xf32>
    %46 = vector.multi_reduction <add>, %43, %cst_19 [0] : vector<256x64xf32> to vector<64xf32>
    %47 = vector.shape_cast %46 : vector<64xf32> to vector<1x64xf32>
    %48 = arith.addf %45, %47 : vector<1x64xf32>
    %cst_20 = arith.constant 3.906250e-03 : f32
    %49 = vector.broadcast %cst_20 : f32 to vector<1x64xf32>
    %50 = arith.mulf %48, %49 : vector<1x64xf32>
    %51 = arith.truncf %50 : vector<1x64xf32> to vector<1x64xbf16>
    %c0_21 = arith.constant 0 : index
    %c0_22 = arith.constant 0 : index
    %52 = vector.load %arg8[%c0_21, %c0_22] : memref<64x32xbf16, #tpu.memory_space<vmem>>, vector<64x32xbf16>
    %cst_23 = arith.constant dense<0.000000e+00> : vector<1x32xf32>
    %53 = tpu.matmul %51, %52, %cst_23 {dimension_numbers = #tpu.dot_dimension_numbers<[1], [0], [0], [1], [0, 0, 1, 1], [], []>} : vector<1x64xbf16>, vector<64x32xbf16>, vector<1x32xf32> -> vector<1x32xf32>
    %c0_24 = arith.constant 0 : index
    %c0_25 = arith.constant 0 : index
    %54 = vector.load %arg9[%c0_24, %c0_25] : memref<1x32xf32, #tpu.memory_space<vmem>>, vector<1x32xf32>
    %55 = arith.mulf %53, %54 : vector<1x32xf32>
    %c0_26 = arith.constant 0 : index
    %c0_27 = arith.constant 0 : index
    %56 = vector.load %arg10[%c0_26, %c0_27] : memref<1x32xf32, #tpu.memory_space<vmem>>, vector<1x32xf32>
    %57 = arith.addf %55, %56 : vector<1x32xf32>
    %cst_28 = arith.constant 0.000000e+00 : f32
    %58 = vector.broadcast %cst_28 : f32 to vector<1x32xf32>
    %59 = arith.maximumf %57, %58 : vector<1x32xf32>
    %60 = arith.truncf %59 : vector<1x32xf32> to vector<1x32xbf16>
    %c0_29 = arith.constant 0 : index
    %c0_30 = arith.constant 0 : index
    %61 = vector.load %arg11[%c0_29, %c0_30] : memref<32x128xbf16, #tpu.memory_space<vmem>>, vector<32x128xbf16>
    %cst_31 = arith.constant dense<0.000000e+00> : vector<1x128xf32>
    %62 = tpu.matmul %60, %61, %cst_31 {dimension_numbers = #tpu.dot_dimension_numbers<[1], [0], [0], [1], [0, 0, 1, 1], [], []>} : vector<1x32xbf16>, vector<32x128xbf16>, vector<1x128xf32> -> vector<1x128xf32>
    %c0_32 = arith.constant 0 : index
    %c0_33 = arith.constant 0 : index
    %63 = vector.load %arg12[%c0_32, %c0_33] : memref<1x128xf32, #tpu.memory_space<vmem>>, vector<1x128xf32>
    %64 = arith.addf %62, %63 : vector<1x128xf32>
    %65 = vector.extract_strided_slice %64 {offsets = [0, 0], sizes = [1, 64], strides = [1, 1]} : vector<1x128xf32> to vector<1x64xf32>
    %66 = vector.extract_strided_slice %64 {offsets = [0, 64], sizes = [1, 64], strides = [1, 1]} : vector<1x128xf32> to vector<1x64xf32>
    %67 = arith.maximumf %65, %66 : vector<1x64xf32>
    %68 = arith.subf %65, %67 : vector<1x64xf32>
    %69 = math.exp %68 : vector<1x64xf32>
    %70 = arith.subf %66, %67 : vector<1x64xf32>
    %71 = math.exp %70 : vector<1x64xf32>
    %72 = arith.addf %69, %71 : vector<1x64xf32>
    %73 = tpu.reciprocal %72 {approx = true} : vector<1x64xf32> -> vector<1x64xf32>
    %74 = vector.shape_cast %22 : vector<256x64xf32> to vector<16x16x64xf32>
    %75 = vector.shape_cast %43 : vector<256x64xf32> to vector<16x16x64xf32>
    %cst_34 = arith.constant dense<0.000000e+00> : vector<16x16xf32>
    %76 = vector.multi_reduction <add>, %74, %cst_34 [2] : vector<16x16x64xf32> to vector<16x16xf32>
    %cst_35 = arith.constant dense<0.000000e+00> : vector<16xf32>
    %77 = vector.multi_reduction <add>, %76, %cst_35 [1] : vector<16x16xf32> to vector<16xf32>
    %78 = vector.shape_cast %77 : vector<16xf32> to vector<16x1xf32>
    %cst_36 = arith.constant 6.250000e-02 : f32
    %79 = vector.broadcast %cst_36 : f32 to vector<16x1xf32>
    %80 = arith.mulf %78, %79 : vector<16x1xf32>
    %cst_37 = arith.constant dense<0.000000e+00> : vector<16x16xf32>
    %81 = vector.multi_reduction <add>, %75, %cst_37 [2] : vector<16x16x64xf32> to vector<16x16xf32>
    %cst_38 = arith.constant dense<0.000000e+00> : vector<16xf32>
    %82 = vector.multi_reduction <add>, %81, %cst_38 [1] : vector<16x16xf32> to vector<16xf32>
    %83 = vector.shape_cast %82 : vector<16xf32> to vector<16x1xf32>
    %cst_39 = arith.constant 6.250000e-02 : f32
    %84 = vector.broadcast %cst_39 : f32 to vector<16x1xf32>
    %85 = arith.mulf %83, %84 : vector<16x1xf32>
    %86 = arith.maximumf %80, %85 : vector<16x1xf32>
    %87 = arith.subf %80, %86 : vector<16x1xf32>
    %88 = math.exp %87 : vector<16x1xf32>
    %89 = arith.subf %85, %86 : vector<16x1xf32>
    %90 = math.exp %89 : vector<16x1xf32>
    %91 = arith.addf %88, %90 : vector<16x1xf32>
    %92 = tpu.reciprocal %91 {approx = true} : vector<16x1xf32> -> vector<16x1xf32>
    %93 = arith.mulf %69, %73 : vector<1x64xf32>
    %94 = vector.shape_cast %93 : vector<1x64xf32> to vector<1x1x64xf32>
    %95 = arith.mulf %88, %92 : vector<16x1xf32>
    %96 = vector.shape_cast %95 : vector<16x1xf32> to vector<16x1x1xf32>
    %97 = vector.broadcast %94 : vector<1x1x64xf32> to vector<16x1x64xf32>
    %98 = vector.broadcast %96 : vector<16x1x1xf32> to vector<16x1x64xf32>
    %99 = arith.addf %97, %98 : vector<16x1x64xf32>
    %100 = vector.broadcast %99 : vector<16x1x64xf32> to vector<16x16x64xf32>
    %101 = arith.mulf %74, %100 : vector<16x16x64xf32>
    %102 = arith.mulf %71, %73 : vector<1x64xf32>
    %103 = vector.shape_cast %102 : vector<1x64xf32> to vector<1x1x64xf32>
    %104 = arith.mulf %90, %92 : vector<16x1xf32>
    %105 = vector.shape_cast %104 : vector<16x1xf32> to vector<16x1x1xf32>
    %106 = vector.broadcast %103 : vector<1x1x64xf32> to vector<16x1x64xf32>
    %107 = vector.broadcast %105 : vector<16x1x1xf32> to vector<16x1x64xf32>
    %108 = arith.addf %106, %107 : vector<16x1x64xf32>
    %109 = vector.broadcast %108 : vector<16x1x64xf32> to vector<16x16x64xf32>
    %110 = arith.mulf %75, %109 : vector<16x16x64xf32>
    %111 = arith.addf %101, %110 : vector<16x16x64xf32>
    %112 = vector.shape_cast %111 : vector<16x16x64xf32> to vector<1x16x16x64xf32>
    %c0_40 = arith.constant 0 : index
    %c0_41 = arith.constant 0 : index
    %c0_42 = arith.constant 0 : index
    %c0_43 = arith.constant 0 : index
    %113 = vector.load %arg13[%c0_40, %c0_41, %c0_42, %c0_43] : memref<1x16x16x64xf32, #tpu.memory_space<vmem>>, vector<1x16x16x64xf32>
    tpu.vector_store %arg13[%c0_40, %c0_41, %c0_42, %c0_43], %112 {strides = array<i32>} : memref<1x16x16x64xf32, #tpu.memory_space<vmem>>, vector<1x16x16x64xf32>,
    return
  }
  func.func @transform_0(%arg0: i32) -> (i32, i32, i32, i32) {
    %c0_i32 = arith.constant 0 : i32
    %c0_i32_0 = arith.constant 0 : i32
    %c0_i32_1 = arith.constant 0 : i32
    %c0_i32_2 = arith.constant 0 : i32
    return %arg0, %c0_i32, %c0_i32_0, %c0_i32_1 : i32, i32, i32, i32
  }
  func.func @transform_1(%arg0: i32) -> (i32, i32) {
    %c0_i32 = arith.constant 0 : i32
    %c0_i32_0 = arith.constant 0 : i32
    %c0_i32_1 = arith.constant 0 : i32
    return %c0_i32, %c0_i32_0 : i32, i32
  }
  func.func @transform_2(%arg0: i32) -> (i32, i32) {
    %c0_i32 = arith.constant 0 : i32
    %c0_i32_0 = arith.constant 0 : i32
    %c0_i32_1 = arith.constant 0 : i32
    return %c0_i32, %c0_i32_0 : i32, i32
  }
  func.func @transform_3(%arg0: i32) -> (i32, i32) {
    %c0_i32 = arith.constant 0 : i32
    %c0_i32_0 = arith.constant 0 : i32
    %c0_i32_1 = arith.constant 0 : i32
    return %c0_i32, %c0_i32_0 : i32, i32
  }
  func.func @transform_4(%arg0: i32) -> (i32, i32) {
    %c0_i32 = arith.constant 0 : i32
    %c0_i32_0 = arith.constant 0 : i32
    %c0_i32_1 = arith.constant 0 : i32
    return %c0_i32, %c0_i32_0 : i32, i32
  }
  func.func @transform_5(%arg0: i32) -> (i32, i32) {
    %c0_i32 = arith.constant 0 : i32
    %c0_i32_0 = arith.constant 0 : i32
    %c0_i32_1 = arith.constant 0 : i32
    return %c0_i32, %c0_i32_0 : i32, i32
  }
  func.func @transform_6(%arg0: i32) -> (i32, i32) {
    %c0_i32 = arith.constant 0 : i32
    %c0_i32_0 = arith.constant 0 : i32
    %c0_i32_1 = arith.constant 0 : i32
    return %c0_i32, %c0_i32_0 : i32, i32
  }
  func.func @transform_7(%arg0: i32) -> (i32, i32) {
    %c0_i32 = arith.constant 0 : i32
    %c0_i32_0 = arith.constant 0 : i32
    %c0_i32_1 = arith.constant 0 : i32
    return %c0_i32, %c0_i32_0 : i32, i32
  }
  func.func @transform_8(%arg0: i32) -> (i32, i32) {
    %c0_i32 = arith.constant 0 : i32
    %c0_i32_0 = arith.constant 0 : i32
    %c0_i32_1 = arith.constant 0 : i32
    return %c0_i32, %c0_i32_0 : i32, i32
  }
  func.func @transform_9(%arg0: i32) -> (i32, i32) {
    %c0_i32 = arith.constant 0 : i32
    %c0_i32_0 = arith.constant 0 : i32
    %c0_i32_1 = arith.constant 0 : i32
    return %c0_i32, %c0_i32_0 : i32, i32
  }
  func.func @transform_10(%arg0: i32) -> (i32, i32) {
    %c0_i32 = arith.constant 0 : i32
    %c0_i32_0 = arith.constant 0 : i32
    %c0_i32_1 = arith.constant 0 : i32
    return %c0_i32, %c0_i32_0 : i32, i32
  }
  func.func @transform_11(%arg0: i32) -> (i32, i32) {
    %c0_i32 = arith.constant 0 : i32
    %c0_i32_0 = arith.constant 0 : i32
    %c0_i32_1 = arith.constant 0 : i32
    return %c0_i32, %c0_i32_0 : i32, i32
  }
  func.func @transform_12(%arg0: i32) -> (i32, i32, i32, i32) {
    %c0_i32 = arith.constant 0 : i32
    %c0_i32_0 = arith.constant 0 : i32
    %c0_i32_1 = arith.constant 0 : i32
    %c0_i32_2 = arith.constant 0 : i32
    return %arg0, %c0_i32, %c0_i32_0, %c0_i32_1 : i32, i32, i32, i32
  }
}

module attributes {stable_mosaic.version = 11 : i64} {
  func.func @_matmul_bn_add_bn_relu_kernel(%arg0: i32, %arg1: memref<512x64xf32, #tpu.memory_space<vmem>>, %arg2: memref<64x64xbf16, #tpu.memory_space<vmem>>, %arg3: memref<1x64xf32, #tpu.memory_space<vmem>>, %arg4: memref<1x64xf32, #tpu.memory_space<vmem>>, %arg5: memref<1x64xf32, #tpu.memory_space<vmem>>, %arg6: memref<1x64xf32, #tpu.memory_space<vmem>>, %arg7: memref<512x64xf32, #tpu.memory_space<vmem>>) attributes {dimension_semantics = [#tpu.dimension_semantics<parallel>], iteration_bounds = array<i64: 1>, scalar_prefetch = 0 : i64, scratch_operands = 0 : i64, tpu.core_type = #tpu.core_type<tc>, window_params = [{transform_indices = @transform_0, window_bounds = array<i64: 512, 64>}, {pipeline_mode = #tpu.pipeline_mode<synchronous>, transform_indices = @transform_1, window_bounds = array<i64: 64, 64>}, {pipeline_mode = #tpu.pipeline_mode<synchronous>, transform_indices = @transform_2, window_bounds = array<i64: 1, 64>}, {pipeline_mode = #tpu.pipeline_mode<synchronous>, transform_indices = @transform_3, window_bounds = array<i64: 1, 64>}, {pipeline_mode = #tpu.pipeline_mode<synchronous>, transform_indices = @transform_4, window_bounds = array<i64: 1, 64>}, {pipeline_mode = #tpu.pipeline_mode<synchronous>, transform_indices = @transform_5, window_bounds = array<i64: 1, 64>}, {transform_indices = @transform_6, window_bounds = array<i64: 512, 64>}]} {
    %c0 = arith.constant 0 : index
    %c0_0 = arith.constant 0 : index
    %0 = vector.load %arg1[%c0, %c0_0] : memref<512x64xf32, #tpu.memory_space<vmem>>, vector<512x64xf32>
    %1 = arith.truncf %0 : vector<512x64xf32> to vector<512x64xbf16>
    %c0_1 = arith.constant 0 : index
    %c0_2 = arith.constant 0 : index
    %2 = vector.load %arg2[%c0_1, %c0_2] : memref<64x64xbf16, #tpu.memory_space<vmem>>, vector<64x64xbf16>
    %cst = arith.constant dense<0.000000e+00> : vector<512x64xf32>
    %3 = tpu.matmul %1, %2, %cst {dimension_numbers = #tpu.dot_dimension_numbers<[1], [0], [0], [1], [0, 0, 1, 1], [], []>} : vector<512x64xbf16>, vector<64x64xbf16>, vector<512x64xf32> -> vector<512x64xf32>
    %c0_3 = arith.constant 0 : index
    %c0_4 = arith.constant 0 : index
    %4 = vector.load %arg3[%c0_3, %c0_4] : memref<1x64xf32, #tpu.memory_space<vmem>>, vector<1x64xf32>
    %5 = vector.broadcast %4 : vector<1x64xf32> to vector<512x64xf32>
    %6 = arith.mulf %3, %5 : vector<512x64xf32>
    %c0_5 = arith.constant 0 : index
    %c0_6 = arith.constant 0 : index
    %7 = vector.load %arg4[%c0_5, %c0_6] : memref<1x64xf32, #tpu.memory_space<vmem>>, vector<1x64xf32>
    %8 = vector.broadcast %7 : vector<1x64xf32> to vector<512x64xf32>
    %9 = arith.addf %6, %8 : vector<512x64xf32>
    %10 = arith.addf %9, %0 : vector<512x64xf32>
    %c0_7 = arith.constant 0 : index
    %c0_8 = arith.constant 0 : index
    %11 = vector.load %arg5[%c0_7, %c0_8] : memref<1x64xf32, #tpu.memory_space<vmem>>, vector<1x64xf32>
    %12 = vector.broadcast %11 : vector<1x64xf32> to vector<512x64xf32>
    %13 = arith.mulf %10, %12 : vector<512x64xf32>
    %c0_9 = arith.constant 0 : index
    %c0_10 = arith.constant 0 : index
    %14 = vector.load %arg6[%c0_9, %c0_10] : memref<1x64xf32, #tpu.memory_space<vmem>>, vector<1x64xf32>
    %15 = vector.broadcast %14 : vector<1x64xf32> to vector<512x64xf32>
    %16 = arith.addf %13, %15 : vector<512x64xf32>
    %cst_11 = arith.constant 0.000000e+00 : f32
    %17 = vector.broadcast %cst_11 : f32 to vector<512x64xf32>
    %18 = arith.maximumf %16, %17 : vector<512x64xf32>
    %c0_12 = arith.constant 0 : index
    %c0_13 = arith.constant 0 : index
    %19 = vector.load %arg7[%c0_12, %c0_13] : memref<512x64xf32, #tpu.memory_space<vmem>>, vector<512x64xf32>
    tpu.vector_store %arg7[%c0_12, %c0_13], %18 {strides = array<i32>} : memref<512x64xf32, #tpu.memory_space<vmem>>, vector<512x64xf32>,
    return
  }
  func.func @transform_0(%arg0: i32) -> (i32, i32) {
    %c0_i32 = arith.constant 0 : i32
    %c0_i32_0 = arith.constant 0 : i32
    return %arg0, %c0_i32 : i32, i32
  }
  func.func @transform_1(%arg0: i32) -> (i32, i32) {
    %c0_i32 = arith.constant 0 : i32
    %c0_i32_0 = arith.constant 0 : i32
    %c0_i32_1 = arith.constant 0 : i32
    return %c0_i32, %c0_i32_0 : i32, i32
  }
  func.func @transform_2(%arg0: i32) -> (i32, i32) {
    %c0_i32 = arith.constant 0 : i32
    %c0_i32_0 = arith.constant 0 : i32
    %c0_i32_1 = arith.constant 0 : i32
    return %c0_i32, %c0_i32_0 : i32, i32
  }
  func.func @transform_3(%arg0: i32) -> (i32, i32) {
    %c0_i32 = arith.constant 0 : i32
    %c0_i32_0 = arith.constant 0 : i32
    %c0_i32_1 = arith.constant 0 : i32
    return %c0_i32, %c0_i32_0 : i32, i32
  }
  func.func @transform_4(%arg0: i32) -> (i32, i32) {
    %c0_i32 = arith.constant 0 : i32
    %c0_i32_0 = arith.constant 0 : i32
    %c0_i32_1 = arith.constant 0 : i32
    return %c0_i32, %c0_i32_0 : i32, i32
  }
  func.func @transform_5(%arg0: i32) -> (i32, i32) {
    %c0_i32 = arith.constant 0 : i32
    %c0_i32_0 = arith.constant 0 : i32
    %c0_i32_1 = arith.constant 0 : i32
    return %c0_i32, %c0_i32_0 : i32, i32
  }
  func.func @transform_6(%arg0: i32) -> (i32, i32) {
    %c0_i32 = arith.constant 0 : i32
    %c0_i32_0 = arith.constant 0 : i32
    return %arg0, %c0_i32 : i32, i32
  }
}

module attributes {stable_mosaic.version = 11 : i64} {
  func.func @_matmul_bn_act_kernel(%arg0: i32, %arg1: memref<512x64xf32, #tpu.memory_space<vmem>>, %arg2: memref<64x64xbf16, #tpu.memory_space<vmem>>, %arg3: memref<1x64xf32, #tpu.memory_space<vmem>>, %arg4: memref<1x64xf32, #tpu.memory_space<vmem>>, %arg5: memref<512x64xbf16, #tpu.memory_space<vmem>>) attributes {dimension_semantics = [#tpu.dimension_semantics<parallel>], iteration_bounds = array<i64: 1>, scalar_prefetch = 0 : i64, scratch_operands = 0 : i64, tpu.core_type = #tpu.core_type<tc>, window_params = [{transform_indices = @transform_0, window_bounds = array<i64: 512, 64>}, {pipeline_mode = #tpu.pipeline_mode<synchronous>, transform_indices = @transform_1, window_bounds = array<i64: 64, 64>}, {pipeline_mode = #tpu.pipeline_mode<synchronous>, transform_indices = @transform_2, window_bounds = array<i64: 1, 64>}, {pipeline_mode = #tpu.pipeline_mode<synchronous>, transform_indices = @transform_3, window_bounds = array<i64: 1, 64>}, {transform_indices = @transform_4, window_bounds = array<i64: 512, 64>}]} {
    %c0 = arith.constant 0 : index
    %c0_0 = arith.constant 0 : index
    %0 = vector.load %arg1[%c0, %c0_0] : memref<512x64xf32, #tpu.memory_space<vmem>>, vector<512x64xf32>
    %1 = arith.truncf %0 : vector<512x64xf32> to vector<512x64xbf16>
    %c0_1 = arith.constant 0 : index
    %c0_2 = arith.constant 0 : index
    %2 = vector.load %arg2[%c0_1, %c0_2] : memref<64x64xbf16, #tpu.memory_space<vmem>>, vector<64x64xbf16>
    %cst = arith.constant dense<0.000000e+00> : vector<512x64xf32>
    %3 = tpu.matmul %1, %2, %cst {dimension_numbers = #tpu.dot_dimension_numbers<[1], [0], [0], [1], [0, 0, 1, 1], [], []>} : vector<512x64xbf16>, vector<64x64xbf16>, vector<512x64xf32> -> vector<512x64xf32>
    %c0_3 = arith.constant 0 : index
    %c0_4 = arith.constant 0 : index
    %4 = vector.load %arg3[%c0_3, %c0_4] : memref<1x64xf32, #tpu.memory_space<vmem>>, vector<1x64xf32>
    %5 = vector.broadcast %4 : vector<1x64xf32> to vector<512x64xf32>
    %6 = arith.mulf %3, %5 : vector<512x64xf32>
    %c0_5 = arith.constant 0 : index
    %c0_6 = arith.constant 0 : index
    %7 = vector.load %arg4[%c0_5, %c0_6] : memref<1x64xf32, #tpu.memory_space<vmem>>, vector<1x64xf32>
    %8 = vector.broadcast %7 : vector<1x64xf32> to vector<512x64xf32>
    %9 = arith.addf %6, %8 : vector<512x64xf32>
    %cst_7 = arith.constant 0.000000e+00 : f32
    %10 = vector.broadcast %cst_7 : f32 to vector<512x64xf32>
    %11 = arith.maximumf %9, %10 : vector<512x64xf32>
    %12 = arith.truncf %11 : vector<512x64xf32> to vector<512x64xbf16>
    %c0_8 = arith.constant 0 : index
    %c0_9 = arith.constant 0 : index
    %13 = vector.load %arg5[%c0_8, %c0_9] : memref<512x64xbf16, #tpu.memory_space<vmem>>, vector<512x64xbf16>
    tpu.vector_store %arg5[%c0_8, %c0_9], %12 {strides = array<i32>} : memref<512x64xbf16, #tpu.memory_space<vmem>>, vector<512x64xbf16>,
    return
  }
  func.func @transform_0(%arg0: i32) -> (i32, i32) {
    %c0_i32 = arith.constant 0 : i32
    %c0_i32_0 = arith.constant 0 : i32
    return %arg0, %c0_i32 : i32, i32
  }
  func.func @transform_1(%arg0: i32) -> (i32, i32) {
    %c0_i32 = arith.constant 0 : i32
    %c0_i32_0 = arith.constant 0 : i32
    %c0_i32_1 = arith.constant 0 : i32
    return %c0_i32, %c0_i32_0 : i32, i32
  }
  func.func @transform_2(%arg0: i32) -> (i32, i32) {
    %c0_i32 = arith.constant 0 : i32
    %c0_i32_0 = arith.constant 0 : i32
    %c0_i32_1 = arith.constant 0 : i32
    return %c0_i32, %c0_i32_0 : i32, i32
  }
  func.func @transform_3(%arg0: i32) -> (i32, i32) {
    %c0_i32 = arith.constant 0 : i32
    %c0_i32_0 = arith.constant 0 : i32
    %c0_i32_1 = arith.constant 0 : i32
    return %c0_i32, %c0_i32_0 : i32, i32
  }
  func.func @transform_4(%arg0: i32) -> (i32, i32) {
    %c0_i32 = arith.constant 0 : i32
    %c0_i32_0 = arith.constant 0 : i32
    return %arg0, %c0_i32 : i32, i32
  }
}

</mosaic_0001>

<bundles_post_ra>
// kernel: _lambda_.3
= control target key start
LH: loop header
LB: loop body
LE: loop exit
PB: predicated region body
PF: predicated region fallthrough
CT: control target
= control target key end

     0   :  { %9 = vsyncpa [#allocation3], 0  ;;  %s1391_s15 = smov [#allocation2]   ;;  %s1869_s0 = inlined_call_operand.hbm [shape: f32[512,64], index: 0, kind: input, shape index: {}]   ;;  %s1870_s1 = inlined_call_operand.vmem [shape: bf16[64,64], index: 1, kind: input, shape index: {}]   ;;  %s1871_s2 = inlined_call_operand.vmem [shape: f32[1,64], index: 2, kind: input, shape index: {}]   ;;  %s1872_s3 = inlined_call_operand.vmem [shape: f32[1,64], index: 3, kind: input, shape index: {}]   ;;  %s1873_s4 = inlined_call_operand.vmem [shape: bf16[512,64], index: 4, kind: output, shape index: {}]  }
   0x1   :  { %s15_s16 = sshll.u32 %s1391_s15, 4  ;;  %s1367_s19 = scalar_lea.hbm %s1869_s0, 8192  ;;  %s16_s16 = int_to_ptr.vmem [resolvable:$true] %s15_s16 }
   0x2   :  { %p1368_p0 = scmp.ne.s32.totalorder %s1869_s0, %s1367_s19  ;;  %p1371_p1 = scmp.lt.u32.totalorder %s1367_s19, %s1869_s0 }
   0x4   :  { %p1373_p2 = pnand %p1371_p1, %p1368_p0 }
   0x6   :  { %1376 = shalt.err (!%p1373_p2)
}
   0x7   :  { %s1377_s24 = scalar_lea.vmem %s16_s16, 8192  ;;  %p1382_p4 = scmp.lt.s32.totalorder %s16_s16, %s16_s16 }
   0x8   :  { %p1378_p3 = scmp.ne.s32.totalorder %s16_s16, %s1377_s24  ;;  %p1383_p5 = scmp.lt.s32.totalorder %s1377_s24, %s1377_s24 }
   0xa   :  { %p1384_p6 = por %p1383_p5, %p1382_p4 }
   0xc   :  { %p1385_p7 = pnand %p1384_p6, %p1378_p3 }
   0xe   :  { %1388 = shalt.err (!%p1385_p7)
}
   0xf   :  { %s1392_s25 = smov 128   ;;  %s1393_s26 = smov 8  }
  0x10   :  { %21 = dma.hbm_to_vmem [thread:$0]  %s1869_s0, 8192, %s16_s16, [#allocation3], %s1392_s25, %s1392_s25, %s1393_s26  }
  0x11   :  { %1389 = dma.done.wait [#allocation3], 8192  }
  0x12   :  { %1390 = vsyncadd [#allocation3], 4294959104  ;;  %v1363_v0 = vld [vmem:[%s1870_s1] sm:$0xff]   ;;  %v1364_v1 = vld [vmem:[%s1870_s1 + $0x8] sm:$0xff]   ;;  %vm160_vm0 = vcmask 523264   ;;  %vm1008_vm1 = vcmask 519168  }
  0x13   :  { %1280 = vmatprep.subr.bf16.mxu0 %v1363_v0  ;;  %1352 = vmatprep.subr.bf16.mxu1 %v1363_v0  ;;  %v1365_v2 = vld [vmem:[%s1870_s1 + $0x10] sm:$0xff]   ;;  %v32_v3 = vld [vmem:[#allocation2] sm:$0xff]  ;;  %v33_v4 = vld [vmem:[#allocation2 + $0x8] sm:$0xff] }
  0x14   :  { %1281 = vmatpush3.bf16.msra.mxu0 %v1363_v0  ;;  %1356 = vmatpush3.bf16.msra.mxu1 %v1363_v0  ;;  %v64_v5 = vld [vmem:[#allocation2 + $0x100] sm:$0xff]  ;;  %v96_v6 = vpack.c.bf16 %v33_v4, %v32_v3  ;;  %v65_v7 = vld [vmem:[#allocation2 + $0x108] sm:$0xff]  ;;  %v1366_v9 = vld [vmem:[%s1870_s1 + $0x18] sm:$0xff]  }
  0x15   :  { %1282 = vmatprep.subr.bf16.mxu0 %v1364_v1  ;;  %1353 = vmatprep.subr.bf16.mxu1 %v1364_v1  ;;  %v112_v8 = vpack.c.bf16 %v65_v7, %v64_v5  ;;  %v34_v10 = vld [vmem:[#allocation2 + $0x10] sm:$0xff]  ;;  %v35_v11 = vld [vmem:[#allocation2 + $0x18] sm:$0xff]  ;;  %v36_v14 = vld [vmem:[#allocation2 + $0x20] sm:$0xff] }
  0x16   :  { %1288 = vmatprep.mubr.msk.bf16.mxu0 %vm160_vm0, %v96_v6  ;;  %v66_v12 = vld [vmem:[#allocation2 + $0x110] sm:$0xff]  ;;  %v67_v13 = vld [vmem:[#allocation2 + $0x118] sm:$0xff]  ;;  %v37_v15 = vld [vmem:[#allocation2 + $0x28] sm:$0xff]  ;;  %v97_v18 = vpack.c.bf16 %v35_v11, %v34_v10 }
  0x17   :  { %1320 = vmatprep.mubr.msk.bf16.mxu1 %vm160_vm0, %v112_v8  ;;  %v68_v16 = vld [vmem:[#allocation2 + $0x120] sm:$0xff]  ;;  %v69_v17 = vld [vmem:[#allocation2 + $0x128] sm:$0xff]  ;;  %v113_v19 = vpack.c.bf16 %v67_v13, %v66_v12  ;;  %v98_v20 = vpack.c.bf16 %v37_v15, %v36_v14  ;;  %v38_v22 = vld [vmem:[#allocation2 + $0x30] sm:$0xff] }
  0x18   :  { %1283 = vmatpush3.bf16.msra.mxu0 %v1364_v1  ;;  %1357 = vmatpush3.bf16.msra.mxu1 %v1364_v1  ;;  %v114_v21 = vpack.c.bf16 %v69_v17, %v68_v16  ;;  %v39_v23 = vld [vmem:[#allocation2 + $0x38] sm:$0xff]  ;;  %v70_v24 = vld [vmem:[#allocation2 + $0x130] sm:$0xff]  ;;  %v40_v26 = vld [vmem:[#allocation2 + $0x40] sm:$0xff] }
  0x19   :  { %1284 = vmatprep.subr.bf16.mxu0 %v1365_v2  ;;  %1354 = vmatprep.subr.bf16.mxu1 %v1365_v2  ;;  %v71_v25 = vld [vmem:[#allocation2 + $0x138] sm:$0xff]  ;;  %v41_v27 = vld [vmem:[#allocation2 + $0x48] sm:$0xff]  ;;  %v72_v28 = vld [vmem:[#allocation2 + $0x140] sm:$0xff]  ;;  %v99_v30 = vpack.c.bf16 %v39_v23, %v38_v22 }
  0x1a   :  { %v73_v29 = vld [vmem:[#allocation2 + $0x148] sm:$0xff]  ;;  %v115_v31 = vpack.c.bf16 %v71_v25, %v70_v24  ;;  %v100_v32 = vpack.c.bf16 %v41_v27, %v40_v26  ;;  %v42_v34 = vld [vmem:[#allocation2 + $0x50] sm:$0xff]  ;;  %v43_v35 = vld [vmem:[#allocation2 + $0x58] sm:$0xff] }
  0x1b   :  { %v116_v33 = vpack.c.bf16 %v73_v29, %v72_v28  ;;  %v74_v36 = vld [vmem:[#allocation2 + $0x150] sm:$0xff]  ;;  %v75_v37 = vld [vmem:[#allocation2 + $0x158] sm:$0xff]  ;;  %v44_v38 = vld [vmem:[#allocation2 + $0x60] sm:$0xff]  ;;  %v101_v42 = vpack.c.bf16 %v43_v35, %v42_v34 }
  0x1c   :  { %1285 = vmatpush3.bf16.msra.mxu0 %v1365_v2  ;;  %1358 = vmatpush3.bf16.msra.mxu1 %v1365_v2  ;;  %v45_v39 = vld [vmem:[#allocation2 + $0x68] sm:$0xff]  ;;  %v76_v40 = vld [vmem:[#allocation2 + $0x160] sm:$0xff]  ;;  %v117_v43 = vpack.c.bf16 %v75_v37, %v74_v36  ;;  %v46_v46 = vld [vmem:[#allocation2 + $0x70] sm:$0xff] }
  0x1d   :  { %1286 = vmatprep.subr.bf16.mxu0 %v1366_v9  ;;  %1355 = vmatprep.subr.bf16.mxu1 %v1366_v9  ;;  %v77_v41 = vld [vmem:[#allocation2 + $0x168] sm:$0xff]  ;;  %v102_v44 = vpack.c.bf16 %v45_v39, %v44_v38  ;;  %v47_v47 = vld [vmem:[#allocation2 + $0x78] sm:$0xff]  ;;  %v78_v48 = vld [vmem:[#allocation2 + $0x170] sm:$0xff] }
  0x1e   :  { %v118_v45 = vpack.c.bf16 %v77_v41, %v76_v40  ;;  %v79_v49 = vld [vmem:[#allocation2 + $0x178] sm:$0xff]  ;;  %v48_v50 = vld [vmem:[#allocation2 + $0x80] sm:$0xff]  ;;  %v49_v51 = vld [vmem:[#allocation2 + $0x88] sm:$0xff]  ;;  %v103_v54 = vpack.c.bf16 %v47_v47, %v46_v46 }
  0x1f   :  { %v80_v52 = vld [vmem:[#allocation2 + $0x180] sm:$0xff]  ;;  %v81_v53 = vld [vmem:[#allocation2 + $0x188] sm:$0xff]  ;;  %v119_v55 = vpack.c.bf16 %v79_v49, %v78_v48  ;;  %v104_v56 = vpack.c.bf16 %v49_v51, %v48_v50  ;;  %v50_v58 = vld [vmem:[#allocation2 + $0x90] sm:$0xff] }
  0x20   :  { %1287 = vmatpush3.bf16.msra.mxu0 %v1366_v9  ;;  %1359 = vmatpush3.bf16.msra.mxu1 %v1366_v9  ;;  %v120_v57 = vpack.c.bf16 %v81_v53, %v80_v52  ;;  %v51_v59 = vld [vmem:[#allocation2 + $0x98] sm:$0xff]  ;;  %v82_v60 = vld [vmem:[#allocation2 + $0x190] sm:$0xff]  ;;  %v52_v62 = vld [vmem:[#allocation2 + $0xa0] sm:$0xff] }
  0x21   :  { %v83_v61 = vld [vmem:[#allocation2 + $0x198] sm:$0xff]  ;;  %v53_v63 = vld [vmem:[#allocation2 + $0xa8] sm:$0xff]  ;;  %v84_v0 = vld [vmem:[#allocation2 + $0x1a0] sm:$0xff]  ;;  %v105_v2 = vpack.c.bf16 %v51_v59, %v50_v58 }
  0x22   :  { %v85_v1 = vld [vmem:[#allocation2 + $0x1a8] sm:$0xff]  ;;  %v121_v3 = vpack.c.bf16 %v83_v61, %v82_v60  ;;  %v106_v4 = vpack.c.bf16 %v53_v63, %v52_v62  ;;  %v54_v6 = vld [vmem:[#allocation2 + $0xb0] sm:$0xff]  ;;  %v55_v7 = vld [vmem:[#allocation2 + $0xb8] sm:$0xff] }
  0x23   :  { %1289 = vmatmul.mubr.msk.bf16.vlgmr.msra.gmra.mrb[0].mxu0 %vm160_vm0, %v97_v18  ;;  %1321 = vmatmul.mubr.msk.bf16.vlgmr.msra.gmra.mrb[0].mxu1 %vm160_vm0, %v113_v19  ;;  %v122_v5 = vpack.c.bf16 %v85_v1, %v84_v0  ;;  %v86_v8 = vld [vmem:[#allocation2 + $0x1b0] sm:$0xff]  ;;  %v87_v9 = vld [vmem:[#allocation2 + $0x1b8] sm:$0xff]  ;;  %v56_v10 = vld [vmem:[#allocation2 + $0xc0] sm:$0xff]  ;;  %v107_v14 = vpack.c.bf16 %v55_v7, %v54_v6 }
  0x24   :  { %1292 = vmatprep.mubr.msk.bf16.mxu0 %vm160_vm0, %v98_v20  ;;  %1324 = vmatprep.mubr.msk.bf16.mxu1 %vm160_vm0, %v114_v21  ;;  %v57_v11 = vld [vmem:[#allocation2 + $0xc8] sm:$0xff]  ;;  %v88_v12 = vld [vmem:[#allocation2 + $0x1c0] sm:$0xff]  ;;  %v123_v15 = vpack.c.bf16 %v87_v9, %v86_v8  ;;  %v58_v18 = vld [vmem:[#allocation2 + $0xd0] sm:$0xff] }
  0x25   :  { %v89_v13 = vld [vmem:[#allocation2 + $0x1c8] sm:$0xff]  ;;  %v108_v16 = vpack.c.bf16 %v57_v11, %v56_v10  ;;  %v59_v19 = vld [vmem:[#allocation2 + $0xd8] sm:$0xff]  ;;  %v90_v20 = vld [vmem:[#allocation2 + $0x1d0] sm:$0xff] }
  0x26   :  { %v124_v17 = vpack.c.bf16 %v89_v13, %v88_v12  ;;  %v91_v21 = vld [vmem:[#allocation2 + $0x1d8] sm:$0xff]  ;;  %v60_v22 = vld [vmem:[#allocation2 + $0xe0] sm:$0xff]  ;;  %v61_v23 = vld [vmem:[#allocation2 + $0xe8] sm:$0xff]  ;;  %v109_v26 = vpack.c.bf16 %v59_v19, %v58_v18 }
  0x27   :  { %v92_v24 = vld [vmem:[#allocation2 + $0x1e0] sm:$0xff]  ;;  %v93_v25 = vld [vmem:[#allocation2 + $0x1e8] sm:$0xff]  ;;  %v125_v27 = vpack.c.bf16 %v91_v21, %v90_v20  ;;  %v110_v28 = vpack.c.bf16 %v61_v23, %v60_v22 }
  0x28   :  { %v126_v29 = vpack.c.bf16 %v93_v25, %v92_v24  ;;  %v1478_v36 = vld [vmem:[%s1871_s2] ss:$0 sm:$0xff] }
  0x29   :  { %v1483_v38 = vld [vmem:[%s1872_s3] ss:$0 sm:$0xff] }
  0x2b   :  { %1293 = vmatmul.mubr.msk.bf16.gmra.mrb[4].mxu0 %vm160_vm0, %v99_v30  ;;  %1325 = vmatmul.mubr.msk.bf16.gmra.mrb[4].mxu1 %vm160_vm0, %v115_v31  ;;  %v62_v30 = vld [vmem:[#allocation2 + $0xf0] sm:$0xff]  ;;  %v63_v31 = vld [vmem:[#allocation2 + $0xf8] sm:$0xff] }
  0x2c   :  { %1296 = vmatprep.mubr.msk.bf16.mxu0 %vm160_vm0, %v100_v32  ;;  %1328 = vmatprep.mubr.msk.bf16.mxu1 %vm160_vm0, %v116_v33  ;;  %v94_v32 = vld [vmem:[#allocation2 + $0x1f0] sm:$0xff]  ;;  %v95_v33 = vld [vmem:[#allocation2 + $0x1f8] sm:$0xff]  ;;  %v111_v34 = vpack.c.bf16 %v63_v31, %v62_v30 }
  0x2d   :  { %v127_v35 = vpack.c.bf16 %v95_v33, %v94_v32 }
  0x33   :  { %1297 = vmatmul.mubr.msk.bf16.gmra.mrb[8].mxu0 %vm160_vm0, %v101_v42  ;;  %1329 = vmatmul.mubr.msk.bf16.gmra.mrb[8].mxu1 %vm160_vm0, %v117_v43 }
  0x34   :  { %1300 = vmatprep.mubr.msk.bf16.mxu0 %vm160_vm0, %v102_v44  ;;  %1332 = vmatprep.mubr.msk.bf16.mxu1 %vm160_vm0, %v118_v45 }
  0x3b   :  { %1301 = vmatmul.mubr.msk.bf16.gmra.mrb[12].mxu0 %vm160_vm0, %v103_v54  ;;  %1333 = vmatmul.mubr.msk.bf16.gmra.mrb[12].mxu1 %vm160_vm0, %v119_v55 }
  0x3c   :  { %1304 = vmatprep.mubr.msk.bf16.mxu0 %vm160_vm0, %v104_v56  ;;  %1336 = vmatprep.mubr.msk.bf16.mxu1 %vm160_vm0, %v120_v57 }
  0x43   :  { %1305 = vmatmul.mubr.msk.bf16.gmra.mrb[16].mxu0 %vm160_vm0, %v105_v2  ;;  %1337 = vmatmul.mubr.msk.bf16.gmra.mrb[16].mxu1 %vm160_vm0, %v121_v3 }
  0x44   :  { %1308 = vmatprep.mubr.msk.bf16.mxu0 %vm160_vm0, %v106_v4  ;;  %1340 = vmatprep.mubr.msk.bf16.mxu1 %vm160_vm0, %v122_v5 }
  0x4b   :  { %1309 = vmatmul.mubr.msk.bf16.gmra.mrb[20].mxu0 %vm160_vm0, %v107_v14  ;;  %1341 = vmatmul.mubr.msk.bf16.gmra.mrb[20].mxu1 %vm160_vm0, %v123_v15 }
  0x4c   :  { %1312 = vmatprep.mubr.msk.bf16.mxu0 %vm160_vm0, %v108_v16  ;;  %1344 = vmatprep.mubr.msk.bf16.mxu1 %vm160_vm0, %v124_v17 }
  0x53   :  { %1313 = vmatmul.mubr.msk.bf16.gmra.mrb[24].mxu0 %vm160_vm0, %v109_v26  ;;  %1345 = vmatmul.mubr.msk.bf16.gmra.mrb[24].mxu1 %vm160_vm0, %v125_v27 }
  0x54   :  { %1316 = vmatprep.mubr.msk.bf16.mxu0 %vm160_vm0, %v110_v28  ;;  %1348 = vmatprep.mubr.msk.bf16.mxu1 %vm160_vm0, %v126_v29 }
  0x5b   :  { %1317 = vmatmul.mubr.msk.bf16.gmra.mrb[28].mxu0 %vm160_vm0, %v111_v34  ;;  %1349 = vmatmul.mubr.msk.bf16.gmra.mrb[28].mxu1 %vm160_vm0, %v127_v35 }
  0xf6   :  { %v1290_v37 = vpop.f32.mrb[0].mxu0  ;;  %v1322_v39 = vpop.f32.mrb[0].mxu1 }
  0xf7   :  { %v555_v40 = vmul.f32 %v1290_v37, %v1478_v36  ;;  %v587_v41 = vmul.f32 %v1322_v39, %v1478_v36  ;;  %v291_v42 = vpop.f32.mrb[1].mxu0  ;;  %v419_v43 = vpop.f32.mrb[1].mxu1 }
  0xf8   :  { %v553_v44 = vmul.f32 %v1478_v36, %v291_v42  ;;  %v585_v45 = vmul.f32 %v1478_v36, %v419_v43  ;;  %v1291_v46 = vpop.f32.mrb[2].mxu0  ;;  %v1323_v47 = vpop.f32.mrb[2].mxu1 }
  0xf9   :  { %v626_v48 = vadd.f32 %v1483_v38, %v555_v40  ;;  %v658_v49 = vadd.f32 %v1483_v38, %v587_v41  ;;  %v556_v50 = vmul.f32 %v1291_v46, %v1478_v36  ;;  %v588_v51 = vmul.f32 %v1323_v47, %v1478_v36  ;;  %v294_v52 = vpop.f32.mrb[3].mxu0  ;;  %v422_v53 = vpop.f32.mrb[3].mxu1 }
  0xfa   :  { %v624_v54 = vadd.f32 %v1483_v38, %v553_v44  ;;  %v656_v55 = vadd.f32 %v1483_v38, %v585_v45  ;;  %v554_v56 = vmul.f32 %v1478_v36, %v294_v52  ;;  %v586_v57 = vmul.f32 %v1478_v36, %v422_v53 }
  0xfb   :  { %v690_v58 = vmax.f32 %v626_v48, 0.0  ;;  %v722_v59 = vmax.f32 %v658_v49, 0.0  ;;  %v627_v60 = vadd.f32 %v1483_v38, %v556_v50  ;;  %v659_v61 = vadd.f32 %v1483_v38, %v588_v51 }
  0xfc   :  { %v688_v62 = vmax.f32 %v624_v54, 0.0  ;;  %v720_v63 = vmax.f32 %v656_v55, 0.0  ;;  %v625_v0 = vadd.f32 %v1483_v38, %v554_v56  ;;  %v657_v1 = vadd.f32 %v1483_v38, %v586_v57 }
  0xfd   :  { %v1182_v2 = vpack.c.bf16 %v690_v58, %v690_v58  ;;  %v1214_v3 = vpack.c.bf16 %v722_v59, %v722_v59  ;;  %v691_v4 = vmax.f32 %v627_v60, 0.0  ;;  %v723_v5 = vmax.f32 %v659_v61, 0.0 }
  0xfe   :  { %v1180_v6 = vpack.c.bf16 %v688_v62, %v688_v62  ;;  %v1212_v7 = vpack.c.bf16 %v720_v63, %v720_v63  ;;  %v689_v8 = vmax.f32 %v625_v0, 0.0  ;;  %v721_v9 = vmax.f32 %v657_v1, 0.0  ;;  %v1294_v10 = vpop.f32.mrb[4].mxu0  ;;  %v1326_v11 = vpop.f32.mrb[4].mxu1 }
  0xff   :  { %1011 = vst.msk [vmem:[%s1873_s4 + $0x8] sm:$0xf] %vm1008_vm1, %v1182_v2  ;;  %1043 = vst.msk [vmem:[%s1873_s4 + $0x88] sm:$0xf] %vm1008_vm1, %v1214_v3  ;;  %v1183_v12 = vpack.c.bf16 %v691_v4, %v691_v4  ;;  %v1215_v13 = vpack.c.bf16 %v723_v5, %v723_v5  ;;  %v559_v14 = vmul.f32 %v1294_v10, %v1478_v36  ;;  %v307_v16 = vpop.f32.mrb[5].mxu0  ;;  %v435_v17 = vpop.f32.mrb[5].mxu1 }
 0x100   :  { %v591_v15 = vmul.f32 %v1326_v11, %v1478_v36  ;;  %1009 = vst.msk [vmem:[%s1873_s4] sm:$0xf] %vm1008_vm1, %v1180_v6  ;;  %1041 = vst.msk [vmem:[%s1873_s4 + $0x80] sm:$0xf] %vm1008_vm1, %v1212_v7  ;;  %v1181_v18 = vpack.c.bf16 %v689_v8, %v689_v8  ;;  %v1213_v19 = vpack.c.bf16 %v721_v9, %v721_v9  ;;  %v1295_v22 = vpop.f32.mrb[6].mxu0  ;;  %v1327_v23 = vpop.f32.mrb[6].mxu1 }
 0x101   :  { %v557_v20 = vmul.f32 %v1478_v36, %v307_v16  ;;  %v589_v21 = vmul.f32 %v1478_v36, %v435_v17  ;;  %1012 = vst.msk [vmem:[%s1873_s4 + $0xc] sm:$0xf] %vm1008_vm1, %v1183_v12  ;;  %1044 = vst.msk [vmem:[%s1873_s4 + $0x8c] sm:$0xf] %vm1008_vm1, %v1215_v13  ;;  %v630_v24 = vadd.f32 %v1483_v38, %v559_v14  ;;  %v310_v28 = vpop.f32.mrb[7].mxu0  ;;  %v438_v29 = vpop.f32.mrb[7].mxu1 }
 0x102   :  { %v662_v25 = vadd.f32 %v1483_v38, %v591_v15  ;;  %v560_v26 = vmul.f32 %v1295_v22, %v1478_v36  ;;  %v592_v27 = vmul.f32 %v1327_v23, %v1478_v36  ;;  %1010 = vst.msk [vmem:[%s1873_s4 + $0x4] sm:$0xf] %vm1008_vm1, %v1181_v18  ;;  %1042 = vst.msk [vmem:[%s1873_s4 + $0x84] sm:$0xf] %vm1008_vm1, %v1213_v19 }
 0x103   :  { %v628_v30 = vadd.f32 %v1483_v38, %v557_v20  ;;  %v660_v31 = vadd.f32 %v1483_v38, %v589_v21  ;;  %v558_v32 = vmul.f32 %v1478_v36, %v310_v28  ;;  %v590_v33 = vmul.f32 %v1478_v36, %v438_v29 }
 0x104   :  { %v694_v34 = vmax.f32 %v630_v24, 0.0  ;;  %v726_v35 = vmax.f32 %v662_v25, 0.0  ;;  %v631_v37 = vadd.f32 %v1483_v38, %v560_v26  ;;  %v663_v39 = vadd.f32 %v1483_v38, %v592_v27 }
 0x105   :  { %v692_v40 = vmax.f32 %v628_v30, 0.0  ;;  %v724_v41 = vmax.f32 %v660_v31, 0.0  ;;  %v629_v42 = vadd.f32 %v1483_v38, %v558_v32  ;;  %v661_v43 = vadd.f32 %v1483_v38, %v590_v33 }
 0x106   :  { %v1186_v44 = vpack.c.bf16 %v694_v34, %v694_v34  ;;  %v1218_v45 = vpack.c.bf16 %v726_v35, %v726_v35  ;;  %v695_v46 = vmax.f32 %v631_v37, 0.0  ;;  %v727_v47 = vmax.f32 %v663_v39, 0.0  ;;  %v1298_v52 = vpop.f32.mrb[8].mxu0  ;;  %v1330_v53 = vpop.f32.mrb[8].mxu1 }
 0x107   :  { %v1184_v48 = vpack.c.bf16 %v692_v40, %v692_v40  ;;  %v1216_v49 = vpack.c.bf16 %v724_v41, %v724_v41  ;;  %v693_v50 = vmax.f32 %v629_v42, 0.0  ;;  %v725_v51 = vmax.f32 %v661_v43, 0.0  ;;  %v323_v58 = vpop.f32.mrb[9].mxu0  ;;  %v451_v59 = vpop.f32.mrb[9].mxu1 }
 0x108   :  { %1015 = vst.msk [vmem:[%s1873_s4 + $0x18] sm:$0xf] %vm1008_vm1, %v1186_v44  ;;  %1047 = vst.msk [vmem:[%s1873_s4 + $0x98] sm:$0xf] %vm1008_vm1, %v1218_v45  ;;  %v1187_v54 = vpack.c.bf16 %v695_v46, %v695_v46  ;;  %v1219_v55 = vpack.c.bf16 %v727_v47, %v727_v47  ;;  %v563_v56 = vmul.f32 %v1298_v52, %v1478_v36  ;;  %v1299_v0 = vpop.f32.mrb[10].mxu0  ;;  %v1331_v1 = vpop.f32.mrb[10].mxu1 }
 0x109   :  { %v595_v57 = vmul.f32 %v1330_v53, %v1478_v36  ;;  %1013 = vst.msk [vmem:[%s1873_s4 + $0x10] sm:$0xf] %vm1008_vm1, %v1184_v48  ;;  %1045 = vst.msk [vmem:[%s1873_s4 + $0x90] sm:$0xf] %vm1008_vm1, %v1216_v49  ;;  %v1185_v60 = vpack.c.bf16 %v693_v50, %v693_v50  ;;  %v1217_v61 = vpack.c.bf16 %v725_v51, %v725_v51  ;;  %v326_v6 = vpop.f32.mrb[11].mxu0  ;;  %v454_v7 = vpop.f32.mrb[11].mxu1 }
 0x10a   :  { %v561_v62 = vmul.f32 %v1478_v36, %v323_v58  ;;  %v593_v63 = vmul.f32 %v1478_v36, %v451_v59  ;;  %1016 = vst.msk [vmem:[%s1873_s4 + $0x1c] sm:$0xf] %vm1008_vm1, %v1187_v54  ;;  %1048 = vst.msk [vmem:[%s1873_s4 + $0x9c] sm:$0xf] %vm1008_vm1, %v1219_v55  ;;  %v634_v2 = vadd.f32 %v1483_v38, %v563_v56 }
 0x10b   :  { %v666_v3 = vadd.f32 %v1483_v38, %v595_v57  ;;  %v564_v4 = vmul.f32 %v1299_v0, %v1478_v36  ;;  %v596_v5 = vmul.f32 %v1331_v1, %v1478_v36  ;;  %1014 = vst.msk [vmem:[%s1873_s4 + $0x14] sm:$0xf] %vm1008_vm1, %v1185_v60  ;;  %1046 = vst.msk [vmem:[%s1873_s4 + $0x94] sm:$0xf] %vm1008_vm1, %v1217_v61 }
 0x10c   :  { %v632_v8 = vadd.f32 %v1483_v38, %v561_v62  ;;  %v664_v9 = vadd.f32 %v1483_v38, %v593_v63  ;;  %v562_v10 = vmul.f32 %v1478_v36, %v326_v6  ;;  %v594_v11 = vmul.f32 %v1478_v36, %v454_v7 }
 0x10d   :  { %v698_v12 = vmax.f32 %v634_v2, 0.0  ;;  %v730_v13 = vmax.f32 %v666_v3, 0.0  ;;  %v635_v14 = vadd.f32 %v1483_v38, %v564_v4  ;;  %v667_v15 = vadd.f32 %v1483_v38, %v596_v5 }
 0x10e   :  { %v696_v16 = vmax.f32 %v632_v8, 0.0  ;;  %v728_v17 = vmax.f32 %v664_v9, 0.0  ;;  %v633_v18 = vadd.f32 %v1483_v38, %v562_v10  ;;  %v665_v19 = vadd.f32 %v1483_v38, %v594_v11  ;;  %v1302_v28 = vpop.f32.mrb[12].mxu0  ;;  %v1334_v29 = vpop.f32.mrb[12].mxu1 }
 0x10f   :  { %v1190_v20 = vpack.c.bf16 %v698_v12, %v698_v12  ;;  %v1222_v21 = vpack.c.bf16 %v730_v13, %v730_v13  ;;  %v699_v22 = vmax.f32 %v635_v14, 0.0  ;;  %v731_v23 = vmax.f32 %v667_v15, 0.0  ;;  %v339_v34 = vpop.f32.mrb[13].mxu0  ;;  %v467_v35 = vpop.f32.mrb[13].mxu1 }
 0x110   :  { %v1188_v24 = vpack.c.bf16 %v696_v16, %v696_v16  ;;  %v1220_v25 = vpack.c.bf16 %v728_v17, %v728_v17  ;;  %v697_v26 = vmax.f32 %v633_v18, 0.0  ;;  %v729_v27 = vmax.f32 %v665_v19, 0.0  ;;  %v1303_v42 = vpop.f32.mrb[14].mxu0  ;;  %v1335_v43 = vpop.f32.mrb[14].mxu1 }
 0x111   :  { %1019 = vst.msk [vmem:[%s1873_s4 + $0x28] sm:$0xf] %vm1008_vm1, %v1190_v20  ;;  %1051 = vst.msk [vmem:[%s1873_s4 + $0xa8] sm:$0xf] %vm1008_vm1, %v1222_v21  ;;  %v1191_v30 = vpack.c.bf16 %v699_v22, %v699_v22  ;;  %v1223_v31 = vpack.c.bf16 %v731_v23, %v731_v23  ;;  %v567_v32 = vmul.f32 %v1302_v28, %v1478_v36  ;;  %v342_v48 = vpop.f32.mrb[15].mxu0  ;;  %v470_v49 = vpop.f32.mrb[15].mxu1 }
 0x112   :  { %v599_v33 = vmul.f32 %v1334_v29, %v1478_v36  ;;  %1017 = vst.msk [vmem:[%s1873_s4 + $0x20] sm:$0xf] %vm1008_vm1, %v1188_v24  ;;  %1049 = vst.msk [vmem:[%s1873_s4 + $0xa0] sm:$0xf] %vm1008_vm1, %v1220_v25  ;;  %v1189_v37 = vpack.c.bf16 %v697_v26, %v697_v26  ;;  %v1221_v39 = vpack.c.bf16 %v729_v27, %v729_v27 }
 0x113   :  { %v565_v40 = vmul.f32 %v1478_v36, %v339_v34  ;;  %v597_v41 = vmul.f32 %v1478_v36, %v467_v35  ;;  %1020 = vst.msk [vmem:[%s1873_s4 + $0x2c] sm:$0xf] %vm1008_vm1, %v1191_v30  ;;  %1052 = vst.msk [vmem:[%s1873_s4 + $0xac] sm:$0xf] %vm1008_vm1, %v1223_v31  ;;  %v638_v44 = vadd.f32 %v1483_v38, %v567_v32 }
 0x114   :  { %v670_v45 = vadd.f32 %v1483_v38, %v599_v33  ;;  %v568_v46 = vmul.f32 %v1303_v42, %v1478_v36  ;;  %v600_v47 = vmul.f32 %v1335_v43, %v1478_v36  ;;  %1018 = vst.msk [vmem:[%s1873_s4 + $0x24] sm:$0xf] %vm1008_vm1, %v1189_v37  ;;  %1050 = vst.msk [vmem:[%s1873_s4 + $0xa4] sm:$0xf] %vm1008_vm1, %v1221_v39 }
 0x115   :  { %v636_v50 = vadd.f32 %v1483_v38, %v565_v40  ;;  %v668_v51 = vadd.f32 %v1483_v38, %v597_v41  ;;  %v566_v52 = vmul.f32 %v1478_v36, %v342_v48  ;;  %v598_v53 = vmul.f32 %v1478_v36, %v470_v49 }
 0x116   :  { %v702_v54 = vmax.f32 %v638_v44, 0.0  ;;  %v734_v55 = vmax.f32 %v670_v45, 0.0  ;;  %v639_v56 = vadd.f32 %v1483_v38, %v568_v46  ;;  %v671_v57 = vadd.f32 %v1483_v38, %v600_v47  ;;  %v1306_v6 = vpop.f32.mrb[16].mxu0  ;;  %v1338_v7 = vpop.f32.mrb[16].mxu1 }
 0x117   :  { %v700_v58 = vmax.f32 %v636_v50, 0.0  ;;  %v732_v59 = vmax.f32 %v668_v51, 0.0  ;;  %v637_v60 = vadd.f32 %v1483_v38, %v566_v52  ;;  %v669_v61 = vadd.f32 %v1483_v38, %v598_v53  ;;  %v355_v12 = vpop.f32.mrb[17].mxu0  ;;  %v483_v13 = vpop.f32.mrb[17].mxu1 }
 0x118   :  { %v1194_v62 = vpack.c.bf16 %v702_v54, %v702_v54  ;;  %v1226_v63 = vpack.c.bf16 %v734_v55, %v734_v55  ;;  %v703_v0 = vmax.f32 %v639_v56, 0.0  ;;  %v735_v1 = vmax.f32 %v671_v57, 0.0  ;;  %v1307_v18 = vpop.f32.mrb[18].mxu0  ;;  %v1339_v19 = vpop.f32.mrb[18].mxu1 }
 0x119   :  { %v1192_v2 = vpack.c.bf16 %v700_v58, %v700_v58  ;;  %v1224_v3 = vpack.c.bf16 %v732_v59, %v732_v59  ;;  %v701_v4 = vmax.f32 %v637_v60, 0.0  ;;  %v733_v5 = vmax.f32 %v669_v61, 0.0  ;;  %v358_v24 = vpop.f32.mrb[19].mxu0  ;;  %v486_v25 = vpop.f32.mrb[19].mxu1 }
 0x11a   :  { %1023 = vst.msk [vmem:[%s1873_s4 + $0x38] sm:$0xf] %vm1008_vm1, %v1194_v62  ;;  %1055 = vst.msk [vmem:[%s1873_s4 + $0xb8] sm:$0xf] %vm1008_vm1, %v1226_v63  ;;  %v1195_v8 = vpack.c.bf16 %v703_v0, %v703_v0  ;;  %v1227_v9 = vpack.c.bf16 %v735_v1, %v735_v1  ;;  %v571_v10 = vmul.f32 %v1306_v6, %v1478_v36 }
 0x11b   :  { %v603_v11 = vmul.f32 %v1338_v7, %v1478_v36  ;;  %1021 = vst.msk [vmem:[%s1873_s4 + $0x30] sm:$0xf] %vm1008_vm1, %v1192_v2  ;;  %1053 = vst.msk [vmem:[%s1873_s4 + $0xb0] sm:$0xf] %vm1008_vm1, %v1224_v3  ;;  %v1193_v14 = vpack.c.bf16 %v701_v4, %v701_v4  ;;  %v1225_v15 = vpack.c.bf16 %v733_v5, %v733_v5 }
 0x11c   :  { %v569_v16 = vmul.f32 %v1478_v36, %v355_v12  ;;  %v601_v17 = vmul.f32 %v1478_v36, %v483_v13  ;;  %1024 = vst.msk [vmem:[%s1873_s4 + $0x3c] sm:$0xf] %vm1008_vm1, %v1195_v8  ;;  %1056 = vst.msk [vmem:[%s1873_s4 + $0xbc] sm:$0xf] %vm1008_vm1, %v1227_v9  ;;  %v642_v20 = vadd.f32 %v1483_v38, %v571_v10 }
 0x11d   :  { %v674_v21 = vadd.f32 %v1483_v38, %v603_v11  ;;  %v572_v22 = vmul.f32 %v1307_v18, %v1478_v36  ;;  %v604_v23 = vmul.f32 %v1339_v19, %v1478_v36  ;;  %1022 = vst.msk [vmem:[%s1873_s4 + $0x34] sm:$0xf] %vm1008_vm1, %v1193_v14  ;;  %1054 = vst.msk [vmem:[%s1873_s4 + $0xb4] sm:$0xf] %vm1008_vm1, %v1225_v15 }
 0x11e   :  { %v640_v26 = vadd.f32 %v1483_v38, %v569_v16  ;;  %v672_v27 = vadd.f32 %v1483_v38, %v601_v17  ;;  %v570_v28 = vmul.f32 %v1478_v36, %v358_v24  ;;  %v602_v29 = vmul.f32 %v1478_v36, %v486_v25  ;;  %v1310_v48 = vpop.f32.mrb[20].mxu0  ;;  %v1342_v49 = vpop.f32.mrb[20].mxu1 }
 0x11f   :  { %v706_v30 = vmax.f32 %v642_v20, 0.0  ;;  %v738_v31 = vmax.f32 %v674_v21, 0.0  ;;  %v643_v32 = vadd.f32 %v1483_v38, %v572_v22  ;;  %v675_v33 = vadd.f32 %v1483_v38, %v604_v23  ;;  %v371_v54 = vpop.f32.mrb[21].mxu0  ;;  %v499_v55 = vpop.f32.mrb[21].mxu1 }
 0x120   :  { %v704_v34 = vmax.f32 %v640_v26, 0.0  ;;  %v736_v35 = vmax.f32 %v672_v27, 0.0  ;;  %v641_v37 = vadd.f32 %v1483_v38, %v570_v28  ;;  %v673_v39 = vadd.f32 %v1483_v38, %v602_v29  ;;  %v1311_v60 = vpop.f32.mrb[22].mxu0  ;;  %v1343_v61 = vpop.f32.mrb[22].mxu1 }
 0x121   :  { %v1198_v40 = vpack.c.bf16 %v706_v30, %v706_v30  ;;  %v1230_v41 = vpack.c.bf16 %v738_v31, %v738_v31  ;;  %v707_v42 = vmax.f32 %v643_v32, 0.0  ;;  %v739_v43 = vmax.f32 %v675_v33, 0.0  ;;  %v374_v2 = vpop.f32.mrb[23].mxu0  ;;  %v502_v3 = vpop.f32.mrb[23].mxu1 }
 0x122   :  { %v1196_v44 = vpack.c.bf16 %v704_v34, %v704_v34  ;;  %v1228_v45 = vpack.c.bf16 %v736_v35, %v736_v35  ;;  %v705_v46 = vmax.f32 %v641_v37, 0.0  ;;  %v737_v47 = vmax.f32 %v673_v39, 0.0 }
 0x123   :  { %1027 = vst.msk [vmem:[%s1873_s4 + $0x48] sm:$0xf] %vm1008_vm1, %v1198_v40  ;;  %1059 = vst.msk [vmem:[%s1873_s4 + $0xc8] sm:$0xf] %vm1008_vm1, %v1230_v41  ;;  %v1199_v50 = vpack.c.bf16 %v707_v42, %v707_v42  ;;  %v1231_v51 = vpack.c.bf16 %v739_v43, %v739_v43  ;;  %v575_v52 = vmul.f32 %v1310_v48, %v1478_v36 }
 0x124   :  { %v607_v53 = vmul.f32 %v1342_v49, %v1478_v36  ;;  %1025 = vst.msk [vmem:[%s1873_s4 + $0x40] sm:$0xf] %vm1008_vm1, %v1196_v44  ;;  %1057 = vst.msk [vmem:[%s1873_s4 + $0xc0] sm:$0xf] %vm1008_vm1, %v1228_v45  ;;  %v1197_v56 = vpack.c.bf16 %v705_v46, %v705_v46  ;;  %v1229_v57 = vpack.c.bf16 %v737_v47, %v737_v47 }
 0x125   :  { %v573_v58 = vmul.f32 %v1478_v36, %v371_v54  ;;  %v605_v59 = vmul.f32 %v1478_v36, %v499_v55  ;;  %1028 = vst.msk [vmem:[%s1873_s4 + $0x4c] sm:$0xf] %vm1008_vm1, %v1199_v50  ;;  %1060 = vst.msk [vmem:[%s1873_s4 + $0xcc] sm:$0xf] %vm1008_vm1, %v1231_v51  ;;  %v646_v62 = vadd.f32 %v1483_v38, %v575_v52 }
 0x126   :  { %v678_v63 = vadd.f32 %v1483_v38, %v607_v53  ;;  %v576_v0 = vmul.f32 %v1311_v60, %v1478_v36  ;;  %v608_v1 = vmul.f32 %v1343_v61, %v1478_v36  ;;  %1026 = vst.msk [vmem:[%s1873_s4 + $0x44] sm:$0xf] %vm1008_vm1, %v1197_v56  ;;  %1058 = vst.msk [vmem:[%s1873_s4 + $0xc4] sm:$0xf] %vm1008_vm1, %v1229_v57  ;;  %v1314_v24 = vpop.f32.mrb[24].mxu0  ;;  %v1346_v25 = vpop.f32.mrb[24].mxu1 }
 0x127   :  { %v644_v4 = vadd.f32 %v1483_v38, %v573_v58  ;;  %v676_v5 = vadd.f32 %v1483_v38, %v605_v59  ;;  %v574_v6 = vmul.f32 %v1478_v36, %v374_v2  ;;  %v606_v7 = vmul.f32 %v1478_v36, %v502_v3  ;;  %v387_v30 = vpop.f32.mrb[25].mxu0  ;;  %v515_v31 = vpop.f32.mrb[25].mxu1 }
 0x128   :  { %v710_v8 = vmax.f32 %v646_v62, 0.0  ;;  %v742_v9 = vmax.f32 %v678_v63, 0.0  ;;  %v647_v10 = vadd.f32 %v1483_v38, %v576_v0  ;;  %v679_v11 = vadd.f32 %v1483_v38, %v608_v1  ;;  %v1315_v37 = vpop.f32.mrb[26].mxu0  ;;  %v1347_v39 = vpop.f32.mrb[26].mxu1 }
 0x129   :  { %v708_v12 = vmax.f32 %v644_v4, 0.0  ;;  %v740_v13 = vmax.f32 %v676_v5, 0.0  ;;  %v645_v14 = vadd.f32 %v1483_v38, %v574_v6  ;;  %v677_v15 = vadd.f32 %v1483_v38, %v606_v7  ;;  %v390_v44 = vpop.f32.mrb[27].mxu0  ;;  %v518_v45 = vpop.f32.mrb[27].mxu1 }
 0x12a   :  { %v1202_v16 = vpack.c.bf16 %v710_v8, %v710_v8  ;;  %v1234_v17 = vpack.c.bf16 %v742_v9, %v742_v9  ;;  %v711_v18 = vmax.f32 %v647_v10, 0.0  ;;  %v743_v19 = vmax.f32 %v679_v11, 0.0 }
 0x12b   :  { %v1200_v20 = vpack.c.bf16 %v708_v12, %v708_v12  ;;  %v1232_v21 = vpack.c.bf16 %v740_v13, %v740_v13  ;;  %v709_v22 = vmax.f32 %v645_v14, 0.0  ;;  %v741_v23 = vmax.f32 %v677_v15, 0.0 }
 0x12c   :  { %1031 = vst.msk [vmem:[%s1873_s4 + $0x58] sm:$0xf] %vm1008_vm1, %v1202_v16  ;;  %1063 = vst.msk [vmem:[%s1873_s4 + $0xd8] sm:$0xf] %vm1008_vm1, %v1234_v17  ;;  %v1203_v26 = vpack.c.bf16 %v711_v18, %v711_v18  ;;  %v1235_v27 = vpack.c.bf16 %v743_v19, %v743_v19  ;;  %v579_v28 = vmul.f32 %v1314_v24, %v1478_v36 }
 0x12d   :  { %v611_v29 = vmul.f32 %v1346_v25, %v1478_v36  ;;  %1029 = vst.msk [vmem:[%s1873_s4 + $0x50] sm:$0xf] %vm1008_vm1, %v1200_v20  ;;  %1061 = vst.msk [vmem:[%s1873_s4 + $0xd0] sm:$0xf] %vm1008_vm1, %v1232_v21  ;;  %v1201_v32 = vpack.c.bf16 %v709_v22, %v709_v22  ;;  %v1233_v33 = vpack.c.bf16 %v741_v23, %v741_v23 }
 0x12e   :  { %v577_v34 = vmul.f32 %v1478_v36, %v387_v30  ;;  %v609_v35 = vmul.f32 %v1478_v36, %v515_v31  ;;  %1032 = vst.msk [vmem:[%s1873_s4 + $0x5c] sm:$0xf] %vm1008_vm1, %v1203_v26  ;;  %1064 = vst.msk [vmem:[%s1873_s4 + $0xdc] sm:$0xf] %vm1008_vm1, %v1235_v27  ;;  %v650_v40 = vadd.f32 %v1483_v38, %v579_v28  ;;  %v1318_v2 = vpop.f32.mrb[28].mxu0  ;;  %v1350_v3 = vpop.f32.mrb[28].mxu1 }
 0x12f   :  { %v682_v41 = vadd.f32 %v1483_v38, %v611_v29  ;;  %v580_v42 = vmul.f32 %v1315_v37, %v1478_v36  ;;  %v612_v43 = vmul.f32 %v1347_v39, %v1478_v36  ;;  %1030 = vst.msk [vmem:[%s1873_s4 + $0x54] sm:$0xf] %vm1008_vm1, %v1201_v32  ;;  %1062 = vst.msk [vmem:[%s1873_s4 + $0xd4] sm:$0xf] %vm1008_vm1, %v1233_v33  ;;  %v403_v8 = vpop.f32.mrb[29].mxu0  ;;  %v531_v9 = vpop.f32.mrb[29].mxu1 }
 0x130   :  { %v648_v46 = vadd.f32 %v1483_v38, %v577_v34  ;;  %v680_v47 = vadd.f32 %v1483_v38, %v609_v35  ;;  %v578_v48 = vmul.f32 %v1478_v36, %v390_v44  ;;  %v610_v49 = vmul.f32 %v1478_v36, %v518_v45  ;;  %v1319_v14 = vpop.f32.mrb[30].mxu0  ;;  %v1351_v15 = vpop.f32.mrb[30].mxu1 }
 0x131   :  { %v714_v50 = vmax.f32 %v650_v40, 0.0  ;;  %v746_v51 = vmax.f32 %v682_v41, 0.0  ;;  %v651_v52 = vadd.f32 %v1483_v38, %v580_v42  ;;  %v683_v53 = vadd.f32 %v1483_v38, %v612_v43  ;;  %v406_v20 = vpop.f32.mrb[31].mxu0  ;;  %v534_v21 = vpop.f32.mrb[31].mxu1 }
 0x132   :  { %v712_v54 = vmax.f32 %v648_v46, 0.0  ;;  %v744_v55 = vmax.f32 %v680_v47, 0.0  ;;  %v649_v56 = vadd.f32 %v1483_v38, %v578_v48  ;;  %v681_v57 = vadd.f32 %v1483_v38, %v610_v49 }
 0x133   :  { %v1206_v58 = vpack.c.bf16 %v714_v50, %v714_v50  ;;  %v1238_v59 = vpack.c.bf16 %v746_v51, %v746_v51  ;;  %v715_v60 = vmax.f32 %v651_v52, 0.0  ;;  %v747_v61 = vmax.f32 %v683_v53, 0.0 }
 0x134   :  { %v1204_v62 = vpack.c.bf16 %v712_v54, %v712_v54  ;;  %v1236_v63 = vpack.c.bf16 %v744_v55, %v744_v55  ;;  %v713_v0 = vmax.f32 %v649_v56, 0.0  ;;  %v745_v1 = vmax.f32 %v681_v57, 0.0 }
 0x135   :  { %1035 = vst.msk [vmem:[%s1873_s4 + $0x68] sm:$0xf] %vm1008_vm1, %v1206_v58  ;;  %1067 = vst.msk [vmem:[%s1873_s4 + $0xe8] sm:$0xf] %vm1008_vm1, %v1238_v59  ;;  %v1207_v4 = vpack.c.bf16 %v715_v60, %v715_v60  ;;  %v1239_v5 = vpack.c.bf16 %v747_v61, %v747_v61  ;;  %v583_v6 = vmul.f32 %v1318_v2, %v1478_v36 }
 0x136   :  { %v615_v7 = vmul.f32 %v1350_v3, %v1478_v36  ;;  %1033 = vst.msk [vmem:[%s1873_s4 + $0x60] sm:$0xf] %vm1008_vm1, %v1204_v62  ;;  %1065 = vst.msk [vmem:[%s1873_s4 + $0xe0] sm:$0xf] %vm1008_vm1, %v1236_v63  ;;  %v1205_v10 = vpack.c.bf16 %v713_v0, %v713_v0  ;;  %v1237_v11 = vpack.c.bf16 %v745_v1, %v745_v1 }
 0x137   :  { %v581_v12 = vmul.f32 %v1478_v36, %v403_v8  ;;  %v613_v13 = vmul.f32 %v1478_v36, %v531_v9  ;;  %1036 = vst.msk [vmem:[%s1873_s4 + $0x6c] sm:$0xf] %vm1008_vm1, %v1207_v4  ;;  %1068 = vst.msk [vmem:[%s1873_s4 + $0xec] sm:$0xf] %vm1008_vm1, %v1239_v5  ;;  %v654_v16 = vadd.f32 %v1483_v38, %v583_v6 }
 0x138   :  { %v686_v17 = vadd.f32 %v1483_v38, %v615_v7  ;;  %v584_v18 = vmul.f32 %v1319_v14, %v1478_v36  ;;  %v616_v19 = vmul.f32 %v1351_v15, %v1478_v36  ;;  %1034 = vst.msk [vmem:[%s1873_s4 + $0x64] sm:$0xf] %vm1008_vm1, %v1205_v10  ;;  %1066 = vst.msk [vmem:[%s1873_s4 + $0xe4] sm:$0xf] %vm1008_vm1, %v1237_v11 }
 0x139   :  { %v652_v22 = vadd.f32 %v1483_v38, %v581_v12  ;;  %v684_v23 = vadd.f32 %v1483_v38, %v613_v13  ;;  %v582_v24 = vmul.f32 %v1478_v36, %v406_v20  ;;  %v614_v25 = vmul.f32 %v1478_v36, %v534_v21 }
 0x13a   :  { %v718_v26 = vmax.f32 %v654_v16, 0.0  ;;  %v750_v27 = vmax.f32 %v686_v17, 0.0  ;;  %v655_v28 = vadd.f32 %v1483_v38, %v584_v18  ;;  %v687_v29 = vadd.f32 %v1483_v38, %v616_v19 }
 0x13b   :  { %v716_v30 = vmax.f32 %v652_v22, 0.0  ;;  %v748_v31 = vmax.f32 %v684_v23, 0.0  ;;  %v653_v32 = vadd.f32 %v1483_v38, %v582_v24  ;;  %v685_v33 = vadd.f32 %v1483_v38, %v614_v25 }
 0x13c   :  { %v1210_v34 = vpack.c.bf16 %v718_v26, %v718_v26  ;;  %v1242_v35 = vpack.c.bf16 %v750_v27, %v750_v27  ;;  %v719_v37 = vmax.f32 %v655_v28, 0.0  ;;  %v751_v39 = vmax.f32 %v687_v29, 0.0 }
 0x13d   :  { %v1208_v40 = vpack.c.bf16 %v716_v30, %v716_v30  ;;  %v1240_v41 = vpack.c.bf16 %v748_v31, %v748_v31  ;;  %v717_v42 = vmax.f32 %v653_v32, 0.0  ;;  %v749_v36 = vmax.f32 %v685_v33, 0.0 }
 0x13e   :  { %1039 = vst.msk [vmem:[%s1873_s4 + $0x78] sm:$0xf] %vm1008_vm1, %v1210_v34  ;;  %1071 = vst.msk [vmem:[%s1873_s4 + $0xf8] sm:$0xf] %vm1008_vm1, %v1242_v35  ;;  %v1211_v43 = vpack.c.bf16 %v719_v37, %v719_v37  ;;  %v1243_v38 = vpack.c.bf16 %v751_v39, %v751_v39 }
 0x13f   :  { %1037 = vst.msk [vmem:[%s1873_s4 + $0x70] sm:$0xf] %vm1008_vm1, %v1208_v40  ;;  %1069 = vst.msk [vmem:[%s1873_s4 + $0xf0] sm:$0xf] %vm1008_vm1, %v1240_v41  ;;  %v1209_v44 = vpack.c.bf16 %v717_v42, %v717_v42  ;;  %v1241_v45 = vpack.c.bf16 %v749_v36, %v749_v36 }
 0x140   :  { %1040 = vst.msk [vmem:[%s1873_s4 + $0x7c] sm:$0xf] %vm1008_vm1, %v1211_v43  ;;  %1072 = vst.msk [vmem:[%s1873_s4 + $0xfc] sm:$0xf] %vm1008_vm1, %v1243_v38 }
 0x141   :  { %1038 = vst.msk [vmem:[%s1873_s4 + $0x74] sm:$0xf] %vm1008_vm1, %v1209_v44  ;;  %1070 = vst.msk [vmem:[%s1873_s4 + $0xf4] sm:$0xf] %vm1008_vm1, %v1241_v45 }
 0x142   :  { %1077 = vsyncpa [#allocation3], 1 }

// kernel: _lambda_.5
= control target key start
LH: loop header
LB: loop body
LE: loop exit
PB: predicated region body
PF: predicated region fallthrough
CT: control target
= control target key end

     0   :  { %vm153_vm0 = vcmask 523264   ;;  %s2220_s0 = inlined_call_operand.vmem [shape: f32[512,64], index: 0, kind: input, shape index: {}]   ;;  %s2221_s1 = inlined_call_operand.vmem [shape: bf16[64,64], index: 1, kind: input, shape index: {}]   ;;  %s2222_s2 = inlined_call_operand.vmem [shape: f32[1,64], index: 2, kind: input, shape index: {}]   ;;  %s2223_s3 = inlined_call_operand.vmem [shape: f32[1,64], index: 3, kind: input, shape index: {}]   ;;  %s2224_s4 = inlined_call_operand.vmem [shape: f32[1,64], index: 4, kind: input, shape index: {}]   ;;  %s2225_s5 = inlined_call_operand.vmem [shape: f32[1,64], index: 5, kind: input, shape index: {}]   ;;  %s2226_s6 = inlined_call_operand.hbm [shape: f32[512,64], index: 6, kind: output, shape index: {}]  }
   0x1   :  { %v1190_v0 = vld [vmem:[%s2221_s1] sm:$0xff]   ;;  %v1191_v1 = vld [vmem:[%s2221_s1 + $0x8] sm:$0xff]   ;;  %v1192_v2 = vld [vmem:[%s2221_s1 + $0x10] sm:$0xff]  }
   0x2   :  { %1107 = vmatprep.subr.bf16.mxu0 %v1190_v0  ;;  %1179 = vmatprep.subr.bf16.mxu1 %v1190_v0  ;;  %v1268_v3 = vld [vmem:[%s2220_s0] sm:$0xff]  ;;  %v1273_v4 = vld [vmem:[%s2220_s0 + $0x8] sm:$0xff]  ;;  %v1193_v9 = vld [vmem:[%s2221_s1 + $0x18] sm:$0xff]  }
   0x3   :  { %1108 = vmatpush3.bf16.msra.mxu0 %v1190_v0  ;;  %1183 = vmatpush3.bf16.msra.mxu1 %v1190_v0  ;;  %v1278_v5 = vld [vmem:[%s2220_s0 + $0x100] sm:$0xff]  ;;  %v89_v6 = vpack.c.bf16 %v1273_v4, %v1268_v3  ;;  %v1285_v7 = vld [vmem:[%s2220_s0 + $0x108] sm:$0xff]  ;;  %v1297_v10 = vld [vmem:[%s2220_s0 + $0x10] sm:$0xff] }
   0x4   :  { %1109 = vmatprep.subr.bf16.mxu0 %v1191_v1  ;;  %1180 = vmatprep.subr.bf16.mxu1 %v1191_v1  ;;  %v105_v8 = vpack.c.bf16 %v1285_v7, %v1278_v5  ;;  %v1302_v11 = vld [vmem:[%s2220_s0 + $0x18] sm:$0xff]  ;;  %v1307_v12 = vld [vmem:[%s2220_s0 + $0x110] sm:$0xff]  ;;  %v1317_v14 = vld [vmem:[%s2220_s0 + $0x20] sm:$0xff] }
   0x5   :  { %1115 = vmatprep.mubr.msk.bf16.mxu0 %vm153_vm0, %v89_v6  ;;  %v1312_v13 = vld [vmem:[%s2220_s0 + $0x118] sm:$0xff]  ;;  %v1322_v15 = vld [vmem:[%s2220_s0 + $0x28] sm:$0xff]  ;;  %v1327_v16 = vld [vmem:[%s2220_s0 + $0x120] sm:$0xff]  ;;  %v90_v18 = vpack.c.bf16 %v1302_v11, %v1297_v10 }
   0x6   :  { %1147 = vmatprep.mubr.msk.bf16.mxu1 %vm153_vm0, %v105_v8  ;;  %v1332_v17 = vld [vmem:[%s2220_s0 + $0x128] sm:$0xff]  ;;  %v106_v19 = vpack.c.bf16 %v1312_v13, %v1307_v12  ;;  %v91_v20 = vpack.c.bf16 %v1322_v15, %v1317_v14  ;;  %v1347_v22 = vld [vmem:[%s2220_s0 + $0x30] sm:$0xff]  ;;  %v1352_v23 = vld [vmem:[%s2220_s0 + $0x38] sm:$0xff] }
   0x7   :  { %1110 = vmatpush3.bf16.msra.mxu0 %v1191_v1  ;;  %1184 = vmatpush3.bf16.msra.mxu1 %v1191_v1  ;;  %v107_v21 = vpack.c.bf16 %v1332_v17, %v1327_v16  ;;  %v1359_v24 = vld [vmem:[%s2220_s0 + $0x130] sm:$0xff]  ;;  %v1364_v25 = vld [vmem:[%s2220_s0 + $0x138] sm:$0xff]  ;;  %v1369_v26 = vld [vmem:[%s2220_s0 + $0x40] sm:$0xff]  ;;  %v92_v30 = vpack.c.bf16 %v1352_v23, %v1347_v22 }
   0x8   :  { %1111 = vmatprep.subr.bf16.mxu0 %v1192_v2  ;;  %1181 = vmatprep.subr.bf16.mxu1 %v1192_v2  ;;  %v1374_v27 = vld [vmem:[%s2220_s0 + $0x48] sm:$0xff]  ;;  %v1379_v28 = vld [vmem:[%s2220_s0 + $0x140] sm:$0xff]  ;;  %v108_v31 = vpack.c.bf16 %v1364_v25, %v1359_v24 }
   0x9   :  { %v1384_v29 = vld [vmem:[%s2220_s0 + $0x148] sm:$0xff]  ;;  %v93_v32 = vpack.c.bf16 %v1374_v27, %v1369_v26 }
   0xa   :  { %v109_v33 = vpack.c.bf16 %v1384_v29, %v1379_v28 }
   0xb   :  { %1112 = vmatpush3.bf16.msra.mxu0 %v1192_v2  ;;  %1185 = vmatpush3.bf16.msra.mxu1 %v1192_v2 }
   0xc   :  { %1113 = vmatprep.subr.bf16.mxu0 %v1193_v9  ;;  %1182 = vmatprep.subr.bf16.mxu1 %v1193_v9 }
   0xf   :  { %1114 = vmatpush3.bf16.msra.mxu0 %v1193_v9  ;;  %1186 = vmatpush3.bf16.msra.mxu1 %v1193_v9 }
  0x12   :  { %1116 = vmatmul.mubr.msk.bf16.vlgmr.msra.gmra.mrb[0].mxu0 %vm153_vm0, %v90_v18  ;;  %1148 = vmatmul.mubr.msk.bf16.vlgmr.msra.gmra.mrb[0].mxu1 %vm153_vm0, %v106_v19 }
  0x13   :  { %1119 = vmatprep.mubr.msk.bf16.mxu0 %vm153_vm0, %v91_v20  ;;  %1151 = vmatprep.mubr.msk.bf16.mxu1 %vm153_vm0, %v107_v21 }
  0x14   :  { %11 = vsyncpa [#allocation3], 0  ;;  %v1399_v34 = vld [vmem:[%s2220_s0 + $0x50] sm:$0xff]  ;;  %v1404_v35 = vld [vmem:[%s2220_s0 + $0x58] sm:$0xff] }
  0x15   :  { %v1411_v36 = vld [vmem:[%s2220_s0 + $0x150] sm:$0xff]  ;;  %v1416_v37 = vld [vmem:[%s2220_s0 + $0x158] sm:$0xff]  ;;  %v1421_v38 = vld [vmem:[%s2220_s0 + $0x60] sm:$0xff]  ;;  %v94_v42 = vpack.c.bf16 %v1404_v35, %v1399_v34 }
  0x16   :  { %v1426_v39 = vld [vmem:[%s2220_s0 + $0x68] sm:$0xff]  ;;  %v1431_v40 = vld [vmem:[%s2220_s0 + $0x160] sm:$0xff]  ;;  %v110_v43 = vpack.c.bf16 %v1416_v37, %v1411_v36  ;;  %v1451_v46 = vld [vmem:[%s2220_s0 + $0x70] sm:$0xff] }
  0x17   :  { %v1436_v41 = vld [vmem:[%s2220_s0 + $0x168] sm:$0xff]  ;;  %v95_v44 = vpack.c.bf16 %v1426_v39, %v1421_v38  ;;  %v1456_v47 = vld [vmem:[%s2220_s0 + $0x78] sm:$0xff]  ;;  %v1463_v48 = vld [vmem:[%s2220_s0 + $0x170] sm:$0xff] }
  0x18   :  { %v111_v45 = vpack.c.bf16 %v1436_v41, %v1431_v40  ;;  %v1468_v49 = vld [vmem:[%s2220_s0 + $0x178] sm:$0xff]  ;;  %v1473_v50 = vld [vmem:[%s2220_s0 + $0x80] sm:$0xff]  ;;  %v1478_v51 = vld [vmem:[%s2220_s0 + $0x88] sm:$0xff]  ;;  %v96_v54 = vpack.c.bf16 %v1456_v47, %v1451_v46 }
  0x19   :  { %v1483_v52 = vld [vmem:[%s2220_s0 + $0x180] sm:$0xff]  ;;  %v1488_v53 = vld [vmem:[%s2220_s0 + $0x188] sm:$0xff]  ;;  %v112_v55 = vpack.c.bf16 %v1468_v49, %v1463_v48  ;;  %v97_v56 = vpack.c.bf16 %v1478_v51, %v1473_v50  ;;  %v1503_v58 = vld [vmem:[%s2220_s0 + $0x90] sm:$0xff] }
  0x1a   :  { %1120 = vmatmul.mubr.msk.bf16.gmra.mrb[4].mxu0 %vm153_vm0, %v92_v30  ;;  %1152 = vmatmul.mubr.msk.bf16.gmra.mrb[4].mxu1 %vm153_vm0, %v108_v31  ;;  %v113_v57 = vpack.c.bf16 %v1488_v53, %v1483_v52  ;;  %v1508_v59 = vld [vmem:[%s2220_s0 + $0x98] sm:$0xff]  ;;  %v1515_v60 = vld [vmem:[%s2220_s0 + $0x190] sm:$0xff]  ;;  %v1525_v62 = vld [vmem:[%s2220_s0 + $0xa0] sm:$0xff] }
  0x1b   :  { %1123 = vmatprep.mubr.msk.bf16.mxu0 %vm153_vm0, %v93_v32  ;;  %1155 = vmatprep.mubr.msk.bf16.mxu1 %vm153_vm0, %v109_v33  ;;  %v1520_v61 = vld [vmem:[%s2220_s0 + $0x198] sm:$0xff]  ;;  %2249 = vst [vmem:[#allocation5_spill] sm:$0xff] %v1525_v62  ;;  %v1530_v63 = vld [vmem:[%s2220_s0 + $0xa8] sm:$0xff]  ;;  %v1535_v0 = vld [vmem:[%s2220_s0 + $0x1a0] sm:$0xff]  ;;  %v98_v2 = vpack.c.bf16 %v1508_v59, %v1503_v58 }
  0x1c   :  { %2250 = vst [vmem:[#allocation6_spill] sm:$0xff] %v1530_v63  ;;  %2251 = vst [vmem:[#allocation7_spill] sm:$0xff] %v1535_v0  ;;  %v1540_v1 = vld [vmem:[%s2220_s0 + $0x1a8] sm:$0xff]  ;;  %v114_v6 = vpack.c.bf16 %v1520_v61, %v1515_v60  ;;  %v99_v8 = vpack.c.bf16 %v1530_v63, %v1525_v62  ;;  %v1555_v18 = vld [vmem:[%s2220_s0 + $0xb0] sm:$0xff] }
  0x1d   :  { %2252 = vst [vmem:[#allocation8_spill] sm:$0xff] %v1540_v1  ;;  %v115_v9 = vpack.c.bf16 %v1540_v1, %v1535_v0  ;;  %v1560_v19 = vld [vmem:[%s2220_s0 + $0xb8] sm:$0xff]  ;;  %v1567_v20 = vld [vmem:[%s2220_s0 + $0x1b0] sm:$0xff]  ;;  %v1577_v30 = vld [vmem:[%s2220_s0 + $0xc0] sm:$0xff] }
  0x1e   :  { %2253 = vst [vmem:[#allocation9_spill] sm:$0xff] %v1560_v19  ;;  %v1572_v21 = vld [vmem:[%s2220_s0 + $0x1b8] sm:$0xff]  ;;  %2255 = vst [vmem:[#allocation11_spill] sm:$0xff] %v1577_v30  ;;  %v1582_v31 = vld [vmem:[%s2220_s0 + $0xc8] sm:$0xff] }
  0x1f   :  { %2254 = vst [vmem:[#allocation10_spill] sm:$0xff] %v1572_v21  ;;  %2256 = vst [vmem:[#allocation12_spill] sm:$0xff] %v1582_v31  ;;  %v1587_v32 = vld [vmem:[%s2220_s0 + $0x1c0] sm:$0xff]  ;;  %v1592_v33 = vld [vmem:[%s2220_s0 + $0x1c8] sm:$0xff] }
  0x20   :  { %2257 = vst [vmem:[#allocation13_spill] sm:$0xff] %v1587_v32  ;;  %2258 = vst [vmem:[#allocation14_spill] sm:$0xff] %v1592_v33 }
  0x22   :  { %1124 = vmatmul.mubr.msk.bf16.gmra.mrb[8].mxu0 %vm153_vm0, %v94_v42  ;;  %1156 = vmatmul.mubr.msk.bf16.gmra.mrb[8].mxu1 %vm153_vm0, %v110_v43  ;;  %v100_v42 = vpack.c.bf16 %v1560_v19, %v1555_v18  ;;  %v116_v43 = vpack.c.bf16 %v1572_v21, %v1567_v20  ;;  %v1718_v19 = vld [vmem:[%s2225_s5] ss:$0 sm:$0xff] }
  0x23   :  { %1127 = vmatprep.mubr.msk.bf16.mxu0 %vm153_vm0, %v95_v44  ;;  %1159 = vmatprep.mubr.msk.bf16.mxu1 %vm153_vm0, %v111_v45  ;;  %v101_v44 = vpack.c.bf16 %v1582_v31, %v1577_v30  ;;  %v117_v45 = vpack.c.bf16 %v1592_v33, %v1587_v32  ;;  %v1659_v33 = vld [vmem:[%s2220_s0 + $0xf0] sm:$0xff] }
  0x24   :  { %2267 = vst [vmem:[#allocation23_spill] sm:$0xff] %v1659_v33 }
  0x2a   :  { %1128 = vmatmul.mubr.msk.bf16.gmra.mrb[12].mxu0 %vm153_vm0, %v96_v54  ;;  %1160 = vmatmul.mubr.msk.bf16.gmra.mrb[12].mxu1 %vm153_vm0, %v112_v55  ;;  %v1607_v54 = vld [vmem:[%s2220_s0 + $0xd0] sm:$0xff]  ;;  %v1612_v55 = vld [vmem:[%s2220_s0 + $0xd8] sm:$0xff] }
  0x2b   :  { %1131 = vmatprep.mubr.msk.bf16.mxu0 %vm153_vm0, %v97_v56  ;;  %1163 = vmatprep.mubr.msk.bf16.mxu1 %vm153_vm0, %v113_v57  ;;  %2259 = vst [vmem:[#allocation15_spill] sm:$0xff] %v1607_v54  ;;  %2260 = vst [vmem:[#allocation16_spill] sm:$0xff] %v1612_v55  ;;  %v1619_v56 = vld [vmem:[%s2220_s0 + $0x1d0] sm:$0xff]  ;;  %v1624_v57 = vld [vmem:[%s2220_s0 + $0x1d8] sm:$0xff] }
  0x2c   :  { %2261 = vst [vmem:[#allocation17_spill] sm:$0xff] %v1619_v56  ;;  %2262 = vst [vmem:[#allocation18_spill] sm:$0xff] %v1624_v57 }
  0x32   :  { %1132 = vmatmul.mubr.msk.bf16.gmra.mrb[16].mxu0 %vm153_vm0, %v98_v2  ;;  %1164 = vmatmul.mubr.msk.bf16.gmra.mrb[16].mxu1 %vm153_vm0, %v114_v6  ;;  %v1629_v2 = vld [vmem:[%s2220_s0 + $0xe0] sm:$0xff]  ;;  %v1634_v6 = vld [vmem:[%s2220_s0 + $0xe8] sm:$0xff] }
  0x33   :  { %1135 = vmatprep.mubr.msk.bf16.mxu0 %vm153_vm0, %v99_v8  ;;  %1167 = vmatprep.mubr.msk.bf16.mxu1 %vm153_vm0, %v115_v9  ;;  %2263 = vst [vmem:[#allocation19_spill] sm:$0xff] %v1629_v2  ;;  %2264 = vst [vmem:[#allocation20_spill] sm:$0xff] %v1634_v6  ;;  %v1639_v8 = vld [vmem:[%s2220_s0 + $0x1e0] sm:$0xff]  ;;  %v1644_v9 = vld [vmem:[%s2220_s0 + $0x1e8] sm:$0xff] }
  0x34   :  { %2265 = vst [vmem:[#allocation21_spill] sm:$0xff] %v1639_v8  ;;  %2266 = vst [vmem:[#allocation22_spill] sm:$0xff] %v1644_v9 }
  0x3a   :  { %1136 = vmatmul.mubr.msk.bf16.gmra.mrb[20].mxu0 %vm153_vm0, %v100_v42  ;;  %1168 = vmatmul.mubr.msk.bf16.gmra.mrb[20].mxu1 %vm153_vm0, %v116_v43  ;;  %v102_v42 = vpack.c.bf16 %v1612_v55, %v1607_v54  ;;  %v118_v43 = vpack.c.bf16 %v1624_v57, %v1619_v56 }
  0x3b   :  { %1139 = vmatprep.mubr.msk.bf16.mxu0 %vm153_vm0, %v101_v44  ;;  %1171 = vmatprep.mubr.msk.bf16.mxu1 %vm153_vm0, %v117_v45  ;;  %v103_v44 = vpack.c.bf16 %v1634_v6, %v1629_v2  ;;  %v119_v45 = vpack.c.bf16 %v1644_v9, %v1639_v8  ;;  %v1666_v6 = vld [vmem:[%s2220_s0 + $0xf8] sm:$0xff]  ;;  %v1687_v9 = vld [vmem:[%s2222_s2] ss:$0 sm:$0xff] }
  0x3c   :  { %2268 = vst [vmem:[#allocation24_spill] sm:$0xff] %v1666_v6  ;;  %v1692_v2 = vld [vmem:[%s2223_s3] ss:$0 sm:$0xff] }
  0x42   :  { %1140 = vmatmul.mubr.msk.bf16.gmra.mrb[24].mxu0 %vm153_vm0, %v102_v42  ;;  %1172 = vmatmul.mubr.msk.bf16.gmra.mrb[24].mxu1 %vm153_vm0, %v118_v43  ;;  %v1671_v42 = vld [vmem:[%s2220_s0 + $0x1f0] sm:$0xff]  ;;  %v1676_v43 = vld [vmem:[%s2220_s0 + $0x1f8] sm:$0xff] }
  0x43   :  { %1143 = vmatprep.mubr.msk.bf16.mxu0 %vm153_vm0, %v103_v44  ;;  %1175 = vmatprep.mubr.msk.bf16.mxu1 %vm153_vm0, %v119_v45  ;;  %2269 = vst [vmem:[#allocation25_spill] sm:$0xff] %v1671_v42  ;;  %2270 = vst [vmem:[#allocation26_spill] sm:$0xff] %v1676_v43  ;;  %v104_v44 = vpack.c.bf16 %v1666_v6, %v1659_v33  ;;  %v120_v45 = vpack.c.bf16 %v1676_v43, %v1671_v42 }
  0x4a   :  { %1144 = vmatmul.mubr.msk.bf16.gmra.mrb[28].mxu0 %vm153_vm0, %v104_v44  ;;  %1176 = vmatmul.mubr.msk.bf16.gmra.mrb[28].mxu1 %vm153_vm0, %v120_v45 }
  0xe5   :  { %v1117_v8 = vpop.f32.mrb[0].mxu0  ;;  %v1149_v31 = vpop.f32.mrb[0].mxu1 }
  0xe6   :  { %v548_v6 = vmul.f32 %v1117_v8, %v1687_v9  ;;  %v580_v43 = vmul.f32 %v1149_v31, %v1687_v9  ;;  %v284_v42 = vpop.f32.mrb[1].mxu0  ;;  %v412_v44 = vpop.f32.mrb[1].mxu1  ;;  %v1705_v31 = vld [vmem:[%s2224_s4] ss:$0 sm:$0xff]  ;;  %s1218_s4 = smov [#allocation2]  }
  0xe7   :  { %v546_v45 = vmul.f32 %v1687_v9, %v284_v42  ;;  %v578_v33 = vmul.f32 %v1687_v9, %v412_v44  ;;  %v1118_v57 = vpop.f32.mrb[2].mxu0  ;;  %v1150_v55 = vpop.f32.mrb[2].mxu1  ;;  %s1020_s5 = sshll.u32 %s1218_s4, 4  ;;  %s1021_s5 = int_to_ptr.vmem [resolvable:$true] %s1020_s5 }
  0xe8   :  { %v619_v32 = vadd.f32 %v1692_v2, %v548_v6  ;;  %v651_v30 = vadd.f32 %v1692_v2, %v580_v43  ;;  %v549_v56 = vmul.f32 %v1118_v57, %v1687_v9  ;;  %v581_v54 = vmul.f32 %v1150_v55, %v1687_v9  ;;  %v287_v1 = vpop.f32.mrb[3].mxu0  ;;  %v415_v8 = vpop.f32.mrb[3].mxu1  ;;  %s1194_s13 = scalar_lea.vmem %s1021_s5, 8192  ;;  %p1199_p1 = scmp.lt.s32.totalorder %s1021_s5, %s1021_s5 }
  0xe9   :  { %v617_v42 = vadd.f32 %v1692_v2, %v546_v45  ;;  %v649_v44 = vadd.f32 %v1692_v2, %v578_v33  ;;  %v547_v63 = vmul.f32 %v1687_v9, %v287_v1  ;;  %v579_v6 = vmul.f32 %v1687_v9, %v415_v8  ;;  %p1195_p0 = scmp.ne.s32.totalorder %s1021_s5, %s1194_s13  ;;  %p1200_p2 = scmp.lt.s32.totalorder %s1194_s13, %s1194_s13 }
  0xea   :  { %v683_v43 = vadd.f32 %v619_v32, %v1297_v10  ;;  %v715_v57 = vadd.f32 %v651_v30, %v1307_v12  ;;  %v620_v55 = vadd.f32 %v1692_v2, %v549_v56  ;;  %v652_v21 = vadd.f32 %v1692_v2, %v581_v54 }
  0xeb   :  { %v681_v45 = vadd.f32 %v617_v42, %v1268_v3  ;;  %v713_v33 = vadd.f32 %v649_v44, %v1278_v5  ;;  %v618_v1 = vadd.f32 %v1692_v2, %v547_v63  ;;  %v650_v8 = vadd.f32 %v1692_v2, %v579_v6  ;;  %p1201_p3 = por %p1200_p2, %p1199_p1 }
  0xec   :  { %v754_v10 = vmul.f32 %v1705_v31, %v683_v43  ;;  %v786_v12 = vmul.f32 %v1705_v31, %v715_v57  ;;  %v684_v30 = vadd.f32 %v620_v55, %v1302_v11  ;;  %v716_v32 = vadd.f32 %v652_v21, %v1312_v13 }
  0xed   :  { %v752_v54 = vmul.f32 %v1705_v31, %v681_v45  ;;  %v784_v56 = vmul.f32 %v1705_v31, %v713_v33  ;;  %v682_v3 = vadd.f32 %v618_v1, %v1273_v4  ;;  %v714_v5 = vadd.f32 %v650_v8, %v1285_v7  ;;  %v1121_v42 = vpop.f32.mrb[4].mxu0  ;;  %v1153_v63 = vpop.f32.mrb[4].mxu1  ;;  %p1202_p4 = pnand %p1201_p3, %p1195_p0 }
  0xee   :  { %v825_v44 = vadd.f32 %v1718_v19, %v754_v10  ;;  %v857_v6 = vadd.f32 %v1718_v19, %v786_v12  ;;  %v755_v43 = vmul.f32 %v1705_v31, %v684_v30  ;;  %v787_v11 = vmul.f32 %v1705_v31, %v716_v32  ;;  %v300_v57 = vpop.f32.mrb[5].mxu0  ;;  %v428_v13 = vpop.f32.mrb[5].mxu1 }
  0xef   :  { %v823_v21 = vadd.f32 %v1718_v19, %v752_v54  ;;  %v855_v55 = vadd.f32 %v1718_v19, %v784_v56  ;;  %v753_v4 = vmul.f32 %v1705_v31, %v682_v3  ;;  %v785_v7 = vmul.f32 %v1705_v31, %v714_v5  ;;  %v1122_v45 = vpop.f32.mrb[6].mxu0  ;;  %v1154_v33 = vpop.f32.mrb[6].mxu1 }
  0xf0   :  { %v889_v1 = vmax.f32 %v825_v44, 0.0  ;;  %v921_v8 = vmax.f32 %v857_v6, 0.0  ;;  %v826_v10 = vadd.f32 %v1718_v19, %v755_v43  ;;  %v858_v12 = vadd.f32 %v1718_v19, %v787_v11  ;;  %v303_v30 = vpop.f32.mrb[7].mxu0  ;;  %v431_v32 = vpop.f32.mrb[7].mxu1 }
  0xf1   :  { %v887_v0 = vmax.f32 %v823_v21, 0.0  ;;  %v919_v62 = vmax.f32 %v855_v55, 0.0  ;;  %v824_v54 = vadd.f32 %v1718_v19, %v753_v4  ;;  %v856_v56 = vadd.f32 %v1718_v19, %v785_v7 }
  0xf2   :  { %953 = vst.msk [vmem:[#allocation2 + $0x10] sm:$0xff] %vm153_vm0, %v889_v1  ;;  %985 = vst.msk [vmem:[#allocation2 + $0x110] sm:$0xff] %vm153_vm0, %v921_v8  ;;  %v890_v3 = vmax.f32 %v826_v10, 0.0  ;;  %v922_v5 = vmax.f32 %v858_v12, 0.0  ;;  %v552_v44 = vmul.f32 %v1121_v42, %v1687_v9  ;;  %v584_v6 = vmul.f32 %v1153_v63, %v1687_v9 }
  0xf3   :  { %951 = vst.msk [vmem:[#allocation2] sm:$0xff] %vm153_vm0, %v887_v0  ;;  %983 = vst.msk [vmem:[#allocation2 + $0x100] sm:$0xff] %vm153_vm0, %v919_v62  ;;  %v888_v43 = vmax.f32 %v824_v54, 0.0  ;;  %v920_v11 = vmax.f32 %v856_v56, 0.0  ;;  %v550_v21 = vmul.f32 %v1687_v9, %v300_v57  ;;  %v582_v55 = vmul.f32 %v1687_v9, %v428_v13 }
  0xf4   :  { %954 = vst.msk [vmem:[#allocation2 + $0x18] sm:$0xff] %vm153_vm0, %v890_v3  ;;  %986 = vst.msk [vmem:[#allocation2 + $0x118] sm:$0xff] %vm153_vm0, %v922_v5  ;;  %v623_v4 = vadd.f32 %v1692_v2, %v552_v44  ;;  %v655_v42 = vadd.f32 %v1692_v2, %v584_v6  ;;  %v553_v63 = vmul.f32 %v1122_v45, %v1687_v9 }
  0xf5   :  { %v585_v0 = vmul.f32 %v1154_v33, %v1687_v9  ;;  %952 = vst.msk [vmem:[#allocation2 + $0x8] sm:$0xff] %vm153_vm0, %v888_v43  ;;  %984 = vst.msk [vmem:[#allocation2 + $0x108] sm:$0xff] %vm153_vm0, %v920_v11  ;;  %v621_v62 = vadd.f32 %v1692_v2, %v550_v21  ;;  %v653_v57 = vadd.f32 %v1692_v2, %v582_v55  ;;  %v1125_v1 = vpop.f32.mrb[8].mxu0  ;;  %v1157_v8 = vpop.f32.mrb[8].mxu1 }
  0xf6   :  { %v551_v13 = vmul.f32 %v1687_v9, %v303_v30  ;;  %v583_v7 = vmul.f32 %v1687_v9, %v431_v32  ;;  %v687_v10 = vadd.f32 %v623_v4, %v1347_v22  ;;  %v719_v45 = vadd.f32 %v655_v42, %v1359_v24  ;;  %v316_v54 = vpop.f32.mrb[9].mxu0  ;;  %v444_v56 = vpop.f32.mrb[9].mxu1 }
  0xf7   :  { %v624_v33 = vadd.f32 %v1692_v2, %v553_v63  ;;  %v656_v12 = vadd.f32 %v1692_v2, %v585_v0  ;;  %v685_v3 = vadd.f32 %v621_v62, %v1317_v14  ;;  %v717_v5 = vadd.f32 %v653_v57, %v1327_v16  ;;  %v1126_v44 = vpop.f32.mrb[10].mxu0  ;;  %v1158_v6 = vpop.f32.mrb[10].mxu1 }
  0xf8   :  { %v622_v30 = vadd.f32 %v1692_v2, %v551_v13  ;;  %v654_v32 = vadd.f32 %v1692_v2, %v583_v7  ;;  %v758_v22 = vmul.f32 %v1705_v31, %v687_v10  ;;  %v790_v24 = vmul.f32 %v1705_v31, %v719_v45  ;;  %v319_v21 = vpop.f32.mrb[11].mxu0  ;;  %v447_v55 = vpop.f32.mrb[11].mxu1 }
  0xf9   :  { %v688_v43 = vadd.f32 %v624_v33, %v1352_v23  ;;  %v720_v11 = vadd.f32 %v656_v12, %v1364_v25  ;;  %v756_v14 = vmul.f32 %v1705_v31, %v685_v3  ;;  %v788_v16 = vmul.f32 %v1705_v31, %v717_v5 }
  0xfa   :  { %v686_v4 = vadd.f32 %v622_v30, %v1322_v15  ;;  %v718_v42 = vadd.f32 %v654_v32, %v1332_v17  ;;  %v829_v63 = vadd.f32 %v1718_v19, %v758_v22  ;;  %v861_v0 = vadd.f32 %v1718_v19, %v790_v24 }
  0xfb   :  { %v759_v62 = vmul.f32 %v1705_v31, %v688_v43  ;;  %v791_v23 = vmul.f32 %v1705_v31, %v720_v11  ;;  %v827_v25 = vadd.f32 %v1718_v19, %v756_v14  ;;  %v859_v57 = vadd.f32 %v1718_v19, %v788_v16 }
  0xfc   :  { %v757_v13 = vmul.f32 %v1705_v31, %v686_v4  ;;  %v789_v7 = vmul.f32 %v1705_v31, %v718_v42  ;;  %v893_v10 = vmax.f32 %v829_v63, 0.0  ;;  %v925_v15 = vmax.f32 %v861_v0, 0.0 }
  0xfd   :  { %v830_v17 = vadd.f32 %v1718_v19, %v759_v62  ;;  %v862_v45 = vadd.f32 %v1718_v19, %v791_v23  ;;  %v891_v33 = vmax.f32 %v827_v25, 0.0  ;;  %v923_v12 = vmax.f32 %v859_v57, 0.0  ;;  %v1792_v30 = vpop.f32.mrb[12].mxu0  ;;  %v1794_v32 = vpop.f32.mrb[12].mxu1 }
  0xfe   :  { %v828_v3 = vadd.f32 %v1718_v19, %v757_v13  ;;  %v860_v5 = vadd.f32 %v1718_v19, %v789_v7  ;;  %957 = vst.msk [vmem:[#allocation2 + $0x30] sm:$0xff] %vm153_vm0, %v893_v10  ;;  %989 = vst.msk [vmem:[#allocation2 + $0x130] sm:$0xff] %vm153_vm0, %v925_v15  ;;  %v556_v43 = vmul.f32 %v1125_v1, %v1687_v9  ;;  %v1800_v14 = vpop.f32.mrb[13].mxu0  ;;  %v1802_v16 = vpop.f32.mrb[13].mxu1 }
  0xff   :  { %v894_v22 = vmax.f32 %v830_v17, 0.0  ;;  %v926_v24 = vmax.f32 %v862_v45, 0.0  ;;  %v588_v11 = vmul.f32 %v1157_v8, %v1687_v9  ;;  %955 = vst.msk [vmem:[#allocation2 + $0x20] sm:$0xff] %vm153_vm0, %v891_v33  ;;  %987 = vst.msk [vmem:[#allocation2 + $0x120] sm:$0xff] %vm153_vm0, %v923_v12  ;;  %v554_v63 = vmul.f32 %v1687_v9, %v316_v54  ;;  %v1808_v62 = vpop.f32.mrb[14].mxu0  ;;  %v1810_v23 = vpop.f32.mrb[14].mxu1 }
 0x100   :  { %v892_v4 = vmax.f32 %v828_v3, 0.0  ;;  %v924_v42 = vmax.f32 %v860_v5, 0.0  ;;  %v586_v0 = vmul.f32 %v1687_v9, %v444_v56  ;;  %v627_v1 = vadd.f32 %v1692_v2, %v556_v43  ;;  %v1818_v13 = vpop.f32.mrb[15].mxu0  ;;  %v1820_v54 = vpop.f32.mrb[15].mxu1 }
 0x101   :  { %958 = vst.msk [vmem:[#allocation2 + $0x38] sm:$0xff] %vm153_vm0, %v894_v22  ;;  %990 = vst.msk [vmem:[#allocation2 + $0x138] sm:$0xff] %vm153_vm0, %v926_v24  ;;  %v659_v8 = vadd.f32 %v1692_v2, %v588_v11  ;;  %v557_v25 = vmul.f32 %v1126_v44, %v1687_v9  ;;  %v589_v57 = vmul.f32 %v1158_v6, %v1687_v9 }
 0x102   :  { %956 = vst.msk [vmem:[#allocation2 + $0x28] sm:$0xff] %vm153_vm0, %v892_v4  ;;  %988 = vst.msk [vmem:[#allocation2 + $0x128] sm:$0xff] %vm153_vm0, %v924_v42  ;;  %v625_v56 = vadd.f32 %v1692_v2, %v554_v63  ;;  %v657_v7 = vadd.f32 %v1692_v2, %v586_v0  ;;  %v555_v10 = vmul.f32 %v1687_v9, %v319_v21 }
 0x103   :  { %v587_v15 = vmul.f32 %v1687_v9, %v447_v55  ;;  %v691_v44 = vadd.f32 %v627_v1, %v1399_v34  ;;  %v723_v6 = vadd.f32 %v659_v8, %v1411_v36  ;;  %v628_v17 = vadd.f32 %v1692_v2, %v557_v25 }
 0x104   :  { %v660_v45 = vadd.f32 %v1692_v2, %v589_v57  ;;  %v689_v33 = vadd.f32 %v625_v56, %v1369_v26  ;;  %v721_v12 = vadd.f32 %v657_v7, %v1379_v28  ;;  %v626_v3 = vadd.f32 %v1692_v2, %v555_v10 }
 0x105   :  { %v658_v5 = vadd.f32 %v1692_v2, %v587_v15  ;;  %v762_v21 = vmul.f32 %v1705_v31, %v691_v44  ;;  %v794_v55 = vmul.f32 %v1705_v31, %v723_v6  ;;  %v692_v34 = vadd.f32 %v628_v17, %v1404_v35  ;;  %v1844_v43 = vpop.f32.mrb[16].mxu0  ;;  %v1846_v11 = vpop.f32.mrb[16].mxu1 }
 0x106   :  { %v724_v36 = vadd.f32 %v660_v45, %v1416_v37  ;;  %v760_v22 = vmul.f32 %v1705_v31, %v689_v33  ;;  %v792_v24 = vmul.f32 %v1705_v31, %v721_v12  ;;  %v690_v26 = vadd.f32 %v626_v3, %v1374_v27  ;;  %v1852_v63 = vpop.f32.mrb[17].mxu0  ;;  %v1854_v0 = vpop.f32.mrb[17].mxu1 }
 0x107   :  { %v722_v28 = vadd.f32 %v658_v5, %v1384_v29  ;;  %v833_v4 = vadd.f32 %v1718_v19, %v762_v21  ;;  %v865_v42 = vadd.f32 %v1718_v19, %v794_v55  ;;  %v763_v35 = vmul.f32 %v1705_v31, %v692_v34  ;;  %v1860_v25 = vpop.f32.mrb[18].mxu0  ;;  %v1862_v57 = vpop.f32.mrb[18].mxu1 }
 0x108   :  { %v795_v37 = vmul.f32 %v1705_v31, %v724_v36  ;;  %v831_v27 = vadd.f32 %v1718_v19, %v760_v22  ;;  %v863_v29 = vadd.f32 %v1718_v19, %v792_v24  ;;  %v761_v1 = vmul.f32 %v1705_v31, %v690_v26  ;;  %v1866_v44 = vpop.f32.mrb[19].mxu0  ;;  %v1868_v6 = vpop.f32.mrb[19].mxu1 }
 0x109   :  { %v793_v8 = vmul.f32 %v1705_v31, %v722_v28  ;;  %v897_v56 = vmax.f32 %v833_v4, 0.0  ;;  %v929_v7 = vmax.f32 %v865_v42, 0.0  ;;  %v834_v10 = vadd.f32 %v1718_v19, %v763_v35 }
 0x10a   :  { %v866_v15 = vadd.f32 %v1718_v19, %v795_v37  ;;  %v895_v17 = vmax.f32 %v831_v27, 0.0  ;;  %v927_v45 = vmax.f32 %v863_v29, 0.0  ;;  %v832_v33 = vadd.f32 %v1718_v19, %v761_v1 }
 0x10b   :  { %v864_v12 = vadd.f32 %v1718_v19, %v793_v8  ;;  %961 = vst.msk [vmem:[#allocation2 + $0x50] sm:$0xff] %vm153_vm0, %v897_v56  ;;  %993 = vst.msk [vmem:[#allocation2 + $0x150] sm:$0xff] %vm153_vm0, %v929_v7  ;;  %v898_v3 = vmax.f32 %v834_v10, 0.0  ;;  %v560_v21 = vmul.f32 %v1792_v30, %v1687_v9  ;;  %v592_v55 = vmul.f32 %v1794_v32, %v1687_v9 }
 0x10c   :  { %v930_v5 = vmax.f32 %v866_v15, 0.0  ;;  %959 = vst.msk [vmem:[#allocation2 + $0x40] sm:$0xff] %vm153_vm0, %v895_v17  ;;  %991 = vst.msk [vmem:[#allocation2 + $0x140] sm:$0xff] %vm153_vm0, %v927_v45  ;;  %v896_v34 = vmax.f32 %v832_v33, 0.0  ;;  %v558_v22 = vmul.f32 %v1687_v9, %v1800_v14  ;;  %v590_v24 = vmul.f32 %v1687_v9, %v1802_v16 }
 0x10d   :  { %v928_v36 = vmax.f32 %v864_v12, 0.0  ;;  %962 = vst.msk [vmem:[#allocation2 + $0x58] sm:$0xff] %vm153_vm0, %v898_v3  ;;  %v631_v30 = vadd.f32 %v1692_v2, %v560_v21  ;;  %v663_v32 = vadd.f32 %v1692_v2, %v592_v55  ;;  %v561_v26 = vmul.f32 %v1808_v62, %v1687_v9  ;;  %v1900_v35 = vpop.f32.mrb[20].mxu0  ;;  %v1902_v62 = vpop.f32.mrb[20].mxu1 }
 0x10e   :  { %994 = vst.msk [vmem:[#allocation2 + $0x158] sm:$0xff] %vm153_vm0, %v930_v5  ;;  %v593_v28 = vmul.f32 %v1810_v23, %v1687_v9  ;;  %960 = vst.msk [vmem:[#allocation2 + $0x48] sm:$0xff] %vm153_vm0, %v896_v34  ;;  %v629_v14 = vadd.f32 %v1692_v2, %v558_v22  ;;  %v661_v16 = vadd.f32 %v1692_v2, %v590_v24  ;;  %v1908_v1 = vpop.f32.mrb[21].mxu0  ;;  %v1910_v8 = vpop.f32.mrb[21].mxu1 }
 0x10f   :  { %992 = vst.msk [vmem:[#allocation2 + $0x148] sm:$0xff] %vm153_vm0, %v928_v36  ;;  %v559_v4 = vmul.f32 %v1687_v9, %v1818_v13  ;;  %v591_v42 = vmul.f32 %v1687_v9, %v1820_v54  ;;  %v695_v23 = vadd.f32 %v631_v30, %v1451_v46  ;;  %v727_v37 = vadd.f32 %v663_v32, %v1463_v48  ;;  %v1916_v10 = vpop.f32.mrb[22].mxu0  ;;  %v1918_v46 = vpop.f32.mrb[22].mxu1 }
 0x110   :  { %v632_v27 = vadd.f32 %v1692_v2, %v561_v26  ;;  %v664_v29 = vadd.f32 %v1692_v2, %v593_v28  ;;  %v693_v13 = vadd.f32 %v629_v14, %v1421_v38  ;;  %v725_v54 = vadd.f32 %v661_v16, %v1431_v40  ;;  %v1924_v33 = vpop.f32.mrb[23].mxu0  ;;  %v1926_v38 = vpop.f32.mrb[23].mxu1 }
 0x111   :  { %v630_v56 = vadd.f32 %v1692_v2, %v559_v4  ;;  %v662_v7 = vadd.f32 %v1692_v2, %v591_v42  ;;  %v766_v48 = vmul.f32 %v1705_v31, %v695_v23  ;;  %v798_v15 = vmul.f32 %v1705_v31, %v727_v37 }
 0x112   :  { %v696_v17 = vadd.f32 %v632_v27, %v1456_v47  ;;  %v728_v45 = vadd.f32 %v664_v29, %v1468_v49  ;;  %v764_v40 = vmul.f32 %v1705_v31, %v693_v13  ;;  %v796_v12 = vmul.f32 %v1705_v31, %v725_v54 }
 0x113   :  { %v694_v3 = vadd.f32 %v630_v56, %v1426_v39  ;;  %v726_v5 = vadd.f32 %v662_v7, %v1436_v41  ;;  %v837_v21 = vadd.f32 %v1718_v19, %v766_v48  ;;  %v869_v55 = vadd.f32 %v1718_v19, %v798_v15 }
 0x114   :  { %v767_v47 = vmul.f32 %v1705_v31, %v696_v17  ;;  %v799_v49 = vmul.f32 %v1705_v31, %v728_v45  ;;  %v835_v34 = vadd.f32 %v1718_v19, %v764_v40  ;;  %v867_v36 = vadd.f32 %v1718_v19, %v796_v12 }
 0x115   :  { %v765_v22 = vmul.f32 %v1705_v31, %v694_v3  ;;  %v797_v24 = vmul.f32 %v1705_v31, %v726_v5  ;;  %v901_v30 = vmax.f32 %v837_v21, 0.0  ;;  %v933_v39 = vmax.f32 %v869_v55, 0.0  ;;  %v1944_v4 = vpop.f32.mrb[24].mxu0  ;;  %v1946_v42 = vpop.f32.mrb[24].mxu1 }
 0x116   :  { %v838_v41 = vadd.f32 %v1718_v19, %v767_v47  ;;  %v870_v32 = vadd.f32 %v1718_v19, %v799_v49  ;;  %v899_v26 = vmax.f32 %v835_v34, 0.0  ;;  %v931_v28 = vmax.f32 %v867_v36, 0.0  ;;  %v1954_v13 = vpop.f32.mrb[25].mxu0  ;;  %v1956_v54 = vpop.f32.mrb[25].mxu1 }
 0x117   :  { %v836_v14 = vadd.f32 %v1718_v19, %v765_v22  ;;  %v868_v16 = vadd.f32 %v1718_v19, %v797_v24  ;;  %965 = vst.msk [vmem:[#allocation2 + $0x70] sm:$0xff] %vm153_vm0, %v901_v30  ;;  %997 = vst.msk [vmem:[#allocation2 + $0x170] sm:$0xff] %vm153_vm0, %v933_v39  ;;  %v564_v27 = vmul.f32 %v1844_v43, %v1687_v9  ;;  %v1964_v43 = vpop.f32.mrb[26].mxu0  ;;  %v1966_v17 = vpop.f32.mrb[26].mxu1 }
 0x118   :  { %v902_v23 = vmax.f32 %v838_v41, 0.0  ;;  %v934_v37 = vmax.f32 %v870_v32, 0.0  ;;  %v596_v29 = vmul.f32 %v1846_v11, %v1687_v9  ;;  %963 = vst.msk [vmem:[#allocation2 + $0x60] sm:$0xff] %vm153_vm0, %v899_v26  ;;  %995 = vst.msk [vmem:[#allocation2 + $0x160] sm:$0xff] %vm153_vm0, %v931_v28  ;;  %v562_v48 = vmul.f32 %v1687_v9, %v1852_v63  ;;  %v1976_v12 = vpop.f32.mrb[27].mxu0 }
 0x119   :  { %v900_v56 = vmax.f32 %v836_v14, 0.0  ;;  %v932_v7 = vmax.f32 %v868_v16, 0.0  ;;  %v594_v15 = vmul.f32 %v1687_v9, %v1854_v0  ;;  %v635_v11 = vadd.f32 %v1692_v2, %v564_v27  ;;  %v1978_v0 = vpop.f32.mrb[27].mxu1 }
 0x11a   :  { %966 = vst.msk [vmem:[#allocation2 + $0x78] sm:$0xff] %vm153_vm0, %v902_v23  ;;  %998 = vst.msk [vmem:[#allocation2 + $0x178] sm:$0xff] %vm153_vm0, %v934_v37  ;;  %v667_v45 = vadd.f32 %v1692_v2, %v596_v29  ;;  %v565_v40 = vmul.f32 %v1860_v25, %v1687_v9  ;;  %v597_v63 = vmul.f32 %v1862_v57, %v1687_v9 }
 0x11b   :  { %964 = vst.msk [vmem:[#allocation2 + $0x68] sm:$0xff] %vm153_vm0, %v900_v56  ;;  %996 = vst.msk [vmem:[#allocation2 + $0x168] sm:$0xff] %vm153_vm0, %v932_v7  ;;  %v633_v3 = vadd.f32 %v1692_v2, %v562_v48  ;;  %v665_v5 = vadd.f32 %v1692_v2, %v594_v15  ;;  %v563_v21 = vmul.f32 %v1687_v9, %v1866_v44 }
 0x11c   :  { %v595_v25 = vmul.f32 %v1687_v9, %v1868_v6  ;;  %v699_v57 = vadd.f32 %v635_v11, %v1503_v58  ;;  %v731_v55 = vadd.f32 %v667_v45, %v1515_v60  ;;  %v636_v47 = vadd.f32 %v1692_v2, %v565_v40 }
 0x11d   :  { %v668_v49 = vadd.f32 %v1692_v2, %v597_v63  ;;  %v697_v34 = vadd.f32 %v633_v3, %v1473_v50  ;;  %v729_v36 = vadd.f32 %v665_v5, %v1483_v52  ;;  %v634_v22 = vadd.f32 %v1692_v2, %v563_v21  ;;  %v2004_v41 = vpop.f32.mrb[28].mxu0  ;;  %v2006_v32 = vpop.f32.mrb[28].mxu1 }
 0x11e   :  { %v666_v24 = vadd.f32 %v1692_v2, %v595_v25  ;;  %v770_v44 = vmul.f32 %v1705_v31, %v699_v57  ;;  %v802_v6 = vmul.f32 %v1705_v31, %v731_v55  ;;  %v700_v58 = vadd.f32 %v636_v47, %v1508_v59  ;;  %v2012_v14 = vpop.f32.mrb[29].mxu0  ;;  %v2014_v16 = vpop.f32.mrb[29].mxu1 }
 0x11f   :  { %v732_v60 = vadd.f32 %v668_v49, %v1520_v61  ;;  %v768_v30 = vmul.f32 %v1705_v31, %v697_v34  ;;  %v800_v39 = vmul.f32 %v1705_v31, %v729_v36  ;;  %v698_v50 = vadd.f32 %v634_v22, %v1478_v51  ;;  %v2020_v27 = vpop.f32.mrb[30].mxu0  ;;  %v2022_v29 = vpop.f32.mrb[30].mxu1 }
 0x120   :  { %v730_v52 = vadd.f32 %v666_v24, %v1488_v53  ;;  %v841_v26 = vadd.f32 %v1718_v19, %v770_v44  ;;  %v873_v28 = vadd.f32 %v1718_v19, %v802_v6  ;;  %v771_v59 = vmul.f32 %v1705_v31, %v700_v58  ;;  %v2026_v11 = vpop.f32.mrb[31].mxu0  ;;  %v2028_v45 = vpop.f32.mrb[31].mxu1 }
 0x121   :  { %v803_v61 = vmul.f32 %v1705_v31, %v732_v60  ;;  %v839_v51 = vadd.f32 %v1718_v19, %v768_v30  ;;  %v871_v53 = vadd.f32 %v1718_v19, %v800_v39  ;;  %v769_v23 = vmul.f32 %v1705_v31, %v698_v50  ;;  %v2271_v30 = vld [vmem:[#allocation5_spill] sm:$0xff]  ;;  %v2272_v50 = vld [vmem:[#allocation7_spill] sm:$0xff] }
 0x122   :  { %v801_v37 = vmul.f32 %v1705_v31, %v730_v52  ;;  %v905_v56 = vmax.f32 %v841_v26, 0.0  ;;  %v937_v7 = vmax.f32 %v873_v28, 0.0  ;;  %v842_v48 = vadd.f32 %v1718_v19, %v771_v59  ;;  %v2273_v59 = vld [vmem:[#allocation9_spill] sm:$0xff] }
 0x123   :  { %v874_v15 = vadd.f32 %v1718_v19, %v803_v61  ;;  %v903_v40 = vmax.f32 %v839_v51, 0.0  ;;  %v935_v63 = vmax.f32 %v871_v53, 0.0  ;;  %v840_v3 = vadd.f32 %v1718_v19, %v769_v23  ;;  %v2274_v61 = vld [vmem:[#allocation10_spill] sm:$0xff] }
 0x124   :  { %v872_v5 = vadd.f32 %v1718_v19, %v801_v37  ;;  %969 = vst.msk [vmem:[#allocation2 + $0x90] sm:$0xff] %vm153_vm0, %v905_v56  ;;  %1001 = vst.msk [vmem:[#allocation2 + $0x190] sm:$0xff] %vm153_vm0, %v937_v7  ;;  %v906_v21 = vmax.f32 %v842_v48, 0.0  ;;  %v568_v57 = vmul.f32 %v1900_v35, %v1687_v9  ;;  %v600_v55 = vmul.f32 %v1902_v62, %v1687_v9  ;;  %v2275_v23 = vld [vmem:[#allocation6_spill] sm:$0xff]  ;;  %v2276_v56 = vld [vmem:[#allocation8_spill] sm:$0xff] }
 0x125   :  { %v938_v25 = vmax.f32 %v874_v15, 0.0  ;;  %967 = vst.msk [vmem:[#allocation2 + $0x80] sm:$0xff] %vm153_vm0, %v903_v40  ;;  %999 = vst.msk [vmem:[#allocation2 + $0x180] sm:$0xff] %vm153_vm0, %v935_v63  ;;  %v904_v47 = vmax.f32 %v840_v3, 0.0  ;;  %v566_v34 = vmul.f32 %v1687_v9, %v1908_v1  ;;  %v598_v36 = vmul.f32 %v1687_v9, %v1910_v8 }
 0x126   :  { %v936_v49 = vmax.f32 %v872_v5, 0.0  ;;  %970 = vst.msk [vmem:[#allocation2 + $0x98] sm:$0xff] %vm153_vm0, %v906_v21  ;;  %v639_v35 = vadd.f32 %v1692_v2, %v568_v57  ;;  %v671_v62 = vadd.f32 %v1692_v2, %v600_v55  ;;  %v569_v22 = vmul.f32 %v1916_v10, %v1687_v9 }
 0x127   :  { %1002 = vst.msk [vmem:[#allocation2 + $0x198] sm:$0xff] %vm153_vm0, %v938_v25  ;;  %v601_v24 = vmul.f32 %v1918_v46, %v1687_v9  ;;  %968 = vst.msk [vmem:[#allocation2 + $0x88] sm:$0xff] %vm153_vm0, %v904_v47  ;;  %v637_v1 = vadd.f32 %v1692_v2, %v566_v34  ;;  %v669_v8 = vadd.f32 %v1692_v2, %v598_v36 }
 0x128   :  { %1000 = vst.msk [vmem:[#allocation2 + $0x188] sm:$0xff] %vm153_vm0, %v936_v49  ;;  %v567_v44 = vmul.f32 %v1687_v9, %v1924_v33  ;;  %v599_v6 = vmul.f32 %v1687_v9, %v1926_v38  ;;  %v703_v58 = vadd.f32 %v639_v35, %v1555_v18  ;;  %v735_v10 = vadd.f32 %v671_v62, %v1567_v20 }
 0x129   :  { %v640_v46 = vadd.f32 %v1692_v2, %v569_v22  ;;  %v672_v60 = vadd.f32 %v1692_v2, %v601_v24  ;;  %v701_v39 = vadd.f32 %v637_v1, %v2271_v30  ;;  %v733_v52 = vadd.f32 %v669_v8, %v2272_v50  ;;  %v2277_v50 = vld [vmem:[#allocation15_spill] sm:$0xff] }
 0x12a   :  { %v638_v26 = vadd.f32 %v1692_v2, %v567_v44  ;;  %v670_v28 = vadd.f32 %v1692_v2, %v599_v6  ;;  %v774_v33 = vmul.f32 %v1705_v31, %v703_v58  ;;  %v806_v38 = vmul.f32 %v1705_v31, %v735_v10 }
 0x12b   :  { %v704_v18 = vadd.f32 %v640_v46, %v2273_v59  ;;  %v736_v20 = vadd.f32 %v672_v60, %v2274_v61  ;;  %v772_v51 = vmul.f32 %v1705_v31, %v701_v39  ;;  %v804_v53 = vmul.f32 %v1705_v31, %v733_v52  ;;  %v2280_v59 = vld [vmem:[#allocation13_spill] sm:$0xff] }
 0x12c   :  { %v702_v37 = vadd.f32 %v638_v26, %v2275_v23  ;;  %v734_v7 = vadd.f32 %v670_v28, %v2276_v56  ;;  %v845_v48 = vadd.f32 %v1718_v19, %v774_v33  ;;  %v877_v15 = vadd.f32 %v1718_v19, %v806_v38  ;;  %v2279_v33 = vld [vmem:[#allocation11_spill] sm:$0xff]  ;;  %v2282_v23 = vld [vmem:[#allocation18_spill] sm:$0xff] }
 0x12d   :  { %v775_v40 = vmul.f32 %v1705_v31, %v704_v18  ;;  %v807_v63 = vmul.f32 %v1705_v31, %v736_v20  ;;  %v843_v3 = vadd.f32 %v1718_v19, %v772_v51  ;;  %v875_v5 = vadd.f32 %v1718_v19, %v804_v53  ;;  %v2281_v51 = vld [vmem:[#allocation16_spill] sm:$0xff] }
 0x12e   :  { %v773_v21 = vmul.f32 %v1705_v31, %v702_v37  ;;  %v805_v25 = vmul.f32 %v1705_v31, %v734_v7  ;;  %v909_v57 = vmax.f32 %v845_v48, 0.0  ;;  %v941_v55 = vmax.f32 %v877_v15, 0.0  ;;  %v2283_v48 = vld [vmem:[#allocation12_spill] sm:$0xff] }
 0x12f   :  { %v846_v47 = vadd.f32 %v1718_v19, %v775_v40  ;;  %v878_v49 = vadd.f32 %v1718_v19, %v807_v63  ;;  %v907_v34 = vmax.f32 %v843_v3, 0.0  ;;  %v939_v36 = vmax.f32 %v875_v5, 0.0  ;;  %v2284_v40 = vld [vmem:[#allocation14_spill] sm:$0xff] }
 0x130   :  { %v844_v35 = vadd.f32 %v1718_v19, %v773_v21  ;;  %v876_v62 = vadd.f32 %v1718_v19, %v805_v25  ;;  %973 = vst.msk [vmem:[#allocation2 + $0xb0] sm:$0xff] %vm153_vm0, %v909_v57  ;;  %1005 = vst.msk [vmem:[#allocation2 + $0x1b0] sm:$0xff] %vm153_vm0, %v941_v55  ;;  %v572_v1 = vmul.f32 %v1944_v4, %v1687_v9 }
 0x131   :  { %v910_v22 = vmax.f32 %v846_v47, 0.0  ;;  %v942_v24 = vmax.f32 %v878_v49, 0.0  ;;  %v604_v8 = vmul.f32 %v1946_v42, %v1687_v9  ;;  %971 = vst.msk [vmem:[#allocation2 + $0xa0] sm:$0xff] %vm153_vm0, %v907_v34  ;;  %1003 = vst.msk [vmem:[#allocation2 + $0x1a0] sm:$0xff] %vm153_vm0, %v939_v36  ;;  %v570_v58 = vmul.f32 %v1687_v9, %v1954_v13 }
 0x132   :  { %v908_v44 = vmax.f32 %v844_v35, 0.0  ;;  %v940_v6 = vmax.f32 %v876_v62, 0.0  ;;  %v602_v10 = vmul.f32 %v1687_v9, %v1956_v54  ;;  %v643_v4 = vadd.f32 %v1692_v2, %v572_v1 }
 0x133   :  { %974 = vst.msk [vmem:[#allocation2 + $0xb8] sm:$0xff] %vm153_vm0, %v910_v22  ;;  %1006 = vst.msk [vmem:[#allocation2 + $0x1b8] sm:$0xff] %vm153_vm0, %v942_v24  ;;  %v675_v42 = vadd.f32 %v1692_v2, %v604_v8  ;;  %v573_v46 = vmul.f32 %v1964_v43, %v1687_v9  ;;  %v605_v60 = vmul.f32 %v1966_v17, %v1687_v9  ;;  %v2278_v43 = vld [vmem:[#allocation17_spill] sm:$0xff] }
 0x134   :  { %972 = vst.msk [vmem:[#allocation2 + $0xa8] sm:$0xff] %vm153_vm0, %v908_v44  ;;  %1004 = vst.msk [vmem:[#allocation2 + $0x1a8] sm:$0xff] %vm153_vm0, %v940_v6  ;;  %v641_v13 = vadd.f32 %v1692_v2, %v570_v58  ;;  %v673_v54 = vadd.f32 %v1692_v2, %v602_v10  ;;  %v571_v30 = vmul.f32 %v1687_v9, %v1976_v12 }
 0x135   :  { %v603_v39 = vmul.f32 %v1687_v9, %v1978_v0  ;;  %v707_v52 = vadd.f32 %v643_v4, %v2277_v50  ;;  %v739_v26 = vadd.f32 %v675_v42, %v2278_v43  ;;  %v644_v17 = vadd.f32 %v1692_v2, %v573_v46  ;;  %v2285_v50 = vld [vmem:[#allocation23_spill] sm:$0xff] }
 0x136   :  { %v676_v28 = vadd.f32 %v1692_v2, %v605_v60  ;;  %v705_v38 = vadd.f32 %v641_v13, %v2279_v33  ;;  %v737_v18 = vadd.f32 %v673_v54, %v2280_v59  ;;  %v642_v61 = vadd.f32 %v1692_v2, %v571_v30  ;;  %v2288_v33 = vld [vmem:[#allocation21_spill] sm:$0xff] }
 0x137   :  { %v674_v20 = vadd.f32 %v1692_v2, %v603_v39  ;;  %v778_v12 = vmul.f32 %v1705_v31, %v707_v52  ;;  %v810_v0 = vmul.f32 %v1705_v31, %v739_v26  ;;  %v708_v53 = vadd.f32 %v644_v17, %v2281_v51  ;;  %v2287_v17 = vld [vmem:[#allocation19_spill] sm:$0xff] }
 0x138   :  { %v740_v37 = vadd.f32 %v676_v28, %v2282_v23  ;;  %v776_v56 = vmul.f32 %v1705_v31, %v705_v38  ;;  %v808_v7 = vmul.f32 %v1705_v31, %v737_v18  ;;  %v706_v15 = vadd.f32 %v642_v61, %v2283_v48 }
 0x139   :  { %v738_v63 = vadd.f32 %v674_v20, %v2284_v40  ;;  %v849_v3 = vadd.f32 %v1718_v19, %v778_v12  ;;  %v881_v5 = vadd.f32 %v1718_v19, %v810_v0  ;;  %v779_v21 = vmul.f32 %v1705_v31, %v708_v53  ;;  %v2290_v20 = vld [vmem:[#allocation26_spill] sm:$0xff]  ;;  %v2291_v53 = vld [vmem:[#allocation20_spill] sm:$0xff] }
 0x13a   :  { %v811_v25 = vmul.f32 %v1705_v31, %v740_v37  ;;  %v847_v57 = vadd.f32 %v1718_v19, %v776_v56  ;;  %v879_v55 = vadd.f32 %v1718_v19, %v808_v7  ;;  %v777_v47 = vmul.f32 %v1705_v31, %v706_v15  ;;  %v2292_v37 = vld [vmem:[#allocation22_spill] sm:$0xff] }
 0x13b   :  { %v809_v49 = vmul.f32 %v1705_v31, %v738_v63  ;;  %v913_v34 = vmax.f32 %v849_v3, 0.0  ;;  %v945_v36 = vmax.f32 %v881_v5, 0.0  ;;  %v850_v35 = vadd.f32 %v1718_v19, %v779_v21 }
 0x13c   :  { %v882_v62 = vadd.f32 %v1718_v19, %v811_v25  ;;  %v911_v22 = vmax.f32 %v847_v57, 0.0  ;;  %v943_v24 = vmax.f32 %v879_v55, 0.0  ;;  %v848_v1 = vadd.f32 %v1718_v19, %v777_v47 }
 0x13d   :  { %v880_v8 = vadd.f32 %v1718_v19, %v809_v49  ;;  %977 = vst.msk [vmem:[#allocation2 + $0xd0] sm:$0xff] %vm153_vm0, %v913_v34  ;;  %1009 = vst.msk [vmem:[#allocation2 + $0x1d0] sm:$0xff] %vm153_vm0, %v945_v36  ;;  %v914_v44 = vmax.f32 %v850_v35, 0.0  ;;  %v576_v58 = vmul.f32 %v2004_v41, %v1687_v9  ;;  %v608_v10 = vmul.f32 %v2006_v32, %v1687_v9 }
 0x13e   :  { %v946_v6 = vmax.f32 %v882_v62, 0.0  ;;  %975 = vst.msk [vmem:[#allocation2 + $0xc0] sm:$0xff] %vm153_vm0, %v911_v22  ;;  %1007 = vst.msk [vmem:[#allocation2 + $0x1c0] sm:$0xff] %vm153_vm0, %v943_v24  ;;  %v912_v4 = vmax.f32 %v848_v1, 0.0  ;;  %v574_v46 = vmul.f32 %v1687_v9, %v2012_v14  ;;  %v606_v60 = vmul.f32 %v1687_v9, %v2014_v16 }
 0x13f   :  { %v944_v42 = vmax.f32 %v880_v8, 0.0  ;;  %978 = vst.msk [vmem:[#allocation2 + $0xd8] sm:$0xff] %vm153_vm0, %v914_v44  ;;  %v647_v41 = vadd.f32 %v1692_v2, %v576_v58  ;;  %v679_v32 = vadd.f32 %v1692_v2, %v608_v10  ;;  %v577_v13 = vmul.f32 %v2020_v27, %v1687_v9  ;;  %v2286_v27 = vld [vmem:[#allocation25_spill] sm:$0xff] }
 0x140   :  { %1010 = vst.msk [vmem:[#allocation2 + $0x1d8] sm:$0xff] %vm153_vm0, %v946_v6  ;;  %v609_v54 = vmul.f32 %v2022_v29, %v1687_v9  ;;  %976 = vst.msk [vmem:[#allocation2 + $0xc8] sm:$0xff] %vm153_vm0, %v912_v4  ;;  %v645_v14 = vadd.f32 %v1692_v2, %v574_v46  ;;  %v677_v16 = vadd.f32 %v1692_v2, %v606_v60 }
 0x141   :  { %1008 = vst.msk [vmem:[#allocation2 + $0x1c8] sm:$0xff] %vm153_vm0, %v944_v42  ;;  %v575_v30 = vmul.f32 %v1687_v9, %v2026_v11  ;;  %v607_v39 = vmul.f32 %v1687_v9, %v2028_v45  ;;  %v711_v52 = vadd.f32 %v647_v41, %v2285_v50  ;;  %v743_v43 = vadd.f32 %v679_v32, %v2286_v27  ;;  %v2289_v45 = vld [vmem:[#allocation24_spill] sm:$0xff] }
 0x142   :  { %v648_v29 = vadd.f32 %v1692_v2, %v577_v13  ;;  %v680_v26 = vadd.f32 %v1692_v2, %v609_v54  ;;  %v709_v28 = vadd.f32 %v645_v14, %v2287_v17  ;;  %v741_v38 = vadd.f32 %v677_v16, %v2288_v33 }
 0x143   :  { %v646_v59 = vadd.f32 %v1692_v2, %v575_v30  ;;  %v678_v18 = vadd.f32 %v1692_v2, %v607_v39  ;;  %v782_v11 = vmul.f32 %v1705_v31, %v711_v52  ;;  %v814_v9 = vmul.f32 %v1705_v31, %v743_v43 }
 0x144   :  { %v712_v61 = vadd.f32 %v648_v29, %v2289_v45  ;;  %v744_v12 = vadd.f32 %v680_v26, %v2290_v20  ;;  %v780_v0 = vmul.f32 %v1705_v31, %v709_v28  ;;  %v812_v51 = vmul.f32 %v1705_v31, %v741_v38 }
 0x145   :  { %v710_v23 = vadd.f32 %v646_v59, %v2291_v53  ;;  %v742_v56 = vadd.f32 %v678_v18, %v2292_v37  ;;  %v853_v7 = vadd.f32 %v1718_v19, %v782_v11  ;;  %v885_v2 = vadd.f32 %v1718_v19, %v814_v9 }
 0x146   :  { %v783_v48 = vmul.f32 %v1705_v31, %v712_v61  ;;  %v815_v15 = vmul.f32 %v1705_v31, %v744_v12  ;;  %v851_v40 = vadd.f32 %v1718_v19, %v780_v0  ;;  %v883_v63 = vadd.f32 %v1718_v19, %v812_v51 }
 0x147   :  { %v781_v3 = vmul.f32 %v1705_v31, %v710_v23  ;;  %v813_v5 = vmul.f32 %v1705_v31, %v742_v56  ;;  %v917_v21 = vmax.f32 %v853_v7, 0.0  ;;  %v949_v25 = vmax.f32 %v885_v2, 0.0 }
 0x148   :  { %v854_v57 = vadd.f32 %v1718_v19, %v783_v48  ;;  %v886_v55 = vadd.f32 %v1718_v19, %v815_v15  ;;  %v915_v47 = vmax.f32 %v851_v40, 0.0  ;;  %v947_v49 = vmax.f32 %v883_v63, 0.0 }
 0x149   :  { %v852_v34 = vadd.f32 %v1718_v19, %v781_v3  ;;  %v884_v36 = vadd.f32 %v1718_v19, %v813_v5  ;;  %981 = vst.msk [vmem:[#allocation2 + $0xf0] sm:$0xff] %vm153_vm0, %v917_v21  ;;  %1013 = vst.msk [vmem:[#allocation2 + $0x1f0] sm:$0xff] %vm153_vm0, %v949_v25 }
 0x14a   :  { %v918_v35 = vmax.f32 %v854_v57, 0.0  ;;  %v950_v31 = vmax.f32 %v886_v55, 0.0  ;;  %979 = vst.msk [vmem:[#allocation2 + $0xe0] sm:$0xff] %vm153_vm0, %v915_v47  ;;  %1011 = vst.msk [vmem:[#allocation2 + $0x1e0] sm:$0xff] %vm153_vm0, %v947_v49 }
 0x14b   :  { %v916_v62 = vmax.f32 %v852_v34, 0.0  ;;  %v948_v22 = vmax.f32 %v884_v36, 0.0 }
 0x14c   :  { %982 = vst.msk [vmem:[#allocation2 + $0xf8] sm:$0xff] %vm153_vm0, %v918_v35  ;;  %1014 = vst.msk [vmem:[#allocation2 + $0x1f8] sm:$0xff] %vm153_vm0, %v950_v31 }
 0x14d   :  { %980 = vst.msk [vmem:[#allocation2 + $0xe8] sm:$0xff] %vm153_vm0, %v916_v62  ;;  %1012 = vst.msk [vmem:[#allocation2 + $0x1e8] sm:$0xff] %vm153_vm0, %v948_v22 }
 0x14e   :  { %1205 = shalt.err (!%p1202_p4)
}
 0x14f   :  { %s1206_s16 = scalar_lea.hbm %s2226_s6, 8192 }
 0x150   :  { %p1207_p5 = scmp.ne.s32.totalorder %s2226_s6, %s1206_s16  ;;  %p1210_p6 = scmp.lt.u32.totalorder %s1206_s16, %s2226_s6 }
 0x152   :  { %p1212_p7 = pnand %p1210_p6, %p1207_p5 }
 0x154   :  { %1215 = shalt.err (!%p1212_p7)
}
 0x155   :  { %s1219_s20 = smov 128   ;;  %s1220_s21 = smov 8  }
 0x156   :  { %1026 = dma.vmem_to_hbm [thread:$0]  %s1021_s5, 8192, %s2226_s6, [#allocation3], %s1219_s20, %s1219_s20, %s1220_s21  }
 0x157   :  { %1216 = dma.done.wait [#allocation3], 8192  }
 0x158   :  { %1217 = vsyncadd [#allocation3], 4294959104 }
 0x159   :  { %1030 = vsyncpa [#allocation3], 1 }

// kernel: _lambda_.4
= control target key start
LH: loop header
LB: loop body
LE: loop exit
PB: predicated region body
PF: predicated region fallthrough
CT: control target
= control target key end

     0   :  { %s6705_s21 = smov 0   ;;  %s10012_s0 = inlined_call_operand.vmem [shape: bf16[2,20,20,64], index: 0, kind: input, shape index: {}]   ;;  %s10013_s1 = inlined_call_operand.vmem [shape: bf16[576,64], index: 1, kind: input, shape index: {}]   ;;  %s10014_s2 = inlined_call_operand.vmem [shape: bf16[576,64], index: 2, kind: input, shape index: {}]   ;;  %s10015_s3 = inlined_call_operand.vmem [shape: f32[1,64], index: 3, kind: input, shape index: {}]   ;;  %s10016_s4 = inlined_call_operand.vmem [shape: f32[1,64], index: 4, kind: input, shape index: {}]   ;;  %s10017_s5 = inlined_call_operand.vmem [shape: f32[1,64], index: 5, kind: input, shape index: {}]   ;;  %s10018_s6 = inlined_call_operand.vmem [shape: f32[1,64], index: 6, kind: input, shape index: {}]   ;;  %s10019_s7 = inlined_call_operand.vmem [shape: bf16[64,32], index: 7, kind: input, shape index: {}]   ;;  %s10020_s8 = inlined_call_operand.vmem [shape: f32[1,32], index: 8, kind: input, shape index: {}]   ;;  %s10021_s9 = inlined_call_operand.vmem [shape: f32[1,32], index: 9, kind: input, shape index: {}]   ;;  %s10022_s10 = inlined_call_operand.vmem [shape: bf16[32,128], index: 10, kind: input, shape index: {}]   ;;  %s10023_s11 = inlined_call_operand.vmem [shape: f32[1,128], index: 11, kind: input, shape index: {}]   ;;  %s10024_s12 = inlined_call_operand.vmem [shape: f32[2,16,16,64], index: 12, kind: output, shape index: {}]  }
   0x1 LB: > { %s5660_s22 = sadd.s32 4294967295, %s6635_s21   ;;  %p5664_p0 = scmp.ge.s32.totalorder %s6635_s21, 1  ;;  %s6635_s21 = sphi %s6705_s21, %s22_s21  }
   0x2   : > { %p362_p1 = scmp.lt.s32.totalorder %s6635_s21, 3 }
   0x4   : > { %p363_p2 = pnand %p5664_p0, %p362_p1 }
   0x6   : > { %366 = sbr.rel (%p363_p2) target bundleno = 1879 (0x757), region = 68 }
   0xd   : > { %p404_p3 = scmp.lt.s32.totalorder %s5660_s22, 1  ;;  %v6455_v0 = vld [vmem:[%s10013_s1 + $0xc0] sm:$0xff]   ;;  %v6461_v4 = vld [vmem:[%s10013_s1 + $0xc8] sm:$0xff]   ;;  %vm892_vm0 = vcmask 1046528   ;;  %vm603_vm1 = vsmask.f32 7424 }
   0xe   : > { %5939 = vmatprep.subr.bf16.mxu1 %v6455_v0  ;;  %v6458_v1 = vld [vmem:[%s10013_s1 + $0x80] sm:$0xff]   ;;  %v6462_v5 = vld [vmem:[%s10013_s1 + $0x88] sm:$0xff]   ;;  %s6637_s23 = smov 64   ;;  %v6465_v60 = vld [vmem:[%s10013_s1 + $0xd0] sm:$0xff]   ;;  %vm1127_vm2 = vcmask 523264   ;;  %vm3050_vm3 = vcmask 1045504  }
   0xf   : > { %s10580_s22 = smov (!%p404_p3, %s5660_s22), 1  ;;  %v6459_v2 = vld [vmem:[%s10013_s1 + $0x40] sm:$0xff]   ;;  %5940 = vmatpush3.bf16.msra.mxu1 %v6458_v1  ;;  %v6463_v53 = vld [vmem:[%s10013_s1 + $0x48] sm:$0xff]   ;;  %v6466_v0 = vld [vmem:[%s10013_s1 + $0x90] sm:$0xff]   ;;  %vm6639_vm4 = vmmov 0   ;;  %vm4628_vm5 = vcmask 130112  }
  0x10   : > { %s6423_s29 = smul.u32 240, %s10580_s22  ;;  %v6460_v3 = vld [vmem:[%s10013_s1] sm:$0xff]   ;;  %5827 = vmatprep.subr.bf16.mxu0 %v6459_v2  ;;  %5941 = vmatprep.subr.bf16.mxu1 %v6461_v4  ;;  %v6464_v58 = vld [vmem:[%s10013_s1 + $0x8] sm:$0xff]   ;;  %vm4765_vm6 = vcmask 1041409   ;;  %vm4767_vm7 = vcmask 1042434   ;;  %vm4769_vm8 = vcmask 1043459  }
  0x11   : > { %5828 = vmatpush3.bf16.msra.mxu0 %v6460_v3  ;;  %vm4456_vm9 = vcmask 261120   ;;  %vm4771_vm10 = vcmask 1044484   ;;  %vm4773_vm11 = vcmask 1045509   ;;  %vm4775_vm12 = vcmask 1046534   ;;  %s5826_s28 = sshll.u32 %s10580_s22, 8 }
  0x12   : > { %s6734_s18 = scalar_lea.vmem %s10012_s0, %s6423_s29  ;;  %5829 = vmatprep.subr.bf16.mxu0 %v6463_v53  ;;  %vm4777_vm13 = vcmask 1047559   ;;  %vm4788_vm14 = vcmask 130048   ;;  %s9803_s29 = scalar_lea.vmem %s10024_s12, %s5826_s28 }
  0x13   : > { %v6740_v6 = vld [vmem:[%s6734_s18 + $0x20] ss:$0 sps:$4 sm:$0x33]   ;;  %v6436_v7 = vld [vmem:[%s6734_s18 + $0x18] sm:$0xff]   ;;  %5942 = vmatpush3.bf16.msra.mxu1 %v6462_v5  ;;  %v6753_v11 = vld [vmem:[%s6734_s18 + $0x24] sm:$0xff]  }
  0x14   : > { %951 = vrot.lane.b32.xlu1 %v6740_v6, %s6637_s23  ;;  %949 = vrot.lane.b32.xlu0 %v6436_v7, %s6637_s23  ;;  %v6747_v8 = vrot.slane %v6740_v6, 1  ;;  %v6750_v9 = vld [vmem:[%s6734_s18 + $0x2c] ss:$0 sps:$4 sm:$0x33]   ;;  %v896_v10 = vrot.slane %v6436_v7, 1  ;;  %v6759_v13 = vld [vmem:[%s6734_s18 + $0x30] sm:$0xff]  }
  0x15   : > { %v6756_v12 = vld [vmem:[%s6734_s18 + $0x14] ss:$0 sps:$4 sm:$0x33]   ;;  %v10033_v14 = vshrl.u32 %v6750_v9, 16  ;;  %v633_v15 = vshrl.u32 %v6753_v11, 16  ;;  %v635_v17 = vshll.u32 %v6753_v11, 16  ;;  %5830 = vmatpush3.bf16.msra.mxu0 %v6464_v58  ;;  %5943 = vmatprep.subr.bf16.mxu1 %v6465_v60 }
  0x16   : > { %v616_v16 = vshrl.u32 %v6756_v12, 16  ;;  %v640_v18 = vshll.u32 %v6750_v9, 16  ;;  %v647_v19 = vshrl.u32 %v6759_v13, 16  ;;  %v649_v20 = vshll.u32 %v6759_v13, 16  ;;  %v6782_v26 = vld [vmem:[%s6734_s18 + $0xc] sm:$0xff]   ;;  %v6807_v48 = vld [vmem:[%s6734_s18 + $0x3c] sm:$0xff]  }
  0x17   : > { %v612_v21 = vshll.u32 %v6756_v12, 16  ;;  %v6776_v22 = vsel %vm892_vm0, %v896_v10, %v6747_v8  ;;  %v637_v23 = vrot.slane %v635_v17, 1  ;;  %v6779_v25 = vld [vmem:[%s6734_s18 + $0x38] ss:$0 sps:$4 sm:$0x33]   ;;  %v605_v30 = vshrl.u32 %v6782_v26, 16  ;;  %5944 = vmatpush3.bf16.msra.mxu1 %v6466_v0 }
  0x18   : > { %1032 = vrot.lane.b32.xlu1 %v6747_v8, %s6637_s23  ;;  %838 = vrot.lane.b32.xlu0 %v10033_v14, %s6637_s23  ;;  %10233 = vst [vmem:[#allocation2_spill] sm:$0xff] %v6776_v22  ;;  %v642_v24 = vrot.slane %v640_v18, 1  ;;  %v651_v27 = vrot.slane %v649_v20, 1  ;;  %v654_v29 = vshll.u32 %v6779_v25, 16  ;;  %v607_v31 = vshll.u32 %v6782_v26, 16  ;;  %v6846_v63 = vld [vmem:[%s6734_s18 + $0x48] sm:$0xff]  }
  0x19   : > { %v638_v28 = vor.u32 %v637_v23, %v633_v15  ;;  %v614_v33 = vrot.slane %v612_v21, 1  ;;  %v621_v34 = vshll.u32 %v6436_v7, 16  ;;  %v626_v35 = vshll.u32 %v6740_v6, 16  ;;  %v6820_v51 = vld [vmem:[%s6734_s18 + $0x44] ss:$0 sps:$4 sm:$0x33]  }
  0x1a   : > { %v652_v32 = vor.u32 %v651_v27, %v647_v19  ;;  %v656_v37 = vrot.slane %v654_v29, 1  ;;  %v609_v38 = vrot.slane %v607_v31, 1  ;;  %v619_v39 = vshrl.u32 %v6436_v7, 16  ;;  %v6864_v4 = vld [vmem:[%s6734_s18 + $0x50] ss:$0 sps:$4 sm:$0x33]  }
  0x1b   : > { %v6792_v36 = vsel %vm603_vm1, %v638_v28, %v642_v24  ;;  %v623_v40 = vrot.slane %v621_v34, 1  ;;  %v628_v42 = vrot.slane %v626_v35, 1  ;;  %v899_v43 = vrot.slane %v6753_v11, 1  ;;  %v6467_v7 = vld [vmem:[%s10013_s1 + $0x50] sm:$0xff]   ;;  %v6469_v23 = vld [vmem:[%s10013_s1 + $0xd8] sm:$0xff]   ;;  %v6475_v34 = vld [vmem:[%s10013_s1 + $0xe0] sm:$0xff]  }
  0x1c   : > { %1030 = vrot.lane.b32.xlu1 %v6776_v22, %s6637_s23  ;;  %830 = vrot.lane.b32.xlu0 %v616_v16, %s6637_s23  ;;  %v610_v41 = vor.u32 %v609_v38, %v605_v30  ;;  %v6800_v44 = vsel %vm603_vm1, %v652_v32, %v656_v37  ;;  %v6804_v47 = vrot.slane %v6750_v9, 1  ;;  %v663_v52 = vshll.u32 %v6807_v48, 16  ;;  %v6882_v19 = vld [vmem:[%s6734_s18 + $0x54] sm:$0xff]   ;;  %v6896_v24 = vld [vmem:[%s6734_s18 + $0x5c] ss:$0 sps:$4 sm:$0x33]  }
  0x1d   : > { %v624_v46 = vor.u32 %v623_v40, %v619_v39  ;;  %v10032_v54 = vshrl.u32 %v6779_v25, 16  ;;  %v661_v55 = vshrl.u32 %v6807_v48, 16  ;;  %v668_v57 = vshll.u32 %v6820_v51, 16  ;;  %5831 = vmatprep.subr.bf16.mxu0 %v6467_v7  ;;  %v6468_v20 = vld [vmem:[%s10013_s1 + $0x10] sm:$0xff]   ;;  %5945 = vmatprep.subr.bf16.mxu1 %v6469_v23  ;;  %v6472_v27 = vld [vmem:[%s10013_s1 + $0x98] sm:$0xff]   ;;  %v6476_v37 = vld [vmem:[%s10013_s1 + $0xa0] sm:$0xff]  }
  0x1e   : > { %v615_v45 = vsel %vm603_vm1, %v610_v41, %v614_v33  ;;  %10234 = vst [vmem:[#allocation3_spill] sm:$0xff] %v6804_v47  ;;  %v6817_v50 = vsel %vm892_vm0, %v899_v43, %v6804_v47  ;;  %v665_v56 = vrot.slane %v663_v52, 1  ;;  %v10034_v59 = vshrl.u32 %v6740_v6, 16  ;;  %5832 = vmatpush3.bf16.msra.mxu0 %v6468_v20  ;;  %v6473_v31 = vld [vmem:[%s10013_s1 + $0x58] sm:$0xff]   ;;  %5946 = vmatpush3.bf16.msra.mxu1 %v6472_v27  ;;  %v6478_v43 = vld [vmem:[%s10013_s1 + $0x20] sm:$0xff]  }
  0x1f   : > { %v6813_v49 = vsel %vm603_vm1, %v624_v46, %v628_v42  ;;  %10235 = vst [vmem:[#allocation4_spill] sm:$0xff] %v6817_v50  ;;  %v670_v62 = vrot.slane %v668_v57, 1  ;;  %v902_v2 = vrot.slane %v6759_v13, 1  ;;  %v6861_v3 = vrot.slane %v6779_v25, 1  ;;  %5833 = vmatprep.subr.bf16.mxu0 %v6473_v31  ;;  %v6474_v33 = vld [vmem:[%s10013_s1 + $0x18] sm:$0xff]   ;;  %5947 = vmatprep.subr.bf16.mxu1 %v6475_v34  ;;  %v6477_v42 = vld [vmem:[%s10013_s1 + $0x60] sm:$0xff]  }
  0x20   : > { %953 = vrot.lane.b32.xlu1 %v6753_v11, %s6637_s23  ;;  %836 = vrot.lane.b32.xlu0 %v6792_v36, %s6637_s23  ;;  %v666_v61 = vor.u32 %v665_v56, %v661_v55  ;;  %v677_v5 = vshll.u32 %v6846_v63, 16  ;;  %v10031_v10 = vshrl.u32 %v6820_v51, 16  ;;  %v675_v15 = vshrl.u32 %v6846_v63, 16  ;;  %v6479_v46 = vld [vmem:[%s10013_s1 + $0xe8] sm:$0xff]   ;;  %v6483_v57 = vld [vmem:[%s10013_s1 + $0xf0] sm:$0xff]  }
  0x21   : > { %10236 = vst [vmem:[#allocation5_spill] sm:$0xff] %v6861_v3  ;;  %v6878_v16 = vsel %vm892_vm0, %v902_v2, %v6861_v3  ;;  %v682_v18 = vshll.u32 %v6864_v4, 16  ;;  %v905_v28 = vrot.slane %v6807_v48, 1  ;;  %v6907_v29 = vrot.slane %v6820_v51, 1  ;;  %v6481_v55 = vld [vmem:[%s10013_s1 + $0x68] sm:$0xff]   ;;  %v6486_v2 = vld [vmem:[%s10013_s1 + $0xb0] sm:$0xff]  }
  0x22   : > { %v6857_v1 = vsel %vm603_vm1, %v666_v61, %v670_v62  ;;  %10237 = vst [vmem:[#allocation6_spill] sm:$0xff] %v6878_v16  ;;  %v679_v17 = vrot.slane %v677_v5, 1  ;;  %v691_v30 = vshll.u32 %v6882_v19, 16  ;;  %v10030_v35 = vshrl.u32 %v6864_v4, 16  ;;  %5834 = vmatpush3.bf16.msra.mxu0 %v6474_v33  ;;  %5948 = vmatpush3.bf16.msra.mxu1 %v6476_v37  ;;  %v6482_v56 = vld [vmem:[%s10013_s1 + $0x28] sm:$0xff]   ;;  %v6487_v5 = vld [vmem:[%s10013_s1 + $0x70] sm:$0xff]  }
  0x23   : > { %v684_v21 = vrot.slane %v682_v18, 1  ;;  %v689_v38 = vshrl.u32 %v6882_v19, 16  ;;  %v696_v39 = vshll.u32 %v6896_v24, 16  ;;  %v6934_v40 = vsel %vm892_vm0, %v905_v28, %v6907_v29  ;;  %5835 = vmatprep.subr.bf16.mxu0 %v6477_v42  ;;  %5949 = vmatprep.subr.bf16.mxu1 %v6479_v46  ;;  %v6977_v62 = vld [vmem:[%s6734_s18 + $0x68] ss:$0 sps:$4 sm:$0x33]  }
  0x24   : > { %840 = vrot.lane.b32.xlu0 %v6800_v44, %s6637_s23  ;;  %828 = vrot.lane.b32.xlu1 %v615_v45, %s6637_s23  ;;  %10238 = vst [vmem:[#allocation7_spill] sm:$0xff] %v6934_v40  ;;  %v693_v41 = vrot.slane %v691_v30, 1  ;;  %v6943_v45 = vld [vmem:[%s6734_s18 + $0x60] sm:$0xff]   ;;  %v908_v58 = vrot.slane %v6846_v63, 1  ;;  %v6971_v60 = vrot.slane %v6864_v4, 1  ;;  %v10029_v7 = vshrl.u32 %v6896_v24, 16 }
  0x25   : > { %v698_v53 = vrot.slane %v696_v39, 1  ;;  %v705_v0 = vshll.u32 %v6943_v45, 16  ;;  %v710_v20 = vshll.u32 %v6977_v62, 16  ;;  %v6490_v23 = vld [vmem:[%s10013_s1 + $0xb8] sm:$0xff]   ;;  %v911_v34 = vrot.slane %v6882_v19, 1 }
  0x26   : > { %v694_v52 = vor.u32 %v693_v41, %v689_v38  ;;  %5836 = vmatpush3.bf16.msra.mxu0 %v6478_v43  ;;  %v6491_v27 = vld [vmem:[%s10013_s1 + $0x78] sm:$0xff]   ;;  %v7029_v37 = vrot.slane %v6896_v24, 1  ;;  %v7032_v38 = vld [vmem:[%s6734_s18 + $0x74] ss:$0 sps:$4 sm:$0x33]   ;;  %v10028_v41 = vshrl.u32 %v6977_v62, 16 }
  0x27   : > { %5837 = vmatprep.subr.bf16.mxu0 %v6481_v55  ;;  %v707_v18 = vrot.slane %v705_v0, 1  ;;  %v712_v30 = vrot.slane %v710_v20, 1  ;;  %v6492_v31 = vld [vmem:[%s10013_s1 + $0x38] sm:$0xff]   ;;  %v7053_v55 = vld [vmem:[%s6734_s18 + $0x80] ss:$0 sps:$4 sm:$0x33]  }
  0x28   : > { %832 = vrot.lane.b32.xlu0 %v6813_v49, %s6637_s23  ;;  %1034 = vrot.lane.b32.xlu1 %v6817_v50, %s6637_s23  ;;  %v6974_v61 = vsel %vm603_vm1, %v694_v52, %v698_v53  ;;  %v7042_v42 = vsel %vm892_vm0, %v911_v34, %v7029_v37  ;;  %v6453_v53 = vld [vmem:[%s6734_s18 + $0x78] sm:$0xff]   ;;  %10239 = vst [vmem:[#allocation8_spill] sm:$0xff] %v7053_v55  ;;  %v7099_v34 = vld [vmem:[%s6734_s18 + $0x8c] ss:$0 sps:$4 sm:$0x33]  }
  0x29   : > { %10241 = vst [vmem:[#allocation10_spill] sm:$0xff] %v7099_v34 }
  0x2a   : > { %5838 = vmatpush3.bf16.msra.mxu0 %v6482_v56  ;;  %v7058_v56 = vld [vmem:[%s10013_s1 + $0x100] sm:$0xff]  }
  0x2b   : > { %5839 = vmatprep.subr.bf16.mxu0 %v6487_v5  ;;  %v733_v5 = vshll.u32 %v6453_v53, 16 }
  0x2c   : > { %842 = vrot.lane.b32.xlu0 %v10032_v54, %s6637_s23  ;;  %955 = vrot.lane.b32.xlu1 %v6750_v9, %s6637_s23 }
  0x30   : > { %834 = vrot.lane.b32.xlu0 %v10034_v59, %s6637_s23  ;;  %1036 = vrot.lane.b32.xlu1 %v6804_v47, %s6637_s23 }
  0x34   : > { %844 = vrot.lane.b32.xlu0 %v6857_v1, %s6637_s23  ;;  %957 = vrot.lane.b32.xlu1 %v6759_v13, %s6637_s23  ;;  %v680_v13 = vor.u32 %v679_v17, %v675_v15  ;;  %v703_v15 = vshrl.u32 %v6943_v45, 16  ;;  %v6994_v17 = vsel %vm892_vm0, %v908_v58, %v6971_v60  ;;  %v6504_v58 = vld [vmem:[%s10014_s2 + $0x40] sm:$0xff]  }
  0x36   : > { %v6914_v32 = vsel %vm603_vm1, %v680_v13, %v684_v21  ;;  %v6488_v13 = vld [vmem:[%s10013_s1 + $0x30] sm:$0xff]   ;;  %v708_v28 = vor.u32 %v707_v18, %v703_v15  ;;  %v10026_v15 = vshrl.u32 %v7032_v38, 16  ;;  %v738_v18 = vshll.u32 %v7053_v55, 16 }
  0x37   : > { %v7004_v21 = vld [vmem:[%s6734_s18 + $0x6c] sm:$0xff]   ;;  %5840 = vmatpush3.bf16.msra.mxu0 %v6488_v13  ;;  %v731_v13 = vshrl.u32 %v6453_v53, 16 }
  0x38   : > { %1038 = vrot.lane.b32.xlu0 %v6878_v16, %s6637_s23  ;;  %846 = vrot.lane.b32.xlu1 %v10031_v10, %s6637_s23  ;;  %v7025_v33 = vsel %vm603_vm1, %v708_v28, %v712_v30  ;;  %v719_v39 = vshll.u32 %v7004_v21, 16  ;;  %v717_v43 = vshrl.u32 %v7004_v21, 16  ;;  %v7095_v28 = vrot.slane %v7032_v38, 1 }
  0x39   : > { %5841 = vmatprep.subr.bf16.mxu0 %v6491_v27  ;;  %v7087_v27 = vld [vmem:[%s6734_s18 + $0x84] sm:$0xff]  }
  0x3a   : > { %v721_v46 = vrot.slane %v719_v39, 1  ;;  %10240 = vst [vmem:[#allocation9_spill] sm:$0xff] %v7095_v28  ;;  %v745_v39 = vshrl.u32 %v7087_v27, 16 }
  0x3b   : > { %5842 = vmatpush3.bf16.msra.mxu0 %v6492_v31  ;;  %v10025_v31 = vshrl.u32 %v7053_v55, 16 }
  0x3c   : > { %959 = vrot.lane.b32.xlu0 %v6779_v25, %s6637_s23  ;;  %1040 = vrot.lane.b32.xlu1 %v6861_v3, %s6637_s23  ;;  %v722_v52 = vor.u32 %v721_v46, %v717_v43  ;;  %v747_v43 = vshll.u32 %v7087_v27, 16 }
  0x3d   : > { %6323 = vmatprep.subr.bf16.mxu0 %v7058_v56 }
  0x40   : > { %848 = vrot.lane.b32.xlu0 %v6914_v32, %s6637_s23  ;;  %961 = vrot.lane.b32.xlu1 %v6807_v48, %s6637_s23  ;;  %v6480_v48 = vld [vmem:[%s10013_s1 + $0xa8] sm:$0xff]  }
  0x41   : > { %5950 = vmatpush3.bf16.msra.mxu1 %v6480_v48  ;;  %v724_v48 = vshll.u32 %v7032_v38, 16 }
  0x42   : > { %5951 = vmatprep.subr.bf16.mxu1 %v6483_v57  ;;  %v914_v57 = vrot.slane %v6943_v45, 1 }
  0x44   : > { %1042 = vrot.lane.b32.xlu0 %v6934_v40, %s6637_s23  ;;  %850 = vrot.lane.b32.xlu1 %v10030_v35, %s6637_s23 }
  0x45   : > { %5952 = vmatpush3.bf16.msra.mxu1 %v6486_v2  ;;  %v7072_v2 = vrot.slane %v6977_v62, 1 }
  0x47   : > { %v7083_v20 = vsel %vm892_vm0, %v914_v57, %v7072_v2  ;;  %v7120_v57 = vld [vmem:[%s6734_s18 + $0x90] sm:$0xff]  }
  0x48   : > { %963 = vrot.lane.b32.xlu0 %v6820_v51, %s6637_s23  ;;  %1044 = vrot.lane.b32.xlu1 %v6907_v29, %s6637_s23 }
  0x4c   : > { %852 = vrot.lane.b32.xlu0 %v6974_v61, %s6637_s23  ;;  %965 = vrot.lane.b32.xlu1 %v6846_v63, %s6637_s23  ;;  %v6489_v63 = vld [vmem:[%s10013_s1 + $0xf8] sm:$0xff]  }
  0x4d   : > { %5953 = vmatprep.subr.bf16.mxu1 %v6489_v63  ;;  %v735_v63 = vrot.slane %v733_v5, 1  ;;  %v920_v5 = vrot.slane %v6453_v53, 1 }
  0x4e   : > { %5954 = vmatpush3.bf16.msra.mxu1 %v6490_v23  ;;  %v917_v23 = vrot.slane %v7004_v21, 1 }
  0x4f   : > { %6071 = vmatprep.subr.bf16.mxu1 %v6504_v58  ;;  %v736_v30 = vor.u32 %v735_v63, %v731_v13  ;;  %v7135_v13 = vrot.slane %v7053_v55, 1  ;;  %v761_v63 = vshll.u32 %v7120_v57, 16 }
  0x50   : > { %1046 = vrot.lane.b32.xlu0 %v6994_v17, %s6637_s23  ;;  %854 = vrot.lane.b32.xlu1 %v10029_v7, %s6637_s23 }
  0x51   : > { %10245 = vst [vmem:[#allocation14_spill] sm:$0xff] %v7135_v13 }
  0x54   : > { %967 = vrot.lane.b32.xlu0 %v6864_v4, %s6637_s23  ;;  %1048 = vrot.lane.b32.xlu1 %v6971_v60, %s6637_s23 }
  0x58   : > { %856 = vrot.lane.b32.xlu0 %v7025_v33, %s6637_s23  ;;  %969 = vrot.lane.b32.xlu1 %v6882_v19, %s6637_s23  ;;  %v726_v19 = vrot.slane %v724_v48, 1  ;;  %v749_v48 = vrot.slane %v747_v43, 1  ;;  %v759_v43 = vshrl.u32 %v7120_v57, 16 }
  0x5a   : > { %v7069_v0 = vsel %vm603_vm1, %v722_v52, %v726_v19  ;;  %v752_v52 = vshll.u32 %v7099_v34, 16  ;;  %v7117_v19 = vsel %vm892_vm0, %v917_v23, %v7095_v28 }
  0x5b   : > { %10243 = vst [vmem:[#allocation12_spill] sm:$0xff] %v7117_v19 }
  0x5c   : > { %1050 = vrot.lane.b32.xlu0 %v7042_v42, %s6637_s23  ;;  %858 = vrot.lane.b32.xlu1 %v10028_v41, %s6637_s23  ;;  %v754_v58 = vrot.slane %v752_v52, 1 }
  0x60   : > { %971 = vrot.lane.b32.xlu0 %v6896_v24, %s6637_s23  ;;  %1052 = vrot.lane.b32.xlu1 %v7029_v37, %s6637_s23 }
  0x64   : > { %860 = vrot.lane.b32.xlu0 %v7069_v0, %s6637_s23  ;;  %973 = vrot.lane.b32.xlu1 %v6943_v45, %s6637_s23  ;;  %v740_v45 = vrot.slane %v738_v18, 1  ;;  %v750_v18 = vor.u32 %v749_v48, %v745_v39  ;;  %v893_v39 = vrot.slane %v6782_v26, 1  ;;  %v763_v48 = vrot.slane %v761_v63, 1  ;;  %v7163_v63 = vld [vmem:[%s6734_s18 + $0xa4] ss:$0 sps:$4 sm:$0x33]  }
  0x65   : > { %v780_v10 = vshll.u32 %v7163_v63, 16 }
  0x66   : > { %v7108_v46 = vsel %vm603_vm1, %v736_v30, %v740_v45  ;;  %v7139_v23 = vsel %vm603_vm1, %v750_v18, %v754_v58  ;;  %v10027_v45 = vshrl.u32 %v7099_v34, 16  ;;  %v894_v30 = vrot.slane %v6756_v12, 1  ;;  %v7154_v18 = vld [vmem:[%s6734_s18 + $0x9c] sm:$0xff]  }
  0x67   : > { %10242 = vst [vmem:[#allocation11_spill] sm:$0xff] %v7108_v46  ;;  %10246 = vst [vmem:[#allocation15_spill] sm:$0xff] %v7139_v23  ;;  %v7151_v58 = vsel %vm892_vm0, %v920_v5, %v7135_v13 }
  0x68   : > { %1054 = vrot.lane.b32.xlu0 %v7083_v20, %s6637_s23  ;;  %862 = vrot.lane.b32.xlu1 %v10026_v15, %s6637_s23  ;;  %10247 = vst [vmem:[#allocation16_spill] sm:$0xff] %v7151_v58  ;;  %v7170_v5 = vsel %vm892_vm0, %v893_v39, %v894_v30  ;;  %v7173_v15 = vrot.slane %v7099_v34, 1 }
  0x6a   : > { %10248 = vst [vmem:[#allocation17_spill] sm:$0xff] %v7173_v15 }
  0x6c   : > { %975 = vrot.lane.b32.xlu0 %v6977_v62, %s6637_s23  ;;  %1056 = vrot.lane.b32.xlu1 %v7072_v2, %s6637_s23 }
  0x70   : > { %864 = vrot.lane.b32.xlu0 %v7108_v46, %s6637_s23  ;;  %977 = vrot.lane.b32.xlu1 %v7004_v21, %s6637_s23  ;;  %v7128_v21 = vld [vmem:[%s6734_s18 + $0x98] ss:$0 sps:$4 sm:$0x33]  }
  0x71   : > { %10244 = vst [vmem:[#allocation13_spill] sm:$0xff] %v7128_v21  ;;  %v766_v52 = vshll.u32 %v7128_v21, 16 }
  0x73   : > { %v768_v12 = vrot.slane %v766_v52, 1 }
  0x74   : > { %1058 = vrot.lane.b32.xlu0 %v7117_v19, %s6637_s23  ;;  %866 = vrot.lane.b32.xlu1 %v10025_v31, %s6637_s23  ;;  %v764_v31 = vor.u32 %v763_v48, %v759_v43 }
  0x76   : > { %v7177_v52 = vsel %vm603_vm1, %v764_v31, %v768_v12  ;;  %v10042_v31 = vshrl.u32 %v7128_v21, 16 }
  0x77   : > { %10249 = vst [vmem:[#allocation18_spill] sm:$0xff] %v7177_v52 }
  0x78   : > { %979 = vrot.lane.b32.xlu0 %v7032_v38, %s6637_s23  ;;  %1060 = vrot.lane.b32.xlu1 %v7095_v28, %s6637_s23 }
  0x7c   : > { %868 = vrot.lane.b32.xlu0 %v7139_v23, %s6637_s23  ;;  %981 = vrot.lane.b32.xlu1 %v6453_v53, %s6637_s23  ;;  %v923_v53 = vrot.slane %v7087_v27, 1 }
  0x7e   : > { %v7192_v12 = vsel %vm892_vm0, %v923_v53, %v7173_v15  ;;  %v7202_v53 = vld [vmem:[%s6734_s18 + $0xa8] sm:$0xff]  }
  0x7f   : > { %10251 = vst [vmem:[#allocation20_spill] sm:$0xff] %v7192_v12 }
  0x80   : > { %1062 = vrot.lane.b32.xlu0 %v7151_v58, %s6637_s23  ;;  %870 = vrot.lane.b32.xlu1 %v10027_v45, %s6637_s23  ;;  %v775_v45 = vshll.u32 %v7154_v18, 16  ;;  %v7253_v58 = vld [vmem:[%s6734_s18 + $0x30] sm:$0xff]  }
  0x84   : > { %983 = vrot.lane.b32.xlu0 %v7053_v55, %s6637_s23  ;;  %1064 = vrot.lane.b32.xlu1 %v7135_v13, %s6637_s23 }
  0x86   : > { %v952_v43 = vpop.permute.xlu1 %951  ;;  %v7179_v48 = vpop.permute.xlu0 %949 }
  0x87   : > { %10250 = vst [vmem:[#allocation19_spill] sm:$0xff] %v7179_v48  ;;  %v1197_v41 = vsel %vm1127_vm2, %v894_v30, %v952_v43  ;;  %v1194_v7 = vsel %vm1127_vm2, %v7170_v5, %v7179_v48  ;;  %v773_v30 = vshrl.u32 %v7154_v18, 16  ;;  %v777_v43 = vrot.slane %v775_v45, 1 }
  0x88   : > { %v1408_v35 = vshll.u32 %v1197_v41, 16  ;;  %v1404_v39 = vshll.u32 %v1194_v7, 16  ;;  %872 = vrot.lane.b32.xlu0 %v7177_v52, %s6637_s23  ;;  %985 = vrot.lane.b32.xlu1 %v7087_v27, %s6637_s23  ;;  %v1402_v54 = vshrl.u32 %v1194_v7, 16  ;;  %v782_v45 = vrot.slane %v780_v10, 1 }
  0x89   : > { %v778_v52 = vor.u32 %v777_v43, %v773_v30  ;;  %v10253_v10 = vshrl.u32 %v6740_v6, 16 }
  0x8a   : > { %v1410_v41 = vrot.slane %v1408_v35, 1  ;;  %v1406_v14 = vrot.slane %v1404_v39, 1  ;;  %v1033_v59 = vpop.permute.xlu1 %1032  ;;  %v839_v48 = vpop.permute.xlu0 %838 }
  0x8b   : > { %v1293_v30 = vsel %vm1127_vm2, %v10253_v10, %v1033_v59  ;;  %v7225_v43 = vsel %vm603_vm1, %v778_v52, %v782_v45 }
  0x8c   : > { %1066 = vrot.lane.b32.xlu0 %v7192_v12, %s6637_s23  ;;  %874 = vrot.lane.b32.xlu1 %v10042_v31, %s6637_s23  ;;  %v1407_v27 = vor.u32 %v1406_v14, %v1402_v54  ;;  %v7211_v12 = vld [vmem:[%s6734_s18 + $0xb0] ss:$0 sps:$4 sm:$0x33]   ;;  %v926_v14 = vrot.slane %v7120_v57, 1  ;;  %v789_v54 = vshll.u32 %v7202_v53, 16  ;;  %10254 = vst [vmem:[#allocation22_spill] sm:$0xff] %v7225_v43 }
  0x8d   : > { %v794_v52 = vshll.u32 %v7211_v12, 16  ;;  %v10065_v19 = vshrl.u32 %v7211_v12, 16 }
  0x8e   : > { %v7204_v13 = vpop.permute.xlu1 %1030  ;;  %v831_v35 = vpop.permute.xlu0 %830  ;;  %v1411_v7 = vsel %vm603_vm1, %v1407_v27, %v1410_v41  ;;  %v7228_v41 = vrot.slane %v7128_v21, 1  ;;  %v791_v31 = vrot.slane %v789_v54, 1 }
  0x8f   : > { %10252 = vst [vmem:[#allocation21_spill] sm:$0xff] %v7204_v13  ;;  %v1290_v39 = vsel %vm1127_vm2, %v6813_v49, %v7204_v13  ;;  %2474 = vmatprep.mubr.bf16.mxu0 %v1411_v7  ;;  %v1139_v49 = vsel %vm1127_vm2, %v6750_v9, %v839_v48  ;;  %v787_v13 = vshrl.u32 %v7202_v53, 16  ;;  %v1418_v48 = vshll.u32 %v1293_v30, 16 }
  0x90   : > { %v1414_v23 = vshll.u32 %v1290_v39, 16  ;;  %987 = vrot.lane.b32.xlu0 %v7099_v34, %s6637_s23  ;;  %1068 = vrot.lane.b32.xlu1 %v7173_v15, %s6637_s23  ;;  %10255 = vst [vmem:[#allocation23_spill] sm:$0xff] %v7228_v41  ;;  %v1412_v6 = vshrl.u32 %v1290_v39, 16  ;;  %v1428_v45 = vshll.u32 %v1139_v49, 16  ;;  %v7243_v39 = vsel %vm892_vm0, %v926_v14, %v7228_v41 }
  0x91   : > { %10257 = vst [vmem:[#allocation25_spill] sm:$0xff] %v7243_v39  ;;  %v796_v54 = vrot.slane %v794_v52, 1 }
  0x92   : > { %v7230_v27 = vpop.permute.xlu1 %953  ;;  %v837_v7 = vpop.permute.xlu0 %836  ;;  %v1416_v15 = vrot.slane %v1414_v23, 1  ;;  %v6571_v23 = vld [vmem:[%s6734_s18 + $0x14] ss:$0 sps:$4 sm:$0x33]   ;;  %v1430_v55 = vrot.slane %v1428_v45, 1 }
  0x93   : > { %10256 = vst [vmem:[#allocation24_spill] sm:$0xff] %v7230_v27  ;;  %v1137_v59 = vsel %vm1127_vm2, %v6753_v11, %v837_v7  ;;  %v1131_v11 = vsel %vm1127_vm2, %v6571_v23, %v831_v35  ;;  %v7250_v30 = vsel %vm1127_vm2, %v6776_v22, %v7230_v27  ;;  %v1420_v23 = vrot.slane %v1418_v48, 1  ;;  %v7267_v27 = vld [vmem:[%s6734_s18 + $0xb4] sm:$0xff]  }
  0x94   : > { %v1424_v10 = vshll.u32 %v1137_v59, 16  ;;  %876 = vrot.lane.b32.xlu0 %v7225_v43, %s6637_s23  ;;  %989 = vrot.lane.b32.xlu1 %v7120_v57, %s6637_s23  ;;  %v1422_v49 = vshrl.u32 %v1137_v59, 16  ;;  %v1417_v35 = vor.u32 %v1416_v15, %v1412_v6  ;;  %v10258_v59 = vshrl.u32 %v7163_v63, 16 }
  0x95   : > { %v1454_v28 = vshll.u32 %v7250_v30, 16 }
  0x96   : > { %v1426_v7 = vrot.slane %v1424_v10, 1  ;;  %v841_v43 = vpop.permute.xlu0 %840  ;;  %v829_v34 = vpop.permute.xlu1 %828  ;;  %v792_v10 = vor.u32 %v791_v31, %v787_v13  ;;  %v929_v13 = vrot.slane %v7154_v18, 1  ;;  %v7281_v31 = vrot.slane %v7163_v63, 1 }
  0x97   : > { %v7257_v57 = vsel %vm1127_vm2, %v7253_v58, %v841_v43  ;;  %v1129_v14 = vsel %vm1127_vm2, %v6782_v26, %v829_v34  ;;  %v1398_v43 = vshll.u32 %v1131_v11, 16  ;;  %v6505_v34 = vld [vmem:[%s10014_s2] sm:$0xff]   ;;  %v6508_v11 = vld [vmem:[%s10014_s2 + $0x48] sm:$0xff]   ;;  %v1456_v46 = vrot.slane %v1454_v28, 1 }
  0x98   : > { %v1427_v22 = vor.u32 %v1426_v7, %v1422_v49  ;;  %1070 = vrot.lane.b32.xlu0 %v7243_v39, %s6637_s23  ;;  %878 = vrot.lane.b32.xlu1 %v10258_v59, %s6637_s23  ;;  %v1392_v26 = vshrl.u32 %v1129_v14, 16  ;;  %v1394_v15 = vshll.u32 %v1129_v14, 16  ;;  %v1474_v6 = vshll.u32 %v7257_v57, 16  ;;  %v7287_v7 = vld [vmem:[%s6734_s18 + $0x18] sm:$0xff]   ;;  %v6509_v28 = vld [vmem:[%s10014_s2 + $0x8] sm:$0xff]  }
  0x99   : > { %v7303_v59 = vsel %vm603_vm1, %v792_v10, %v796_v54  ;;  %v1452_v39 = vshrl.u32 %v7250_v30, 16  ;;  %v7315_v10 = vsel %vm892_vm0, %v929_v13, %v7281_v31  ;;  %v6510_v30 = vld [vmem:[%s10013_s1 + $0x108] sm:$0xff]  }
  0x9a   : > { %v833_v52 = vpop.permute.xlu0 %832  ;;  %v7274_v48 = vpop.permute.xlu1 %1034  ;;  %v7277_v45 = vsel %vm603_vm1, %v1427_v22, %v1430_v55  ;;  %v1396_v49 = vrot.slane %v1394_v15, 1  ;;  %v1421_v22 = vsel %vm603_vm1, %v1417_v35, %v1420_v23  ;;  %10260 = vst [vmem:[#allocation27_spill] sm:$0xff] %v7303_v59  ;;  %v803_v15 = vshll.u32 %v7267_v27, 16 }
  0x9b   : > { %10259 = vst [vmem:[#allocation26_spill] sm:$0xff] %v7274_v48  ;;  %v7291_v14 = vsel %vm1127_vm2, %v7287_v7, %v833_v52  ;;  %2635 = vmatprep.mubr.bf16.mxu1 %v7277_v45  ;;  %v7298_v55 = vsel %vm1127_vm2, %v6792_v36, %v7274_v48  ;;  %v1400_v52 = vrot.slane %v1398_v43, 1  ;;  %v7310_v36 = vld [vmem:[%s6734_s18 + $0xbc] ss:$0 sps:$4 sm:$0x33]   ;;  %v1476_v23 = vrot.slane %v1474_v6, 1 }
  0x9c   : > { %991 = vrot.lane.b32.xlu0 %v7128_v21, %s6637_s23  ;;  %2636 = vmatmul.mubr.bf16.vlgmr.msra.gmra.mrb[0].mxu1 %v1421_v22  ;;  %v1397_v35 = vor.u32 %v1396_v49, %v1392_v26  ;;  %v1444_v22 = vshll.u32 %v7291_v14, 16  ;;  %v1464_v43 = vshll.u32 %v7298_v55, 16  ;;  %v7325_v26 = vld [vmem:[%s6734_s18 + $0x38] ss:$0 sps:$4 sm:$0x33]   ;;  %v1472_v49 = vshrl.u32 %v7257_v57, 16 }
  0x9d   : > { %1072 = vrot.lane.b32.xlu1 %v7228_v41, %s6637_s23  ;;  %6072 = vmatpush3.bf16.msra.mxu1 %v6505_v34 }
  0x9e   : > { %v843_v48 = vpop.permute.xlu0 %842  ;;  %v956_v54 = vpop.permute.xlu1 %955  ;;  %6073 = vmatprep.subr.bf16.mxu1 %v6508_v11  ;;  %v1401_v13 = vsel %vm603_vm1, %v1397_v35, %v1400_v52  ;;  %v6511_v11 = vld [vmem:[%s10014_s2 + $0x50] sm:$0xff]   ;;  %v805_v52 = vrot.slane %v803_v15, 1  ;;  %v808_v35 = vshll.u32 %v7310_v36, 16  ;;  %v1477_v57 = vor.u32 %v1476_v23, %v1472_v49  ;;  %v7349_v15 = vld [vmem:[%s6734_s18 + $0x20] ss:$0 sps:$4 sm:$0x33]  }
  0x9f   : > { %v1143_v34 = vsel %vm1127_vm2, %v7325_v26, %v843_v48  ;;  %v1203_v6 = vsel %vm1127_vm2, %v6747_v8, %v956_v54  ;;  %2475 = vmatmul.mubr.bf16.vlgmr.msra.gmra.mrb[0].mxu0 %v1401_v13  ;;  %v1457_v8 = vor.u32 %v1456_v46, %v1452_v39  ;;  %v801_v48 = vshrl.u32 %v7267_v27, 16  ;;  %v6512_v46 = vld [vmem:[%s10014_s2 + $0x10] sm:$0xff]  }
  0xa0   : > { %v1478_v41 = vshll.u32 %v1143_v34, 16  ;;  %v1458_v21 = vshll.u32 %v1203_v6, 16  ;;  %880 = vrot.lane.b32.xlu0 %v7303_v59, %s6637_s23  ;;  %6324 = vmatpush3.bf16.msra.mxu0 %v7058_v56  ;;  %v1462_v54 = vshrl.u32 %v7298_v55, 16  ;;  %v1466_v39 = vrot.slane %v1464_v43, 1 }
  0xa1   : > { %993 = vrot.lane.b32.xlu1 %v7154_v18, %s6637_s23  ;;  %6074 = vmatpush3.bf16.msra.mxu1 %v6509_v28  ;;  %v1446_v18 = vrot.slane %v1444_v22, 1  ;;  %v10261_v55 = vshrl.u32 %v6750_v9, 16  ;;  %v6515_v9 = vld [vmem:[%s10013_s1 + $0x110] sm:$0xff]   ;;  %v810_v49 = vrot.slane %v808_v35, 1 }
  0xa2   : > { %v1480_v34 = vrot.slane %v1478_v41, 1  ;;  %v1460_v6 = vrot.slane %v1458_v21, 1  ;;  %v835_v13 = vpop.permute.xlu0 %834  ;;  %v1037_v59 = vpop.permute.xlu1 %1036  ;;  %6325 = vmatprep.subr.bf16.mxu0 %v6510_v30  ;;  %6075 = vmatprep.subr.bf16.mxu1 %v6511_v11  ;;  %v6513_v41 = vld [vmem:[%s10014_s2 + $0x58] sm:$0xff]   ;;  %v806_v11 = vor.u32 %v805_v52, %v801_v48 }
  0xa3   : > { %v1135_v56 = vsel %vm1127_vm2, %v7349_v15, %v835_v13  ;;  %v1299_v21 = vsel %vm1127_vm2, %v10261_v55, %v1037_v59  ;;  %v1442_v59 = vshrl.u32 %v7291_v14, 16  ;;  %v7373_v13 = vld [vmem:[%s6734_s18 + $0xc0] sm:$0xff]   ;;  %v6514_v48 = vld [vmem:[%s10014_s2 + $0x18] sm:$0xff]  }
  0xa4   : > { %v1448_v23 = vshll.u32 %v1135_v56, 16  ;;  %v1468_v28 = vshll.u32 %v1299_v21, 16  ;;  %1074 = vrot.lane.b32.xlu0 %v7315_v10, %s6637_s23  ;;  %v1461_v22 = vsel %vm603_vm1, %v1457_v8, %v1460_v6  ;;  %v7363_v43 = vsel %vm603_vm1, %v1477_v57, %v1480_v34  ;;  %v7379_v55 = vld [vmem:[%s6734_s18 + $0x3c] sm:$0xff]   ;;  %6326 = vmatpush3.bf16.msra.mxu0 %v6510_v30 }
  0xa5   : > { %882 = vrot.lane.b32.xlu1 %v10065_v19, %s6637_s23  ;;  %2482 = vmatprep.mubr.bf16.mxu0 %v1461_v22  ;;  %v1447_v56 = vor.u32 %v1446_v18, %v1442_v59  ;;  %v1467_v21 = vor.u32 %v1466_v39, %v1462_v54  ;;  %v7395_v18 = vrot.slane %v7211_v12, 1  ;;  %v6516_v30 = vld [vmem:[%s10014_s2 + $0x60] sm:$0xff]  }
  0xa6   : > { %v1450_v8 = vrot.slane %v1448_v23, 1  ;;  %v1470_v6 = vrot.slane %v1468_v28, 1  ;;  %2643 = vmatprep.mubr.bf16.mxu1 %v7363_v43  ;;  %v845_v57 = vpop.permute.xlu0 %844  ;;  %v7376_v34 = vpop.permute.xlu1 %957  ;;  %6076 = vmatpush3.bf16.msra.mxu1 %v6512_v46  ;;  %v932_v46 = vrot.slane %v7202_v53, 1  ;;  %v7408_v23 = vld [vmem:[%s6734_s18 + $0xc8] ss:$0 sps:$4 sm:$0x33]  }
  0xa7   : > { %10262 = vst [vmem:[#allocation28_spill] sm:$0xff] %v7376_v34  ;;  %v1145_v14 = vsel %vm1127_vm2, %v7379_v55, %v845_v57  ;;  %6077 = vmatprep.subr.bf16.mxu1 %v6513_v41  ;;  %v7389_v35 = vsel %vm1127_vm2, %v6817_v50, %v7376_v34  ;;  %10263 = vst [vmem:[#allocation29_spill] sm:$0xff] %v7395_v18  ;;  %6327 = vmatprep.subr.bf16.mxu0 %v6515_v9  ;;  %v817_v28 = vshll.u32 %v7373_v13, 16 }
  0xa8   : > { %v1514_v52 = vshll.u32 %v1145_v14, 16  ;;  %995 = vrot.lane.b32.xlu0 %v7163_v63, %s6637_s23  ;;  %v1451_v54 = vsel %vm603_vm1, %v1447_v56, %v1450_v8  ;;  %v1471_v39 = vsel %vm603_vm1, %v1467_v21, %v1470_v6  ;;  %v7405_v41 = vsel %vm603_vm1, %v806_v11, %v810_v49  ;;  %v7418_v6 = vld [vmem:[%s6734_s18 + $0x44] ss:$0 sps:$4 sm:$0x33]   ;;  %6328 = vmatpush3.bf16.msra.mxu0 %v6515_v9 }
  0xa9   : > { %1076 = vrot.lane.b32.xlu1 %v7281_v31, %s6637_s23  ;;  %10264 = vst [vmem:[#allocation30_spill] sm:$0xff] %v7405_v41  ;;  %2483 = vmatmul.mubr.bf16.gmra.mrb[4].mxu0 %v1451_v54  ;;  %v1494_v19 = vshll.u32 %v7389_v35, 16  ;;  %v6517_v49 = vld [vmem:[%s10014_s2 + $0x20] sm:$0xff]   ;;  %v1512_v56 = vshrl.u32 %v1145_v14, 16  ;;  %v815_v14 = vshrl.u32 %v7373_v13, 16  ;;  %v819_v54 = vrot.slane %v817_v28, 1 }
  0xaa   : > { %v1516_v22 = vrot.slane %v1514_v52, 1  ;;  %2644 = vmatmul.mubr.bf16.gmra.mrb[4].mxu1 %v1471_v39  ;;  %v7411_v59 = vpop.permute.xlu0 %1038  ;;  %v847_v57 = vpop.permute.xlu1 %846  ;;  %v822_v39 = vshll.u32 %v7408_v23, 16  ;;  %v6519_v28 = vld [vmem:[%s10014_s2 + $0x28] sm:$0xff]  }
  0xab   : > { %10265 = vst [vmem:[#allocation31_spill] sm:$0xff] %v7411_v59  ;;  %v1302_v8 = vsel %vm1127_vm2, %v6800_v44, %v7411_v59  ;;  %v1147_v11 = vsel %vm1127_vm2, %v7418_v6, %v847_v57  ;;  %6078 = vmatpush3.bf16.msra.mxu1 %v6514_v48  ;;  %v7429_v44 = vsel %vm892_vm0, %v932_v46, %v7395_v18  ;;  %v6518_v48 = vld [vmem:[%s10014_s2 + $0x68] sm:$0xff]   ;;  %v1496_v34 = vrot.slane %v1494_v19, 1 }
  0xac   : > { %v1504_v21 = vshll.u32 %v1302_v8, 16  ;;  %v1518_v52 = vshll.u32 %v1147_v11, 16  ;;  %884 = vrot.lane.b32.xlu0 %v7405_v41, %s6637_s23  ;;  %10266 = vst [vmem:[#allocation32_spill] sm:$0xff] %v7429_v44  ;;  %6079 = vmatprep.subr.bf16.mxu1 %v6516_v30  ;;  %v1517_v57 = vor.u32 %v1516_v22, %v1512_v56  ;;  %v1492_v11 = vshrl.u32 %v7389_v35, 16 }
  0xad   : > { %997 = vrot.lane.b32.xlu1 %v7202_v53, %s6637_s23  ;;  %v10267_v53 = vshrl.u32 %v6779_v25, 16  ;;  %v10268_v25 = vshrl.u32 %v7310_v36, 16  ;;  %v824_v56 = vrot.slane %v822_v39, 1  ;;  %v7474_v39 = vrot.slane %v7310_v36, 1 }
  0xae   : > { %v1520_v46 = vrot.slane %v1518_v52, 1  ;;  %v960_v59 = vpop.permute.xlu0 %959  ;;  %v1041_v30 = vpop.permute.xlu1 %1040  ;;  %v1506_v50 = vrot.slane %v1504_v21, 1  ;;  %v7458_v21 = vld [vmem:[%s6734_s18 + $0xcc] sm:$0xff]  }
  0xaf   : > { %v1209_v41 = vsel %vm1127_vm2, %v6804_v47, %v960_v59  ;;  %v1305_v9 = vsel %vm1127_vm2, %v10267_v53, %v1041_v30  ;;  %6080 = vmatpush3.bf16.msra.mxu1 %v6517_v49  ;;  %v1502_v59 = vshrl.u32 %v1302_v8, 16  ;;  %v820_v49 = vor.u32 %v819_v54, %v815_v14  ;;  %v7463_v53 = vld [vmem:[%s6734_s18 + $0x48] sm:$0xff]   ;;  %10270 = vst [vmem:[#allocation34_spill] sm:$0xff] %v7474_v39 }
  0xb0   : > { %v1498_v35 = vshll.u32 %v1209_v41, 16  ;;  %v1508_v22 = vshll.u32 %v1305_v9, 16  ;;  %1078 = vrot.lane.b32.xlu0 %v7429_v44, %s6637_s23  ;;  %v7451_v19 = vsel %vm603_vm1, %v1517_v57, %v1520_v46  ;;  %6081 = vmatprep.subr.bf16.mxu1 %v6518_v48  ;;  %v1497_v48 = vor.u32 %v1496_v34, %v1492_v11 }
  0xb1   : > { %886 = vrot.lane.b32.xlu1 %v10268_v25, %s6637_s23  ;;  %2651 = vmatprep.mubr.bf16.mxu1 %v7451_v19  ;;  %v1507_v57 = vor.u32 %v1506_v50, %v1502_v59  ;;  %v935_v54 = vrot.slane %v7267_v27, 1  ;;  %v7481_v11 = vsel %vm603_vm1, %v820_v49, %v824_v56  ;;  %v7487_v25 = vld [vmem:[%s6734_s18 + $0xd4] ss:$0 sps:$4 sm:$0x33]  }
  0xb2   : > { %v1500_v41 = vrot.slane %v1498_v35, 1  ;;  %v1510_v52 = vrot.slane %v1508_v22, 1  ;;  %v849_v9 = vpop.permute.xlu0 %848  ;;  %v7460_v30 = vpop.permute.xlu1 %961  ;;  %10271 = vst [vmem:[#allocation35_spill] sm:$0xff] %v7481_v11 }
  0xb3   : > { %10269 = vst [vmem:[#allocation33_spill] sm:$0xff] %v7460_v30  ;;  %v1149_v8 = vsel %vm1127_vm2, %v7463_v53, %v849_v9  ;;  %6082 = vmatpush3.bf16.msra.mxu1 %v6519_v28  ;;  %v1212_v14 = vsel %vm1127_vm2, %v6878_v16, %v7460_v30  ;;  %v1016_v28 = vshll.u32 %v7458_v21, 16  ;;  %v1021_v30 = vshll.u32 %v7487_v25, 16 }
  0xb4   : > { %v1554_v46 = vshll.u32 %v1149_v8, 16  ;;  %999 = vrot.lane.b32.xlu0 %v7211_v12, %s6637_s23  ;;  %v1501_v50 = vsel %vm603_vm1, %v1497_v48, %v1500_v41  ;;  %v1511_v34 = vsel %vm603_vm1, %v1507_v57, %v1510_v52  ;;  %v1534_v9 = vshll.u32 %v1212_v14, 16  ;;  %v7494_v52 = vld [vmem:[%s6734_s18 + $0x50] ss:$0 sps:$4 sm:$0x33]  }
  0xb5   : > { %1080 = vrot.lane.b32.xlu1 %v7395_v18, %s6637_s23  ;;  %2490 = vmatprep.mubr.bf16.mxu0 %v1501_v50  ;;  %v1552_v56 = vshrl.u32 %v1149_v8, 16  ;;  %v1018_v50 = vrot.slane %v1016_v28, 1 }
  0xb6   : > { %v1556_v35 = vrot.slane %v1554_v46, 1  ;;  %2652 = vmatmul.mubr.bf16.gmra.mrb[8].mxu1 %v1511_v34  ;;  %v7484_v22 = vpop.permute.xlu0 %1042  ;;  %v851_v59 = vpop.permute.xlu1 %850  ;;  %2491 = vmatmul.mubr.bf16.gmra.mrb[8].mxu0 %v7277_v45  ;;  %v7504_v46 = vsel %vm892_vm0, %v935_v54, %v7474_v39  ;;  %v1014_v45 = vshrl.u32 %v7458_v21, 16  ;;  %v1536_v16 = vrot.slane %v1534_v9, 1 }
  0xb7   : > { %10272 = vst [vmem:[#allocation36_spill] sm:$0xff] %v7484_v22  ;;  %v1308_v41 = vsel %vm1127_vm2, %v6857_v1, %v7484_v22  ;;  %v1151_v49 = vsel %vm1127_vm2, %v7494_v52, %v851_v59  ;;  %v1532_v59 = vshrl.u32 %v1212_v14, 16  ;;  %v10273_v54 = vshrl.u32 %v6820_v51, 16  ;;  %v6520_v51 = vld [vmem:[%s10013_s1 + $0x118] sm:$0xff]  }
  0xb8   : > { %v1544_v48 = vshll.u32 %v1308_v41, 16  ;;  %v1558_v57 = vshll.u32 %v1151_v49, 16  ;;  %888 = vrot.lane.b32.xlu0 %v7481_v11, %s6637_s23  ;;  %v1557_v34 = vor.u32 %v1556_v35, %v1552_v56  ;;  %v1542_v28 = vshrl.u32 %v1308_v41, 16  ;;  %6329 = vmatprep.subr.bf16.mxu0 %v6520_v51 }
  0xb9   : > { %1001 = vrot.lane.b32.xlu1 %v7267_v27, %s6637_s23  ;;  %v10274_v35 = vshrl.u32 %v7408_v23, 16  ;;  %6330 = vmatpush3.bf16.msra.mxu0 %v6520_v51 }
  0xba   : > { %v1560_v8 = vrot.slane %v1558_v57, 1  ;;  %v964_v22 = vpop.permute.xlu0 %963  ;;  %v1045_v49 = vpop.permute.xlu1 %1044  ;;  %v1546_v47 = vrot.slane %v1544_v48, 1  ;;  %v1019_v48 = vor.u32 %v1018_v50, %v1014_v45  ;;  %v1023_v57 = vrot.slane %v1021_v30, 1  ;;  %v7556_v45 = vld [vmem:[%s6734_s18 + $0xe0] ss:$0 sps:$4 sm:$0x33]  }
  0xbb   : > { %v1215_v11 = vsel %vm1127_vm2, %v6861_v3, %v964_v22  ;;  %v1311_v18 = vsel %vm1127_vm2, %v10273_v54, %v1045_v49  ;;  %v1537_v54 = vor.u32 %v1536_v16, %v1532_v59 }
  0xbc   : > { %v1538_v1 = vshll.u32 %v1215_v11, 16  ;;  %v1548_v44 = vshll.u32 %v1311_v18, 16  ;;  %1082 = vrot.lane.b32.xlu0 %v7504_v46, %s6637_s23  ;;  %v7517_v14 = vsel %vm603_vm1, %v1557_v34, %v1560_v8  ;;  %v6521_v18 = vld [vmem:[%s10014_s2 + $0x70] sm:$0xff]   ;;  %v7535_v34 = vld [vmem:[%s6734_s18 + $0xd8] sm:$0xff]  }
  0xbd   : > { %890 = vrot.lane.b32.xlu1 %v10274_v35, %s6637_s23  ;;  %2659 = vmatprep.mubr.bf16.mxu1 %v7517_v14  ;;  %v6522_v11 = vld [vmem:[%s10014_s2 + $0x30] sm:$0xff]   ;;  %v1547_v35 = vor.u32 %v1546_v47, %v1542_v28  ;;  %v938_v47 = vrot.slane %v7373_v13, 1 }
  0xbe   : > { %v1540_v22 = vrot.slane %v1538_v1, 1  ;;  %v1550_v9 = vrot.slane %v1548_v44, 1  ;;  %v853_v41 = vpop.permute.xlu0 %852  ;;  %v7532_v56 = vpop.permute.xlu1 %965  ;;  %v7538_v8 = vld [vmem:[%s6734_s18 + $0x54] sm:$0xff]   ;;  %6083 = vmatprep.subr.bf16.mxu1 %v6521_v18  ;;  %v7553_v1 = vrot.slane %v7408_v23, 1  ;;  %v7561_v18 = vsel %vm603_vm1, %v1019_v48, %v1023_v57 }
  0xbf   : > { %10275 = vst [vmem:[#allocation37_spill] sm:$0xff] %v7532_v56  ;;  %v1153_v49 = vsel %vm1127_vm2, %v7538_v8, %v853_v41  ;;  %v1218_v44 = vsel %vm1127_vm2, %v6934_v40, %v7532_v56  ;;  %6084 = vmatpush3.bf16.msra.mxu1 %v6522_v11  ;;  %10277 = vst [vmem:[#allocation39_spill] sm:$0xff] %v7561_v18  ;;  %v1105_v11 = vshll.u32 %v7535_v34, 16  ;;  %v7569_v41 = vld [vmem:[%s6734_s18 + $0x5c] ss:$0 sps:$4 sm:$0x33]  }
  0xc0   : > { %v1594_v3 = vshll.u32 %v1153_v49, 16  ;;  %1003 = vrot.lane.b32.xlu0 %v7310_v36, %s6637_s23  ;;  %v1541_v30 = vsel %vm603_vm1, %v1537_v54, %v1540_v22  ;;  %v1551_v16 = vsel %vm603_vm1, %v1547_v35, %v1550_v9  ;;  %v1574_v22 = vshll.u32 %v1218_v44, 16 }
  0xc1   : > { %1084 = vrot.lane.b32.xlu1 %v7474_v39, %s6637_s23  ;;  %2498 = vmatprep.mubr.bf16.mxu0 %v1541_v30  ;;  %v1592_v51 = vshrl.u32 %v1153_v49, 16  ;;  %v7579_v48 = vsel %vm892_vm0, %v938_v47, %v7553_v1  ;;  %v1572_v30 = vshrl.u32 %v1218_v44, 16  ;;  %v10278_v40 = vshrl.u32 %v6864_v4, 16 }
  0xc2   : > { %v1596_v50 = vrot.slane %v1594_v3, 1  ;;  %2660 = vmatmul.mubr.bf16.gmra.mrb[12].mxu1 %v1551_v16  ;;  %v7558_v59 = vpop.permute.xlu0 %1046  ;;  %v855_v28 = vpop.permute.xlu1 %854  ;;  %2499 = vmatmul.mubr.bf16.gmra.mrb[12].mxu0 %v7363_v43  ;;  %v1110_v43 = vshll.u32 %v7556_v45, 16 }
  0xc3   : > { %10276 = vst [vmem:[#allocation38_spill] sm:$0xff] %v7558_v59  ;;  %v1314_v9 = vsel %vm1127_vm2, %v6914_v32, %v7558_v59  ;;  %v1155_v3 = vsel %vm1127_vm2, %v7569_v41, %v855_v28  ;;  %v1103_v32 = vshrl.u32 %v7535_v34, 16  ;;  %v1576_v59 = vrot.slane %v1574_v22, 1 }
  0xc4   : > { %v1584_v54 = vshll.u32 %v1314_v9, 16  ;;  %v1598_v35 = vshll.u32 %v1155_v3, 16  ;;  %1005 = vrot.lane.b32.xlu0 %v7373_v13, %s6637_s23  ;;  %v1597_v57 = vor.u32 %v1596_v50, %v1592_v51  ;;  %v1107_v3 = vrot.slane %v1105_v11, 1 }
  0xc5   : > { %1116 = vrot.lane.b32.xlu1 %v7561_v18, %s6637_s23  ;;  %v10089_v50 = vshrl.u32 %v7487_v25, 16  ;;  %v1582_v11 = vshrl.u32 %v1314_v9, 16  ;;  %v6523_v9 = vld [vmem:[%s10014_s2 + $0x78] sm:$0xff]  }
  0xc6   : > { %v1600_v16 = vrot.slane %v1598_v35, 1  ;;  %v968_v49 = vpop.permute.xlu0 %967  ;;  %v1049_v28 = vpop.permute.xlu1 %1048  ;;  %v1586_v56 = vrot.slane %v1584_v54, 1  ;;  %v1108_v54 = vor.u32 %v1107_v3, %v1103_v32  ;;  %v1112_v35 = vrot.slane %v1110_v43, 1  ;;  %6085 = vmatprep.subr.bf16.mxu1 %v6523_v9 }
  0xc7   : > { %v1221_v13 = vsel %vm1127_vm2, %v6907_v29, %v968_v49  ;;  %v1317_v47 = vsel %vm1127_vm2, %v10278_v40, %v1049_v28  ;;  %v7600_v49 = vld [vmem:[%s6734_s18 + $0x60] sm:$0xff]   ;;  %v1027_v43 = vrot.slane %v7458_v21, 1 }
  0xc8   : > { %v1578_v18 = vshll.u32 %v1221_v13, 16  ;;  %v1588_v39 = vshll.u32 %v1317_v47, 16  ;;  %1086 = vrot.lane.b32.xlu0 %v7579_v48, %s6637_s23  ;;  %v7591_v44 = vsel %vm603_vm1, %v1597_v57, %v1600_v16  ;;  %v1577_v16 = vor.u32 %v1576_v59, %v1572_v30 }
  0xc9   : > { %1007 = vrot.lane.b32.xlu1 %v7408_v23, %s6637_s23  ;;  %2667 = vmatprep.mubr.bf16.mxu1 %v7591_v44  ;;  %v1587_v28 = vor.u32 %v1586_v56, %v1582_v11  ;;  %v7622_v30 = vrot.slane %v7487_v25, 1  ;;  %v1113_v11 = vsel %vm603_vm1, %v1108_v54, %v1112_v35 }
  0xca   : > { %v1580_v4 = vrot.slane %v1578_v18, 1  ;;  %v1590_v22 = vrot.slane %v1588_v39, 1  ;;  %v857_v51 = vpop.permute.xlu0 %856  ;;  %v7597_v40 = vpop.permute.xlu1 %969  ;;  %v6524_v39 = vld [vmem:[%s10014_s2 + $0x38] sm:$0xff]  }
  0xcb   : > { %10279 = vst [vmem:[#allocation40_spill] sm:$0xff] %v7597_v40  ;;  %v1157_v57 = vsel %vm1127_vm2, %v7600_v49, %v857_v51  ;;  %v1224_v32 = vsel %vm1127_vm2, %v6994_v17, %v7597_v40  ;;  %10280 = vst [vmem:[#allocation41_spill] sm:$0xff] %v7622_v30  ;;  %6086 = vmatpush3.bf16.msra.mxu1 %v6524_v39  ;;  %v6526_v40 = vld [vmem:[%s10014_s2 + $0x100] sm:$0xff]  }
  0xcc   : > { %v1634_v18 = vshll.u32 %v1157_v57, 16  ;;  %1118 = vrot.lane.b32.xlu0 %v10089_v50, %s6637_s23  ;;  %v1581_v56 = vsel %vm603_vm1, %v1577_v16, %v1580_v4  ;;  %v1591_v59 = vsel %vm603_vm1, %v1587_v28, %v1590_v22  ;;  %v1614_v51 = vshll.u32 %v1224_v32, 16  ;;  %v7632_v22 = vld [vmem:[%s6734_s18 + $0x68] ss:$0 sps:$4 sm:$0x33]   ;;  %6363 = vmatprep.subr.bf16.mxu1 %v6526_v40 }
  0xcd   : > { %1088 = vrot.lane.b32.xlu1 %v7553_v1, %s6637_s23  ;;  %2506 = vmatprep.mubr.bf16.mxu0 %v1581_v56  ;;  %v1632_v28 = vshrl.u32 %v1157_v57, 16  ;;  %v1612_v54 = vshrl.u32 %v1224_v32, 16 }
  0xce   : > { %v1636_v3 = vrot.slane %v1634_v18, 1  ;;  %2668 = vmatmul.mubr.bf16.gmra.mrb[16].mxu1 %v1591_v59  ;;  %v7624_v13 = vpop.permute.xlu0 %1050  ;;  %v859_v47 = vpop.permute.xlu1 %858  ;;  %2507 = vmatmul.mubr.bf16.gmra.mrb[16].mxu0 %v7451_v19  ;;  %v1616_v39 = vrot.slane %v1614_v51, 1  ;;  %v1114_v51 = vshrl.u32 %v7556_v45, 16 }
  0xcf   : > { %10281 = vst [vmem:[#allocation42_spill] sm:$0xff] %v7624_v13  ;;  %v1320_v4 = vsel %vm1127_vm2, %v6974_v61, %v7624_v13  ;;  %v1159_v16 = vsel %vm1127_vm2, %v7632_v22, %v859_v47  ;;  %v7641_v61 = vsel %vm892_vm0, %v1027_v43, %v7622_v30  ;;  %v7649_v13 = vld [vmem:[%s6734_s18] sm:$0xff]  }
  0xd0   : > { %v1624_v9 = vshll.u32 %v1320_v4, 16  ;;  %v1638_v18 = vshll.u32 %v1159_v16, 16  ;;  %1009 = vrot.lane.b32.xlu0 %v7458_v21, %s6637_s23  ;;  %10282 = vst [vmem:[#allocation43_spill] sm:$0xff] %v7641_v61  ;;  %v1637_v19 = vor.u32 %v1636_v3, %v1632_v28  ;;  %v10283_v16 = vshrl.u32 %v6896_v24, 16 }
  0xd1   : > { %1120 = vrot.lane.b32.xlu1 %v1113_v11, %s6637_s23  ;;  %v7652_v11 = vld [vmem:[%s6734_s18 + $0x8] ss:$0 sps:$4 sm:$0x33]   ;;  %v1622_v28 = vshrl.u32 %v1320_v4, 16  ;;  %v3043_v24 = vrot.slane %v7649_v13, 1  ;;  %v1617_v4 = vor.u32 %v1616_v39, %v1612_v54 }
  0xd2   : > { %v1640_v35 = vrot.slane %v1638_v18, 1  ;;  %v972_v56 = vpop.permute.xlu0 %971  ;;  %v1053_v59 = vpop.permute.xlu1 %1052  ;;  %v1626_v47 = vrot.slane %v1624_v9, 1  ;;  %v3044_v9 = vrot.slane %v7652_v11, 1 }
  0xd3   : > { %v1227_v57 = vsel %vm1127_vm2, %v6971_v60, %v972_v56  ;;  %v1323_v50 = vsel %vm1127_vm2, %v10283_v16, %v1053_v59  ;;  %v6525_v16 = vld [vmem:[%s10014_s2 + $0xc0] sm:$0xff]  }
  0xd4   : > { %v1618_v43 = vshll.u32 %v1227_v57, 16  ;;  %v1628_v3 = vshll.u32 %v1323_v50, 16  ;;  %1090 = vrot.lane.b32.xlu0 %v7641_v61, %s6637_s23  ;;  %v7657_v32 = vsel %vm603_vm1, %v1637_v19, %v1640_v35  ;;  %v7668_v57 = vld [vmem:[%s6734_s18 + $0x6c] sm:$0xff]   ;;  %v1627_v35 = vor.u32 %v1626_v47, %v1622_v28  ;;  %6183 = vmatprep.subr.bf16.mxu0 %v6525_v16 }
  0xd5   : > { %1011 = vrot.lane.b32.xlu1 %v7487_v25, %s6637_s23  ;;  %2675 = vmatprep.mubr.bf16.mxu1 %v7657_v32  ;;  %v3045_v47 = vsel %vm892_vm0, %v3043_v24, %v3044_v9  ;;  %v7699_v24 = vld [vmem:[%s6734_s18 + $0x74] ss:$0 sps:$4 sm:$0x33]  }
  0xd6   : > { %v1620_v18 = vrot.slane %v1618_v43, 1  ;;  %v1630_v50 = vrot.slane %v1628_v3, 1  ;;  %v861_v56 = vpop.permute.xlu0 %860  ;;  %v7665_v59 = vpop.permute.xlu1 %973 }
  0xd7   : > { %10284 = vst [vmem:[#allocation44_spill] sm:$0xff] %v7665_v59  ;;  %v1161_v19 = vsel %vm1127_vm2, %v7668_v57, %v861_v56  ;;  %v7681_v3 = vsel %vm1127_vm2, %v7042_v42, %v7665_v59 }
  0xd8   : > { %v1674_v43 = vshll.u32 %v1161_v19, 16  ;;  %1122 = vrot.lane.b32.xlu0 %v1114_v51, %s6637_s23  ;;  %v1621_v54 = vsel %vm603_vm1, %v1617_v4, %v1620_v18  ;;  %v1631_v39 = vsel %vm603_vm1, %v1627_v35, %v1630_v50  ;;  %v3057_v51 = vrot.slane %v7287_v7, 2  ;;  %v6586_v4 = vld [vmem:[%s6734_s18 + $0x24] sm:$0xff]  }
  0xd9   : > { %1092 = vrot.lane.b32.xlu1 %v7622_v30, %s6637_s23  ;;  %2514 = vmatprep.mubr.bf16.mxu0 %v1621_v54  ;;  %v3058_v30 = vrot.slane %v7349_v15, 2  ;;  %v1654_v18 = vshll.u32 %v7681_v3, 16  ;;  %v3060_v35 = vrot.slane %v6586_v4, 2  ;;  %v1672_v16 = vshrl.u32 %v1161_v19, 16 }
  0xda   : > { %v1676_v28 = vrot.slane %v1674_v43, 1  ;;  %2676 = vmatmul.mubr.bf16.gmra.mrb[20].mxu1 %v1631_v39  ;;  %v7689_v56 = vpop.permute.xlu0 %1054  ;;  %v863_v59 = vpop.permute.xlu1 %862  ;;  %2515 = vmatmul.mubr.bf16.gmra.mrb[20].mxu0 %v7517_v14  ;;  %v6587_v15 = vld [vmem:[%s6734_s18 + $0x2c] ss:$0 sps:$4 sm:$0x33]   ;;  %v3064_v14 = vrot.slane %v7325_v26, 2  ;;  %v3066_v39 = vrot.slane %v7379_v55, 2 }
  0xdb   : > { %10285 = vst [vmem:[#allocation45_spill] sm:$0xff] %v7689_v56  ;;  %v1326_v50 = vsel %vm1127_vm2, %v7025_v33, %v7689_v56  ;;  %v1163_v9 = vsel %vm1127_vm2, %v7699_v24, %v863_v59  ;;  %v3061_v54 = vrot.slane %v6587_v15, 2  ;;  %v3063_v33 = vrot.slane %v7253_v58, 2 }
  0xdc   : > { %v1664_v7 = vshll.u32 %v1326_v50, 16  ;;  %v1678_v43 = vshll.u32 %v1163_v9, 16  ;;  %3046 = vrot.lane.b32.xlu0 %v3045_v47, %s6637_s23  ;;  %v3067_v59 = vrot.slane %v7418_v6, 2  ;;  %v1677_v4 = vor.u32 %v1676_v28, %v1672_v16 }
  0xdd   : > { %3048 = vrot.lane.b32.xlu1 %v7170_v5, %s6637_s23  ;;  %v1652_v40 = vshrl.u32 %v7681_v3, 16  ;;  %v7714_v47 = vsel %vm3050_vm3, %v3057_v51, %v3058_v30  ;;  %v1656_v15 = vrot.slane %v1654_v18, 1  ;;  %v10286_v5 = vshrl.u32 %v6977_v62, 16 }
  0xde   : > { %v1680_v19 = vrot.slane %v1678_v43, 1  ;;  %v976_v9 = vpop.permute.xlu0 %975  ;;  %v1057_v56 = vpop.permute.xlu1 %1056  ;;  %v1666_v61 = vrot.slane %v1664_v7, 1  ;;  %v7727_v30 = vsel %vm3050_vm3, %v3060_v35, %v3061_v54  ;;  %v1662_v28 = vshrl.u32 %v1326_v50, 16  ;;  %v7744_v54 = vld [vmem:[%s6734_s18 + $0x78] sm:$0xff]  }
  0xdf   : > { %v1233_v58 = vsel %vm1127_vm2, %v7029_v37, %v976_v9  ;;  %v1329_v26 = vsel %vm1127_vm2, %v10286_v5, %v1057_v56  ;;  %v7733_v62 = vsel %vm3050_vm3, %v3063_v33, %v3064_v14  ;;  %v7736_v56 = vsel %vm3050_vm3, %v3066_v39, %v3067_v59  ;;  %v6589_v5 = vld [vmem:[%s6734_s18 + $0x80] ss:$0 sps:$4 sm:$0x33]  }
  0xe0   : > { %v1658_v55 = vshll.u32 %v1233_v58, 16  ;;  %v1668_v6 = vshll.u32 %v1329_v26, 16  ;;  %v7722_v3 = vsel %vm603_vm1, %v1677_v4, %v1680_v19  ;;  %3105 = vrot.lane.b32.xlu0 %v7714_v47, %s6637_s23  ;;  %v3069_v51 = vrot.slane %v7463_v53, 2 }
  0xe1   : > { %2683 = vmatprep.mubr.bf16.mxu1 %v7722_v3  ;;  %3107 = vrot.lane.b32.xlu1 %v7727_v30, %s6637_s23  ;;  %v3070_v50 = vrot.slane %v7494_v52, 2  ;;  %v3072_v35 = vrot.slane %v7538_v8, 2  ;;  %v1657_v14 = vor.u32 %v1656_v15, %v1652_v40  ;;  %v1667_v4 = vor.u32 %v1666_v61, %v1662_v28 }
  0xe2   : > { %v1660_v18 = vrot.slane %v1658_v55, 1  ;;  %v1670_v16 = vrot.slane %v1668_v6, 1  ;;  %v865_v7 = vpop.permute.xlu0 %864  ;;  %v7739_v43 = vpop.permute.xlu1 %977  ;;  %v3073_v39 = vrot.slane %v7569_v41, 2  ;;  %v3075_v52 = vrot.slane %v7600_v49, 2 }
  0xe3   : > { %v1165_v33 = vsel %vm1127_vm2, %v7744_v54, %v865_v7  ;;  %v7752_v53 = vsel %vm1127_vm2, %v7083_v20, %v7739_v43  ;;  %v3076_v8 = vrot.slane %v7632_v22, 2  ;;  %v3078_v41 = vrot.slane %v7668_v57, 2 }
  0xe4   : > { %v1714_v59 = vshll.u32 %v1165_v33, 16  ;;  %3109 = vrot.lane.b32.xlu0 %v7733_v62, %s6637_s23  ;;  %v1661_v19 = vsel %vm603_vm1, %v1657_v14, %v1660_v18  ;;  %v1671_v61 = vsel %vm603_vm1, %v1667_v4, %v1670_v16  ;;  %v3079_v40 = vrot.slane %v7699_v24, 2  ;;  %v6590_v14 = vld [vmem:[%s6734_s18 + $0x84] sm:$0xff]  }
  0xe5   : > { %3111 = vrot.lane.b32.xlu1 %v7736_v56, %s6637_s23  ;;  %2522 = vmatprep.mubr.bf16.mxu0 %v1661_v19  ;;  %v1694_v49 = vshll.u32 %v7752_v53, 16  ;;  %v7774_v57 = vsel %vm3050_vm3, %v3069_v51, %v3070_v50  ;;  %v1712_v24 = vshrl.u32 %v1165_v33, 16  ;;  %v7779_v28 = vsel %vm3050_vm3, %v3072_v35, %v3073_v39 }
  0xe6   : > { %v1716_v9 = vrot.slane %v1714_v59, 1  ;;  %2684 = vmatmul.mubr.bf16.gmra.mrb[24].mxu1 %v1671_v61  ;;  %v7764_v15 = vpop.permute.xlu0 %1058  ;;  %v867_v58 = vpop.permute.xlu1 %866  ;;  %2523 = vmatmul.mubr.bf16.gmra.mrb[24].mxu0 %v7591_v44  ;;  %10288 = vst [vmem:[#allocation47_spill] sm:$0xff] %v7779_v28  ;;  %v7787_v44 = vsel %vm3050_vm3, %v3078_v41, %v3079_v40  ;;  %v3081_v51 = vrot.slane %v7744_v54, 2  ;;  %v3082_v18 = vrot.slane %v6589_v5, 2 }
  0xe7   : > { %10287 = vst [vmem:[#allocation46_spill] sm:$0xff] %v7764_v15  ;;  %v1332_v22 = vsel %vm1127_vm2, %v7069_v0, %v7764_v15  ;;  %v1167_v26 = vsel %vm1127_vm2, %v6589_v5, %v867_v58  ;;  %v7784_v0 = vsel %vm3050_vm3, %v3075_v52, %v3076_v8  ;;  %10290 = vst [vmem:[#allocation49_spill] sm:$0xff] %v7787_v44  ;;  %v1692_v7 = vshrl.u32 %v7752_v53, 16  ;;  %v6591_v41 = vld [vmem:[%s6734_s18 + $0x8c] ss:$0 sps:$4 sm:$0x33]  }
  0xe8   : > { %v1704_v55 = vshll.u32 %v1332_v22, 16  ;;  %v1718_v6 = vshll.u32 %v1167_v26, 16  ;;  %3113 = vrot.lane.b32.xlu0 %v7774_v57, %s6637_s23  ;;  %10289 = vst [vmem:[#allocation48_spill] sm:$0xff] %v7784_v0  ;;  %v1717_v16 = vor.u32 %v1716_v9, %v1712_v24  ;;  %v3084_v4 = vrot.slane %v6590_v14, 2 }
  0xe9   : > { %3115 = vrot.lane.b32.xlu1 %v7779_v28, %s6637_s23  ;;  %v1696_v39 = vrot.slane %v1694_v49, 1  ;;  %v10291_v8 = vshrl.u32 %v7032_v38, 16  ;;  %v3085_v40 = vrot.slane %v6591_v41, 2  ;;  %v1702_v9 = vshrl.u32 %v1332_v22, 16  ;;  %v7807_v38 = vld [vmem:[%s6734_s18 + $0x90] sm:$0xff]  }
  0xea   : > { %v1720_v50 = vrot.slane %v1718_v6, 1  ;;  %v980_v33 = vpop.permute.xlu0 %979  ;;  %v1061_v35 = vpop.permute.xlu1 %1060  ;;  %v1706_v59 = vrot.slane %v1704_v55, 1  ;;  %v3087_v58 = vrot.slane %v7807_v38, 2  ;;  %v7811_v49 = vld [vmem:[%s6734_s18 + $0x98] ss:$0 sps:$4 sm:$0x33]  }
  0xeb   : > { %v1239_v52 = vsel %vm1127_vm2, %v7072_v2, %v980_v33  ;;  %v1335_v54 = vsel %vm1127_vm2, %v10291_v8, %v1061_v35  ;;  %v3088_v5 = vrot.slane %v7811_v49, 2 }
  0xec   : > { %v1698_v19 = vshll.u32 %v1239_v52, 16  ;;  %v1708_v61 = vshll.u32 %v1335_v54, 16  ;;  %v7798_v53 = vsel %vm603_vm1, %v1717_v16, %v1720_v50  ;;  %3117 = vrot.lane.b32.xlu0 %v7784_v0, %s6637_s23  ;;  %v7817_v16 = vld [vmem:[%s6734_s18 + $0x9c] sm:$0xff]   ;;  %v7821_v50 = vld [vmem:[%s6734_s18 + $0xa4] ss:$0 sps:$4 sm:$0x33]   ;;  %v1697_v52 = vor.u32 %v1696_v39, %v1692_v7 }
  0xed   : > { %2691 = vmatprep.mubr.bf16.mxu1 %v7798_v53  ;;  %3119 = vrot.lane.b32.xlu1 %v7787_v44, %s6637_s23  ;;  %v3090_v22 = vrot.slane %v7817_v16, 2  ;;  %v3091_v33 = vrot.slane %v7821_v50, 2  ;;  %v1707_v8 = vor.u32 %v1706_v59, %v1702_v9  ;;  %v7826_v54 = vsel %vm3050_vm3, %v3081_v51, %v3082_v18 }
  0xee   : > { %v1700_v26 = vrot.slane %v1698_v19, 1  ;;  %v1710_v24 = vrot.slane %v1708_v61, 1  ;;  %v869_v55 = vpop.permute.xlu0 %868  ;;  %v7814_v6 = vpop.permute.xlu1 %981  ;;  %10293 = vst [vmem:[#allocation51_spill] sm:$0xff] %v7826_v54  ;;  %v10294_v61 = vld [vmem:[#allocation12_spill] sm:$0xff]  ;;  %v7834_v44 = vsel %vm3050_vm3, %v3084_v4, %v3085_v40  ;;  %v7841_v51 = vsel %vm3050_vm3, %v3087_v58, %v3088_v5  ;;  %v7849_v4 = vld [vmem:[%s6734_s18 + $0xa8] sm:$0xff]  }
  0xef   : > { %10292 = vst [vmem:[#allocation50_spill] sm:$0xff] %v7814_v6  ;;  %v1169_v35 = vsel %vm1127_vm2, %v6590_v14, %v869_v55  ;;  %v1242_v15 = vsel %vm1127_vm2, %v10294_v61, %v7814_v6  ;;  %10295 = vst [vmem:[#allocation12_spill] sm:$0xff] %v7834_v44  ;;  %v7846_v9 = vsel %vm3050_vm3, %v3090_v22, %v3091_v33  ;;  %v3093_v40 = vrot.slane %v7849_v4, 2  ;;  %v10299_v58 = vld [vmem:[#allocation11_spill] sm:$0xff] }
  0xf0   : > { %v1754_v19 = vshll.u32 %v1169_v35, 16  ;;  %3121 = vrot.lane.b32.xlu0 %v7826_v54, %s6637_s23  ;;  %v1701_v14 = vsel %vm603_vm1, %v1697_v52, %v1700_v26  ;;  %v1711_v7 = vsel %vm603_vm1, %v1707_v8, %v1710_v24  ;;  %10296 = vst [vmem:[#allocation52_spill] sm:$0xff] %v7841_v51  ;;  %10298 = vst [vmem:[#allocation54_spill] sm:$0xff] %v7846_v9  ;;  %v7853_v26 = vld [vmem:[%s6734_s18 + $0xb0] ss:$0 sps:$4 sm:$0x33]  }
  0xf1   : > { %3123 = vrot.lane.b32.xlu1 %v7834_v44, %s6637_s23  ;;  %2530 = vmatprep.mubr.bf16.mxu0 %v1701_v14  ;;  %v3094_v24 = vrot.slane %v7853_v26, 2  ;;  %v1734_v55 = vshll.u32 %v1242_v15, 16  ;;  %v3096_v22 = vrot.slane %v7267_v27, 2  ;;  %v1752_v33 = vshrl.u32 %v1169_v35, 16  ;;  %v10302_v54 = vld [vmem:[#allocation8_spill] sm:$0xff] }
  0xf2   : > { %v1756_v18 = vrot.slane %v1754_v19, 1  ;;  %2692 = vmatmul.mubr.bf16.gmra.mrb[28].mxu1 %v1711_v7  ;;  %v7843_v39 = vpop.permute.xlu0 %1062  ;;  %v871_v59 = vpop.permute.xlu1 %870  ;;  %2531 = vmatmul.mubr.bf16.gmra.mrb[28].mxu0 %v7657_v32  ;;  %v3097_v14 = vrot.slane %v7310_v36, 2  ;;  %v1732_v44 = vshrl.u32 %v1242_v15, 16 }
  0xf3   : > { %10297 = vst [vmem:[#allocation53_spill] sm:$0xff] %v7843_v39  ;;  %v1338_v5 = vsel %vm1127_vm2, %v10299_v58, %v7843_v39  ;;  %v1171_v52 = vsel %vm1127_vm2, %v6591_v41, %v871_v59  ;;  %v7868_v41 = vsel %vm3050_vm3, %v3093_v40, %v3094_v24  ;;  %v1736_v27 = vrot.slane %v1734_v55, 1  ;;  %v10301_v59 = vld [vmem:[#allocation9_spill] sm:$0xff] }
  0xf4   : > { %v1744_v8 = vshll.u32 %v1338_v5, 16  ;;  %v1758_v19 = vshll.u32 %v1171_v52, 16  ;;  %3125 = vrot.lane.b32.xlu0 %v7841_v51, %s6637_s23  ;;  %v1757_v7 = vor.u32 %v1756_v18, %v1752_v33  ;;  %10300 = vst [vmem:[#allocation11_spill] sm:$0xff] %v7868_v41  ;;  %v10303_v51 = vshrl.u32 %v10302_v54, 16 }
  0xf5   : > { %3127 = vrot.lane.b32.xlu1 %v7846_v9, %s6637_s23  ;;  %v7881_v15 = vsel %vm3050_vm3, %v3096_v22, %v3097_v14  ;;  %v1742_v40 = vshrl.u32 %v1338_v5, 16  ;;  %v1737_v55 = vor.u32 %v1736_v27, %v1732_v44  ;;  %v10305_v22 = vld [vmem:[#allocation16_spill] sm:$0xff] }
  0xf6   : > { %v1760_v58 = vrot.slane %v1758_v19, 1  ;;  %v984_v39 = vpop.permute.xlu0 %983  ;;  %v1065_v32 = vpop.permute.xlu1 %1064  ;;  %v1746_v35 = vrot.slane %v1744_v8, 1  ;;  %10304 = vst [vmem:[#allocation9_spill] sm:$0xff] %v7881_v15 }
  0xf7   : > { %v1245_v52 = vsel %vm1127_vm2, %v10301_v59, %v984_v39  ;;  %v1341_v0 = vsel %vm1127_vm2, %v10303_v51, %v1065_v32 }
  0xf8   : > { %v1738_v6 = vshll.u32 %v1245_v52, 16  ;;  %v1748_v28 = vshll.u32 %v1341_v0, 16  ;;  %v7876_v18 = vsel %vm603_vm1, %v1757_v7, %v1760_v58  ;;  %3129 = vrot.lane.b32.xlu0 %v7868_v41, %s6637_s23  ;;  %v1747_v33 = vor.u32 %v1746_v35, %v1742_v40 }
  0xf9   : > { %2699 = vmatprep.mubr.bf16.mxu1 %v7876_v18  ;;  %3131 = vrot.lane.b32.xlu1 %v7881_v15, %s6637_s23  ;;  %v10309_v15 = vld [vmem:[#allocation10_spill] sm:$0xff] }
  0xfa   : > { %v1740_v54 = vrot.slane %v1738_v6, 1  ;;  %v1750_v39 = vrot.slane %v1748_v28, 1  ;;  %v873_v51 = vpop.permute.xlu0 %872  ;;  %v7886_v24 = vpop.permute.xlu1 %985 }
  0xfb   : > { %v1173_v0 = vsel %vm1127_vm2, %v7807_v38, %v873_v51  ;;  %v1248_v5 = vsel %vm1127_vm2, %v10305_v22, %v7886_v24  ;;  %v10307_v38 = vld [vmem:[#allocation15_spill] sm:$0xff] }
  0xfc   : > { %v1794_v8 = vshll.u32 %v1173_v0, 16  ;;  %v1741_v19 = vsel %vm603_vm1, %v1737_v55, %v1740_v54  ;;  %v1751_v14 = vsel %vm603_vm1, %v1747_v33, %v1750_v39  ;;  %v1774_v58 = vshll.u32 %v1248_v5, 16 }
  0xfd   : > { %2538 = vmatprep.mubr.bf16.mxu0 %v1741_v19  ;;  %2700 = vmatmul.mubr.bf16.gmra.mrb[32].mxu1 %v1751_v14  ;;  %v1792_v27 = vshrl.u32 %v1173_v0, 16  ;;  %v1772_v54 = vshrl.u32 %v1248_v5, 16  ;;  %v10308_v19 = vld [vmem:[#allocation14_spill] sm:$0xff] }
  0xfe   : > { %v1796_v7 = vrot.slane %v1794_v8, 1  ;;  %v7895_v28 = vpop.permute.xlu0 %1066  ;;  %v875_v6 = vpop.permute.xlu1 %874  ;;  %2539 = vmatmul.mubr.bf16.gmra.mrb[32].mxu0 %v7722_v3  ;;  %v1776_v33 = vrot.slane %v1774_v58, 1 }
  0xff   : > { %10306 = vst [vmem:[#allocation8_spill] sm:$0xff] %v7895_v28  ;;  %v1344_v44 = vsel %vm1127_vm2, %v10307_v38, %v7895_v28  ;;  %v1175_v32 = vsel %vm1127_vm2, %v7811_v49, %v875_v6  ;;  %v10310_v38 = vshrl.u32 %v10309_v15, 16  ;;  %v10312_v15 = vld [vmem:[#allocation20_spill] sm:$0xff] }
 0x100   : > { %v1784_v35 = vshll.u32 %v1344_v44, 16  ;;  %v1798_v52 = vshll.u32 %v1175_v32, 16  ;;  %v1797_v40 = vor.u32 %v1796_v7, %v1792_v27  ;;  %v1782_v0 = vshrl.u32 %v1344_v44, 16 }
 0x102   : > { %v1800_v39 = vrot.slane %v1798_v52, 1  ;;  %v988_v51 = vpop.permute.xlu0 %987  ;;  %v1069_v55 = vpop.permute.xlu1 %1068  ;;  %v1786_v8 = vrot.slane %v1784_v35, 1  ;;  %v1777_v35 = vor.u32 %v1776_v33, %v1772_v54 }
 0x103   : > { %v1251_v14 = vsel %vm1127_vm2, %v10308_v19, %v988_v51  ;;  %v1347_v3 = vsel %vm1127_vm2, %v10310_v38, %v1069_v55 }
 0x104   : > { %v1778_v41 = vshll.u32 %v1251_v14, 16  ;;  %v1788_v9 = vshll.u32 %v1347_v3, 16  ;;  %v7909_v49 = vsel %vm603_vm1, %v1797_v40, %v1800_v39  ;;  %v1787_v52 = vor.u32 %v1786_v8, %v1782_v0 }
 0x105   : > { %2707 = vmatprep.mubr.bf16.mxu1 %v7909_v49 }
 0x106   : > { %v1780_v5 = vrot.slane %v1778_v41, 1  ;;  %v1790_v7 = vrot.slane %v1788_v9, 1  ;;  %v877_v6 = vpop.permute.xlu0 %876  ;;  %v7912_v58 = vpop.permute.xlu1 %989 }
 0x107   : > { %10311 = vst [vmem:[#allocation16_spill] sm:$0xff] %v7912_v58  ;;  %v1177_v32 = vsel %vm1127_vm2, %v7817_v16, %v877_v6  ;;  %v1254_v27 = vsel %vm1127_vm2, %v10312_v15, %v7912_v58  ;;  %v10314_v16 = vld [vmem:[#allocation18_spill] sm:$0xff] }
 0x108   : > { %v1834_v51 = vshll.u32 %v1177_v32, 16  ;;  %v1781_v40 = vsel %vm603_vm1, %v1777_v35, %v1780_v5  ;;  %v1791_v44 = vsel %vm603_vm1, %v1787_v52, %v1790_v7  ;;  %v1814_v41 = vshll.u32 %v1254_v27, 16  ;;  %v10315_v52 = vld [vmem:[#allocation17_spill] sm:$0xff] }
 0x109   : > { %2546 = vmatprep.mubr.bf16.mxu0 %v1781_v40  ;;  %2708 = vmatmul.mubr.bf16.gmra.mrb[36].mxu1 %v1791_v44  ;;  %v1832_v33 = vshrl.u32 %v1177_v32, 16  ;;  %v1812_v0 = vshrl.u32 %v1254_v27, 16  ;;  %v1124_v44 = vrot.slane %v7535_v34, 1 }
 0x10a   : > { %v1836_v39 = vrot.slane %v1834_v51, 1  ;;  %v7921_v9 = vpop.permute.xlu0 %1070  ;;  %v879_v55 = vpop.permute.xlu1 %878  ;;  %2547 = vmatmul.mubr.bf16.gmra.mrb[36].mxu0 %v7798_v53  ;;  %v1816_v5 = vrot.slane %v1814_v41, 1  ;;  %v1125_v53 = vrot.slane %v7556_v45, 1 }
 0x10b   : > { %10313 = vst [vmem:[#allocation15_spill] sm:$0xff] %v7921_v9  ;;  %v1350_v14 = vsel %vm1127_vm2, %v10314_v16, %v7921_v9  ;;  %v1179_v54 = vsel %vm1127_vm2, %v7821_v50, %v879_v55  ;;  %v10316_v9 = vld [vmem:[#allocation13_spill] sm:$0xff] }
 0x10c   : > { %v1824_v8 = vshll.u32 %v1350_v14, 16  ;;  %v1838_v38 = vshll.u32 %v1179_v54, 16  ;;  %v1837_v3 = vor.u32 %v1836_v39, %v1832_v33  ;;  %v10317_v50 = vshrl.u32 %v10316_v9, 16 }
 0x10d   : > { %v1822_v27 = vshrl.u32 %v1350_v14, 16  ;;  %v1126_v55 = vsel %vm892_vm0, %v1124_v44, %v1125_v53  ;;  %v2052_v54 = vshll.u32 %v1125_v53, 16  ;;  %v1817_v34 = vor.u32 %v1816_v5, %v1812_v0 }
 0x10e   : > { %v1840_v7 = vrot.slane %v1838_v38, 1  ;;  %v992_v6 = vpop.permute.xlu0 %991  ;;  %v1826_v35 = vrot.slane %v1824_v8, 1  ;;  %v2047_v45 = vshll.u32 %v1126_v55, 16  ;;  %3148 = vrot.lane.b32.xlu0 %v1126_v55, %s6637_s23 }
 0x10f   : > { %v1257_v51 = vsel %vm1127_vm2, %v10315_v52, %v992_v6  ;;  %v1073_v40 = vpop.permute.xlu1 %1072  ;;  %v2054_v53 = vrot.slane %v2052_v54, 1 }
 0x110   : > { %v1818_v16 = vshll.u32 %v1257_v51, 16  ;;  %v1353_v32 = vsel %vm1127_vm2, %v10317_v50, %v1073_v40  ;;  %v7937_v39 = vsel %vm603_vm1, %v1837_v3, %v1840_v7  ;;  %v1827_v14 = vor.u32 %v1826_v35, %v1822_v27  ;;  %v10319_v51 = vld [vmem:[#allocation25_spill] sm:$0xff] }
 0x111   : > { %v1828_v41 = vshll.u32 %v1353_v32, 16  ;;  %2715 = vmatprep.mubr.bf16.mxu1 %v7937_v39  ;;  %v2045_v7 = vshrl.u32 %v1126_v55, 16  ;;  %v2049_v5 = vrot.slane %v2047_v45, 1  ;;  %v3100_v27 = vrot.slane %v7408_v23, 2 }
 0x112   : > { %v1820_v33 = vrot.slane %v1818_v16, 1  ;;  %v881_v8 = vpop.permute.xlu0 %880  ;;  %v7952_v16 = vld [vmem:[%s6734_s18 + $0xc0] sm:$0xff]  }
 0x113   : > { %v1830_v9 = vrot.slane %v1828_v41, 1  ;;  %v1181_v38 = vsel %vm1127_vm2, %v7849_v4, %v881_v8  ;;  %v7944_v3 = vpop.permute.xlu1 %993  ;;  %v3099_v4 = vrot.slane %v7952_v16, 2  ;;  %v10321_v41 = vld [vmem:[#allocation22_spill] sm:$0xff] }
 0x114   : > { %10318 = vst [vmem:[#allocation14_spill] sm:$0xff] %v7944_v3  ;;  %v1874_v6 = vshll.u32 %v1181_v38, 16  ;;  %v1260_v40 = vsel %vm1127_vm2, %v10319_v51, %v7944_v3  ;;  %v1821_v44 = vsel %vm603_vm1, %v1817_v34, %v1820_v33  ;;  %v2050_v33 = vor.u32 %v2049_v5, %v2045_v7  ;;  %v6544_v7 = vld [vmem:[%s6734_s18 + $0xec] ss:$0 sps:$4 sm:$0x33]  }
 0x115   : > { %2554 = vmatprep.mubr.bf16.mxu0 %v1821_v44  ;;  %v1831_v0 = vsel %vm603_vm1, %v1827_v14, %v1830_v9  ;;  %v1854_v32 = vshll.u32 %v1260_v40, 16  ;;  %v1872_v8 = vshrl.u32 %v1181_v38, 16  ;;  %v1852_v9 = vshrl.u32 %v1260_v40, 16  ;;  %v6543_v38 = vld [vmem:[%s6734_s18 + $0xe4] sm:$0xff]  }
 0x116   : > { %v1876_v50 = vrot.slane %v1874_v6, 1  ;;  %2716 = vmatmul.mubr.bf16.gmra.mrb[40].mxu1 %v1831_v0  ;;  %v7955_v35 = vpop.permute.xlu0 %1074  ;;  %2555 = vmatmul.mubr.bf16.gmra.mrb[40].mxu0 %v7876_v18  ;;  %v7965_v6 = vsel %vm603_vm1, %v2050_v33, %v2054_v53  ;;  %v7968_v18 = vsel %vm3050_vm3, %v3099_v4, %v3100_v27  ;;  %v3102_v53 = vrot.slane %v7458_v21, 2 }
 0x117   : > { %10320 = vst [vmem:[#allocation10_spill] sm:$0xff] %v7955_v35  ;;  %v1356_v55 = vsel %vm1127_vm2, %v10321_v41, %v7955_v35  ;;  %v883_v54 = vpop.permute.xlu1 %882  ;;  %10322 = vst [vmem:[#allocation20_spill] sm:$0xff] %v7968_v18  ;;  %v1856_v0 = vrot.slane %v1854_v32, 1  ;;  %3133 = vrot.lane.b32.xlu1 %v7968_v18, %s6637_s23  ;;  %v10323_v35 = vld [vmem:[#allocation23_spill] sm:$0xff]  ;;  %v3103_v4 = vrot.slane %v7487_v25, 2  ;;  %v10324_v32 = vshrl.u32 %v7163_v63, 16 }
 0x118   : > { %v1864_v34 = vshll.u32 %v1356_v55, 16  ;;  %v1183_v45 = vsel %vm1127_vm2, %v7853_v26, %v883_v54  ;;  %v1877_v44 = vor.u32 %v1876_v50, %v1872_v8  ;;  %v1862_v27 = vshrl.u32 %v1356_v55, 16  ;;  %v6599_v55 = vld [vmem:[%s6734_s18 + $0xb4] sm:$0xff]  }
 0x119   : > { %v1878_v14 = vshll.u32 %v1183_v45, 16  ;;  %v3145_v33 = vrot.slane %v6543_v38, 1  ;;  %v3146_v45 = vrot.slane %v6544_v7, 1  ;;  %v1857_v18 = vor.u32 %v1856_v0, %v1852_v9 }
 0x11a   : > { %v1866_v28 = vrot.slane %v1864_v34, 1  ;;  %v996_v41 = vpop.permute.xlu0 %995 }
 0x11b   : > { %v1880_v5 = vrot.slane %v1878_v14, 1  ;;  %v1263_v26 = vsel %vm1127_vm2, %v10323_v35, %v996_v41  ;;  %v1077_v40 = vpop.permute.xlu1 %1076  ;;  %v7985_v14 = vsel %vm3050_vm3, %v3102_v53, %v3103_v4  ;;  %v3147_v7 = vsel %vm892_vm0, %v3145_v33, %v3146_v45  ;;  %v6600_v33 = vld [vmem:[%s6734_s18 + $0xbc] ss:$0 sps:$4 sm:$0x33]  }
 0x11c   : > { %v1858_v50 = vshll.u32 %v1263_v26, 16  ;;  %v1359_v54 = vsel %vm1127_vm2, %v10324_v32, %v1077_v40  ;;  %10325 = vst [vmem:[#allocation18_spill] sm:$0xff] %v7985_v14  ;;  %3135 = vrot.lane.b32.xlu1 %v7985_v14, %s6637_s23  ;;  %3150 = vrot.lane.b32.xlu0 %v3147_v7, %s6637_s23 }
 0x11d   : > { %v1868_v8 = vshll.u32 %v1359_v54, 16  ;;  %v7982_v34 = vsel %vm603_vm1, %v1877_v44, %v1880_v5  ;;  %v1867_v44 = vor.u32 %v1866_v28, %v1862_v27  ;;  %v10328_v27 = vld [vmem:[#allocation27_spill] sm:$0xff] }
 0x11e   : > { %v1860_v41 = vrot.slane %v1858_v50, 1  ;;  %2723 = vmatprep.mubr.bf16.mxu1 %v7982_v34  ;;  %v885_v21 = vpop.permute.xlu0 %884 }
 0x11f   : > { %v1870_v63 = vrot.slane %v1868_v8, 1  ;;  %v1185_v38 = vsel %vm1127_vm2, %v6599_v55, %v885_v21  ;;  %v7992_v26 = vpop.permute.xlu1 %997 }
 0x120   : > { %10326 = vst [vmem:[#allocation17_spill] sm:$0xff] %v7992_v26  ;;  %v1914_v5 = vshll.u32 %v1185_v38, 16  ;;  %v1266_v40 = vsel %vm1127_vm2, %v7315_v10, %v7992_v26  ;;  %v1861_v9 = vsel %vm603_vm1, %v1857_v18, %v1860_v41  ;;  %v1912_v8 = vshrl.u32 %v1185_v38, 16 }
 0x121   : > { %2562 = vmatprep.mubr.bf16.mxu0 %v1861_v9  ;;  %v1871_v0 = vsel %vm603_vm1, %v1867_v44, %v1870_v63  ;;  %v1894_v53 = vshll.u32 %v1266_v40, 16  ;;  %v1892_v41 = vshrl.u32 %v1266_v40, 16 }
 0x122   : > { %2724 = vmatmul.mubr.bf16.gmra.mrb[44].mxu1 %v1871_v0  ;;  %v8001_v4 = vpop.permute.xlu0 %1078  ;;  %2563 = vmatmul.mubr.bf16.gmra.mrb[44].mxu0 %v7909_v49  ;;  %v1916_v28 = vrot.slane %v1914_v5, 1  ;;  %v10329_v0 = vshrl.u32 %v7211_v12, 16 }
 0x123   : > { %10327 = vst [vmem:[#allocation13_spill] sm:$0xff] %v8001_v4  ;;  %v1362_v50 = vsel %vm1127_vm2, %v10328_v27, %v8001_v4  ;;  %v887_v32 = vpop.permute.xlu1 %886  ;;  %v1896_v21 = vrot.slane %v1894_v53, 1 }
 0x124   : > { %v1904_v54 = vshll.u32 %v1362_v50, 16  ;;  %v1187_v18 = vsel %vm1127_vm2, %v6600_v33, %v887_v32  ;;  %v1917_v55 = vor.u32 %v1916_v28, %v1912_v8  ;;  %v1902_v14 = vshrl.u32 %v1362_v50, 16  ;;  %v10331_v50 = vld [vmem:[#allocation32_spill] sm:$0xff] }
 0x125   : > { %v1918_v45 = vshll.u32 %v1187_v18, 16  ;;  %v1897_v28 = vor.u32 %v1896_v21, %v1892_v41  ;;  %v10333_v41 = vld [vmem:[#allocation30_spill] sm:$0xff] }
 0x126   : > { %v1000_v63 = vpop.permute.xlu0 %999  ;;  %v1906_v44 = vrot.slane %v1904_v54, 1 }
 0x127   : > { %v1920_v7 = vrot.slane %v1918_v45, 1  ;;  %v1269_v49 = vsel %vm1127_vm2, %v7281_v31, %v1000_v63  ;;  %v1081_v5 = vpop.permute.xlu1 %1080 }
 0x128   : > { %v1898_v9 = vshll.u32 %v1269_v49, 16  ;;  %v1365_v27 = vsel %vm1127_vm2, %v10329_v0, %v1081_v5  ;;  %v1907_v12 = vor.u32 %v1906_v44, %v1902_v14 }
 0x129   : > { %v1908_v4 = vshll.u32 %v1365_v27, 16  ;;  %v8015_v38 = vsel %vm603_vm1, %v1917_v55, %v1920_v7  ;;  %v6601_v7 = vld [vmem:[%s6734_s18 + $0xc8] ss:$0 sps:$4 sm:$0x33]  }
 0x12a   : > { %v1900_v40 = vrot.slane %v1898_v9, 1  ;;  %2731 = vmatprep.mubr.bf16.mxu1 %v8015_v38  ;;  %v889_v53 = vpop.permute.xlu0 %888 }
 0x12b   : > { %v1910_v32 = vrot.slane %v1908_v4, 1  ;;  %v1189_v54 = vsel %vm1127_vm2, %v7952_v16, %v889_v53  ;;  %v8020_v33 = vpop.permute.xlu1 %1001 }
 0x12c   : > { %10330 = vst [vmem:[#allocation25_spill] sm:$0xff] %v8020_v33  ;;  %v1954_v18 = vshll.u32 %v1189_v54, 16  ;;  %v1272_v8 = vsel %vm1127_vm2, %v10331_v50, %v8020_v33  ;;  %v1901_v45 = vsel %vm603_vm1, %v1897_v28, %v1900_v40  ;;  %v1952_v5 = vshrl.u32 %v1189_v54, 16 }
 0x12d   : > { %2570 = vmatprep.mubr.bf16.mxu0 %v1901_v45  ;;  %v1911_v63 = vsel %vm603_vm1, %v1907_v12, %v1910_v32  ;;  %v1934_v55 = vshll.u32 %v1272_v8, 16  ;;  %v1932_v0 = vshrl.u32 %v1272_v8, 16  ;;  %v10334_v12 = vld [vmem:[#allocation29_spill] sm:$0xff] }
 0x12e   : > { %2732 = vmatmul.mubr.bf16.gmra.mrb[48].mxu1 %v1911_v63  ;;  %v8027_v4 = vpop.permute.xlu0 %1082  ;;  %2571 = vmatmul.mubr.bf16.gmra.mrb[48].mxu0 %v7937_v39  ;;  %v1956_v16 = vrot.slane %v1954_v18, 1  ;;  %v10335_v63 = vshrl.u32 %v7310_v36, 16 }
 0x12f   : > { %10332 = vst [vmem:[#allocation22_spill] sm:$0xff] %v8027_v4  ;;  %v1368_v14 = vsel %vm1127_vm2, %v10333_v41, %v8027_v4  ;;  %v891_v21 = vpop.permute.xlu1 %890  ;;  %v1936_v27 = vrot.slane %v1934_v55, 1 }
 0x130   : > { %v1944_v44 = vshll.u32 %v1368_v14, 16  ;;  %v1191_v49 = vsel %vm1127_vm2, %v6601_v7, %v891_v21  ;;  %v1957_v53 = vor.u32 %v1956_v16, %v1952_v5  ;;  %v1942_v4 = vshrl.u32 %v1368_v14, 16 }
 0x131   : > { %v1958_v9 = vshll.u32 %v1191_v49, 16  ;;  %v1937_v16 = vor.u32 %v1936_v27, %v1932_v0 }
 0x132   : > { %v1004_v40 = vpop.permute.xlu0 %1003  ;;  %v1946_v28 = vrot.slane %v1944_v44, 1 }
 0x133   : > { %v1960_v32 = vrot.slane %v1958_v9, 1  ;;  %v1275_v39 = vsel %vm1127_vm2, %v10334_v12, %v1004_v40  ;;  %v1085_v18 = vpop.permute.xlu1 %1084  ;;  %v6602_v9 = vld [vmem:[%s6734_s18 + $0xcc] sm:$0xff]  }
 0x134   : > { %v1938_v45 = vshll.u32 %v1275_v39, 16  ;;  %v1371_v41 = vsel %vm1127_vm2, %v10335_v63, %v1085_v18  ;;  %v1947_v36 = vor.u32 %v1946_v28, %v1942_v4  ;;  %v10338_v39 = vld [vmem:[#allocation35_spill] sm:$0xff] }
 0x135   : > { %v1948_v21 = vshll.u32 %v1371_v41, 16  ;;  %v8041_v54 = vsel %vm603_vm1, %v1957_v53, %v1960_v32 }
 0x136   : > { %v1940_v8 = vrot.slane %v1938_v45, 1  ;;  %2739 = vmatprep.mubr.bf16.mxu1 %v8041_v54  ;;  %v8044_v55 = vpop.permute.xlu0 %1005  ;;  %v10339_v45 = vld [vmem:[#allocation34_spill] sm:$0xff] }
 0x137   : > { %10336 = vst [vmem:[#allocation23_spill] sm:$0xff] %v8044_v55  ;;  %v1950_v44 = vrot.slane %v1948_v21, 1  ;;  %v1278_v7 = vsel %vm1127_vm2, %v7504_v46, %v8044_v55  ;;  %v1117_v49 = vpop.permute.xlu1 %1116 }
 0x138   : > { %v1974_v5 = vshll.u32 %v1278_v7, 16  ;;  %v1385_v14 = vsel %vm1127_vm2, %v6602_v9, %v1117_v49  ;;  %v1941_v40 = vsel %vm603_vm1, %v1937_v16, %v1940_v8  ;;  %v1972_v41 = vshrl.u32 %v1278_v7, 16  ;;  %v10340_v49 = vld [vmem:[#allocation4_spill] sm:$0xff] }
 0x139   : > { %2578 = vmatprep.mubr.bf16.mxu0 %v1941_v40  ;;  %v1951_v53 = vsel %vm603_vm1, %v1947_v36, %v1950_v44  ;;  %v1994_v32 = vshll.u32 %v1385_v14, 16  ;;  %v1992_v8 = vshrl.u32 %v1385_v14, 16  ;;  %v1434_v36 = vshll.u32 %v10340_v49, 16 }
 0x13a   : > { %2740 = vmatmul.mubr.bf16.gmra.mrb[52].mxu1 %v1951_v53  ;;  %v8053_v0 = vpop.permute.xlu0 %1086  ;;  %2579 = vmatmul.mubr.bf16.gmra.mrb[52].mxu0 %v7982_v34  ;;  %v1976_v27 = vrot.slane %v1974_v5, 1  ;;  %v6603_v34 = vld [vmem:[%s6734_s18 + $0xd4] ss:$0 sps:$4 sm:$0x33]  }
 0x13b   : > { %10337 = vst [vmem:[#allocation27_spill] sm:$0xff] %v8053_v0  ;;  %v1374_v4 = vsel %vm1127_vm2, %v10338_v39, %v8053_v0  ;;  %v1008_v28 = vpop.permute.xlu1 %1007  ;;  %v1996_v16 = vrot.slane %v1994_v32, 1  ;;  %v10341_v0 = vshrl.u32 %v7408_v23, 16  ;;  %v1432_v32 = vshrl.u32 %v10340_v49, 16 }
 0x13c   : > { %v1984_v18 = vshll.u32 %v1374_v4, 16  ;;  %v1281_v63 = vsel %vm1127_vm2, %v10339_v45, %v1008_v28  ;;  %v1977_v55 = vor.u32 %v1976_v27, %v1972_v41  ;;  %v1982_v28 = vshrl.u32 %v1374_v4, 16 }
 0x13d   : > { %v1978_v21 = vshll.u32 %v1281_v63, 16  ;;  %v1997_v63 = vor.u32 %v1996_v16, %v1992_v8  ;;  %v8078_v8 = vld [vmem:[%s6734_s18 + $0xd8] sm:$0xff]  }
 0x13e   : > { %v1119_v44 = vpop.permute.xlu0 %1118  ;;  %v1986_v9 = vrot.slane %v1984_v18, 1  ;;  %10345 = vst [vmem:[#allocation30_spill] sm:$0xff] %v8078_v8 }
 0x13f   : > { %v1980_v40 = vrot.slane %v1978_v21, 1  ;;  %v1387_v5 = vsel %vm1127_vm2, %v6603_v34, %v1119_v44  ;;  %v1089_v53 = vpop.permute.xlu1 %1088  ;;  %v1436_v44 = vrot.slane %v1434_v36, 1  ;;  %v10343_v34 = vld [vmem:[#allocation3_spill] sm:$0xff] }
 0x140   : > { %v1998_v39 = vshll.u32 %v1387_v5, 16  ;;  %v1377_v33 = vsel %vm1127_vm2, %v10341_v0, %v1089_v53  ;;  %v1438_v27 = vshll.u32 %v10343_v34, 16  ;;  %v1987_v0 = vor.u32 %v1986_v9, %v1982_v28 }
 0x141   : > { %v1988_v7 = vshll.u32 %v1377_v33, 16  ;;  %v1981_v14 = vsel %vm603_vm1, %v1977_v55, %v1980_v40  ;;  %v10344_v55 = vld [vmem:[#allocation6_spill] sm:$0xff] }
 0x142   : > { %v2000_v18 = vrot.slane %v1998_v39, 1  ;;  %2586 = vmatprep.mubr.bf16.mxu0 %v1981_v14  ;;  %v8069_v21 = vpop.permute.xlu0 %1009  ;;  %v1484_v4 = vshll.u32 %v10344_v55, 16  ;;  %v1482_v9 = vshrl.u32 %v10344_v55, 16  ;;  %v10347_v14 = vld [vmem:[#allocation39_spill] sm:$0xff] }
 0x143   : > { %10342 = vst [vmem:[#allocation32_spill] sm:$0xff] %v8069_v21  ;;  %v1990_v41 = vrot.slane %v1988_v7, 1  ;;  %v1284_v23 = vsel %vm1127_vm2, %v7579_v48, %v8069_v21  ;;  %2587 = vmatmul.mubr.bf16.gmra.mrb[56].mxu0 %v8015_v38  ;;  %v1121_v33 = vpop.permute.xlu1 %1120  ;;  %v1437_v38 = vor.u32 %v1436_v44, %v1432_v32  ;;  %v1440_v7 = vrot.slane %v1438_v27, 1  ;;  %v8098_v55 = vld [vmem:[%s6734_s18 + $0xe0] ss:$0 sps:$4 sm:$0x33]  }
 0x144   : > { %v2016_v40 = vshll.u32 %v1284_v23, 16  ;;  %v1389_v16 = vsel %vm1127_vm2, %v8078_v8, %v1121_v33  ;;  %v2001_v36 = vsel %vm603_vm1, %v1997_v63, %v2000_v18  ;;  %v1486_v33 = vrot.slane %v1484_v4, 1 }
 0x145   : > { %2747 = vmatprep.mubr.bf16.mxu1 %v2001_v36  ;;  %v1991_v5 = vsel %vm603_vm1, %v1987_v0, %v1990_v41  ;;  %v2036_v53 = vshll.u32 %v1389_v16, 16  ;;  %v10348_v41 = vld [vmem:[#allocation7_spill] sm:$0xff]  ;;  %v2014_v36 = vshrl.u32 %v1284_v23, 16  ;;  %v3051_v32 = vrot.slane %v7649_v13, 2 }
 0x146   : > { %v8084_v39 = vpop.permute.xlu0 %1090  ;;  %2748 = vmatmul.mubr.bf16.gmra.mrb[56].mxu1 %v1991_v5  ;;  %v2018_v28 = vrot.slane %v2016_v40, 1  ;;  %v1524_v0 = vshll.u32 %v10348_v41, 16  ;;  %v3052_v44 = vrot.slane %v7652_v11, 2  ;;  %v2034_v27 = vshrl.u32 %v1389_v16, 16 }
 0x147   : > { %10346 = vst [vmem:[#allocation29_spill] sm:$0xff] %v8084_v39  ;;  %v1380_v34 = vsel %vm1127_vm2, %v10347_v14, %v8084_v39  ;;  %v1012_v21 = vpop.permute.xlu1 %1011  ;;  %v2038_v40 = vrot.slane %v2036_v53, 1  ;;  %v1441_v14 = vsel %vm603_vm1, %v1437_v38, %v1440_v7  ;;  %v10349_v39 = vld [vmem:[#allocation5_spill] sm:$0xff]  ;;  %v10350_v13 = vshrl.u32 %v7487_v25, 16 }
 0x148   : > { %v2026_v63 = vshll.u32 %v1380_v34, 16  ;;  %v1287_v18 = vsel %vm1127_vm2, %v7553_v1, %v1012_v21  ;;  %v1488_v26 = vshll.u32 %v10349_v39, 16  ;;  %v1522_v16 = vshrl.u32 %v10348_v41, 16 }
 0x149   : > { %v2020_v5 = vshll.u32 %v1287_v18, 16  ;;  %v2019_v18 = vor.u32 %v2018_v28, %v2014_v36  ;;  %v1526_v53 = vrot.slane %v1524_v0, 1  ;;  %v2024_v38 = vshrl.u32 %v1380_v34, 16 }
 0x14a   : > { %v1123_v8 = vpop.permute.xlu0 %1122  ;;  %v2028_v4 = vrot.slane %v2026_v63, 1  ;;  %v1528_v63 = vshll.u32 %v6907_v29, 16  ;;  %v3053_v25 = vsel %vm3050_vm3, %v3051_v32, %v3052_v44  ;;  %v1487_v34 = vor.u32 %v1486_v33, %v1482_v9  ;;  %v6606_v44 = vld [vmem:[%s6734_s18 + $0xc] sm:$0xff]  }
 0x14b   : > { %v2022_v3 = vrot.slane %v2020_v5, 1  ;;  %v1391_v21 = vsel %vm1127_vm2, %v8098_v55, %v1123_v8  ;;  %v1093_v23 = vpop.permute.xlu1 %1092  ;;  %v2039_v5 = vor.u32 %v2038_v40, %v2034_v27  ;;  %v1490_v0 = vrot.slane %v1488_v26, 1  ;;  %v10351_v40 = vld [vmem:[#allocation19_spill] sm:$0xff] }
 0x14c   : > { %v2040_v58 = vshll.u32 %v1391_v21, 16  ;;  %v1383_v11 = vsel %vm1127_vm2, %v10350_v13, %v1093_v23  ;;  %v2029_v28 = vor.u32 %v2028_v4, %v2024_v38  ;;  %v1530_v27 = vrot.slane %v1528_v63, 1  ;;  %v6527_v4 = vld [vmem:[%s10014_s2 + $0x80] sm:$0xff]  }
 0x14d   : > { %v2030_v7 = vshll.u32 %v1383_v11, 16  ;;  %v2023_v39 = vsel %vm603_vm1, %v2019_v18, %v2022_v3  ;;  %v1564_v3 = vshll.u32 %v6994_v17, 16  ;;  %v3194_v32 = vsel %vm1127_vm2, %v3053_v25, %v10351_v40  ;;  %v6528_v11 = vld [vmem:[%s10014_s2 + $0xc8] sm:$0xff]  }
 0x14e   : > { %v2042_v49 = vrot.slane %v2040_v58, 1  ;;  %2594 = vmatprep.mubr.bf16.mxu0 %v2023_v39  ;;  %v1527_v58 = vor.u32 %v1526_v53, %v1522_v16  ;;  %v1491_v26 = vsel %vm603_vm1, %v1487_v34, %v1490_v0  ;;  %v3047_v33 = vpop.permute.xlu0 %3046  ;;  %v1562_v21 = vshrl.u32 %v6994_v17, 16  ;;  %v6530_v34 = vld [vmem:[%s10014_s2 + $0xd0] sm:$0xff]  }
 0x14f   : > { %v2032_v8 = vrot.slane %v2030_v7, 1  ;;  %2595 = vmatmul.mubr.bf16.gmra.mrb[60].mxu0 %v8041_v54  ;;  %v1604_v54 = vshll.u32 %v7042_v42, 16  ;;  %v1566_v23 = vrot.slane %v1564_v3, 1  ;;  %v1568_v18 = vshll.u32 %v6971_v60, 16  ;;  %v6608_v7 = vld [vmem:[%s6734_s18] sm:$0xff]   ;;  %v10352_v3 = vld [vmem:[#allocation24_spill] sm:$0xff] }
 0x150   : > { %v2043_v36 = vsel %vm603_vm1, %v2039_v5, %v2042_v49  ;;  %6331 = vmatprep.mubr.msk.bf16.mxu0 %vm1127_vm2, %v1441_v14  ;;  %v3054_v49 = vrot.slane %v6606_v44, 2  ;;  %v6607_v14 = vld [vmem:[%s6734_s18 + $0x14] ss:$0 sps:$4 sm:$0x33]   ;;  %v1531_v13 = vsel %vm603_vm1, %v1527_v58, %v1530_v27  ;;  %v1602_v16 = vshrl.u32 %v7042_v42, 16  ;;  %v6609_v58 = vld [vmem:[%s10014_s2 + $0x100] sm:$0xff]  }
 0x151   : > { %2755 = vmatprep.mubr.bf16.mxu1 %v2043_v36  ;;  %v2033_v29 = vsel %vm603_vm1, %v2029_v28, %v2032_v8  ;;  %v3055_v9 = vrot.slane %v6607_v14, 2  ;;  %v1606_v53 = vrot.slane %v1604_v54, 1  ;;  %v1608_v38 = vshll.u32 %v7029_v37, 16  ;;  %v6529_v8 = vld [vmem:[%s10014_s2 + $0x88] sm:$0xff]   ;;  %v3049_v54 = vpop.permute.xlu1 %3048  ;;  %v6531_v14 = vld [vmem:[%s10014_s2 + $0x90] sm:$0xff]  }
 0x152   : > { %2756 = vmatmul.mubr.bf16.gmra.mrb[60].mxu1 %v2033_v29  ;;  %v3160_v39 = vsel %vm1127_vm2, %v6608_v7, %v3047_v33  ;;  %v1567_v60 = vor.u32 %v1566_v23, %v1562_v21  ;;  %v1570_v5 = vrot.slane %v1568_v18, 1  ;;  %v1644_v28 = vshll.u32 %v7083_v20, 16  ;;  %v6535_v37 = vld [vmem:[%s10014_s2 + $0x108] sm:$0xff]   ;;  %v6532_v21 = vld [vmem:[%s10014_s2 + $0xd8] sm:$0xff]   ;;  %v6534_v7 = vld [vmem:[%s10014_s2 + $0xe0] sm:$0xff]  }
 0x153   : > { %3656 = vmatprep.mubr.bf16.mxu1 %v3194_v32  ;;  %v3056_v63 = vsel %vm3050_vm3, %v3054_v49, %v3055_v9  ;;  %v1607_v25 = vor.u32 %v1606_v53, %v1602_v16  ;;  %v1610_v36 = vrot.slane %v1608_v38, 1  ;;  %v1684_v0 = vshll.u32 %v10294_v61, 16  ;;  %v6546_v16 = vld [vmem:[%s10014_s2 + $0x118] sm:$0xff]  }
 0x154   : > { %v3197_v29 = vsel %vm1127_vm2, %v3056_v63, %v10352_v3  ;;  %v1571_v27 = vsel %vm603_vm1, %v1567_v60, %v1570_v5  ;;  %v1642_v40 = vshrl.u32 %v7083_v20, 16  ;;  %v1646_v32 = vrot.slane %v1644_v28, 1 }
 0x155   : > { %v1648_v49 = vshll.u32 %v7072_v2, 16  ;;  %v1611_v9 = vsel %vm603_vm1, %v1607_v25, %v1610_v36  ;;  %v1686_v33 = vrot.slane %v1684_v0, 1  ;;  %v6545_v2 = vld [vmem:[%s10014_s2 + $0x110] sm:$0xff]   ;;  %v3163_v23 = vsel %vm1127_vm2, %v6606_v44, %v3049_v54  ;;  %v10354_v54 = vld [vmem:[#allocation21_spill] sm:$0xff] }
 0x156   : > { %v1724_v18 = vshll.u32 %v10305_v22, 16  ;;  %v1764_v44 = vshll.u32 %v10312_v15, 16  ;;  %v1722_v60 = vshrl.u32 %v10305_v22, 16 }
 0x157   : > { %6332 = vmatmul.mubr.msk.bf16.vlgmr.msra.gmra.mrb[64].mxu0 %vm1127_vm2, %v1491_v26  ;;  %v1682_v26 = vshrl.u32 %v10294_v61, 16 }
 0x158   : > { %6184 = vmatpush3.bf16.msra.mxu0 %v6527_v4  ;;  %6335 = vmatprep.mubr.msk.bf16.mxu0 %vm1127_vm2, %v1531_v13  ;;  %v1688_v4 = vshll.u32 %v10301_v59, 16  ;;  %v1647_v13 = vor.u32 %v1646_v32, %v1642_v40  ;;  %v6533_v59 = vld [vmem:[%s10014_s2 + $0x98] sm:$0xff]   ;;  %v1726_v5 = vrot.slane %v1724_v18, 1  ;;  %v1766_v36 = vrot.slane %v1764_v44, 1 }
 0x159   : > { %6185 = vmatprep.subr.bf16.mxu0 %v6528_v11  ;;  %v1650_v11 = vrot.slane %v1648_v49, 1  ;;  %v1687_v53 = vor.u32 %v1686_v33, %v1682_v26 }
 0x15a   : > { %3657 = vmatmul.mubr.bf16.vlgmr.msra.gmra.mrb[64].mxu1 %v3160_v39  ;;  %v1690_v38 = vrot.slane %v1688_v4, 1  ;;  %v10353_v39 = vld [vmem:[#allocation28_spill] sm:$0xff]  ;;  %v1727_v0 = vor.u32 %v1726_v5, %v1722_v60  ;;  %v1802_v4 = vshrl.u32 %v10319_v51, 16  ;;  %v6611_v5 = vld [vmem:[%s6734_s18 + $0x24] sm:$0xff]  }
 0x15b   : > { %6364 = vmatpush3.bf16.msra.mxu1 %v6609_v58  ;;  %3664 = vmatprep.mubr.bf16.mxu1 %v3197_v29  ;;  %v3200_v63 = vsel %vm1127_vm2, %v7714_v47, %v10353_v39  ;;  %v1651_v28 = vsel %vm603_vm1, %v1647_v13, %v1650_v11  ;;  %v1762_v47 = vshrl.u32 %v10312_v15, 16  ;;  %v1804_v29 = vshll.u32 %v10319_v51, 16  ;;  %v6540_v11 = vld [vmem:[%s10014_s2 + $0xb0] sm:$0xff]   ;;  %v6542_v39 = vld [vmem:[%s10014_s2 + $0xb8] sm:$0xff]  }
 0x15c   : > { %6186 = vmatpush3.bf16.msra.mxu0 %v6529_v8  ;;  %6365 = vmatprep.subr.bf16.mxu1 %v6535_v37  ;;  %v1728_v8 = vshll.u32 %v10308_v19, 16  ;;  %v1691_v25 = vsel %vm603_vm1, %v1687_v53, %v1690_v38  ;;  %v6537_v19 = vld [vmem:[%s10014_s2 + $0xe8] sm:$0xff]   ;;  %v1844_v58 = vshll.u32 %v7315_v10, 16  ;;  %v1848_v13 = vshll.u32 %v7281_v31, 16 }
 0x15d   : > { %6187 = vmatprep.subr.bf16.mxu0 %v6530_v34  ;;  %v1768_v34 = vshll.u32 %v10315_v52, 16  ;;  %v6538_v52 = vld [vmem:[%s10014_s2 + $0xa8] sm:$0xff]   ;;  %v1767_v32 = vor.u32 %v1766_v36, %v1762_v47  ;;  %v10357_v47 = vld [vmem:[#allocation37_spill] sm:$0xff] }
 0x15e   : > { %v1730_v3 = vrot.slane %v1728_v8, 1  ;;  %v1846_v18 = vrot.slane %v1844_v58, 1  ;;  %v1850_v44 = vrot.slane %v1848_v13, 1  ;;  %v10356_v8 = vld [vmem:[#allocation26_spill] sm:$0xff]  ;;  %v3206_v36 = vsel %vm1127_vm2, %v7733_v62, %v10357_v47  ;;  %v10359_v13 = vld [vmem:[#allocation31_spill] sm:$0xff] }
 0x15f   : > { %6336 = vmatmul.mubr.msk.bf16.gmra.mrb[68].mxu0 %vm1127_vm2, %v1571_v27  ;;  %6366 = vmatpush3.bf16.msra.mxu1 %v6535_v37  ;;  %v6536_v37 = vld [vmem:[%s10014_s2 + $0xa0] sm:$0xff]   ;;  %v6610_v27 = vld [vmem:[%s6734_s18 + $0x18] sm:$0xff]   ;;  %v1770_v49 = vrot.slane %v1768_v34, 1 }
 0x160   : > { %6339 = vmatprep.mubr.msk.bf16.mxu0 %vm1127_vm2, %v1611_v9  ;;  %6188 = vmatpush3.bf16.msra.mxu0 %v6531_v14  ;;  %v3165_v40 = vsel %vm1127_vm2, %v6610_v27, %v10354_v54  ;;  %v6539_v14 = vld [vmem:[%s10014_s2 + $0xf0] sm:$0xff]   ;;  %v10355_v9 = vld [vmem:[#allocation33_spill] sm:$0xff]  ;;  %v1731_v33 = vsel %vm603_vm1, %v1727_v0, %v1730_v3  ;;  %v1882_v0 = vshrl.u32 %v10331_v50, 16  ;;  %v1888_v27 = vshll.u32 %v10334_v12, 16 }
 0x161   : > { %6189 = vmatprep.subr.bf16.mxu0 %v6532_v21  ;;  %6367 = vmatprep.subr.bf16.mxu1 %v6545_v2  ;;  %v3203_v26 = vsel %vm1127_vm2, %v7727_v30, %v10355_v9  ;;  %v1808_v21 = vshll.u32 %v10323_v35, 16  ;;  %v1771_v30 = vsel %vm603_vm1, %v1767_v32, %v1770_v49  ;;  %v1922_v32 = vshrl.u32 %v7504_v46, 16 }
 0x162   : > { %3665 = vmatmul.mubr.bf16.gmra.mrb[68].mxu1 %v3163_v23  ;;  %v1842_v23 = vshrl.u32 %v7315_v10, 16 }
 0x163   : > { %3672 = vmatprep.mubr.bf16.mxu1 %v3200_v63  ;;  %6368 = vmatpush3.bf16.msra.mxu1 %v6545_v2  ;;  %v1806_v2 = vrot.slane %v1804_v29, 1 }
 0x164   : > { %6190 = vmatpush3.bf16.msra.mxu0 %v6533_v59  ;;  %6369 = vmatprep.subr.bf16.mxu1 %v6546_v16  ;;  %v6541_v59 = vld [vmem:[%s10014_s2 + $0xf8] sm:$0xff]   ;;  %v1847_v38 = vor.u32 %v1846_v18, %v1842_v23  ;;  %v1964_v23 = vshll.u32 %v7579_v48, 16  ;;  %v6612_v18 = vld [vmem:[%s6734_s18 + $0x30] sm:$0xff]  }
 0x165   : > { %6191 = vmatprep.subr.bf16.mxu0 %v6534_v7  ;;  %v1807_v31 = vor.u32 %v1806_v2, %v1802_v4  ;;  %v1884_v7 = vshll.u32 %v10331_v50, 16  ;;  %v1890_v2 = vrot.slane %v1888_v27, 1 }
 0x166   : > { %v1851_v58 = vsel %vm603_vm1, %v1847_v38, %v1850_v44  ;;  %v1962_v44 = vshrl.u32 %v7579_v48, 16 }
 0x167   : > { %6340 = vmatmul.mubr.msk.bf16.gmra.mrb[72].mxu0 %vm1127_vm2, %v1651_v28  ;;  %6370 = vmatpush3.bf16.msra.mxu1 %v6546_v16  ;;  %v1810_v16 = vrot.slane %v1808_v21, 1  ;;  %v3167_v28 = vsel %vm1127_vm2, %v6611_v5, %v10356_v8  ;;  %v10361_v8 = vld [vmem:[#allocation41_spill] sm:$0xff] }
 0x168   : > { %6343 = vmatprep.mubr.msk.bf16.mxu0 %vm1127_vm2, %v1691_v25  ;;  %6192 = vmatpush3.bf16.msra.mxu0 %v6536_v37  ;;  %v1924_v37 = vshll.u32 %v7504_v46, 16 }
 0x169   : > { %6193 = vmatprep.subr.bf16.mxu0 %v6537_v19  ;;  %v1811_v29 = vsel %vm603_vm1, %v1807_v31, %v1810_v16 }
 0x16a   : > { %3673 = vmatmul.mubr.bf16.gmra.mrb[72].mxu1 %v3165_v40  ;;  %v1926_v49 = vrot.slane %v1924_v37, 1 }
 0x16b   : > { %3680 = vmatprep.mubr.bf16.mxu1 %v3203_v26  ;;  %v10358_v26 = vld [vmem:[#allocation43_spill] sm:$0xff] }
 0x16c   : > { %6194 = vmatpush3.bf16.msra.mxu0 %v6538_v52  ;;  %v1886_v52 = vrot.slane %v1884_v7, 1  ;;  %v1966_v7 = vrot.slane %v1964_v23, 1 }
 0x16d   : > { %6195 = vmatprep.subr.bf16.mxu0 %v6539_v14  ;;  %v1928_v14 = vshll.u32 %v10339_v45, 16  ;;  %v1927_v45 = vor.u32 %v1926_v49, %v1922_v32 }
 0x16e   : > { %v1887_v12 = vor.u32 %v1886_v52, %v1882_v0  ;;  %v1967_v52 = vor.u32 %v1966_v7, %v1962_v44 }
 0x16f   : > { %6344 = vmatmul.mubr.msk.bf16.gmra.mrb[76].mxu0 %vm1127_vm2, %v1731_v33  ;;  %v5955_v35 = vpop.f32.mrb[0].mxu1  ;;  %v2005_v33 = vshll.u32 %v10358_v26, 16 }
 0x170   : > { %v5956_v53 = vpop.f32.mrb[1].mxu1  ;;  %6347 = vmatprep.mubr.msk.bf16.mxu0 %vm1127_vm2, %v1771_v30  ;;  %6196 = vmatpush3.bf16.msra.mxu0 %v6540_v11  ;;  %v8252_v11 = vsel %vm1127_vm2, %v6612_v18, %v10359_v13  ;;  %v1930_v30 = vrot.slane %v1928_v14, 1  ;;  %v1891_v38 = vsel %vm603_vm1, %v1887_v12, %v1890_v2  ;;  %v6614_v18 = vld [vmem:[%s6734_s18 + $0x48] sm:$0xff]   ;;  %v10364_v13 = vld [vmem:[#allocation38_spill] sm:$0xff] }
 0x171   : > { %v5957_v63 = vadd.f32 %v5956_v53, %v5955_v35  ;;  %v5958_v60 = vpop.f32.mrb[2].mxu1  ;;  %6197 = vmatprep.subr.bf16.mxu0 %v6541_v59  ;;  %v10360_v35 = vld [vmem:[#allocation40_spill] sm:$0xff]  ;;  %v2003_v53 = vshrl.u32 %v10358_v26, 16  ;;  %v2007_v31 = vrot.slane %v2005_v33, 1 }
 0x172   : > { %v5959_v25 = vpop.f32.mrb[3].mxu1  ;;  %3681 = vmatmul.mubr.bf16.gmra.mrb[76].mxu1 %v3167_v28  ;;  %v5843_v34 = vpop.f32.mrb[0].mxu0  ;;  %v3209_v16 = vsel %vm1127_vm2, %v7736_v56, %v10360_v35  ;;  %v1931_v5 = vsel %vm603_vm1, %v1927_v45, %v1930_v30  ;;  %v2010_v28 = vshll.u32 %v10361_v8, 16  ;;  %v3173_v45 = vsel %vm1127_vm2, %v6614_v18, %v10364_v13 }
 0x173   : > { %v5960_v19 = vadd.f32 %v5959_v25, %v5958_v60  ;;  %3688 = vmatprep.mubr.bf16.mxu1 %v3206_v36  ;;  %v5844_v3 = vpop.f32.mrb[1].mxu0  ;;  %v3108_v18 = vpop.permute.xlu1 %3107 }
 0x174   : > { %6198 = vmatpush3.bf16.msra.mxu0 %v6542_v39  ;;  %v5845_v54 = vadd.f32 %v5844_v3, %v5843_v34  ;;  %v5846_v40 = vpop.f32.mrb[2].mxu0  ;;  %v1968_v39 = vshll.u32 %v7553_v1, 16  ;;  %v2012_v49 = vrot.slane %v2010_v28, 1 }
 0x175   : > { %v5847_v9 = vpop.f32.mrb[3].mxu0 }
 0x176   : > { %v5848_v4 = vadd.f32 %v5847_v9, %v5846_v40  ;;  %v8245_v21 = vadd.f32 %v5957_v63, %v5845_v54  ;;  %v1970_v27 = vrot.slane %v1968_v39, 1  ;;  %v2008_v54 = vor.u32 %v2007_v31, %v2003_v53  ;;  %v10363_v9 = vld [vmem:[#allocation44_spill] sm:$0xff] }
 0x177   : > { %6348 = vmatmul.mubr.msk.bf16.gmra.mrb[80].mxu0 %vm1127_vm2, %v1811_v29  ;;  %v6613_v29 = vld [vmem:[%s6734_s18 + $0x3c] sm:$0xff]   ;;  %v3212_v33 = vsel %vm1127_vm2, %v7774_v57, %v10363_v9 }
 0x178   : > { %6351 = vmatprep.mubr.msk.bf16.mxu0 %vm1127_vm2, %v1851_v58  ;;  %v8254_v59 = vadd.f32 %v5960_v19, %v5848_v4  ;;  %v10362_v58 = vld [vmem:[#allocation36_spill] sm:$0xff]  ;;  %v1971_v12 = vsel %vm603_vm1, %v1967_v52, %v1970_v27  ;;  %v2013_v2 = vsel %vm603_vm1, %v2008_v54, %v2012_v49 }
 0x179   : > { %v3171_v1 = vsel %vm1127_vm2, %v6613_v29, %v10362_v58 }
 0x17a   : > { %3689 = vmatmul.mubr.bf16.gmra.mrb[80].mxu1 %v8252_v11 }
 0x17b   : > { %3696 = vmatprep.mubr.bf16.mxu1 %v3209_v16  ;;  %v10365_v16 = vld [vmem:[#allocation47_spill] sm:$0xff] }
 0x17c   : > { %v5849_v63 = vpop.f32.mrb[4].mxu0  ;;  %v3215_v53 = vsel %vm1127_vm2, %v10365_v16, %v7739_v43  ;;  %v6615_v43 = vld [vmem:[%s6734_s18 + $0x54] sm:$0xff]  }
 0x17d   : > { %v5961_v60 = vpop.f32.mrb[4].mxu1  ;;  %v5850_v37 = vpop.f32.mrb[5].mxu0 }
 0x17e   : > { %v5962_v25 = vpop.f32.mrb[5].mxu1  ;;  %v5851_v47 = vadd.f32 %v5850_v37, %v5849_v63  ;;  %v5852_v34 = vpop.f32.mrb[6].mxu0 }
 0x17f   : > { %v5963_v36 = vadd.f32 %v5962_v25, %v5961_v60  ;;  %v5964_v19 = vpop.f32.mrb[6].mxu1  ;;  %6352 = vmatmul.mubr.msk.bf16.gmra.mrb[84].mxu0 %vm1127_vm2, %v1891_v38  ;;  %v5853_v0 = vpop.f32.mrb[7].mxu0  ;;  %v10366_v25 = vld [vmem:[#allocation42_spill] sm:$0xff] }
 0x180   : > { %v5965_v3 = vpop.f32.mrb[7].mxu1  ;;  %6355 = vmatprep.mubr.msk.bf16.mxu0 %vm1127_vm2, %v1931_v5  ;;  %v5854_v40 = vadd.f32 %v5853_v0, %v5852_v34  ;;  %v10367_v34 = vld [vmem:[#allocation50_spill] sm:$0xff] }
 0x181   : > { %v5966_v32 = vadd.f32 %v5965_v3, %v5964_v19  ;;  %v8271_v14 = vadd.f32 %v5963_v36, %v5851_v47  ;;  %v3175_v47 = vsel %vm1127_vm2, %v6615_v43, %v10366_v25  ;;  %v3106_v36 = vpop.permute.xlu0 %3105  ;;  %v10368_v19 = vld [vmem:[#allocation48_spill] sm:$0xff]  ;;  %v10369_v3 = vld [vmem:[#allocation2_spill] sm:$0xff]  ;;  %v10375_v43 = vld [vmem:[#allocation51_spill] sm:$0xff] }
 0x182   : > { %3697 = vmatmul.mubr.bf16.gmra.mrb[84].mxu1 %v3171_v1  ;;  %v3218_v0 = vsel %vm1127_vm2, %v10368_v19, %v10367_v34  ;;  %v3242_v29 = vsel %vm1127_vm2, %v10369_v3, %v3106_v36 }
 0x183   : > { %3704 = vmatprep.mubr.bf16.mxu1 %v3212_v33  ;;  %v8276_v4 = vadd.f32 %v5966_v32, %v5854_v40 }
 0x187   : > { %6356 = vmatmul.mubr.msk.bf16.gmra.mrb[88].mxu0 %vm1127_vm2, %v1971_v12  ;;  %v6616_v12 = vld [vmem:[%s6734_s18 + $0x60] sm:$0xff]  }
 0x188   : > { %6359 = vmatprep.mubr.msk.bf16.mxu0 %vm1127_vm2, %v2013_v2  ;;  %v10370_v2 = vld [vmem:[#allocation45_spill] sm:$0xff] }
 0x189   : > { %v5967_v23 = vpop.f32.mrb[8].mxu1  ;;  %v5855_v30 = vpop.f32.mrb[8].mxu0 }
 0x18a   : > { %v5968_v35 = vpop.f32.mrb[9].mxu1  ;;  %3705 = vmatmul.mubr.bf16.gmra.mrb[88].mxu1 %v3173_v45  ;;  %v5856_v38 = vpop.f32.mrb[9].mxu0 }
 0x18b   : > { %v5969_v31 = vadd.f32 %v5968_v35, %v5967_v23  ;;  %v5970_v44 = vpop.f32.mrb[10].mxu1  ;;  %3712 = vmatprep.mubr.bf16.mxu1 %v3215_v53  ;;  %v5857_v7 = vadd.f32 %v5856_v38, %v5855_v30  ;;  %v5858_v39 = vpop.f32.mrb[10].mxu0  ;;  %v3177_v23 = vsel %vm1127_vm2, %v6616_v12, %v10370_v2  ;;  %v10371_v30 = vld [vmem:[#allocation49_spill] sm:$0xff]  ;;  %v10378_v12 = vld [vmem:[#allocation14_spill] sm:$0xff]  ;;  %v10379_v2 = vld [vmem:[#allocation12_spill] sm:$0xff] }
 0x18c   : > { %v5971_v63 = vpop.f32.mrb[11].mxu1  ;;  %v5859_v5 = vpop.f32.mrb[11].mxu0  ;;  %v3221_v35 = vsel %vm1127_vm2, %v10371_v30, %v7886_v24  ;;  %v10374_v24 = vld [vmem:[#allocation16_spill] sm:$0xff] }
 0x18d   : > { %v5972_v60 = vadd.f32 %v5971_v63, %v5970_v44  ;;  %v5860_v8 = vadd.f32 %v5859_v5, %v5858_v39  ;;  %v8288_v28 = vadd.f32 %v5969_v31, %v5857_v7  ;;  %v10372_v31 = vld [vmem:[#allocation4_spill] sm:$0xff]  ;;  %v10373_v39 = vld [vmem:[#allocation46_spill] sm:$0xff]  ;;  %v3224_v25 = vsel %vm1127_vm2, %v10375_v43, %v10374_v24 }
 0x18e   : > { %v6617_v7 = vld [vmem:[%s6734_s18 + $0x6c] sm:$0xff]  }
 0x18f   : > { %6360 = vmatmul.mubr.msk.bf16.gmra.mrb[92].mxu0 %vm1127_vm2, %v7965_v6  ;;  %v8293_v37 = vadd.f32 %v5972_v60, %v5860_v8  ;;  %v3179_v63 = vsel %vm1127_vm2, %v6617_v7, %v10373_v39  ;;  %v3110_v60 = vpop.permute.xlu0 %3109 }
 0x190   : > { %3817 = vmatprep.mubr.bf16.mxu0 %v8252_v11 }
 0x192   : > { %3713 = vmatmul.mubr.bf16.gmra.mrb[92].mxu1 %v3175_v47 }
 0x193   : > { %3720 = vmatprep.mubr.bf16.mxu1 %v3218_v0 }
 0x195   : > { %v5973_v6 = vpop.f32.mrb[12].mxu1  ;;  %v5861_v58 = vpop.f32.mrb[12].mxu0 }
 0x196   : > { %v5974_v11 = vpop.f32.mrb[13].mxu1  ;;  %v5862_v27 = vpop.f32.mrb[13].mxu0 }
 0x197   : > { %v5975_v52 = vadd.f32 %v5974_v11, %v5973_v6  ;;  %v5976_v54 = vpop.f32.mrb[14].mxu1  ;;  %3818 = vmatmul.mubr.bf16.vlgmr.msra.gmra.mrb[96].mxu0 %v3242_v29  ;;  %v5863_v40 = vadd.f32 %v5862_v27, %v5861_v58  ;;  %v5864_v32 = vpop.f32.mrb[14].mxu0  ;;  %v10376_v6 = vld [vmem:[#allocation6_spill] sm:$0xff] }
 0x198   : > { %v5977_v49 = vpop.f32.mrb[15].mxu1  ;;  %3825 = vmatprep.mubr.bf16.mxu0 %v3171_v1  ;;  %v5865_v33 = vpop.f32.mrb[15].mxu0  ;;  %v3245_v1 = vsel %vm1127_vm2, %v10372_v31, %v3108_v18  ;;  %v3248_v58 = vsel %vm1127_vm2, %v10376_v6, %v3110_v60  ;;  %v3227_v18 = vsel %vm1127_vm2, %v10379_v2, %v10378_v12 }
 0x199   : > { %v5978_v9 = vadd.f32 %v5977_v49, %v5976_v54  ;;  %v5866_v13 = vadd.f32 %v5865_v33, %v5864_v32  ;;  %v8309_v53 = vadd.f32 %v5975_v52, %v5863_v40  ;;  %v6618_v32 = vld [vmem:[%s6734_s18 + $0x78] sm:$0xff]   ;;  %v3112_v33 = vpop.permute.xlu1 %3111 }
 0x19a   : > { %3721 = vmatmul.mubr.bf16.gmra.mrb[96].mxu1 %v3177_v23  ;;  %v10377_v49 = vld [vmem:[#allocation53_spill] sm:$0xff] }
 0x19b   : > { %3728 = vmatprep.mubr.bf16.mxu1 %v3221_v35  ;;  %v8313_v38 = vadd.f32 %v5978_v9, %v5866_v13  ;;  %v3181_v9 = vsel %vm1127_vm2, %v6618_v32, %v10377_v49  ;;  %v3251_v13 = vsel %vm1127_vm2, %v10348_v41, %v3112_v33 }
 0x19d   : > { %v3116_v49 = vpop.permute.xlu1 %3115 }
 0x19f   : > { %3826 = vmatmul.mubr.bf16.gmra.mrb[100].mxu0 %v3245_v1 }
 0x1a0   : > { %3833 = vmatprep.mubr.bf16.mxu0 %v3173_v45 }
 0x1a1   : > { %v5979_v44 = vpop.f32.mrb[16].mxu1  ;;  %v5867_v5 = vpop.f32.mrb[16].mxu0 }
 0x1a2   : > { %v5980_v8 = vpop.f32.mrb[17].mxu1  ;;  %3729 = vmatmul.mubr.bf16.gmra.mrb[100].mxu1 %v3179_v63  ;;  %v5868_v34 = vpop.f32.mrb[17].mxu0 }
 0x1a3   : > { %v5981_v36 = vadd.f32 %v5980_v8, %v5979_v44  ;;  %v5982_v0 = vpop.f32.mrb[18].mxu1  ;;  %3736 = vmatprep.mubr.bf16.mxu1 %v3224_v25  ;;  %v5869_v3 = vadd.f32 %v5868_v34, %v5867_v5  ;;  %v5870_v45 = vpop.f32.mrb[18].mxu0  ;;  %v6619_v25 = vld [vmem:[%s6734_s18 + $0x84] sm:$0xff]  }
 0x1a4   : > { %v5983_v29 = vpop.f32.mrb[19].mxu1  ;;  %v5871_v52 = vpop.f32.mrb[19].mxu0 }
 0x1a5   : > { %v5984_v11 = vadd.f32 %v5983_v29, %v5982_v0  ;;  %v5872_v27 = vadd.f32 %v5871_v52, %v5870_v45  ;;  %v8323_v54 = vadd.f32 %v5981_v36, %v5869_v3  ;;  %v10380_v36 = vld [vmem:[#allocation8_spill] sm:$0xff]  ;;  %v3114_v0 = vpop.permute.xlu0 %3113  ;;  %v10381_v3 = vld [vmem:[#allocation17_spill] sm:$0xff] }
 0x1a6   : > { %v3183_v34 = vsel %vm1127_vm2, %v6619_v25, %v10380_v36  ;;  %v10382_v45 = vld [vmem:[#allocation52_spill] sm:$0xff]  ;;  %v6621_v25 = vld [vmem:[%s6734_s18 + $0x9c] sm:$0xff]  }
 0x1a7   : > { %3834 = vmatmul.mubr.bf16.gmra.mrb[104].mxu0 %v3248_v58  ;;  %v8325_v40 = vadd.f32 %v5984_v11, %v5872_v27  ;;  %v3230_v29 = vsel %vm1127_vm2, %v10382_v45, %v10381_v3  ;;  %v6620_v52 = vld [vmem:[%s6734_s18 + $0x90] sm:$0xff]   ;;  %v10383_v27 = vld [vmem:[#allocation15_spill] sm:$0xff]  ;;  %v10386_v36 = vld [vmem:[#allocation10_spill] sm:$0xff] }
 0x1a8   : > { %3841 = vmatprep.mubr.bf16.mxu0 %v3175_v47  ;;  %v3185_v32 = vsel %vm1127_vm2, %v6620_v52, %v10383_v27  ;;  %v10387_v3 = vld [vmem:[#allocation23_spill] sm:$0xff] }
 0x1aa   : > { %3737 = vmatmul.mubr.bf16.gmra.mrb[104].mxu1 %v3181_v9 }
 0x1ab   : > { %3744 = vmatprep.mubr.bf16.mxu1 %v3227_v18  ;;  %v10384_v18 = vld [vmem:[#allocation25_spill] sm:$0xff] }
 0x1ad   : > { %v5985_v35 = vpop.f32.mrb[20].mxu1  ;;  %v5873_v31 = vpop.f32.mrb[20].mxu0 }
 0x1ae   : > { %v5986_v47 = vpop.f32.mrb[21].mxu1  ;;  %v5874_v44 = vpop.f32.mrb[21].mxu0 }
 0x1af   : > { %v5987_v1 = vadd.f32 %v5986_v47, %v5985_v35  ;;  %v5988_v7 = vpop.f32.mrb[22].mxu1  ;;  %3842 = vmatmul.mubr.bf16.gmra.mrb[108].mxu0 %v3251_v13  ;;  %v5875_v39 = vadd.f32 %v5874_v44, %v5873_v31  ;;  %v5876_v60 = vpop.f32.mrb[22].mxu0  ;;  %v10385_v13 = vld [vmem:[#allocation54_spill] sm:$0xff] }
 0x1b0   : > { %v5989_v5 = vpop.f32.mrb[23].mxu1  ;;  %3849 = vmatprep.mubr.bf16.mxu0 %v3177_v23  ;;  %v5877_v24 = vpop.f32.mrb[23].mxu0  ;;  %v3254_v23 = vsel %vm1127_vm2, %v6994_v17, %v3114_v0  ;;  %v3233_v35 = vsel %vm1127_vm2, %v10385_v13, %v10384_v18  ;;  %v3187_v0 = vsel %vm1127_vm2, %v6621_v25, %v10386_v36 }
 0x1b1   : > { %v5990_v8 = vadd.f32 %v5989_v5, %v5988_v7  ;;  %v5878_v41 = vadd.f32 %v5877_v24, %v5876_v60  ;;  %v8341_v6 = vadd.f32 %v5987_v1, %v5875_v39  ;;  %v3257_v7 = vsel %vm1127_vm2, %v7042_v42, %v3116_v49 }
 0x1b2   : > { %3745 = vmatmul.mubr.bf16.gmra.mrb[108].mxu1 %v3183_v34 }
 0x1b3   : > { %3752 = vmatprep.mubr.bf16.mxu1 %v3230_v29  ;;  %v8345_v58 = vadd.f32 %v5990_v8, %v5878_v41  ;;  %v3118_v41 = vpop.permute.xlu0 %3117  ;;  %v10388_v29 = vld [vmem:[#allocation11_spill] sm:$0xff] }
 0x1b4   : > { %v3260_v42 = vsel %vm1127_vm2, %v7083_v20, %v3118_v41  ;;  %v6623_v41 = vld [vmem:[%s6734_s18 + $0xb4] sm:$0xff]  }
 0x1b7   : > { %3850 = vmatmul.mubr.bf16.gmra.mrb[112].mxu0 %v3254_v23  ;;  %v3236_v23 = vsel %vm1127_vm2, %v10388_v29, %v10387_v3  ;;  %v10392_v3 = vld [vmem:[#allocation22_spill] sm:$0xff] }
 0x1b8   : > { %3857 = vmatprep.mubr.bf16.mxu0 %v3179_v63 }
 0x1b9   : > { %v5991_v11 = vpop.f32.mrb[24].mxu1  ;;  %v5879_v33 = vpop.f32.mrb[24].mxu0 }
 0x1ba   : > { %v5992_v12 = vpop.f32.mrb[25].mxu1  ;;  %3753 = vmatmul.mubr.bf16.gmra.mrb[112].mxu1 %v3185_v32  ;;  %v5880_v17 = vpop.f32.mrb[25].mxu0 }
 0x1bb   : > { %v5993_v31 = vadd.f32 %v5992_v12, %v5991_v11  ;;  %v5994_v47 = vpop.f32.mrb[26].mxu1  ;;  %3760 = vmatprep.mubr.bf16.mxu1 %v3233_v35  ;;  %v5881_v1 = vadd.f32 %v5880_v17, %v5879_v33  ;;  %v5882_v63 = vpop.f32.mrb[26].mxu0 }
 0x1bc   : > { %v5995_v44 = vpop.f32.mrb[27].mxu1  ;;  %v5883_v60 = vpop.f32.mrb[27].mxu0 }
 0x1bd   : > { %v5996_v39 = vadd.f32 %v5995_v44, %v5994_v47  ;;  %v5884_v5 = vadd.f32 %v5883_v60, %v5882_v63  ;;  %v8355_v8 = vadd.f32 %v5993_v31, %v5881_v1  ;;  %v6622_v47 = vld [vmem:[%s6734_s18 + $0xa8] sm:$0xff]   ;;  %v10389_v1 = vld [vmem:[#allocation13_spill] sm:$0xff]  ;;  %v3120_v44 = vpop.permute.xlu1 %3119 }
 0x1be   : > { %v3189_v63 = vsel %vm1127_vm2, %v6622_v47, %v10389_v1 }
 0x1bf   : > { %3858 = vmatmul.mubr.bf16.gmra.mrb[116].mxu0 %v3257_v7  ;;  %v8357_v24 = vadd.f32 %v5996_v39, %v5884_v5  ;;  %v10390_v7 = vld [vmem:[#allocation32_spill] sm:$0xff]  ;;  %v10391_v39 = vld [vmem:[#allocation9_spill] sm:$0xff] }
 0x1c0   : > { %3865 = vmatprep.mubr.bf16.mxu0 %v3181_v9  ;;  %v3239_v60 = vsel %vm1127_vm2, %v10391_v39, %v10390_v7 }
 0x1c1   : > { %v3124_v1 = vpop.permute.xlu1 %3123 }
 0x1c2   : > { %3761 = vmatmul.mubr.bf16.gmra.mrb[116].mxu1 %v3187_v0 }
 0x1c3   : > { %3768 = vmatprep.mubr.bf16.mxu1 %v3236_v23  ;;  %v3191_v23 = vsel %vm1127_vm2, %v6623_v41, %v10392_v3 }
 0x1c5   : > { %v5997_v11 = vpop.f32.mrb[28].mxu1  ;;  %v5885_v52 = vpop.f32.mrb[28].mxu0 }
 0x1c6   : > { %v5998_v9 = vpop.f32.mrb[29].mxu1  ;;  %v5886_v49 = vpop.f32.mrb[29].mxu0 }
 0x1c7   : > { %v5999_v27 = vadd.f32 %v5998_v9, %v5997_v11  ;;  %v6000_v33 = vpop.f32.mrb[30].mxu1  ;;  %3866 = vmatmul.mubr.bf16.gmra.mrb[120].mxu0 %v3260_v42  ;;  %v5887_v12 = vadd.f32 %v5886_v49, %v5885_v52  ;;  %v5888_v18 = vpop.f32.mrb[30].mxu0 }
 0x1c8   : > { %v6001_v35 = vpop.f32.mrb[31].mxu1  ;;  %3873 = vmatprep.mubr.bf16.mxu0 %v3183_v34  ;;  %v5889_v17 = vpop.f32.mrb[31].mxu0  ;;  %v3263_v34 = vsel %vm1127_vm2, %v10294_v61, %v3120_v44 }
 0x1c9   : > { %v6002_v31 = vadd.f32 %v6001_v35, %v6000_v33  ;;  %v5890_v20 = vadd.f32 %v5889_v17, %v5888_v18  ;;  %v8373_v5 = vadd.f32 %v5999_v27, %v5887_v12  ;;  %v3122_v42 = vpop.permute.xlu0 %3121 }
 0x1ca   : > { %3769 = vmatmul.mubr.bf16.gmra.mrb[120].mxu1 %v3189_v63 }
 0x1cb   : > { %3776 = vmatprep.mubr.bf16.mxu1 %v3239_v60  ;;  %v8377_v25 = vadd.f32 %v6002_v31, %v5890_v20 }
 0x1cf   : > { %3874 = vmatmul.mubr.bf16.gmra.mrb[124].mxu0 %v3263_v34 }
 0x1d0   : > { %3881 = vmatprep.mubr.bf16.mxu0 %v3185_v32  ;;  %v6003_v36 = vpop.f32.mrb[32].mxu1  ;;  %v3266_v32 = vsel %vm1127_vm2, %v10305_v22, %v3122_v42 }
 0x1d1   : > { %v5891_v11 = vpop.f32.mrb[32].mxu0  ;;  %v6004_v52 = vpop.f32.mrb[33].mxu1 }
 0x1d2   : > { %3777 = vmatmul.mubr.bf16.gmra.mrb[124].mxu1 %v3191_v23  ;;  %v6005_v9 = vadd.f32 %v6004_v52, %v6003_v36  ;;  %v5892_v27 = vpop.f32.mrb[33].mxu0  ;;  %v6006_v49 = vpop.f32.mrb[34].mxu1 }
 0x1d3   : > { %6371 = vmatprep.mubr.msk.bf16.mxu1 %vm1127_vm2, %v7733_v62  ;;  %v5893_v61 = vadd.f32 %v5892_v27, %v5891_v11  ;;  %v5894_v33 = vpop.f32.mrb[34].mxu0  ;;  %v6007_v12 = vpop.f32.mrb[35].mxu1  ;;  %v3269_v62 = vsel %vm1127_vm2, %v10312_v15, %v3124_v1  ;;  %v6624_v1 = vld [vmem:[%s6734_s18 + $0xc0] sm:$0xff]  }
 0x1d4   : > { %v6008_v18 = vadd.f32 %v6007_v12, %v6006_v49  ;;  %v5895_v35 = vpop.f32.mrb[35].mxu0 }
 0x1d5   : > { %v5896_v31 = vadd.f32 %v5895_v35, %v5894_v33  ;;  %v8386_v17 = vadd.f32 %v6005_v9, %v5893_v61 }
 0x1d7   : > { %3882 = vmatmul.mubr.bf16.gmra.mrb[128].mxu0 %v3266_v32  ;;  %v8388_v47 = vadd.f32 %v6008_v18, %v5896_v31 }
 0x1d8   : > { %3889 = vmatprep.mubr.bf16.mxu0 %v3187_v0 }
 0x1da   : > { %6372 = vmatmul.mubr.msk.bf16.vlgmr.msra.gmra.mrb[128].mxu1 %vm1127_vm2, %v7736_v56  ;;  %v3126_v56 = vpop.permute.xlu0 %3125 }
 0x1db   : > { %6375 = vmatprep.mubr.msk.bf16.mxu1 %vm1127_vm2, %v7774_v57  ;;  %v3272_v15 = vsel %vm1127_vm2, %v10319_v51, %v3126_v56 }
 0x1dc   : > { %v6009_v22 = vpop.f32.mrb[36].mxu1 }
 0x1dd   : > { %v5897_v44 = vpop.f32.mrb[36].mxu0  ;;  %v6010_v20 = vpop.f32.mrb[37].mxu1 }
 0x1de   : > { %v6011_v7 = vadd.f32 %v6010_v20, %v6009_v22  ;;  %v5898_v60 = vpop.f32.mrb[37].mxu0  ;;  %v6012_v34 = vpop.f32.mrb[38].mxu1 }
 0x1df   : > { %3890 = vmatmul.mubr.bf16.gmra.mrb[132].mxu0 %v3269_v62  ;;  %v5899_v0 = vadd.f32 %v5898_v60, %v5897_v44  ;;  %v5900_v36 = vpop.f32.mrb[38].mxu0  ;;  %v6013_v41 = vpop.f32.mrb[39].mxu1  ;;  %v10393_v62 = vld [vmem:[#allocation27_spill] sm:$0xff] }
 0x1e0   : > { %3897 = vmatprep.mubr.bf16.mxu0 %v3189_v63  ;;  %v6014_v3 = vadd.f32 %v6013_v41, %v6012_v34  ;;  %v5901_v42 = vpop.f32.mrb[39].mxu0  ;;  %v3128_v63 = vpop.permute.xlu1 %3127 }
 0x1e1   : > { %v5902_v11 = vadd.f32 %v5901_v42, %v5900_v36  ;;  %v8398_v57 = vadd.f32 %v6011_v7, %v5899_v0  ;;  %v3130_v44 = vpop.permute.xlu0 %3129  ;;  %v10394_v42 = vld [vmem:[#allocation29_spill] sm:$0xff] }
 0x1e2   : > { %6376 = vmatmul.mubr.msk.bf16.gmra.mrb[132].mxu1 %vm1127_vm2, %v10365_v16 }
 0x1e3   : > { %6379 = vmatprep.mubr.msk.bf16.mxu1 %vm1127_vm2, %v10368_v19  ;;  %v8404_v52 = vadd.f32 %v6014_v3, %v5902_v11  ;;  %v6625_v3 = vld [vmem:[%s6734_s18 + $0xcc] sm:$0xff]  }
 0x1e4   : > { %v3291_v56 = vsel %vm1127_vm2, %v6625_v3, %v10394_v42  ;;  %v6628_v3 = vld [vmem:[%s6734_s18 + $0xec] ss:$0 sps:$4 sm:$0x33]  }
 0x1e5   : > { %v3156_v42 = vrot.slane %v6628_v3, 2 }
 0x1e7   : > { %3898 = vmatmul.mubr.bf16.gmra.mrb[136].mxu0 %v3272_v15 }
 0x1e8   : > { %3905 = vmatprep.mubr.bf16.mxu0 %v3191_v23  ;;  %v3275_v23 = vsel %vm1127_vm2, %v7315_v10, %v3128_v63  ;;  %v3278_v10 = vsel %vm1127_vm2, %v10331_v50, %v3130_v44  ;;  %v3132_v63 = vpop.permute.xlu1 %3131  ;;  %v6626_v44 = vld [vmem:[%s6734_s18 + $0xd8] sm:$0xff]  }
 0x1e9   : > { %v6015_v9 = vpop.f32.mrb[40].mxu1  ;;  %v5903_v27 = vpop.f32.mrb[40].mxu0 }
 0x1ea   : > { %v6016_v49 = vpop.f32.mrb[41].mxu1  ;;  %v5904_v61 = vpop.f32.mrb[41].mxu0  ;;  %6380 = vmatmul.mubr.msk.bf16.gmra.mrb[136].mxu1 %vm1127_vm2, %v10371_v30  ;;  %v3289_v30 = vsel %vm1127_vm2, %v6624_v1, %v10393_v62 }
 0x1eb   : > { %v6017_v16 = vadd.f32 %v6016_v49, %v6015_v9  ;;  %v5905_v33 = vadd.f32 %v5904_v61, %v5903_v27  ;;  %v6018_v12 = vpop.f32.mrb[42].mxu1  ;;  %v5906_v19 = vpop.f32.mrb[42].mxu0  ;;  %6383 = vmatprep.mubr.msk.bf16.mxu1 %vm1127_vm2, %v10375_v43  ;;  %v3281_v49 = vsel %vm1127_vm2, %v7504_v46, %v3132_v63  ;;  %v10395_v61 = vld [vmem:[#allocation30_spill] sm:$0xff] }
 0x1ec   : > { %v6019_v51 = vpop.f32.mrb[43].mxu1  ;;  %v5907_v32 = vpop.f32.mrb[43].mxu0 }
 0x1ed   : > { %v6020_v18 = vadd.f32 %v6019_v51, %v6018_v12  ;;  %v5908_v35 = vadd.f32 %v5907_v32, %v5906_v19  ;;  %v8412_v31 = vadd.f32 %v6017_v16, %v5905_v33  ;;  %v3149_v9 = vpop.permute.xlu0 %3148  ;;  %v3134_v33 = vpop.permute.xlu1 %3133 }
 0x1ee   : > { %v3294_v16 = vsel %vm1127_vm2, %v10395_v61, %v3149_v9 }
 0x1ef   : > { %3906 = vmatmul.mubr.bf16.gmra.mrb[140].mxu0 %v3275_v23  ;;  %v8417_v22 = vadd.f32 %v6020_v18, %v5908_v35  ;;  %v10396_v35 = vld [vmem:[#allocation20_spill] sm:$0xff] }
 0x1f0   : > { %3913 = vmatprep.mubr.bf16.mxu0 %v3289_v30  ;;  %v3284_v30 = vsel %vm1127_vm2, %v7579_v48, %v3134_v33  ;;  %v10397_v48 = vld [vmem:[#allocation18_spill] sm:$0xff] }
 0x1f1   : > { %v3151_v12 = vpop.permute.xlu0 %3150 }
 0x1f2   : > { %6384 = vmatmul.mubr.msk.bf16.gmra.mrb[140].mxu1 %vm1127_vm2, %v10379_v2 }
 0x1f3   : > { %6387 = vmatprep.mubr.msk.bf16.mxu1 %vm1127_vm2, %v10382_v45 }
 0x1f5   : > { %v6021_v43 = vpop.f32.mrb[44].mxu1  ;;  %v5909_v20 = vpop.f32.mrb[44].mxu0 }
 0x1f6   : > { %v6022_v7 = vpop.f32.mrb[45].mxu1  ;;  %v5910_v60 = vpop.f32.mrb[45].mxu0 }
 0x1f7   : > { %v6023_v34 = vadd.f32 %v6022_v7, %v6021_v43  ;;  %v5911_v0 = vadd.f32 %v5910_v60, %v5909_v20  ;;  %v6024_v36 = vpop.f32.mrb[46].mxu1  ;;  %3914 = vmatmul.mubr.bf16.gmra.mrb[144].mxu0 %v3278_v10  ;;  %v5912_v41 = vpop.f32.mrb[46].mxu0  ;;  %v3152_v10 = vrot.slane %v6626_v44, 2  ;;  %v3153_v43 = vrot.slane %v8098_v55, 2 }
 0x1f8   : > { %v6025_v2 = vpop.f32.mrb[47].mxu1  ;;  %3921 = vmatprep.mubr.bf16.mxu0 %v3291_v56  ;;  %v5913_v11 = vpop.f32.mrb[47].mxu0  ;;  %v10151_v56 = vmov 0.0  }
 0x1f9   : > { %v6026_v45 = vadd.f32 %v6025_v2, %v6024_v36  ;;  %v5914_v15 = vadd.f32 %v5913_v11, %v5912_v41  ;;  %v8428_v50 = vadd.f32 %v6023_v34, %v5911_v0  ;;  %v3154_v36 = vsel %vm3050_vm3, %v3152_v10, %v3153_v43  ;;  %v3136_v41 = vpop.permute.xlu1 %3135  ;;  %6403 = vmatprep.subr.bf16.mxu0 %v10151_v56  ;;  %v6547_v11 = vld [vmem:[%s10019_s7] sm:$0xff]  }
 0x1fa   : > { %6388 = vmatmul.mubr.msk.bf16.gmra.mrb[144].mxu1 %vm1127_vm2, %v10385_v13  ;;  %v3287_v2 = vsel %vm1127_vm2, %v10358_v26, %v3136_v41  ;;  %6415 = vmatprep.subr.bf16.mxu1 %v10151_v56 }
 0x1fb   : > { %6391 = vmatprep.mubr.msk.bf16.mxu1 %vm1127_vm2, %v10388_v29  ;;  %v8434_v27 = vadd.f32 %v6026_v45, %v5914_v15  ;;  %6404 = vmatpush3.bf16.msra.mxu0 %v6547_v11 }
 0x1fc   : > { %6405 = vmatprep.subr.bf16.mxu0 %v10151_v56 }
 0x1ff   : > { %3922 = vmatmul.mubr.bf16.gmra.mrb[148].mxu0 %v3281_v49 }
 0x200   : > { %3929 = vmatprep.mubr.bf16.mxu0 %v3294_v16 }
 0x201   : > { %v6027_v19 = vpop.f32.mrb[48].mxu1  ;;  %v5915_v51 = vpop.f32.mrb[48].mxu0 }
 0x202   : > { %v6028_v13 = vpop.f32.mrb[49].mxu1  ;;  %v5916_v32 = vpop.f32.mrb[49].mxu0  ;;  %6392 = vmatmul.mubr.msk.bf16.gmra.mrb[148].mxu1 %vm1127_vm2, %v10391_v39  ;;  %v6627_v39 = vld [vmem:[%s6734_s18 + $0xe4] sm:$0xff]  }
 0x203   : > { %v6029_v29 = vadd.f32 %v6028_v13, %v6027_v19  ;;  %v5917_v23 = vadd.f32 %v5916_v32, %v5915_v51  ;;  %v6030_v18 = vpop.f32.mrb[50].mxu1  ;;  %v5918_v46 = vpop.f32.mrb[50].mxu0  ;;  %6395 = vmatprep.mubr.msk.bf16.mxu1 %vm1127_vm2, %v10396_v35  ;;  %v3298_v60 = vsel %vm1127_vm2, %v6627_v39, %v3151_v12  ;;  %v3155_v55 = vrot.slane %v6627_v39, 2 }
 0x204   : > { %v6031_v1 = vpop.f32.mrb[51].mxu1  ;;  %v5919_v62 = vpop.f32.mrb[51].mxu0 }
 0x205   : > { %v6032_v20 = vadd.f32 %v6031_v1, %v6030_v18  ;;  %v5920_v7 = vadd.f32 %v5919_v62, %v5918_v46  ;;  %v8450_v34 = vadd.f32 %v6029_v29, %v5917_v23  ;;  %v3157_v12 = vsel %vm3050_vm3, %v3155_v55, %v3156_v42 }
 0x207   : > { %3930 = vmatmul.mubr.bf16.gmra.mrb[152].mxu0 %v3284_v30  ;;  %v8452_v0 = vadd.f32 %v6032_v20, %v5920_v7 }
 0x208   : > { %3937 = vmatprep.mubr.bf16.mxu0 %v3298_v60 }
 0x20a   : > { %6396 = vmatmul.mubr.msk.bf16.gmra.mrb[152].mxu1 %vm1127_vm2, %v10397_v48 }
 0x20b   : > { %6399 = vmatprep.mubr.msk.bf16.mxu1 %vm1127_vm2, %v3154_v36 }
 0x20d   : > { %v6033_v45 = vpop.f32.mrb[52].mxu1  ;;  %v5921_v15 = vpop.f32.mrb[52].mxu0 }
 0x20e   : > { %v6034_v63 = vpop.f32.mrb[53].mxu1  ;;  %v5922_v9 = vpop.f32.mrb[53].mxu0 }
 0x20f   : > { %v6035_v49 = vadd.f32 %v6034_v63, %v6033_v45  ;;  %v5923_v61 = vadd.f32 %v5922_v9, %v5921_v15  ;;  %v6036_v16 = vpop.f32.mrb[54].mxu1  ;;  %3938 = vmatmul.mubr.bf16.gmra.mrb[156].mxu0 %v3287_v2  ;;  %v5924_v33 = vpop.f32.mrb[54].mxu0 }
 0x210   : > { %v6037_v26 = vpop.f32.mrb[55].mxu1  ;;  %v5925_v19 = vpop.f32.mrb[55].mxu0 }
 0x211   : > { %v6038_v51 = vadd.f32 %v6037_v26, %v6036_v16  ;;  %v5926_v13 = vadd.f32 %v5925_v19, %v5924_v33  ;;  %v8468_v32 = vadd.f32 %v6035_v49, %v5923_v61  ;;  %v8482_v16 = vld [vmem:[%s10015_s3] ss:$0 sm:$0xff] }
 0x212   : > { %6400 = vmatmul.mubr.msk.bf16.gmra.mrb[156].mxu1 %vm1127_vm2, %v3157_v12 }
 0x213   : > { %v8471_v29 = vadd.f32 %v6038_v51, %v5926_v13  ;;  %v8491_v13 = vld [vmem:[%s10017_s5] ss:$0 sm:$0xff] }
 0x216   : > { %v5927_v23 = vpop.f32.mrb[56].mxu0 }
 0x217   : > { %v5928_v18 = vpop.f32.mrb[57].mxu0 }
 0x218   : > { %v5929_v46 = vadd.f32 %v5928_v18, %v5927_v23  ;;  %v5930_v35 = vpop.f32.mrb[58].mxu0  ;;  %v6548_v23 = vld [vmem:[%s10019_s7 + $0x8] sm:$0xff]  }
 0x219   : > { %v5931_v1 = vpop.f32.mrb[59].mxu0  ;;  %v6039_v62 = vpop.f32.mrb[56].mxu1  ;;  %6406 = vmatpush3.bf16.msra.mxu0 %v6548_v23 }
 0x21a   : > { %v5932_v30 = vadd.f32 %v5931_v1, %v5930_v35  ;;  %v6040_v44 = vpop.f32.mrb[57].mxu1  ;;  %6407 = vmatprep.subr.bf16.mxu0 %v10151_v56 }
 0x21b   : > { %v6041_v10 = vadd.f32 %v6040_v44, %v6039_v62  ;;  %v6042_v43 = vpop.f32.mrb[58].mxu1 }
 0x21c   : > { %v6043_v20 = vpop.f32.mrb[59].mxu1 }
 0x21d   : > { %v6044_v7 = vadd.f32 %v6043_v20, %v6042_v43  ;;  %v8473_v39 = vadd.f32 %v6041_v10, %v5929_v46 }
 0x21f   : > { %v8475_v60 = vadd.f32 %v6044_v7, %v5932_v30 }
 0x222   : > { %v5933_v36 = vpop.f32.mrb[60].mxu0 }
 0x223   : > { %v5934_v41 = vpop.f32.mrb[61].mxu0 }
 0x224   : > { %v5935_v48 = vadd.f32 %v5934_v41, %v5933_v36  ;;  %v5936_v55 = vpop.f32.mrb[62].mxu0 }
 0x225   : > { %v5937_v3 = vpop.f32.mrb[63].mxu0  ;;  %v6045_v42 = vpop.f32.mrb[60].mxu1 }
 0x226   : > { %v5938_v2 = vadd.f32 %v5937_v3, %v5936_v55  ;;  %v6046_v11 = vpop.f32.mrb[61].mxu1 }
 0x227   : > { %v6047_v45 = vadd.f32 %v6046_v11, %v6045_v42  ;;  %v6048_v15 = vpop.f32.mrb[62].mxu1 }
 0x228   : > { %v6049_v63 = vpop.f32.mrb[63].mxu1 }
 0x229   : > { %v6050_v9 = vadd.f32 %v6049_v63, %v6048_v15  ;;  %v8477_v49 = vadd.f32 %v6047_v45, %v5935_v48 }
 0x22a   : > { %v6333_v61 = vpop.f32.mrb[64].mxu0 }
 0x22b   : > { %v2807_v33 = vadd.f32 %v6333_v61, %v8271_v14  ;;  %v2798_v12 = vpop.f32.mrb[65].mxu0  ;;  %v8485_v26 = vadd.f32 %v6050_v9, %v5938_v2 }
 0x22c   : > { %v2799_v19 = vadd.f32 %v2798_v12, %v8245_v21  ;;  %v6334_v51 = vpop.f32.mrb[66].mxu0 }
 0x22d   : > { %v2934_v18 = vmul.f32 %v8482_v16, %v2807_v33  ;;  %v2810_v46 = vadd.f32 %v6334_v51, %v8276_v4  ;;  %v2801_v14 = vpop.f32.mrb[67].mxu0  ;;  %v6087_v35 = vpop.f32.mrb[64].mxu1 }
 0x22e   : > { %v2932_v1 = vmul.f32 %v8482_v16, %v2799_v19  ;;  %v2802_v21 = vadd.f32 %v2801_v14, %v8254_v59  ;;  %v6088_v62 = vpop.f32.mrb[65].mxu1 }
 0x22f   : > { %v2935_v30 = vmul.f32 %v8482_v16, %v2810_v46  ;;  %v8501_v44 = vadd.f32 %v6088_v62, %v6087_v35  ;;  %v6090_v10 = vpop.f32.mrb[66].mxu1  ;;  %v8504_v43 = vadd.f32 %v8491_v13, %v2934_v18 }
 0x230   : > { %v2933_v4 = vmul.f32 %v8482_v16, %v2802_v21  ;;  %v6091_v20 = vpop.f32.mrb[67].mxu1  ;;  %v8509_v7 = vadd.f32 %v8491_v13, %v2932_v1 }
 0x231   : > { %10398 = vst [vmem:[#allocation35_spill] sm:$0xff] %v8504_v43  ;;  %v8511_v36 = vadd.f32 %v6091_v20, %v6090_v10  ;;  %v10150_v59 = vmax.f32 %v8504_v43, 0.0  ;;  %v8515_v41 = vadd.f32 %v8491_v13, %v2935_v30 }
 0x232   : > { %10399 = vst [vmem:[#allocation34_spill] sm:$0xff] %v8509_v7  ;;  %v6337_v48 = vpop.f32.mrb[68].mxu0  ;;  %v8518_v55 = vadd.f32 %v8491_v13, %v2933_v4  ;;  %v10146_v3 = vmax.f32 %v8509_v7, 0.0 }
 0x233   : > { %10400 = vst [vmem:[#allocation3_spill] sm:$0xff] %v8515_v41  ;;  %v2823_v42 = vadd.f32 %v6337_v48, %v8309_v53  ;;  %v2814_v2 = vpop.f32.mrb[69].mxu0  ;;  %v4220_v11 = vsel %vm1127_vm2, %v10150_v59, 0.0  ;;  %v10149_v19 = vmax.f32 %v8515_v41, 0.0 }
 0x234   : > { %10401 = vst [vmem:[#allocation39_spill] sm:$0xff] %v8518_v55  ;;  %v2815_v45 = vadd.f32 %v2814_v2, %v8288_v28  ;;  %v6338_v15 = vpop.f32.mrb[70].mxu0  ;;  %4525 = vadd.xlane.f32.xlu0 %v4220_v11  ;;  %v10144_v63 = vmax.f32 %v8518_v55, 0.0  ;;  %v4217_v18 = vsel %vm1127_vm2, %v10146_v3, 0.0 }
 0x235   : > { %v2938_v9 = vmul.f32 %v8482_v16, %v2823_v42  ;;  %v2826_v61 = vadd.f32 %v6338_v15, %v8313_v38  ;;  %v2817_v33 = vpop.f32.mrb[71].mxu0  ;;  %v6093_v12 = vpop.f32.mrb[68].mxu1  ;;  %v4222_v42 = vsel %vm1127_vm2, %v10149_v19, 0.0 }
 0x236   : > { %v2936_v53 = vmul.f32 %v8482_v16, %v2815_v45  ;;  %v2818_v51 = vadd.f32 %v2817_v33, %v8293_v37  ;;  %v4218_v28 = vsel %vm1127_vm2, %v10144_v63, 0.0  ;;  %v6094_v23 = vpop.f32.mrb[69].mxu1 }
 0x237   : > { %v2939_v46 = vmul.f32 %v8482_v16, %v2826_v61  ;;  %4523 = vadd.xlane.f32.xlu1 %v4218_v28  ;;  %v8539_v38 = vadd.f32 %v6094_v23, %v6093_v12  ;;  %v4219_v14 = vadd.f32 %v4218_v28, %v4217_v18  ;;  %v6096_v35 = vpop.f32.mrb[70].mxu1  ;;  %v8542_v1 = vadd.f32 %v8491_v13, %v2938_v9 }
 0x238   : > { %v2937_v37 = vmul.f32 %v8482_v16, %v2818_v51  ;;  %4521 = vadd.xlane.f32.xlu0 %v4217_v18  ;;  %v6097_v21 = vpop.f32.mrb[71].mxu1  ;;  %v8546_v62 = vadd.f32 %v8491_v13, %v2936_v53 }
 0x239   : > { %10402 = vst [vmem:[#allocation7_spill] sm:$0xff] %v8542_v1  ;;  %v8548_v30 = vadd.f32 %v6097_v21, %v6096_v35  ;;  %v10137_v10 = vmax.f32 %v8542_v1, 0.0  ;;  %v4221_v4 = vadd.f32 %v4220_v11, %v4219_v14  ;;  %v8552_v20 = vadd.f32 %v8491_v13, %v2939_v46 }
 0x23a   : > { %10403 = vst [vmem:[#allocation5_spill] sm:$0xff] %v8546_v62  ;;  %v6341_v48 = vpop.f32.mrb[72].mxu0  ;;  %v10142_v2 = vmax.f32 %v8546_v62, 0.0  ;;  %v8559_v45 = vadd.f32 %v8491_v13, %v2937_v37 }
 0x23b   : > { %10404 = vst [vmem:[#allocation19_spill] sm:$0xff] %v8552_v20  ;;  %v2839_v15 = vadd.f32 %v6341_v48, %v8341_v6  ;;  %v2830_v9 = vpop.f32.mrb[73].mxu0  ;;  %v4228_v11 = vsel %vm1127_vm2, %v10137_v10, 0.0  ;;  %v4223_v61 = vadd.f32 %v4222_v42, %v4221_v4  ;;  %v10136_v33 = vmax.f32 %v8552_v20, 0.0 }
 0x23c   : > { %10405 = vst [vmem:[#allocation24_spill] sm:$0xff] %v8559_v45  ;;  %v2831_v12 = vadd.f32 %v2830_v9, %v8323_v54  ;;  %v6342_v53 = vpop.f32.mrb[74].mxu0  ;;  %4533 = vadd.xlane.f32.xlu1 %v4228_v11  ;;  %4527 = vadd.xlane.f32.xlu0 %v4222_v42  ;;  %v4224_v51 = vsel %vm1127_vm2, %v10142_v2, 0.0  ;;  %v10141_v28 = vmax.f32 %v8559_v45, 0.0 }
 0x23d   : > { %v2942_v6 = vmul.f32 %v8482_v16, %v2839_v15  ;;  %v2842_v23 = vadd.f32 %v6342_v53, %v8345_v58  ;;  %v2833_v18 = vpop.f32.mrb[75].mxu0  ;;  %v6099_v46 = vpop.f32.mrb[72].mxu1  ;;  %v4225_v14 = vadd.f32 %v4224_v51, %v4223_v61  ;;  %v4230_v21 = vsel %vm1127_vm2, %v10136_v33, 0.0 }
 0x23e   : > { %v2940_v35 = vmul.f32 %v8482_v16, %v2831_v12  ;;  %v2834_v54 = vadd.f32 %v2833_v18, %v8325_v40  ;;  %v6100_v37 = vpop.f32.mrb[73].mxu1  ;;  %v4226_v4 = vsel %vm1127_vm2, %v10141_v28, 0.0 }
 0x23f   : > { %v2943_v48 = vmul.f32 %v8482_v16, %v2842_v23  ;;  %v8582_v42 = vadd.f32 %v6100_v37, %v6099_v46  ;;  %v6102_v58 = vpop.f32.mrb[74].mxu1  ;;  %v4227_v15 = vadd.f32 %v4226_v4, %v4225_v14  ;;  %v8585_v9 = vadd.f32 %v8491_v13, %v2942_v6 }
 0x240   : > { %v2941_v40 = vmul.f32 %v8482_v16, %v2834_v54  ;;  %4529 = vadd.xlane.f32.xlu1 %v4224_v51  ;;  %4535 = vadd.xlane.f32.xlu0 %v4230_v21  ;;  %v6103_v61 = vpop.f32.mrb[75].mxu1  ;;  %v8589_v12 = vadd.f32 %v8491_v13, %v2940_v35 }
 0x241   : > { %10406 = vst [vmem:[#allocation28_spill] sm:$0xff] %v8585_v9  ;;  %v8592_v53 = vadd.f32 %v8491_v13, %v2943_v48  ;;  %v8594_v18 = vadd.f32 %v6103_v61, %v6102_v58  ;;  %v4229_v23 = vadd.f32 %v4228_v11, %v4227_v15 }
 0x242   : > { %10407 = vst [vmem:[#allocation21_spill] sm:$0xff] %v8589_v12  ;;  %v8597_v46 = vadd.f32 %v8491_v13, %v2941_v40  ;;  %v6345_v14 = vpop.f32.mrb[76].mxu0  ;;  %v10140_v6 = vmax.f32 %v8589_v12, 0.0 }
 0x243   : > { %10408 = vst [vmem:[#allocation33_spill] sm:$0xff] %v8592_v53  ;;  %v2855_v54 = vadd.f32 %v6345_v14, %v8373_v5  ;;  %v2846_v51 = vpop.f32.mrb[77].mxu0  ;;  %v4231_v37 = vadd.f32 %v4230_v21, %v4229_v23  ;;  %v10139_v21 = vmax.f32 %v8585_v9, 0.0  ;;  %v10143_v14 = vmax.f32 %v8592_v53, 0.0 }
 0x244   : > { %10409 = vst [vmem:[#allocation26_spill] sm:$0xff] %v8597_v46  ;;  %v10138_v33 = vmax.f32 %v8597_v46, 0.0  ;;  %v2847_v35 = vadd.f32 %v2846_v51, %v8355_v8  ;;  %v6346_v10 = vpop.f32.mrb[78].mxu0  ;;  %4531 = vadd.xlane.f32.xlu0 %v4226_v4  ;;  %v4232_v11 = vsel %vm1127_vm2, %v10140_v6, 0.0 }
 0x245   : > { %v2946_v48 = vmul.f32 %v8482_v16, %v2855_v54  ;;  %v2858_v58 = vadd.f32 %v6346_v10, %v8377_v25  ;;  %v2849_v15 = vpop.f32.mrb[79].mxu0  ;;  %4537 = vadd.xlane.f32.xlu1 %v4232_v11  ;;  %v4233_v40 = vadd.f32 %v4232_v11, %v4231_v37  ;;  %v6105_v5 = vpop.f32.mrb[76].mxu1 }
 0x246   : > { %v2944_v61 = vmul.f32 %v8482_v16, %v2847_v35  ;;  %v2850_v8 = vadd.f32 %v2849_v15, %v8357_v24  ;;  %v6106_v23 = vpop.f32.mrb[77].mxu1  ;;  %v8614_v4 = vsel %vm1127_vm2, %v10138_v33, 0.0 }
 0x247   : > { %10410 = vst [vmem:[#allocation37_spill] sm:$0xff] %v8614_v4  ;;  %v8618_v25 = vadd.f32 %v8491_v13, %v2946_v48  ;;  %v2947_v10 = vmul.f32 %v8482_v16, %v2858_v58  ;;  %v8621_v54 = vadd.f32 %v6106_v23, %v6105_v5  ;;  %v6108_v51 = vpop.f32.mrb[78].mxu1  ;;  %v4235_v24 = vadd.f32 %v8614_v4, %v4233_v40 }
 0x248   : > { %v2945_v37 = vmul.f32 %v8482_v16, %v2850_v8  ;;  %v6109_v35 = vpop.f32.mrb[79].mxu1  ;;  %v8626_v11 = vadd.f32 %v8491_v13, %v2944_v61  ;;  %v8636_v48 = vsel %vm1127_vm2, %v10139_v21, 0.0 }
 0x249   : > { %10411 = vst [vmem:[#allocation43_spill] sm:$0xff] %v8618_v25  ;;  %v8629_v15 = vadd.f32 %v8491_v13, %v2947_v10  ;;  %v8631_v33 = vadd.f32 %v6109_v35, %v6108_v51  ;;  %v4237_v8 = vadd.f32 %v8636_v48, %v4235_v24  ;;  %v8647_v10 = vsel %vm1127_vm2, %v10143_v14, 0.0 }
 0x24a   : > { %10412 = vst [vmem:[#allocation31_spill] sm:$0xff] %v8626_v11  ;;  %v8639_v58 = vadd.f32 %v8491_v13, %v2945_v37  ;;  %v6349_v5 = vpop.f32.mrb[80].mxu0  ;;  %v10145_v40 = vmax.f32 %v8626_v11, 0.0  ;;  %10415 = vst [vmem:[#allocation36_spill] sm:$0xff] %v8647_v10  ;;  %v10148_v6 = vmax.f32 %v8618_v25, 0.0 }
 0x24b   : > { %10413 = vst [vmem:[#allocation40_spill] sm:$0xff] %v8629_v15  ;;  %v2871_v61 = vadd.f32 %v6349_v5, %v8398_v57  ;;  %v2862_v23 = vpop.f32.mrb[81].mxu0  ;;  %v4239_v37 = vadd.f32 %v8647_v10, %v4237_v8 }
 0x24c   : > { %10414 = vst [vmem:[#allocation41_spill] sm:$0xff] %v8639_v58  ;;  %v10147_v51 = vmax.f32 %v8639_v58, 0.0  ;;  %v2863_v35 = vadd.f32 %v2862_v23, %v8386_v17  ;;  %v6350_v21 = vpop.f32.mrb[82].mxu0  ;;  %v8660_v17 = vsel %vm1127_vm2, %v10145_v40, 0.0 }
 0x24d   : > { %v2950_v24 = vmul.f32 %v8482_v16, %v2871_v61  ;;  %v2874_v28 = vadd.f32 %v6350_v21, %v8404_v52  ;;  %v2865_v57 = vpop.f32.mrb[83].mxu0  ;;  %v6111_v5 = vpop.f32.mrb[80].mxu1 }
 0x24e   : > { %v2948_v2 = vmul.f32 %v8482_v16, %v2863_v35  ;;  %v2866_v14 = vadd.f32 %v2865_v57, %v8388_v47  ;;  %v6112_v63 = vpop.f32.mrb[81].mxu1  ;;  %v8665_v8 = vsel %vm1127_vm2, %v10147_v51, 0.0  ;;  %v4241_v47 = vadd.f32 %v8660_v17, %v4239_v37 }
 0x24f   : > { %10416 = vst [vmem:[#allocation44_spill] sm:$0xff] %v8665_v8  ;;  %v2951_v61 = vmul.f32 %v8482_v16, %v2874_v28  ;;  %v8668_v52 = vadd.f32 %v6112_v63, %v6111_v5  ;;  %v6114_v21 = vpop.f32.mrb[82].mxu1  ;;  %v8671_v23 = vadd.f32 %v8491_v13, %v2950_v24  ;;  %v10155_v35 = vmax.f32 %v8629_v15, 0.0 }
 0x250   : > { %v2949_v57 = vmul.f32 %v8482_v16, %v2866_v14  ;;  %v6115_v40 = vpop.f32.mrb[83].mxu1  ;;  %v8677_v3 = vadd.f32 %v8491_v13, %v2948_v2  ;;  %v4243_v24 = vadd.f32 %v8665_v8, %v4241_v47  ;;  %v8689_v37 = vsel %vm1127_vm2, %v10148_v6, 0.0 }
 0x251   : > { %10417 = vst [vmem:[#allocation38_spill] sm:$0xff] %v8671_v23  ;;  %v8679_v51 = vadd.f32 %v6115_v40, %v6114_v21  ;;  %v10153_v28 = vmax.f32 %v8671_v23, 0.0  ;;  %v8683_v63 = vadd.f32 %v8491_v13, %v2951_v61  ;;  %v6549_v40 = vld [vmem:[%s10019_s7 + $0x10] sm:$0xff]  }
 0x252   : > { %10418 = vst [vmem:[#allocation47_spill] sm:$0xff] %v8677_v3  ;;  %v6353_v5 = vpop.f32.mrb[84].mxu0  ;;  %v10158_v14 = vmax.f32 %v8677_v3, 0.0  ;;  %v8693_v2 = vadd.f32 %v8491_v13, %v2949_v57  ;;  %v4245_v19 = vadd.f32 %v8689_v37, %v4243_v24  ;;  %v8707_v57 = vsel %vm1127_vm2, %v10155_v35, 0.0  ;;  %6408 = vmatpush3.bf16.msra.mxu0 %v6549_v40 }
 0x253   : > { %10419 = vst [vmem:[#allocation42_spill] sm:$0xff] %v8683_v63  ;;  %v2887_v61 = vadd.f32 %v6353_v5, %v8428_v50  ;;  %v2878_v21 = vpop.f32.mrb[85].mxu0  ;;  %v4252_v47 = vsel %vm1127_vm2, %v10153_v28, 0.0  ;;  %10421 = vst [vmem:[#allocation48_spill] sm:$0xff] %v8707_v57  ;;  %v10422_v23 = vmax.f32 %v8683_v63, 0.0 }
 0x254   : > { %10420 = vst [vmem:[#allocation50_spill] sm:$0xff] %v8693_v2  ;;  %v2879_v59 = vadd.f32 %v2878_v21, %v8412_v31  ;;  %v6354_v56 = vpop.f32.mrb[86].mxu0  ;;  %4557 = vadd.xlane.f32.xlu1 %v4252_v47  ;;  %v4248_v50 = vsel %vm1127_vm2, %v10158_v14, 0.0  ;;  %v10161_v5 = vmax.f32 %v8693_v2, 0.0  ;;  %v10423_v31 = vmov 0.0  }
 0x255   : > { %v2954_v28 = vmul.f32 %v8482_v16, %v2887_v61  ;;  %v2890_v24 = vadd.f32 %v6354_v56, %v8434_v27  ;;  %v2881_v6 = vpop.f32.mrb[87].mxu0  ;;  %v4254_v35 = vsel %vm1127_vm2, %v10422_v23, 0.0  ;;  %v6117_v15 = vpop.f32.mrb[84].mxu1  ;;  %6409 = vmatprep.subr.bf16.mxu0 %v10423_v31  ;;  %v4247_v21 = vadd.f32 %v8707_v57, %v4245_v19  ;;  %6411 = vmatprep.mubr.msk.bf16.mxu0 %vm6639_vm4, %v10423_v31 }
 0x256   : > { %v2952_v25 = vmul.f32 %v8482_v16, %v2879_v59  ;;  %v2882_v14 = vadd.f32 %v2881_v6, %v8417_v22  ;;  %4559 = vadd.xlane.f32.xlu0 %v4254_v35  ;;  %v6118_v40 = vpop.f32.mrb[85].mxu1  ;;  %v4250_v27 = vsel %vm1127_vm2, %v10161_v5, 0.0  ;;  %6419 = vmatprep.mubr.msk.bf16.mxu1 %vm6639_vm4, %v10423_v31 }
 0x257   : > { %v2955_v56 = vmul.f32 %v8482_v16, %v2890_v24  ;;  %v8727_v61 = vadd.f32 %v6118_v40, %v6117_v15  ;;  %v6120_v23 = vpop.f32.mrb[86].mxu1  ;;  %v8730_v63 = vadd.f32 %v8491_v13, %v2954_v28  ;;  %v4249_v53 = vadd.f32 %v4248_v50, %v4247_v21 }
 0x258   : > { %v2953_v19 = vmul.f32 %v8482_v16, %v2882_v14  ;;  %4553 = vadd.xlane.f32.xlu1 %v4248_v50  ;;  %v6121_v59 = vpop.f32.mrb[87].mxu1  ;;  %v8734_v22 = vadd.f32 %v8491_v13, %v2952_v25 }
 0x259   : > { %10424 = vst [vmem:[#allocation2_spill] sm:$0xff] %v8730_v63  ;;  %v8736_v6 = vadd.f32 %v6121_v59, %v6120_v23  ;;  %v10163_v5 = vmax.f32 %v8730_v63, 0.0  ;;  %v8740_v24 = vadd.f32 %v8491_v13, %v2955_v56  ;;  %v4251_v15 = vadd.f32 %v4250_v27, %v4249_v53 }
 0x25a   : > { %10425 = vst [vmem:[#allocation45_spill] sm:$0xff] %v8734_v22  ;;  %v6357_v40 = vpop.f32.mrb[88].mxu0  ;;  %4555 = vadd.xlane.f32.xlu0 %v4250_v27  ;;  %v10165_v28 = vmax.f32 %v8734_v22, 0.0  ;;  %v8744_v21 = vadd.f32 %v8491_v13, %v2953_v19 }
 0x25b   : > { %10426 = vst [vmem:[#allocation49_spill] sm:$0xff] %v8740_v24  ;;  %v2903_v14 = vadd.f32 %v6357_v40, %v8468_v32  ;;  %v2894_v50 = vpop.f32.mrb[89].mxu0  ;;  %v4260_v25 = vsel %vm1127_vm2, %v10163_v5, 0.0  ;;  %v10167_v23 = vmax.f32 %v8740_v24, 0.0  ;;  %v4253_v59 = vadd.f32 %v4252_v47, %v4251_v15 }
 0x25c   : > { %10427 = vst [vmem:[#allocation4_spill] sm:$0xff] %v8744_v21  ;;  %v2895_v56 = vadd.f32 %v2894_v50, %v8450_v34  ;;  %v6358_v53 = vpop.f32.mrb[90].mxu0  ;;  %4565 = vadd.xlane.f32.xlu1 %v4260_v25  ;;  %v4256_v27 = vsel %vm1127_vm2, %v10165_v28, 0.0  ;;  %v10168_v19 = vmax.f32 %v8744_v21, 0.0 }
 0x25d   : > { %v2958_v32 = vmul.f32 %v8482_v16, %v2903_v14  ;;  %v2906_v40 = vadd.f32 %v6358_v53, %v8471_v29  ;;  %v2897_v63 = vpop.f32.mrb[91].mxu0  ;;  %v4262_v5 = vsel %vm1127_vm2, %v10167_v23, 0.0  ;;  %v6123_v47 = vpop.f32.mrb[88].mxu1  ;;  %v4255_v15 = vadd.f32 %v4254_v35, %v4253_v59 }
 0x25e   : > { %v2956_v34 = vmul.f32 %v8482_v16, %v2895_v56  ;;  %v2898_v50 = vadd.f32 %v2897_v63, %v8452_v0  ;;  %4567 = vadd.xlane.f32.xlu0 %v4262_v5  ;;  %v6124_v9 = vpop.f32.mrb[89].mxu1  ;;  %v4258_v28 = vsel %vm1127_vm2, %v10168_v19, 0.0 }
 0x25f   : > { %v2959_v14 = vmul.f32 %v8482_v16, %v2906_v40  ;;  %v8767_v29 = vadd.f32 %v6124_v9, %v6123_v47  ;;  %v6126_v53 = vpop.f32.mrb[90].mxu1  ;;  %v8770_v24 = vadd.f32 %v8491_v13, %v2958_v32  ;;  %v4257_v23 = vadd.f32 %v4256_v27, %v4255_v15 }
 0x260   : > { %v2957_v35 = vmul.f32 %v8482_v16, %v2898_v50  ;;  %4561 = vadd.xlane.f32.xlu1 %v4256_v27  ;;  %v6127_v59 = vpop.f32.mrb[91].mxu1  ;;  %v8774_v0 = vadd.f32 %v8491_v13, %v2956_v34 }
 0x261   : > { %10428 = vst [vmem:[#allocation46_spill] sm:$0xff] %v8770_v24  ;;  %v8777_v63 = vadd.f32 %v8491_v13, %v2959_v14  ;;  %v8779_v56 = vadd.f32 %v6127_v59, %v6126_v53  ;;  %v4259_v40 = vadd.f32 %v4258_v28, %v4257_v23 }
 0x262   : > { %10429 = vst [vmem:[#allocation16_spill] sm:$0xff] %v8774_v0  ;;  %v8782_v9 = vadd.f32 %v8491_v13, %v2957_v35  ;;  %v6361_v47 = vpop.f32.mrb[92].mxu0  ;;  %4563 = vadd.xlane.f32.xlu0 %v4258_v28 }
 0x263   : > { %10430 = vst [vmem:[#allocation51_spill] sm:$0xff] %v8777_v63  ;;  %v2919_v32 = vadd.f32 %v6361_v47, %v8477_v49  ;;  %v2910_v15 = vpop.f32.mrb[93].mxu0  ;;  %v4261_v50 = vadd.f32 %v4260_v25, %v4259_v40 }
 0x264   : > { %10431 = vst [vmem:[#allocation6_spill] sm:$0xff] %v8782_v9  ;;  %v2911_v27 = vadd.f32 %v2910_v15, %v8473_v39  ;;  %v6362_v19 = vpop.f32.mrb[94].mxu0 }
 0x265   : > { %v2962_v34 = vmul.f32 %v8482_v16, %v2919_v32  ;;  %v2922_v14 = vadd.f32 %v6362_v19, %v8485_v26  ;;  %v2913_v21 = vpop.f32.mrb[95].mxu0  ;;  %v6129_v53 = vpop.f32.mrb[92].mxu1  ;;  %v8788_v59 = vadd.f32 %v4262_v5, %v4261_v50 }
 0x266   : > { %v2960_v23 = vmul.f32 %v8482_v16, %v2911_v27  ;;  %v2914_v35 = vadd.f32 %v2913_v21, %v8475_v60  ;;  %v6130_v28 = vpop.f32.mrb[93].mxu1 }
 0x267   : > { %v8793_v49 = vadd.f32 %v8491_v13, %v2962_v34  ;;  %v2963_v25 = vmul.f32 %v8482_v16, %v2922_v14  ;;  %v8796_v39 = vadd.f32 %v6130_v28, %v6129_v53  ;;  %v6132_v40 = vpop.f32.mrb[94].mxu1 }
 0x268   : > { %v2961_v47 = vmul.f32 %v8482_v16, %v2914_v35  ;;  %v6133_v26 = vpop.f32.mrb[95].mxu1  ;;  %v8800_v19 = vadd.f32 %v8491_v13, %v2960_v23 }
 0x269   : > { %v8803_v5 = vadd.f32 %v8491_v13, %v2963_v25  ;;  %v8805_v32 = vadd.f32 %v6133_v26, %v6132_v40 }
 0x26a   : > { %10432 = vst [vmem:[#allocation53_spill] sm:$0xff] %v8800_v19  ;;  %v8808_v60 = vadd.f32 %v8491_v13, %v2961_v47  ;;  %v6199_v21 = vpop.f32.mrb[96].mxu0 }
 0x26b   : > { %v6200_v15 = vpop.f32.mrb[97].mxu0 }
 0x26c   : > { %v6201_v50 = vadd.f32 %v6200_v15, %v6199_v21  ;;  %v6202_v27 = vpop.f32.mrb[98].mxu0  ;;  %v6550_v21 = vld [vmem:[%s10019_s7 + $0x18] sm:$0xff]  }
 0x26d   : > { %v6203_v34 = vpop.f32.mrb[99].mxu0  ;;  %v6135_v14 = vpop.f32.mrb[96].mxu1  ;;  %6410 = vmatpush3.bf16.msra.mxu0 %v6550_v21 }
 0x26e   : > { %v6204_v53 = vadd.f32 %v6203_v34, %v6202_v27  ;;  %v6136_v16 = vpop.f32.mrb[97].mxu1  ;;  %v8811_v35 = vadd.f32 %v6201_v50, %v8501_v44 }
 0x26f   : > { %v8813_v23 = vadd.f32 %v6136_v16, %v6135_v14  ;;  %v6138_v28 = vpop.f32.mrb[98].mxu1 }
 0x270   : > { %v6139_v25 = vpop.f32.mrb[99].mxu1  ;;  %v8816_v40 = vadd.f32 %v6204_v53, %v8511_v36 }
 0x271   : > { %v8818_v13 = vadd.f32 %v6139_v25, %v6138_v28 }
 0x272   : > { %v6205_v47 = vpop.f32.mrb[100].mxu0 }
 0x273   : > { %v6206_v26 = vpop.f32.mrb[101].mxu0 }
 0x274   : > { %v6207_v15 = vadd.f32 %v6206_v26, %v6205_v47  ;;  %v6208_v27 = vpop.f32.mrb[102].mxu0 }
 0x275   : > { %v6209_v34 = vpop.f32.mrb[103].mxu0  ;;  %v6141_v44 = vpop.f32.mrb[100].mxu1 }
 0x276   : > { %v6210_v50 = vadd.f32 %v6209_v34, %v6208_v27  ;;  %v6142_v14 = vpop.f32.mrb[101].mxu1  ;;  %v8824_v16 = vadd.f32 %v6207_v15, %v8539_v38 }
 0x277   : > { %v8826_v36 = vadd.f32 %v6142_v14, %v6141_v44  ;;  %v6144_v53 = vpop.f32.mrb[102].mxu1 }
 0x278   : > { %v6145_v28 = vpop.f32.mrb[103].mxu1  ;;  %v8829_v25 = vadd.f32 %v6210_v50, %v8548_v30 }
 0x279   : > { %v8831_v22 = vadd.f32 %v6145_v28, %v6144_v53 }
 0x27a   : > { %v6211_v46 = vpop.f32.mrb[104].mxu0 }
 0x27b   : > { %v6212_v47 = vpop.f32.mrb[105].mxu0 }
 0x27c   : > { %v6213_v26 = vadd.f32 %v6212_v47, %v6211_v46  ;;  %v6214_v12 = vpop.f32.mrb[106].mxu0 }
 0x27d   : > { %v6215_v2 = vpop.f32.mrb[107].mxu0  ;;  %v6147_v21 = vpop.f32.mrb[104].mxu1 }
 0x27e   : > { %v6216_v27 = vadd.f32 %v6215_v2, %v6214_v12  ;;  %v6148_v34 = vpop.f32.mrb[105].mxu1  ;;  %v8834_v38 = vadd.f32 %v6213_v26, %v8582_v42 }
 0x27f   : > { %v8836_v15 = vadd.f32 %v6148_v34, %v6147_v21  ;;  %v6150_v44 = vpop.f32.mrb[106].mxu1 }
 0x280   : > { %v6151_v14 = vpop.f32.mrb[107].mxu1  ;;  %v8839_v30 = vadd.f32 %v6216_v27, %v8594_v18 }
 0x281   : > { %v8841_v50 = vadd.f32 %v6151_v14, %v6150_v44 }
 0x282   : > { %v6217_v53 = vpop.f32.mrb[108].mxu0 }
 0x283   : > { %v6218_v28 = vpop.f32.mrb[109].mxu0 }
 0x284   : > { %v6219_v46 = vadd.f32 %v6218_v28, %v6217_v53  ;;  %v6220_v47 = vpop.f32.mrb[110].mxu0 }
 0x285   : > { %v6221_v3 = vpop.f32.mrb[111].mxu0  ;;  %v6153_v20 = vpop.f32.mrb[108].mxu1 }
 0x286   : > { %v6222_v12 = vadd.f32 %v6221_v3, %v6220_v47  ;;  %v6154_v2 = vpop.f32.mrb[109].mxu1  ;;  %v8844_v42 = vadd.f32 %v6219_v46, %v8621_v54 }
 0x287   : > { %v8846_v26 = vadd.f32 %v6154_v2, %v6153_v20  ;;  %v6156_v21 = vpop.f32.mrb[110].mxu1 }
 0x288   : > { %v6157_v34 = vpop.f32.mrb[111].mxu1  ;;  %v8849_v18 = vadd.f32 %v6222_v12, %v8631_v33 }
 0x289   : > { %v8851_v27 = vadd.f32 %v6157_v34, %v6156_v21 }
 0x28a   : > { %v6223_v44 = vpop.f32.mrb[112].mxu0 }
 0x28b   : > { %v6224_v14 = vpop.f32.mrb[113].mxu0 }
 0x28c   : > { %v6225_v53 = vadd.f32 %v6224_v14, %v6223_v44  ;;  %v6226_v28 = vpop.f32.mrb[114].mxu0 }
 0x28d   : > { %v6227_v1 = vpop.f32.mrb[115].mxu0  ;;  %v6159_v58 = vpop.f32.mrb[112].mxu1 }
 0x28e   : > { %v6228_v3 = vadd.f32 %v6227_v1, %v6226_v28  ;;  %v6160_v47 = vpop.f32.mrb[113].mxu1  ;;  %v8854_v54 = vadd.f32 %v6225_v53, %v8668_v52 }
 0x28f   : > { %v8856_v20 = vadd.f32 %v6160_v47, %v6159_v58  ;;  %v6162_v46 = vpop.f32.mrb[114].mxu1 }
 0x290   : > { %v6163_v2 = vpop.f32.mrb[115].mxu1  ;;  %v8859_v33 = vadd.f32 %v6228_v3, %v8679_v51 }
 0x291   : > { %v8861_v12 = vadd.f32 %v6163_v2, %v6162_v46 }
 0x292   : > { %v6229_v21 = vpop.f32.mrb[116].mxu0 }
 0x293   : > { %v6230_v34 = vpop.f32.mrb[117].mxu0 }
 0x294   : > { %v6231_v44 = vadd.f32 %v6230_v34, %v6229_v21  ;;  %v6232_v14 = vpop.f32.mrb[118].mxu0 }
 0x295   : > { %v6233_v1 = vpop.f32.mrb[119].mxu0  ;;  %v6165_v52 = vpop.f32.mrb[116].mxu1 }
 0x296   : > { %v6234_v58 = vadd.f32 %v6233_v1, %v6232_v14  ;;  %v6166_v53 = vpop.f32.mrb[117].mxu1  ;;  %v8866_v28 = vadd.f32 %v6231_v44, %v8727_v61 }
 0x297   : > { %v8868_v51 = vadd.f32 %v6166_v53, %v6165_v52  ;;  %v6168_v3 = vpop.f32.mrb[118].mxu1 }
 0x298   : > { %v6169_v47 = vpop.f32.mrb[119].mxu1  ;;  %v8871_v46 = vadd.f32 %v6234_v58, %v8736_v6 }
 0x299   : > { %v8873_v2 = vadd.f32 %v6169_v47, %v6168_v3 }
 0x29a   : > { %v6235_v21 = vpop.f32.mrb[120].mxu0 }
 0x29b   : > { %v6236_v34 = vpop.f32.mrb[121].mxu0 }
 0x29c   : > { %v6237_v11 = vadd.f32 %v6236_v34, %v6235_v21  ;;  %v6238_v45 = vpop.f32.mrb[122].mxu0 }
 0x29d   : > { %v6239_v62 = vpop.f32.mrb[123].mxu0  ;;  %v6171_v55 = vpop.f32.mrb[120].mxu1 }
 0x29e   : > { %v6240_v14 = vadd.f32 %v6239_v62, %v6238_v45  ;;  %v6172_v1 = vpop.f32.mrb[121].mxu1  ;;  %v8876_v61 = vadd.f32 %v6237_v11, %v8767_v29 }
 0x29f   : > { %v8878_v44 = vadd.f32 %v6172_v1, %v6171_v55  ;;  %v6174_v52 = vpop.f32.mrb[122].mxu1 }
 0x2a0   : > { %v6175_v53 = vpop.f32.mrb[123].mxu1  ;;  %v8881_v6 = vadd.f32 %v6240_v14, %v8779_v56 }
 0x2a1   : > { %v8883_v58 = vadd.f32 %v6175_v53, %v6174_v52 }
 0x2a2   : > { %v6241_v3 = vpop.f32.mrb[124].mxu0 }
 0x2a3   : > { %v6242_v47 = vpop.f32.mrb[125].mxu0 }
 0x2a4   : > { %v6243_v21 = vadd.f32 %v6242_v47, %v6241_v3  ;;  %v6244_v34 = vpop.f32.mrb[126].mxu0 }
 0x2a5   : > { %v6245_v7 = vpop.f32.mrb[127].mxu0  ;;  %v6177_v41 = vpop.f32.mrb[124].mxu1 }
 0x2a6   : > { %v6246_v62 = vadd.f32 %v6245_v7, %v6244_v34  ;;  %v6178_v45 = vpop.f32.mrb[125].mxu1  ;;  %v8886_v11 = vadd.f32 %v6243_v21, %v8796_v39  ;;  %v8898_v7 = vld [vmem:[%s10016_s4] ss:$0 sm:$0xff] }
 0x2a7   : > { %v8888_v55 = vadd.f32 %v6178_v45, %v6177_v41  ;;  %v6180_v29 = vpop.f32.mrb[126].mxu1  ;;  %v8908_v45 = vld [vmem:[%s10018_s6] ss:$0 sm:$0xff] }
 0x2a8   : > { %v6181_v1 = vpop.f32.mrb[127].mxu1  ;;  %v8891_v56 = vadd.f32 %v6246_v62, %v8805_v32 }
 0x2a9   : > { %v8893_v14 = vadd.f32 %v6181_v1, %v6180_v29  ;;  %v4617_v29 = vlaneseq }
 0x2aa   : > { %v6247_v52 = vpop.f32.mrb[128].mxu0 }
 0x2ab   : > { %v6248_v53 = vpop.f32.mrb[129].mxu0 }
 0x2ac   : > { %v6249_v3 = vadd.f32 %v6248_v53, %v6247_v52  ;;  %v6250_v47 = vpop.f32.mrb[130].mxu0 }
 0x2ad   : > { %v6251_v43 = vpop.f32.mrb[131].mxu0  ;;  %v6373_v57 = vpop.f32.mrb[128].mxu1 }
 0x2ae   : > { %v6252_v41 = vadd.f32 %v6251_v43, %v6250_v47  ;;  %v3989_v39 = vadd.f32 %v6373_v57, %v8824_v16  ;;  %v3980_v21 = vpop.f32.mrb[129].mxu1  ;;  %v8902_v32 = vadd.f32 %v6249_v3, %v8813_v23 }
 0x2af   : > { %v3981_v34 = vadd.f32 %v3980_v21, %v8811_v35  ;;  %v6374_v62 = vpop.f32.mrb[130].mxu1 }
 0x2b0   : > { %v4116_v1 = vmul.f32 %v8898_v7, %v3989_v39  ;;  %v3992_v52 = vadd.f32 %v6374_v62, %v8829_v25  ;;  %v3983_v43 = vpop.f32.mrb[131].mxu1  ;;  %v8913_v57 = vadd.f32 %v6252_v41, %v8818_v13  ;;  %v8925_v25 = vand.u32 127, %v4617_v29 }
 0x2b1   : > { %v4114_v23 = vmul.f32 %v8898_v7, %v3981_v34  ;;  %v3984_v16 = vadd.f32 %v3983_v43, %v8816_v40 }
 0x2b2   : > { %v4117_v35 = vmul.f32 %v8898_v7, %v3992_v52  ;;  %v6253_v53 = vpop.f32.mrb[132].mxu0  ;;  %v8919_v3 = vadd.f32 %v8908_v45, %v4116_v1 }
 0x2b3   : > { %v4115_v47 = vmul.f32 %v8898_v7, %v3984_v16  ;;  %v6254_v21 = vpop.f32.mrb[133].mxu0  ;;  %v8923_v39 = vadd.f32 %v8908_v45, %v4114_v23  ;;  %v8935_v16 = vshrl.u32 %v4617_v29, 7 }
 0x2b4   : > { %10433 = vst [vmem:[#allocation14_spill] sm:$0xff] %v8919_v3  ;;  %v6255_v13 = vadd.f32 %v6254_v21, %v6253_v53  ;;  %v6256_v41 = vpop.f32.mrb[134].mxu0  ;;  %v10189_v34 = vmax.f32 %v8919_v3, 0.0  ;;  %v8929_v40 = vadd.f32 %v8908_v45, %v4117_v35 }
 0x2b5   : > { %10434 = vst [vmem:[#allocation12_spill] sm:$0xff] %v8923_v39  ;;  %v6257_v62 = vpop.f32.mrb[135].mxu0  ;;  %v6377_v52 = vpop.f32.mrb[132].mxu1  ;;  %v8933_v43 = vadd.f32 %v8908_v45, %v4115_v47  ;;  %v4623_v47 = vadd.s32 4294967288, %v8925_v25 }
 0x2b6   : > { %10435 = vst [vmem:[#allocation8_spill] sm:$0xff] %v8929_v40  ;;  %v6258_v23 = vadd.f32 %v6257_v62, %v6256_v41  ;;  %v4005_v8 = vadd.f32 %v6377_v52, %v8844_v42  ;;  %v3996_v10 = vpop.f32.mrb[133].mxu1  ;;  %v4289_v53 = vsel %vm1127_vm2, %v10189_v34, 0.0  ;;  %v10190_v35 = vmax.f32 %v8929_v40, 0.0 }
 0x2b7   : > { %10436 = vst [vmem:[#allocation17_spill] sm:$0xff] %v8933_v43  ;;  %v3997_v21 = vadd.f32 %v3996_v10, %v8834_v38  ;;  %v6378_v4 = vpop.f32.mrb[134].mxu1  ;;  %4801 = vadd.xlane.f32.xlu1 %v4289_v53  ;;  %v10191_v1 = vmax.f32 %v8933_v43, 0.0  ;;  %v8946_v29 = vadd.f32 %v6255_v13, %v8826_v36  ;;  %v10437_v36 = vmax.f32 %v8923_v39, 0.0 }
 0x2b8   : > { %v4120_v42 = vmul.f32 %v8898_v7, %v4005_v8  ;;  %v4008_v41 = vadd.f32 %v6378_v4, %v8849_v18  ;;  %v3999_v62 = vpop.f32.mrb[135].mxu1  ;;  %v4291_v52 = vsel %vm1127_vm2, %v10190_v35, 0.0  ;;  %v8954_v10 = vadd.f32 %v6258_v23, %v8831_v22 }
 0x2b9   : > { %v4118_v38 = vmul.f32 %v8898_v7, %v3997_v21  ;;  %v4000_v34 = vadd.f32 %v3999_v62, %v8839_v30  ;;  %4803 = vadd.xlane.f32.xlu0 %v4291_v52  ;;  %v4286_v13 = vsel %vm1127_vm2, %v10437_v36, 0.0  ;;  %v4287_v4 = vsel %vm1127_vm2, %v10191_v1, 0.0 }
 0x2ba   : > { %v4121_v8 = vmul.f32 %v8898_v7, %v4008_v41  ;;  %v6259_v18 = vpop.f32.mrb[136].mxu0  ;;  %v4288_v35 = vadd.f32 %v4287_v4, %v4286_v13  ;;  %v8966_v22 = vadd.f32 %v8908_v45, %v4120_v42  ;;  %v8970_v30 = vsub.s32 %v4623_v47, %v8935_v16 }
 0x2bb   : > { %v4119_v23 = vmul.f32 %v8898_v7, %v4000_v34  ;;  %v6260_v21 = vpop.f32.mrb[137].mxu0  ;;  %4797 = vadd.xlane.f32.xlu1 %v4286_v13  ;;  %v8973_v62 = vadd.f32 %v8908_v45, %v4118_v38 }
 0x2bc   : > { %10438 = vst [vmem:[#allocation52_spill] sm:$0xff] %v8966_v22  ;;  %v6261_v1 = vadd.f32 %v6260_v21, %v6259_v18  ;;  %v6262_v43 = vpop.f32.mrb[138].mxu0  ;;  %v4290_v41 = vadd.f32 %v4289_v53, %v4288_v35  ;;  %v10196_v39 = vmax.f32 %v8966_v22, 0.0  ;;  %v8978_v42 = vadd.f32 %v8908_v45, %v4121_v8 }
 0x2bd   : > { %v6263_v40 = vpop.f32.mrb[139].mxu0  ;;  %v6381_v13 = vpop.f32.mrb[136].mxu1  ;;  %4799 = vadd.xlane.f32.xlu0 %v4287_v4  ;;  %v8983_v38 = vadd.f32 %v8908_v45, %v4119_v23  ;;  %v10441_v23 = vmax.f32 %v8973_v62, 0.0 }
 0x2be   : > { %10439 = vst [vmem:[#allocation15_spill] sm:$0xff] %v8978_v42  ;;  %v6264_v21 = vadd.f32 %v6263_v40, %v6262_v43  ;;  %v4021_v53 = vadd.f32 %v6381_v13, %v8866_v28  ;;  %v4012_v35 = vpop.f32.mrb[137].mxu1  ;;  %v4297_v8 = vsel %vm1127_vm2, %v10196_v39, 0.0  ;;  %v10197_v34 = vmax.f32 %v8978_v42, 0.0 }
 0x2bf   : > { %10440 = vst [vmem:[#allocation25_spill] sm:$0xff] %v8983_v38  ;;  %v4013_v4 = vadd.f32 %v4012_v35, %v8854_v54  ;;  %v6382_v36 = vpop.f32.mrb[138].mxu1  ;;  %4809 = vadd.xlane.f32.xlu1 %v4297_v8  ;;  %v4292_v47 = vadd.f32 %v4291_v52, %v4290_v41  ;;  %v4293_v3 = vsel %vm1127_vm2, %v10441_v23, 0.0  ;;  %v10198_v40 = vmax.f32 %v8983_v38, 0.0 }
 0x2c0   : > { %v4124_v28 = vmul.f32 %v8898_v7, %v4021_v53  ;;  %v4024_v43 = vadd.f32 %v6382_v36, %v8871_v46  ;;  %v4015_v13 = vpop.f32.mrb[139].mxu1  ;;  %v4299_v39 = vsel %vm1127_vm2, %v10197_v34, 0.0  ;;  %v9002_v54 = vadd.f32 %v6261_v1, %v8836_v15 }
 0x2c1   : > { %v4122_v52 = vmul.f32 %v8898_v7, %v4013_v4  ;;  %v4016_v41 = vadd.f32 %v4015_v13, %v8859_v33  ;;  %v9006_v35 = vpop.xlane.xlu0 %4525  ;;  %4811 = vadd.xlane.f32.xlu0 %v4299_v39  ;;  %v4294_v23 = vadd.f32 %v4293_v3, %v4292_v47  ;;  %v4295_v46 = vsel %vm1127_vm2, %v10198_v40, 0.0 }
 0x2c2   : > { %v4125_v36 = vmul.f32 %v8898_v7, %v4024_v43  ;;  %v9014_v53 = vsub.s32 %v8925_v25, %v8935_v16  ;;  %v6265_v15 = vpop.f32.mrb[140].mxu0  ;;  %v9017_v1 = vadd.f32 %v6264_v21, %v8841_v50  ;;  %v10442_v33 = vmax.f32 %v8770_v24, 0.0 }
 0x2c3   : > { %v4123_v13 = vmul.f32 %v8898_v7, %v4016_v41  ;;  %v6266_v34 = vpop.f32.mrb[141].mxu0  ;;  %4805 = vadd.xlane.f32.xlu1 %v4293_v3  ;;  %v4296_v43 = vadd.f32 %v4295_v46, %v4294_v23  ;;  %v9027_v25 = vadd.f32 %v8908_v45, %v4122_v52  ;;  %v10444_v21 = vmax.f32 %v8774_v0, 0.0 }
 0x2c4   : > { %v9022_v4 = vsel %vm1127_vm2, %v10442_v33, 0.0  ;;  %v6267_v40 = vadd.f32 %v6266_v34, %v6265_v15  ;;  %v4524_v18 = vpop.xlane.xlu1 %4523  ;;  %v6268_v50 = vpop.f32.mrb[142].mxu0  ;;  %v9035_v33 = vadd.f32 %v8908_v45, %v4124_v28  ;;  %v10446_v41 = vmax.f32 %v8777_v63, 0.0 }
 0x2c5   : > { %10443 = vst [vmem:[#allocation54_spill] sm:$0xff] %v9027_v25  ;;  %v9032_v24 = vsel %vm1127_vm2, %v10444_v21, 0.0  ;;  %v9043_v23 = vadd.f32 %v8908_v45, %v4123_v13  ;;  %v4627_v34 = vrot.slane %v4524_v18, %v8970_v30  ;;  %v6269_v52 = vpop.f32.mrb[143].mxu0  ;;  %v4522_v15 = vpop.xlane.xlu0 %4521  ;;  %4807 = vadd.xlane.f32.xlu0 %v4295_v46  ;;  %v4298_v47 = vadd.f32 %v4297_v8, %v4296_v43 }
 0x2c6   : > { %10445 = vst [vmem:[#allocation10_spill] sm:$0xff] %v9035_v33  ;;  %v9040_v3 = vsel %vm1127_vm2, %v10446_v41, 0.0  ;;  %v10205_v21 = vmax.f32 %v9027_v25, 0.0  ;;  %v9048_v0 = vadd.f32 %v8908_v45, %v4125_v36  ;;  %v6270_v28 = vadd.f32 %v6269_v52, %v6268_v50  ;;  %v6385_v42 = vpop.f32.mrb[140].mxu1 }
 0x2c7   : > { %10447 = vst [vmem:[#allocation23_spill] sm:$0xff] %v9043_v23  ;;  %v4622_v63 = vrot.slane %v4522_v15, %v9014_v53  ;;  %v9052_v41 = vadd.f32 %v6267_v40, %v8846_v26  ;;  %v10206_v13 = vmax.f32 %v9043_v23, 0.0  ;;  %v4037_v18 = vadd.f32 %v6385_v42, %v8886_v11  ;;  %v4028_v22 = vpop.f32.mrb[141].mxu1 }
 0x2c8   : > { %10448 = vst [vmem:[#allocation11_spill] sm:$0xff] %v9048_v0  ;;  %v4300_v38 = vadd.f32 %v4299_v39, %v4298_v47  ;;  %v9059_v8 = vsel %vm1127_vm2, %v10205_v21, 0.0  ;;  %v4029_v36 = vadd.f32 %v4028_v22, %v8876_v61  ;;  %v6386_v43 = vpop.f32.mrb[142].mxu1  ;;  %v9064_v50 = vadd.f32 %v6270_v28, %v8851_v27 }
 0x2c9   : > { %v4629_v46 = vsel %vm4628_vm5, %v4627_v34, %v4622_v63  ;;  %v4265_v26 = vadd.f32 %v9032_v24, %v8788_v59  ;;  %v10449_v11 = vmax.f32 %v8782_v9, 0.0  ;;  %v4128_v42 = vmul.f32 %v8898_v7, %v4037_v18  ;;  %v4534_v47 = vpop.xlane.xlu1 %4533  ;;  %v4031_v63 = vpop.f32.mrb[143].mxu1 }
 0x2ca   : > { %v4040_v40 = vadd.f32 %v6386_v43, %v8891_v56  ;;  %v10208_v61 = vmax.f32 %v9035_v33, 0.0  ;;  %v4633_v27 = vrot.slane %v9006_v35, %v9014_v53  ;;  %v4126_v22 = vmul.f32 %v8898_v7, %v4029_v36  ;;  %v4528_v34 = vpop.xlane.xlu0 %4527  ;;  %v6271_v52 = vpop.f32.mrb[144].mxu0 }
 0x2cb   : > { %v9071_v39 = vsel %vm1127_vm2, %v10449_v11, 0.0  ;;  %v4032_v59 = vadd.f32 %v4031_v63, %v8881_v6  ;;  %v4302_v15 = vadd.f32 %v9059_v8, %v4300_v38  ;;  %v9083_v18 = vadd.f32 %v8908_v45, %v4128_v42  ;;  %v6272_v43 = vpop.f32.mrb[145].mxu0 }
 0x2cc   : > { %v4637_v56 = vrot.slane %v4528_v34, %v8970_v30  ;;  %v9089_v35 = vsel %vm1127_vm2, %v10206_v13, 0.0  ;;  %v9092_v6 = vadd.f32 %v8908_v45, %v4126_v22  ;;  %v6273_v38 = vadd.f32 %v6272_v43, %v6271_v52  ;;  %v6274_v11 = vpop.f32.mrb[146].mxu0 }
 0x2cd   : > { %10450 = vst [vmem:[#allocation13_spill] sm:$0xff] %v9083_v18  ;;  %v4127_v36 = vmul.f32 %v8898_v7, %v4032_v59  ;;  %v9096_v63 = vadd.f32 %v9071_v39, %v4265_v26  ;;  %v4129_v42 = vmul.f32 %v8898_v7, %v4040_v40  ;;  %v6275_v21 = vpop.f32.mrb[147].mxu0  ;;  %v9103_v13 = vsel %vm1127_vm2, %v10208_v61, 0.0  ;;  %v6389_v43 = vpop.f32.mrb[144].mxu1 }
 0x2ce   : > { %v4638_v34 = vsel %vm4628_vm5, %v4637_v56, %v4633_v27  ;;  %v4651_v28 = vrot.slane %v4534_v47, %v9014_v53  ;;  %v4536_v52 = vpop.xlane.xlu0 %4535  ;;  %v4304_v40 = vadd.f32 %v9089_v35, %v4302_v15  ;;  %v6276_v56 = vadd.f32 %v6275_v21, %v6274_v11  ;;  %v4044_v61 = vpop.f32.mrb[145].mxu1 }
 0x2cf   : > { %v9108_v59 = vadd.f32 %v8908_v45, %v4127_v36  ;;  %v4766_v26 = vsel %vm4765_vm6, %v4638_v34, %v4629_v46  ;;  %v4655_v33 = vrot.slane %v4536_v52, %v8970_v30  ;;  %v10452_v9 = vmax.f32 %v9048_v0, 0.0  ;;  %v4530_v46 = vpop.xlane.xlu1 %4529  ;;  %v6390_v23 = vpop.f32.mrb[146].mxu1 }
 0x2d0   : > { %v4053_v34 = vadd.f32 %v6389_v43, %v8946_v29  ;;  %v4045_v15 = vadd.f32 %v4044_v61, %v8902_v32  ;;  %v9124_v21 = vadd.f32 %v8908_v45, %v4129_v42  ;;  %v4056_v52 = vadd.f32 %v6390_v23, %v8954_v10 }
 0x2d1   : > { %10451 = vst [vmem:[#allocation32_spill] sm:$0xff] %v9108_v59  ;;  %v9117_v22 = vsel %vm1127_vm2, %v10452_v9, 0.0  ;;  %v4656_v11 = vsel %vm4628_vm5, %v4655_v33, %v4651_v28  ;;  %v4047_v9 = vpop.f32.mrb[147].mxu1  ;;  %v9129_v27 = vadd.f32 %v6273_v38, %v8856_v20  ;;  %v4306_v61 = vadd.f32 %v9103_v13, %v4304_v40 }
 0x2d2   : > { %10453 = vst [vmem:[#allocation9_spill] sm:$0xff] %v9124_v21  ;;  %v4132_v36 = vmul.f32 %v8898_v7, %v4053_v34  ;;  %v4130_v47 = vmul.f32 %v8898_v7, %v4045_v15  ;;  %v4048_v29 = vadd.f32 %v4047_v9, %v8913_v57  ;;  %v4532_v32 = vpop.xlane.xlu0 %4531  ;;  %v4642_v42 = vrot.slane %v4530_v46, %v9014_v53  ;;  %v6277_v10 = vpop.f32.mrb[148].mxu0 }
 0x2d3   : > { %v4133_v43 = vmul.f32 %v8898_v7, %v4056_v52  ;;  %v4646_v33 = vrot.slane %v4532_v32, %v8970_v30  ;;  %v9139_v23 = vadd.f32 %v6276_v56, %v8861_v12  ;;  %v10454_v20 = vmax.f32 %v9092_v6, 0.0  ;;  %v6278_v40 = vpop.f32.mrb[149].mxu0 }
 0x2d4   : > { %v10455_v57 = vmax.f32 %v9108_v59, 0.0  ;;  %v9152_v46 = vadd.f32 %v8908_v45, %v4132_v36  ;;  %v9155_v34 = vadd.f32 %v8908_v45, %v4130_v47  ;;  %v4131_v12 = vmul.f32 %v8898_v7, %v4048_v29  ;;  %v6280_v52 = vpop.f32.mrb[150].mxu0 }
 0x2d5   : > { %v9144_v28 = vsel %vm1127_vm2, %v10454_v20, 0.0  ;;  %v4647_v56 = vsel %vm4628_vm5, %v4646_v33, %v4642_v42  ;;  %v6279_v15 = vadd.f32 %v6278_v40, %v6277_v10  ;;  %v6393_v9 = vpop.f32.mrb[148].mxu1  ;;  %v9160_v32 = vadd.f32 %v8908_v45, %v4133_v43 }
 0x2d6   : > { %v9149_v38 = vsel %vm1127_vm2, %v10455_v57, 0.0  ;;  %10456 = vst [vmem:[#allocation22_spill] sm:$0xff] %v9152_v46  ;;  %10457 = vst [vmem:[#allocation27_spill] sm:$0xff] %v9155_v34  ;;  %v4768_v20 = vsel %vm4767_vm7, %v4647_v56, %v4766_v26  ;;  %v6281_v57 = vpop.f32.mrb[151].mxu0  ;;  %v4069_v0 = vadd.f32 %v6393_v9, %v9052_v41  ;;  %v4060_v36 = vpop.f32.mrb[149].mxu1  ;;  %v10215_v25 = vmax.f32 %v9152_v46, 0.0 }
 0x2d7   : > { %10458 = vst [vmem:[#allocation29_spill] sm:$0xff] %v9160_v32  ;;  %v4308_v47 = vadd.f32 %v9117_v22, %v4306_v61  ;;  %v6282_v59 = vadd.f32 %v6281_v57, %v6280_v52  ;;  %v4061_v29 = vadd.f32 %v4060_v36, %v9002_v54  ;;  %v6394_v42 = vpop.f32.mrb[150].mxu1  ;;  %v10214_v33 = vmax.f32 %v9160_v32, 0.0 }
 0x2d8   : > { %v3924_v10 = vadd.f32 %v6279_v15, %v8868_v51  ;;  %v4136_v43 = vmul.f32 %v8898_v7, %v4069_v0  ;;  %v4072_v26 = vadd.f32 %v6394_v42, %v9064_v50  ;;  %v9174_v41 = vsel %vm1127_vm2, %v10215_v25, 0.0  ;;  %v4063_v40 = vpop.f32.mrb[151].mxu1 }
 0x2d9   : > { %v10216_v61 = vmax.f32 %v9155_v34, 0.0  ;;  %v4134_v56 = vmul.f32 %v8898_v7, %v4061_v29  ;;  %4833 = vadd.xlane.f32.xlu1 %v9174_v41  ;;  %v4064_v54 = vadd.f32 %v4063_v40, %v9017_v1  ;;  %v9183_v0 = vsel %vm1127_vm2, %v10214_v33, 0.0 }
 0x2da   : > { %v9186_v51 = vadd.f32 %v8908_v45, %v4131_v12  ;;  %v4137_v50 = vmul.f32 %v8898_v7, %v4072_v26  ;;  %4835 = vadd.xlane.f32.xlu0 %v9183_v0  ;;  %v6283_v15 = vpop.f32.mrb[152].mxu0  ;;  %v3927_v52 = vadd.f32 %v6282_v59, %v8873_v2  ;;  %v9192_v9 = vadd.f32 %v8908_v45, %v4136_v43  ;;  %v9203_v26 = vpop.xlane.xlu1 %4537 }
 0x2db   : > { %v4310_v1 = vadd.f32 %v9144_v28, %v4308_v47  ;;  %v4135_v57 = vmul.f32 %v8898_v7, %v4064_v54  ;;  %v6284_v36 = vpop.f32.mrb[153].mxu0  ;;  %v9198_v12 = vadd.f32 %v8908_v45, %v4134_v56  ;;  %v9201_v42 = vsel %vm4769_vm8, %v4656_v11, %v4768_v20 }
 0x2dc   : > { %10459 = vst [vmem:[#allocation30_spill] sm:$0xff] %v9186_v51  ;;  %10460 = vst [vmem:[#allocation20_spill] sm:$0xff] %v9192_v9  ;;  %v10218_v29 = vmax.f32 %v9186_v51, 0.0  ;;  %v6285_v40 = vadd.f32 %v6284_v36, %v6283_v15  ;;  %v4317_v2 = vsel %vm1127_vm2, %v10216_v61, 0.0  ;;  %v6286_v59 = vpop.f32.mrb[154].mxu0  ;;  %v10220_v47 = vmax.f32 %v9192_v9, 0.0 }
 0x2dd   : > { %10461 = vst [vmem:[#allocation18_spill] sm:$0xff] %v9198_v12  ;;  %v9210_v43 = vadd.f32 %v8908_v45, %v4137_v50  ;;  %4829 = vadd.xlane.f32.xlu1 %v4317_v2  ;;  %v6287_v56 = vpop.f32.mrb[155].mxu0  ;;  %v6397_v33 = vpop.f32.mrb[152].mxu1  ;;  %v9217_v20 = vadd.f32 %v8908_v45, %v4135_v57  ;;  %v4312_v15 = vadd.f32 %v9149_v38, %v4310_v1  ;;  %v10464_v32 = vmax.f32 %v9083_v18, 0.0 }
 0x2de   : > { %v4319_v11 = vsel %vm1127_vm2, %v10218_v29, 0.0  ;;  %v6288_v36 = vadd.f32 %v6287_v56, %v6286_v59  ;;  %v4085_v25 = vadd.f32 %v6397_v33, %v3924_v10  ;;  %v4076_v61 = vpop.f32.mrb[153].mxu1  ;;  %v9223_v50 = vsel %vm1127_vm2, %v10220_v47, 0.0 }
 0x2df   : > { %10462 = vst [vmem:[#allocation55_spill] sm:$0xff] %v9210_v43  ;;  %10463 = vst [vmem:[#allocation56_spill] sm:$0xff] %v9217_v20  ;;  %4831 = vadd.xlane.f32.xlu0 %v4319_v11  ;;  %v10222_v54 = vmax.f32 %v9210_v43, 0.0  ;;  %v9229_v29 = vsel %vm1127_vm2, %v10464_v32, 0.0  ;;  %v4077_v57 = vadd.f32 %v4076_v61, %v9129_v27  ;;  %v6398_v46 = vpop.f32.mrb[154].mxu1  ;;  %v10227_v1 = vmax.f32 %v9198_v12, 0.0 }
 0x2e0   : > { %v3932_v33 = vadd.f32 %v6285_v40, %v8878_v44  ;;  %v4140_v10 = vmul.f32 %v8898_v7, %v4085_v25  ;;  %v4088_v59 = vadd.f32 %v6398_v46, %v3927_v52  ;;  %v4079_v56 = vpop.f32.mrb[155].mxu1  ;;  %v3935_v9 = vadd.f32 %v6288_v36, %v8883_v58 }
 0x2e1   : > { %v9238_v47 = vsel %vm1127_vm2, %v10222_v54, 0.0  ;;  %4841 = vadd.xlane.f32.xlu1 %v9223_v50  ;;  %v4558_v32 = vpop.xlane.xlu1 %4557  ;;  %v4080_v27 = vadd.f32 %v4079_v56, %v9139_v23  ;;  %v4314_v44 = vadd.f32 %v9229_v29, %v4312_v15  ;;  %v4269_v25 = vadd.f32 %v9022_v4, %v9096_v63 }
 0x2e2   : > { %v10465_v46 = vmax.f32 %v9124_v21, 0.0  ;;  %v4138_v40 = vmul.f32 %v8898_v7, %v4077_v57  ;;  %v4141_v58 = vmul.f32 %v8898_v7, %v4088_v59  ;;  %v6289_v36 = vpop.f32.mrb[156].mxu0  ;;  %v9256_v23 = vadd.f32 %v8908_v45, %v4140_v10 }
 0x2e3   : > { %4843 = vadd.xlane.f32.xlu0 %v9238_v47  ;;  %v4139_v56 = vmul.f32 %v8898_v7, %v4080_v27  ;;  %v6290_v63 = vpop.f32.mrb[157].mxu0  ;;  %v4560_v54 = vpop.xlane.xlu0 %4559  ;;  %v4705_v61 = vrot.slane %v4558_v32, %v9014_v53  ;;  %v10466_v12 = vmax.f32 %v9217_v20, 0.0 }
 0x2e4   : > { %v9250_v52 = vsel %vm1127_vm2, %v10465_v46, 0.0  ;;  %v4325_v46 = vsel %vm1127_vm2, %v10227_v1, 0.0  ;;  %v9265_v59 = vadd.f32 %v8908_v45, %v4141_v58  ;;  %v6291_v43 = vadd.f32 %v6290_v63, %v6289_v36  ;;  %v6292_v21 = vpop.f32.mrb[158].mxu0 }
 0x2e5   : > { %v4316_v57 = vadd.f32 %v9250_v52, %v4314_v44  ;;  %v4709_v10 = vrot.slane %v4560_v54, %v8970_v30  ;;  %v9270_v15 = vadd.f32 %v8908_v45, %v4139_v56  ;;  %4837 = vadd.xlane.f32.xlu1 %v4325_v46  ;;  %v4554_v27 = vpop.xlane.xlu1 %4553  ;;  %v6293_v18 = vpop.f32.mrb[159].mxu0  ;;  %v4327_v1 = vsel %vm1127_vm2, %v10466_v12, 0.0 }
 0x2e6   : > { %v4271_v58 = vadd.f32 %v9040_v3, %v4269_v25  ;;  %v6294_v32 = vadd.f32 %v6293_v18, %v6292_v21  ;;  %v6401_v36 = vpop.f32.mrb[156].mxu1  ;;  %v9278_v54 = vadd.f32 %v8908_v45, %v4138_v40  ;;  %v10467_v56 = vmax.f32 %v8800_v19, 0.0 }
 0x2e7   : > { %v4318_v44 = vadd.f32 %v4317_v2, %v4316_v57  ;;  %v4710_v51 = vsel %vm4628_vm5, %v4709_v10, %v4705_v61  ;;  %4839 = vadd.xlane.f32.xlu0 %v4327_v1  ;;  %v3940_v20 = vadd.f32 %v6291_v43, %v8888_v55  ;;  %v4092_v34 = vpop.f32.mrb[157].mxu1  ;;  %v4556_v12 = vpop.xlane.xlu0 %4555  ;;  %v4696_v25 = vrot.slane %v4554_v27, %v9014_v53 }
 0x2e8   : > { %v9283_v63 = vsel %vm1127_vm2, %v10467_v56, 0.0  ;;  %v4093_v57 = vadd.f32 %v4092_v34, %v3932_v33  ;;  %v4700_v18 = vrot.slane %v4556_v12, %v8970_v30  ;;  %v3943_v21 = vadd.f32 %v6294_v32, %v8893_v14  ;;  %v6402_v61 = vpop.f32.mrb[158].mxu1 }
 0x2e9   : > { %v4320_v2 = vadd.f32 %v4319_v11, %v4318_v44  ;;  %v4101_v40 = vadd.f32 %v6401_v36, %v3940_v20  ;;  %4569 = vadd.xlane.f32.xlu1 %v9032_v24  ;;  %v4566_v10 = vpop.xlane.xlu1 %4565  ;;  %v4095_v19 = vpop.f32.mrb[159].mxu1  ;;  %v4273_v55 = vadd.f32 %v9283_v63, %v4271_v58  ;;  %v10468_v43 = vmax.f32 %v8808_v60, 0.0 }
 0x2ea   : > { %v4142_v34 = vmul.f32 %v8898_v7, %v4093_v57  ;;  %v4701_v33 = vsel %vm4628_vm5, %v4700_v18, %v4696_v25  ;;  %v4104_v14 = vadd.f32 %v6402_v61, %v3943_v21  ;;  %v4209_v20 = vmax.f32 %v9278_v54, 0.0 }
 0x2eb   : > { %v4322_v56 = vadd.f32 %v9174_v41, %v4320_v2  ;;  %v9295_v11 = vsel %vm1127_vm2, %v10468_v43, 0.0  ;;  %v4144_v24 = vmul.f32 %v8898_v7, %v4101_v40  ;;  %v4779_v27 = vsel %vm4765_vm6, %v4710_v51, %v4701_v33  ;;  %v4568_v41 = vpop.xlane.xlu0 %4567 }
 0x2ec   : > { %v4096_v44 = vadd.f32 %v4095_v19, %v3935_v9  ;;  %v9304_v32 = vadd.f32 %v8908_v45, %v4142_v34  ;;  %v4145_v36 = vmul.f32 %v8898_v7, %v4104_v14  ;;  %v4723_v12 = vrot.slane %v4566_v10, %v9014_v53 }
 0x2ed   : > { %v4324_v58 = vadd.f32 %v9183_v0, %v4322_v56  ;;  %v4727_v2 = vrot.slane %v4568_v41, %v8970_v30  ;;  %v9310_v25 = vadd.f32 %v8908_v45, %v4144_v24  ;;  %4813 = vadd.xlane.f32.xlu1 %v9059_v8  ;;  %v4562_v19 = vpop.xlane.xlu1 %4561  ;;  %v3033_v0 = vmax.f32 %v8793_v49, 0.0 }
 0x2ee   : > { %v4143_v57 = vmul.f32 %v8898_v7, %v4096_v44  ;;  %v9316_v9 = vadd.f32 %v8908_v45, %v4145_v36  ;;  %v4275_v10 = vadd.f32 %v9295_v11, %v4273_v55  ;;  %v4210_v7 = vmax.f32 %v9270_v15, 0.0 }
 0x2ef   : > { %v4326_v51 = vadd.f32 %v4325_v46, %v4324_v58  ;;  %v4728_v18 = vsel %vm4628_vm5, %v4727_v2, %v4723_v12  ;;  %v4564_v61 = vpop.xlane.xlu0 %4563  ;;  %v4714_v8 = vrot.slane %v4562_v19, %v9014_v53  ;;  %v4333_v56 = vsel %vm1127_vm2, %v4209_v20, 0.0 }
 0x2f0   : > { %v9320_v21 = vadd.f32 %v8908_v45, %v4143_v57  ;;  %v4718_v46 = vrot.slane %v4564_v61, %v8970_v30  ;;  %v4276_v45 = vsel %vm1127_vm2, %v3033_v0, 0.0  ;;  %v4211_v24 = vmax.f32 %v9256_v23, 0.0 }
 0x2f1   : > { %v4328_v40 = vadd.f32 %v4327_v1, %v4326_v51  ;;  %4845 = vadd.xlane.f32.xlu1 %v4333_v56  ;;  %v3034_v1 = vmax.f32 %v8803_v5, 0.0  ;;  %v4277_v14 = vadd.f32 %v4276_v45, %v4275_v10  ;;  %v9341_v44 = vsel %vm1127_vm2, %v4210_v7, 0.0 }
 0x2f2   : > { %v4719_v55 = vsel %vm4628_vm5, %v4718_v46, %v4714_v8  ;;  %v4213_v58 = vmax.f32 %v9304_v32, 0.0  ;;  %v4214_v2 = vmax.f32 %v9320_v21, 0.0  ;;  %v10232_v8 = vmax.f32 %v9316_v9, 0.0  ;;  %v10558_v32 = vld [vmem:[#allocation38_spill] sm:$0xff] }
 0x2f3   : > { %v4330_v43 = vadd.f32 %v9223_v50, %v4328_v40  ;;  %v4780_v34 = vsel %vm4767_vm7, %v4719_v55, %v4779_v27  ;;  %v9350_v27 = vsel %vm1127_vm2, %v3034_v1, 0.0  ;;  %v4215_v40 = vmax.f32 %v9310_v25, 0.0 }
 0x2f4   : > { %v9344_v50 = vsel %vm4769_vm8, %v4728_v18, %v4780_v34  ;;  %v4279_v12 = vadd.f32 %v9350_v27, %v4277_v14  ;;  %v4341_v19 = vsel %vm1127_vm2, %v4213_v58, 0.0  ;;  %v9374_v10 = vsel %vm1127_vm2, %v4214_v2, 0.0 }
 0x2f5   : > { %v4332_v33 = vadd.f32 %v9238_v47, %v4330_v43  ;;  %4541 = vadd.xlane.f32.xlu1 %v8636_v48  ;;  %v4212_v47 = vmax.f32 %v9265_v59, 0.0  ;;  %v4337_v48 = vsel %vm1127_vm2, %v4211_v24, 0.0  ;;  %v9382_v43 = vsel %vm1127_vm2, %v4215_v40, 0.0 }
 0x2f6   : > { %v4280_v61 = vrot.slane %v4279_v12, 4  ;;  %v9388_v34 = vsel %vm1127_vm2, %v10232_v8, 0.0  ;;  %v10553_v15 = vmax.f32 %v8808_v60, 0.0  ;;  %v10578_v59 = vmax.f32 %v9316_v9, 0.0 }
 0x2f7   : > { %v4334_v41 = vadd.f32 %v4333_v56, %v4332_v33  ;;  %v9367_v51 = vsel %vm1127_vm2, %v4212_v47, 0.0 }
 0x2f8   : > { %v4281_v56 = vadd.f32 %v4280_v61, %v4279_v12 }
 0x2f9   : > { %v4336_v36 = vadd.f32 %v9341_v44, %v4334_v41  ;;  %4573 = vadd.xlane.f32.xlu1 %v9022_v4 }
 0x2fa   : > { %v4282_v33 = vrot.slane %v4281_v56, 2 }
 0x2fb   : > { %v4338_v57 = vadd.f32 %v4337_v48, %v4336_v36 }
 0x2fc   : > { %v4283_v36 = vadd.f32 %v4282_v33, %v4281_v56 }
 0x2fd   : > { %v4340_v18 = vadd.f32 %v9367_v51, %v4338_v57  ;;  %4817 = vadd.xlane.f32.xlu1 %v9103_v13 }
 0x2ff   : > { %v4342_v4 = vadd.f32 %v4341_v19, %v4340_v18 }
 0x301   : > { %v4344_v46 = vadd.f32 %v9374_v10, %v4342_v4  ;;  %4849 = vadd.xlane.f32.xlu1 %v4337_v48  ;;  %v4284_v48 = vrot.slane %v4283_v36, 1 }
 0x303   : > { %v4346_v55 = vadd.f32 %v9382_v43, %v4344_v46  ;;  %v4285_v61 = vadd.f32 %v4284_v48, %v4283_v36 }
 0x305   : > { %v4348_v13 = vadd.f32 %v9388_v34, %v4346_v55  ;;  %4545 = vadd.xlane.f32.xlu1 %v8660_v17  ;;  %v6551_v17 = vld [vmem:[%s10022_s10] sm:$0xff]  }
 0x306   : > { %6416 = vmatpush3.bf16.msra.mxu1 %v6551_v17 }
 0x307   : > { %v4349_v14 = vrot.slane %v4348_v13, 4  ;;  %6417 = vmatprep.subr.bf16.mxu1 %v10423_v31 }
 0x309   : > { %v4350_v41 = vadd.f32 %v4349_v14, %v4348_v13  ;;  %4577 = vadd.xlane.f32.xlu1 %v9283_v63 }
 0x30b   : > { %v4351_v12 = vrot.slane %v4350_v41, 2 }
 0x30d   : > { %v4352_v57 = vadd.f32 %v4351_v12, %v4350_v41  ;;  %4821 = vadd.xlane.f32.xlu1 %v9144_v28  ;;  %v6552_v28 = vld [vmem:[%s10022_s10 + $0x8] sm:$0xff]  }
 0x30e   : > { %6418 = vmatpush3.bf16.msra.mxu1 %v6552_v28 }
 0x30f   : > { %v4353_v18 = vrot.slane %v4352_v57, 1 }
 0x311   : > { %v4354_v4 = vadd.f32 %v4353_v18, %v4352_v57  ;;  %4853 = vadd.xlane.f32.xlu1 %v4341_v19 }
 0x313   : > { %v4355_v46 = vadd.f32 %v4354_v4, %v4285_v61 }
 0x315   : > { %v4356_v8 = vmul.f32 0.00390625, %v4355_v46  ;;  %4549 = vadd.xlane.f32.xlu1 %v8689_v37 }
 0x317   : > { %v4357_v55 = vpack.c.bf16 %v4356_v8, %v4356_v8 }
 0x319   : > { %6412 = vmatmul.mubr.msk.bf16.vlgmr.msra.gmra.mrb[160].mxu0 %vm1127_vm2, %v4357_v55  ;;  %4581 = vadd.xlane.f32.xlu1 %v4276_v45 }
 0x344   : > { %v4802_v63 = vpop.xlane.xlu1 %4801 }
 0x345   : > { %v4905_v8 = vrot.slane %v4802_v63, %v9014_v53 }
 0x346   : > { %v4804_v19 = vpop.xlane.xlu0 %4803 }
 0x347   : > { %v4909_v37 = vrot.slane %v4804_v19, %v8970_v30 }
 0x348   : > { %v4798_v56 = vpop.xlane.xlu1 %4797 }
 0x349   : > { %v4910_v45 = vsel %vm4628_vm5, %v4909_v37, %v4905_v8  ;;  %v4896_v33 = vrot.slane %v4798_v56, %v9014_v53 }
 0x34a   : > { %v4800_v13 = vpop.xlane.xlu0 %4799 }
 0x34b   : > { %v4900_v14 = vrot.slane %v4800_v13, %v8970_v30 }
 0x34c   : > { %v4810_v41 = vpop.xlane.xlu1 %4809 }
 0x34d   : > { %v4901_v36 = vsel %vm4628_vm5, %v4900_v14, %v4896_v33  ;;  %v4923_v57 = vrot.slane %v4810_v41, %v9014_v53 }
 0x34e   : > { %v5037_v31 = vsel %vm4765_vm6, %v4910_v45, %v4901_v36  ;;  %v4812_v12 = vpop.xlane.xlu0 %4811 }
 0x34f   : > { %v4927_v48 = vrot.slane %v4812_v12, %v8970_v30 }
 0x350   : > { %v4806_v18 = vpop.xlane.xlu1 %4805 }
 0x351   : > { %v4928_v61 = vsel %vm4628_vm5, %v4927_v48, %v4923_v57  ;;  %v4914_v46 = vrot.slane %v4806_v18, %v9014_v53 }
 0x352   : > { %v4808_v4 = vpop.xlane.xlu0 %4807 }
 0x353   : > { %v4918_v55 = vrot.slane %v4808_v4, %v8970_v30 }
 0x355   : > { %v4919_v17 = vsel %vm4628_vm5, %v4918_v55, %v4914_v46 }
 0x356   : > { %v5038_v28 = vsel %vm4767_vm7, %v4919_v17, %v5037_v31 }
 0x357   : > { %v9418_v63 = vsel %vm4769_vm8, %v4928_v61, %v5038_v28 }
 0x366   : > { %v4834_v19 = vpop.xlane.xlu1 %4833 }
 0x367   : > { %v4836_v8 = vpop.xlane.xlu0 %4835  ;;  %v4977_v37 = vrot.slane %v4834_v19, %v9014_v53 }
 0x368   : > { %v4981_v56 = vrot.slane %v4836_v8, %v8970_v30 }
 0x36a   : > { %v4982_v45 = vsel %vm4628_vm5, %v4981_v56, %v4977_v37  ;;  %v4830_v13 = vpop.xlane.xlu1 %4829  ;;  %v4433_v37 = vld [vmem:[%s10020_s8] sm:$0x1] }
 0x36b   : > { %v4968_v14 = vrot.slane %v4830_v13, %v9014_v53 }
 0x36c   : > { %v4832_v33 = vpop.xlane.xlu0 %4831 }
 0x36d   : > { %v4972_v41 = vrot.slane %v4832_v33, %v8970_v30 }
 0x36e   : > { %v4842_v31 = vpop.xlane.xlu1 %4841 }
 0x36f   : > { %v4973_v36 = vsel %vm4628_vm5, %v4972_v41, %v4968_v14  ;;  %v4995_v48 = vrot.slane %v4842_v31, %v9014_v53 }
 0x370   : > { %v5044_v12 = vsel %vm4765_vm6, %v4982_v45, %v4973_v36  ;;  %v4844_v57 = vpop.xlane.xlu0 %4843  ;;  %v4435_v45 = vld [vmem:[%s10021_s9] sm:$0x1] }
 0x371   : > { %v4999_v18 = vrot.slane %v4844_v57, %v8970_v30  ;;  %v4443_v57 = vld [vmem:[%s10023_s11] sm:$0x1] }
 0x372   : > { %v4838_v4 = vpop.xlane.xlu1 %4837 }
 0x373   : > { %v5000_v61 = vsel %vm4628_vm5, %v4999_v18, %v4995_v48  ;;  %v4986_v55 = vrot.slane %v4838_v4, %v9014_v53 }
 0x374   : > { %v4840_v46 = vpop.xlane.xlu0 %4839 }
 0x375   : > { %v4990_v17 = vrot.slane %v4840_v46, %v8970_v30 }
 0x377   : > { %v4991_v28 = vsel %vm4628_vm5, %v4990_v17, %v4986_v55  ;;  %v10469_v55 = vld [vmem:[#allocation37_spill] sm:$0xff]  ;;  %v10470_v17 = vld [vmem:[#allocation36_spill] sm:$0xff] }
 0x378   : > { %v5045_v19 = vsel %vm4767_vm7, %v4991_v28, %v5044_v12  ;;  %v10471_v28 = vld [vmem:[#allocation44_spill] sm:$0xff] }
 0x379   : > { %v9435_v8 = vsel %vm4769_vm8, %v5000_v61, %v5045_v19 }
 0x3ec   : > { %v4427_v56 = vpop.f32.mrb[160].mxu0 }
 0x3ed   : > { %v4434_v13 = vmul.f32 %v4433_v37, %v4427_v56  ;;  %v6413_v33 = vpop.f32.mrb[161].mxu0 }
 0x3ee   : > { %v4430_v14 = vpop.f32.mrb[162].mxu0 }
 0x3ef   : > { %v4436_v41 = vadd.f32 %v4435_v45, %v4434_v13  ;;  %v6414_v36 = vpop.f32.mrb[163].mxu0 }
 0x3f1   : > { %v4437_v31 = vmax.f32 %v4436_v41, 0.0 }
 0x3f3   : > { %v4438_v12 = vpack.c.bf16 %v4437_v31, %v4437_v31 }
 0x3f5   : > { %6420 = vmatmul.mubr.msk.bf16.vlgmr.msra.gmra.mrb[160].mxu1 %vm4456_vm9, %v4438_v12 }
 0x4c8   : > { %v4494_v48 = vpop.f32.mrb[160].mxu1 }
 0x4c9   : > { %v9446_v18 = vadd.f32 %v4494_v48, %v4443_v57  ;;  %v6421_v61 = vpop.f32.mrb[161].mxu1 }
 0x4ca   : > { %v4497_v4 = vpop.f32.mrb[162].mxu1 }
 0x4cb   : > { %4501 = vrot.lane.b32.xlu0 %v9446_v18, %s6637_s23  ;;  %v6422_v46 = vpop.f32.mrb[163].mxu1 }
 0x4ea   : > { %4539 = vadd.xlane.f32.xlu0 %v10469_v55 }
 0x4ee   : > { %4571 = vadd.xlane.f32.xlu0 %v9071_v39  ;;  %v10472_v39 = vld [vmem:[#allocation48_spill] sm:$0xff] }
 0x4f2   : > { %4815 = vadd.xlane.f32.xlu0 %v9089_v35 }
 0x4f6   : > { %4847 = vadd.xlane.f32.xlu0 %v9341_v44 }
 0x4fa   : > { %4543 = vadd.xlane.f32.xlu0 %v10470_v17 }
 0x4fe   : > { %4575 = vadd.xlane.f32.xlu0 %v9040_v3 }
 0x502   : > { %4819 = vadd.xlane.f32.xlu0 %v9117_v22  ;;  %v9471_v22 = vpop.xlane.xlu1 %4569 }
 0x506   : > { %4851 = vadd.xlane.f32.xlu0 %v9367_v51 }
 0x50a   : > { %4547 = vadd.xlane.f32.xlu0 %v10471_v28 }
 0x50e   : > { %4579 = vadd.xlane.f32.xlu0 %v9295_v11 }
 0x512   : > { %4823 = vadd.xlane.f32.xlu0 %v9149_v38  ;;  %v4814_v38 = vpop.xlane.xlu1 %4813 }
 0x513   : > { %v4932_v56 = vrot.slane %v4814_v38, %v9014_v53 }
 0x516   : > { %4855 = vadd.xlane.f32.xlu0 %v9374_v10  ;;  %v4846_v11 = vpop.xlane.xlu1 %4845 }
 0x517   : > { %v5004_v14 = vrot.slane %v4846_v11, %v9014_v53 }
 0x51a   : > { %4551 = vadd.xlane.f32.xlu0 %v10472_v39  ;;  %v4542_v44 = vpop.xlane.xlu1 %4541 }
 0x51e   : > { %4583 = vadd.xlane.f32.xlu0 %v9350_v27  ;;  %v9478_v10 = vpop.xlane.xlu1 %4573 }
 0x522   : > { %4827 = vadd.xlane.f32.xlu0 %v9250_v52  ;;  %v4660_v52 = vrot.slane %v9203_v26, %v9014_v53 }
 0x526   : > { %4859 = vadd.xlane.f32.xlu0 %v9388_v34 }
 0x53d   : > { %v4502_v3 = vpop.permute.xlu0 %4501 }
 0x53e   : > { %v9467_v35 = vmax.f32 %v9446_v18, %v4502_v3 }
 0x540   : > { %4509 = vrot.lane.b32.xlu1 %v9467_v35, %s6637_s23 }
 0x564   : > { %4825 = vadd.xlane.f32.xlu1 %v9229_v29 }
 0x568   : > { %4857 = vadd.xlane.f32.xlu1 %v9382_v43  ;;  %v4818_v43 = vpop.xlane.xlu1 %4817 }
 0x569   : > { %v4941_v4 = vrot.slane %v4818_v43, %v9014_v53 }
 0x577   : > { %v4540_v27 = vpop.xlane.xlu0 %4539 }
 0x578   : > { %v4664_v51 = vrot.slane %v4540_v27, %v8970_v30 }
 0x57a   : > { %v4665_v34 = vsel %vm4628_vm5, %v4664_v51, %v4660_v52 }
 0x57b   : > { %v9483_v19 = vsel %vm4771_vm10, %v4665_v34, %v9201_v42  ;;  %v9485_v29 = vpop.xlane.xlu0 %4571  ;;  %v4850_v42 = vpop.xlane.xlu1 %4849 }
 0x57c   : > { %v5013_v39 = vrot.slane %v4850_v42, %v9014_v53 }
 0x57f   : > { %v4816_v37 = vpop.xlane.xlu0 %4815  ;;  %v4546_v57 = vpop.xlane.xlu1 %4545 }
 0x580   : > { %v4936_v45 = vrot.slane %v4816_v37, %v8970_v30 }
 0x582   : > { %v4937_v26 = vsel %vm4628_vm5, %v4936_v45, %v4932_v56 }
 0x583   : > { %v5040_v13 = vsel %vm4771_vm10, %v4937_v26, %v9418_v63  ;;  %v4848_v33 = vpop.xlane.xlu0 %4847  ;;  %v4578_v63 = vpop.xlane.xlu1 %4577 }
 0x584   : > { %v5008_v41 = vrot.slane %v4848_v33, %v8970_v30 }
 0x586   : > { %v5009_v36 = vsel %vm4628_vm5, %v5008_v41, %v5004_v14  ;;  %v4669_v41 = vrot.slane %v4542_v44, %v9014_v53 }
 0x587   : > { %v5047_v31 = vsel %vm4771_vm10, %v5009_v36, %v9435_v8  ;;  %v4544_v12 = vpop.xlane.xlu0 %4543  ;;  %v4822_v38 = vpop.xlane.xlu1 %4821 }
 0x588   : > { %v4950_v43 = vrot.slane %v4822_v38, %v9014_v53  ;;  %v4673_v56 = vrot.slane %v4544_v12, %v8970_v30  ;;  %v4736_v12 = vrot.slane %v9485_v29, %v8970_v30 }
 0x58b   : > { %v4576_v48 = vpop.xlane.xlu0 %4575  ;;  %v4854_v51 = vpop.xlane.xlu1 %4853 }
 0x58c   : > { %v5022_v42 = vrot.slane %v4854_v51, %v9014_v53 }
 0x58f   : > { %v4820_v61 = vpop.xlane.xlu0 %4819  ;;  %v4550_v26 = vpop.xlane.xlu1 %4549 }
 0x590   : > { %v4945_v46 = vrot.slane %v4820_v61, %v8970_v30  ;;  %v4674_v61 = vsel %vm4628_vm5, %v4673_v56, %v4669_v41  ;;  %v4687_v29 = vrot.slane %v4550_v26, %v9014_v53 }
 0x591   : > { %v4774_v38 = vsel %vm4773_vm11, %v4674_v61, %v9483_v19 }
 0x592   : > { %v4946_v55 = vsel %vm4628_vm5, %v4945_v46, %v4941_v4  ;;  %v4745_v4 = vrot.slane %v4576_v48, %v8970_v30  ;;  %v4750_v48 = vrot.slane %v4578_v63, %v9014_v53 }
 0x593   : > { %v4852_v17 = vpop.xlane.xlu0 %4851  ;;  %v5041_v28 = vsel %vm4773_vm11, %v4946_v55, %v5040_v13  ;;  %v4732_v55 = vrot.slane %v9471_v22, %v9014_v53 }
 0x594   : > { %v5017_v3 = vrot.slane %v4852_v17, %v8970_v30 }
 0x595   : > { %v4737_v22 = vsel %vm4628_vm5, %v4736_v12, %v4732_v55 }
 0x596   : > { %v5018_v8 = vsel %vm4628_vm5, %v5017_v3, %v5013_v39 }
 0x597   : > { %v4548_v11 = vpop.xlane.xlu0 %4547  ;;  %v5048_v27 = vsel %vm4773_vm11, %v5018_v8, %v5047_v31  ;;  %v4678_v31 = vrot.slane %v4546_v57, %v9014_v53  ;;  %v4741_v57 = vrot.slane %v9478_v10, %v9014_v53  ;;  %v4582_v8 = vpop.xlane.xlu1 %4581 }
 0x598   : > { %v4682_v13 = vrot.slane %v4548_v11, %v8970_v30  ;;  %v4759_v63 = vrot.slane %v4582_v8, %v9014_v53 }
 0x599   : > { %v4746_v11 = vsel %vm4628_vm5, %v4745_v4, %v4741_v57 }
 0x59a   : > { %v4683_v44 = vsel %vm4628_vm5, %v4682_v13, %v4678_v31 }
 0x59b   : > { %v4580_v52 = vpop.xlane.xlu0 %4579  ;;  %v4776_v10 = vsel %vm4775_vm12, %v4683_v44, %v4774_v38 }
 0x59c   : > { %v4754_v17 = vrot.slane %v4580_v52, %v8970_v30 }
 0x59e   : > { %v4755_v52 = vsel %vm4628_vm5, %v4754_v17, %v4750_v48 }
 0x59f   : > { %v4824_v34 = vpop.xlane.xlu0 %4823 }
 0x5a0   : > { %v4954_v37 = vrot.slane %v4824_v34, %v8970_v30 }
 0x5a2   : > { %v4955_v45 = vsel %vm4628_vm5, %v4954_v37, %v4950_v43  ;;  %v4782_v43 = vsel %vm4771_vm10, %v4737_v22, %v9344_v50  ;;  %v4505_v22 = vsub.f32 %v9446_v18, %v9467_v35 }
 0x5a3   : > { %v4856_v33 = vpop.xlane.xlu0 %4855  ;;  %v5042_v14 = vsel %vm4775_vm12, %v4955_v45, %v5041_v28  ;;  %v4783_v56 = vsel %vm4773_vm11, %v4746_v11, %v4782_v43 }
 0x5a4   : > { %v5026_v36 = vrot.slane %v4856_v33, %v8970_v30  ;;  %v4784_v26 = vsel %vm4775_vm12, %v4755_v52, %v4783_v56  ;;  %v4506_v38 = vmul.f32 1.442695, %v4505_v22 }
 0x5a6   : > { %v5027_v46 = vsel %vm4628_vm5, %v5026_v36, %v5022_v42 }
 0x5a7   : > { %v4552_v28 = vpop.xlane.xlu0 %4551  ;;  %v5049_v39 = vsel %vm4775_vm12, %v5027_v46, %v5048_v27 }
 0x5a8   : > { %v4691_v3 = vrot.slane %v4552_v28, %v8970_v30 }
 0x5aa   : > { %v4692_v27 = vsel %vm4628_vm5, %v4691_v3, %v4687_v29 }
 0x5ab   : > { %v4584_v51 = vpop.xlane.xlu0 %4583  ;;  %v4778_v34 = vsel %vm4777_vm13, %v4692_v27, %v4776_v10 }
 0x5ac   : > { %v4763_v37 = vrot.slane %v4584_v51, %v8970_v30  ;;  %v4789_v19 = vsel %vm4788_vm14, %v4778_v34, 0.0 }
 0x5ad   : > { %4790 = vadd.xlane.f32.xlu0 %v4789_v19 }
 0x5ae   : > { %v4764_v45 = vsel %vm4628_vm5, %v4763_v37, %v4759_v63 }
 0x5af   : > { %v4785_v13 = vsel %vm4777_vm13, %v4764_v45, %v4784_v26  ;;  %v4828_v31 = vpop.xlane.xlu0 %4827 }
 0x5b0   : > { %v4792_v33 = vsel %vm4788_vm14, %v4785_v13, 0.0  ;;  %v4963_v61 = vrot.slane %v4828_v31, %v8970_v30 }
 0x5b1   : > { %4793 = vadd.xlane.f32.xlu0 %v4792_v33 }
 0x5b2   : > { %v4510_v41 = vpop.permute.xlu1 %4509 }
 0x5b3   : > { %v4512_v42 = vsub.f32 %v9446_v18, %v4510_v41  ;;  %v4860_v46 = vpop.xlane.xlu0 %4859 }
 0x5b4   : > { %v5035_v28 = vrot.slane %v4860_v46, %v8970_v30 }
 0x5b5   : > { %v4513_v50 = vmul.f32 1.442695, %v4512_v42 }
 0x5b7   : > { %6553 = vpow2.f32 %v4513_v50 }
 0x5b8   : > { %6555 = vpow2.f32 %v4506_v38 }
 0x5c1   : > { %v9549_v36 = vpop.eup %6553 }
 0x5c2   : > { %4516 = vrot.lane.b32.xlu1 %v9549_v36, %s6637_s23 }
 0x5f1   : > { %v4826_v12 = vpop.xlane.xlu1 %4825 }
 0x5f2   : > { %v4959_v4 = vrot.slane %v4826_v12, %v9014_v53 }
 0x5f4   : > { %v4964_v55 = vsel %vm4628_vm5, %v4963_v61, %v4959_v4 }
 0x5f5   : > { %v4858_v44 = vpop.xlane.xlu1 %4857  ;;  %v5043_v17 = vsel %vm4777_vm13, %v4964_v55, %v5042_v14  ;;  %v6556_v14 = vpop.eup %6555 }
 0x5f6   : > { %v5031_v57 = vrot.slane %v4858_v44, %v9014_v53  ;;  %v5053_v29 = vsel %vm4788_vm14, %v5043_v17, 0.0  ;;  %v9569_v44 = vsub.s32 0, %v8935_v16 }
 0x5f7   : > { %5054 = vadd.xlane.f32.xlu0 %v5053_v29  ;;  %v9580_v29 = vsub.s32 6, %v8935_v16 }
 0x5f8   : > { %v5036_v3 = vsel %vm4628_vm5, %v5035_v28, %v5031_v57  ;;  %v9574_v28 = vsub.s32 1, %v8935_v16  ;;  %v9577_v57 = vsub.s32 2, %v8935_v16 }
 0x5f9   : > { %v5050_v48 = vsel %vm4777_vm13, %v5036_v3, %v5049_v39  ;;  %v9583_v3 = vsub.s32 3, %v8935_v16 }
 0x5fa   : > { %v5056_v8 = vsel %vm4788_vm14, %v5050_v48, 0.0  ;;  %v9586_v48 = vsub.s32 4, %v8935_v16 }
 0x5fb   : > { %5057 = vadd.xlane.f32.xlu0 %v5056_v8 }
 0x634   : > { %v4517_v11 = vpop.permute.xlu1 %4516 }
 0x635   : > { %v4519_v30 = vadd.f32 %v6556_v14, %v4517_v11 }
 0x637   : > { %6557 = vrcp.f32 %v4519_v30 }
 0x63a   : > { %v4791_v10 = vpop.xlane.xlu0 %4790 }
 0x63b   : > { %v4795_v51 = vmul.f32 0.0625, %v4791_v10 }
 0x63e   : > { %v4794_v52 = vpop.xlane.xlu0 %4793 }
 0x63f   : > { %v4796_v37 = vmul.f32 0.0625, %v4794_v52 }
 0x641   : > { %v6558_v53 = vpop.eup %6557 }
 0x642   : > { %v9565_v27 = vmul.f32 %v6558_v53, %v6556_v14  ;;  %5277 = vrot.lane.b32.xlu1 %v6558_v53, %s6637_s23 }
 0x684   : > { %v5055_v39 = vpop.xlane.xlu0 %5054 }
 0x685   : > { %v5059_v34 = vmul.f32 0.0625, %v5055_v39  ;;  %v9605_v39 = vsub.s32 5, %v8935_v16 }
 0x687   : > { %v5061_v63 = vmax.f32 %v4795_v51, %v5059_v34 }
 0x688   : > { %v5058_v43 = vpop.xlane.xlu0 %5057 }
 0x689   : > { %v5063_v18 = vsub.f32 %v4795_v51, %v5061_v63  ;;  %v5069_v35 = vsub.f32 %v5059_v34, %v5061_v63  ;;  %v5060_v19 = vmul.f32 0.0625, %v5058_v43 }
 0x68b   : > { %v5065_v56 = vmul.f32 1.442695, %v5063_v18  ;;  %v5071_v45 = vmul.f32 1.442695, %v5069_v35  ;;  %v5062_v26 = vmax.f32 %v4796_v37, %v5060_v19 }
 0x68d   : > { %6559 = vpow2.f32 %v5065_v56  ;;  %v5064_v13 = vsub.f32 %v4796_v37, %v5062_v26  ;;  %v5070_v33 = vsub.f32 %v5060_v19, %v5062_v26 }
 0x68e   : > { %6561 = vpow2.f32 %v5071_v45 }
 0x68f   : > { %v5067_v41 = vmul.f32 1.442695, %v5064_v13  ;;  %v5073_v42 = vmul.f32 1.442695, %v5070_v33 }
 0x691   : > { %6563 = vpow2.f32 %v5067_v41 }
 0x692   : > { %6565 = vpow2.f32 %v5073_v42 }
 0x697   : > { %v6560_v50 = vpop.eup %6559 }
 0x698   : > { %v6562_v31 = vpop.eup %6561 }
 0x699   : > { %v5075_v12 = vadd.f32 %v6562_v31, %v6560_v50 }
 0x69b   : > { %v6564_v61 = vpop.eup %6563  ;;  %6567 = vrcp.f32 %v5075_v12 }
 0x69c   : > { %v6566_v4 = vpop.eup %6565 }
 0x69d   : > { %v5076_v46 = vadd.f32 %v6566_v4, %v6564_v61 }
 0x69f   : > { %6569 = vrcp.f32 %v5076_v46 }
 0x6a5   : > { %v6568_v55 = vpop.eup %6567 }
 0x6a6   : > { %v9571_v17 = vmul.f32 %v6568_v55, %v6560_v50  ;;  %v9602_v52 = vmul.f32 %v6568_v55, %v6562_v31  ;;  %v9638_v31 = vsub.s32 7, %v8935_v16 }
 0x6a8   : > { %v5091_v38 = vrot.slane %v9571_v17, %v9574_v28  ;;  %v5087_v14 = vrot.slane %v9571_v17, %v9569_v44  ;;  %v5095_v11 = vrot.slane %v9571_v17, %v9577_v57  ;;  %v5111_v30 = vrot.slane %v9571_v17, %v9580_v29 }
 0x6a9   : > { %v6570_v8 = vpop.eup %6569  ;;  %v5099_v53 = vrot.slane %v9571_v17, %v9583_v3  ;;  %v5103_v10 = vrot.slane %v9571_v17, %v9586_v48  ;;  %v5292_v46 = vrot.slane %v9602_v52, %v9574_v28  ;;  %v5107_v16 = vrot.slane %v9571_v17, %v9605_v39 }
 0x6aa   : > { %v9588_v22 = vmul.f32 %v6570_v8, %v6564_v61  ;;  %v5165_v51 = vadd.f32 %v5091_v38, %v9565_v27  ;;  %v5164_v34 = vadd.f32 %v5087_v14, %v9565_v27  ;;  %v5166_v63 = vadd.f32 %v5095_v11, %v9565_v27 }
 0x6ab   : > { %v5170_v43 = vadd.f32 %v5111_v30, %v9565_v27  ;;  %v5167_v37 = vadd.f32 %v5099_v53, %v9565_v27  ;;  %v5168_v35 = vadd.f32 %v5103_v10, %v9565_v27  ;;  %v9640_v12 = vmul.f32 %v6570_v8, %v6566_v4 }
 0x6ac   : > { %v5119_v18 = vrot.slane %v9588_v22, %v9569_v44  ;;  %v5127_v19 = vrot.slane %v9588_v22, %v9577_v57  ;;  %v9618_v56 = vrot.slane %v5165_v51, %v9569_v44  ;;  %v9621_v45 = vrot.slane %v5164_v34, %v9569_v44 }
 0x6ad   : > { %v9624_v26 = vrot.slane %v5166_v63, %v9569_v44  ;;  %v9627_v13 = vrot.slane %v5170_v43, %v9569_v44  ;;  %v9630_v33 = vrot.slane %v5167_v37, %v9569_v44  ;;  %v9634_v42 = vrot.slane %v5168_v35, %v9569_v44 }
 0x6ae   : > { %v5172_v41 = vadd.f32 %v5119_v18, %v9565_v27  ;;  %v5174_v50 = vadd.f32 %v5127_v19, %v9565_v27  ;;  %v5288_v14 = vrot.slane %v9602_v52, %v9569_v44  ;;  %v5135_v4 = vrot.slane %v9588_v22, %v9586_v48 }
 0x6af   : > { %v5115_v8 = vrot.slane %v9571_v17, %v9638_v31  ;;  %v5296_v53 = vrot.slane %v9602_v52, %v9577_v57  ;;  %v5312_v10 = vrot.slane %v9602_v52, %v9580_v29  ;;  %v5300_v51 = vrot.slane %v9602_v52, %v9583_v3 }
 0x6b0   : > { %v9645_v55 = vrot.slane %v5172_v41, %v9569_v44  ;;  %v9653_v11 = vrot.slane %v5174_v50, %v9569_v44  ;;  %v5320_v34 = vrot.slane %v9640_v12, %v9569_v44  ;;  %v5304_v19 = vrot.slane %v9602_v52, %v9586_v48 }
 0x6b4   : > { %v5278_v61 = vpop.permute.xlu1 %5277 }
 0x6b5   : > { %v9648_v38 = vmul.f32 %v9549_v36, %v5278_v61  ;;  %v5328_v61 = vrot.slane %v9640_v12, %v9577_v57  ;;  %v5169_v57 = vadd.f32 %v5107_v16, %v9565_v27 }
 0x6b7   : > { %v5366_v30 = vadd.f32 %v5292_v46, %v9648_v38  ;;  %v5365_v36 = vadd.f32 %v5288_v14, %v9648_v38  ;;  %v5367_v43 = vadd.f32 %v5296_v53, %v9648_v38  ;;  %v5371_v37 = vadd.f32 %v5312_v10, %v9648_v38 }
 0x6b8   : > { %v5368_v18 = vadd.f32 %v5300_v51, %v9648_v38  ;;  %v5373_v35 = vadd.f32 %v5320_v34, %v9648_v38  ;;  %v5369_v46 = vadd.f32 %v5304_v19, %v9648_v38  ;;  %v5308_v14 = vrot.slane %v9602_v52, %v9605_v39 }
 0x6b9   : > { %v5388_v63 = vrot.slane %v5366_v30, %v9569_v44  ;;  %v5384_v17 = vrot.slane %v5365_v36, %v9569_v44  ;;  %v5392_v41 = vrot.slane %v5367_v43, %v9569_v44  ;;  %v5408_v50 = vrot.slane %v5371_v37, %v9569_v44 }
 0x6ba   : > { %v5336_v30 = vrot.slane %v9640_v12, %v9586_v48  ;;  %v5396_v36 = vrot.slane %v5368_v18, %v9569_v44  ;;  %v5416_v53 = vrot.slane %v5373_v35, %v9569_v44  ;;  %v5375_v10 = vadd.f32 %v5328_v61, %v9648_v38 }
 0x6bb   : > { %5463 = vrot.lane.b32.xlu1 %v5388_v63, %s6637_s23  ;;  %5461 = vrot.lane.b32.xlu0 %v5384_v17, %s6637_s23  ;;  %v5176_v51 = vadd.f32 %v5135_v4, %v9565_v27  ;;  %v5171_v34 = vadd.f32 %v5115_v8, %v9565_v27  ;;  %v5143_v63 = vrot.slane %v9588_v22, %v9580_v29 }
 0x6bc   : > { %v5123_v48 = vrot.slane %v9588_v22, %v9574_v28  ;;  %v5131_v17 = vrot.slane %v9588_v22, %v9583_v3  ;;  %v5139_v43 = vrot.slane %v9588_v22, %v9605_v39  ;;  %v5147_v37 = vrot.slane %v9588_v22, %v9638_v31 }
 0x6bd   : > { %v9709_v16 = vrot.slane %v5169_v57, %v9569_v44  ;;  %v9712_v4 = vrot.slane %v5176_v51, %v9569_v44  ;;  %v9715_v8 = vrot.slane %v5171_v34, %v9569_v44  ;;  %v5178_v18 = vadd.f32 %v5143_v63, %v9565_v27 }
 0x6be   : > { %v5173_v35 = vadd.f32 %v5123_v48, %v9565_v27  ;;  %v5175_v19 = vadd.f32 %v5131_v17, %v9565_v27  ;;  %v5177_v22 = vadd.f32 %v5139_v43, %v9565_v27  ;;  %v5370_v61 = vadd.f32 %v5308_v14, %v9648_v38 }
 0x6bf   : > { %5465 = vrot.lane.b32.xlu1 %v5392_v41, %s6637_s23  ;;  %5473 = vrot.lane.b32.xlu0 %v5408_v50, %s6637_s23  ;;  %v5400_v41 = vrot.slane %v5369_v46, %v9569_v44  ;;  %v5424_v50 = vrot.slane %v5375_v10, %v9569_v44  ;;  %v5377_v57 = vadd.f32 %v5336_v30, %v9648_v38 }
 0x6c0   : > { %v9728_v51 = vrot.slane %v5178_v18, %v9569_v44  ;;  %v9736_v34 = vrot.slane %v5175_v19, %v9569_v44  ;;  %v9739_v46 = vrot.slane %v5177_v22, %v9569_v44  ;;  %v5179_v10 = vadd.f32 %v5147_v37, %v9565_v27 }
 0x6c1   : > { %v5344_v14 = vrot.slane %v9640_v12, %v9580_v29  ;;  %v5404_v63 = vrot.slane %v5370_v61, %v9569_v44  ;;  %v5324_v27 = vrot.slane %v9640_v12, %v9574_v28  ;;  %v5332_v18 = vrot.slane %v9640_v12, %v9583_v3 }
 0x6c2   : > { %v9751_v17 = vrot.slane %v5179_v10, %v9569_v44  ;;  %v5340_v28 = vrot.slane %v9640_v12, %v9605_v39 }
 0x6c3   : > { %5467 = vrot.lane.b32.xlu1 %v5396_v36, %s6637_s23  ;;  %5477 = vrot.lane.b32.xlu0 %v5416_v53, %s6637_s23  ;;  %v9731_v36 = vrot.slane %v5173_v35, %v9569_v44  ;;  %v5316_v53 = vrot.slane %v9602_v52, %v9638_v31  ;;  %v5432_v52 = vrot.slane %v5377_v57, %v9569_v44 }
 0x6c4   : > { %v5379_v48 = vadd.f32 %v5344_v14, %v9648_v38  ;;  %v5374_v37 = vadd.f32 %v5324_v27, %v9648_v38  ;;  %v5376_v19 = vadd.f32 %v5332_v18, %v9648_v38 }
 0x6c5   : > { %v5372_v30 = vadd.f32 %v5316_v53, %v9648_v38  ;;  %v10473_v53 = vld [vmem:[#allocation35_spill] sm:$0xff] }
 0x6c6   : > { %v5440_v43 = vrot.slane %v5379_v48, %v9569_v44  ;;  %v5420_v35 = vrot.slane %v5374_v37, %v9569_v44  ;;  %v5428_v22 = vrot.slane %v5376_v19, %v9569_v44  ;;  %v10474_v10 = vmax.f32 %v10473_v53, 0.0  ;;  %v10479_v48 = vld [vmem:[#allocation39_spill] sm:$0xff] }
 0x6c7   : > { %5469 = vrot.lane.b32.xlu1 %v5400_v41, %s6637_s23  ;;  %5481 = vrot.lane.b32.xlu0 %v5424_v50, %s6637_s23  ;;  %v5412_v29 = vrot.slane %v5372_v30, %v9569_v44  ;;  %v5378_v41 = vadd.f32 %v5340_v28, %v9648_v38  ;;  %v5348_v50 = vrot.slane %v9640_v12, %v9638_v31  ;;  %v10475_v30 = vld [vmem:[#allocation3_spill] sm:$0xff]  ;;  %v10477_v12 = vld [vmem:[#allocation34_spill] sm:$0xff]  ;;  %v10480_v27 = vmax.f32 %v10479_v48, 0.0 }
 0x6c8   : > { %v5246_v14 = vmul.f32 %v9618_v56, %v10474_v10 }
 0x6c9   : > { %v5436_v3 = vrot.slane %v5378_v41, %v9569_v44  ;;  %v5380_v61 = vadd.f32 %v5348_v50, %v9648_v38 }
 0x6cb   : > { %5471 = vrot.lane.b32.xlu1 %v5404_v63, %s6637_s23  ;;  %5485 = vrot.lane.b32.xlu0 %v5432_v52, %s6637_s23  ;;  %v5444_v57 = vrot.slane %v5380_v61, %v9569_v44  ;;  %v10476_v63 = vmax.f32 %v10475_v30, 0.0  ;;  %v10478_v52 = vmax.f32 %v10477_v12, 0.0  ;;  %v5245_v44 = vmul.f32 %v9621_v45, %v10480_v27  ;;  %v10489_v30 = vld [vmem:[#allocation5_spill] sm:$0xff] }
 0x6cd   : > { %v5247_v31 = vmul.f32 %v9618_v56, %v10476_v63  ;;  %v5244_v38 = vmul.f32 %v9621_v45, %v10478_v52  ;;  %v10490_v63 = vmax.f32 %v10489_v30, 0.0  ;;  %v10491_v52 = vld [vmem:[#allocation24_spill] sm:$0xff] }
 0x6ce   : > { %v10492_v48 = vmax.f32 %v10491_v52, 0.0 }
 0x6cf   : > { %5475 = vrot.lane.b32.xlu1 %v5412_v29, %s6637_s23  ;;  %5489 = vrot.lane.b32.xlu0 %v5440_v43, %s6637_s23  ;;  %v10481_v43 = vld [vmem:[#allocation14_spill] sm:$0xff]  ;;  %v5248_v12 = vmul.f32 %v9624_v26, %v10490_v63  ;;  %v10505_v63 = vld [vmem:[#allocation19_spill] sm:$0xff] }
 0x6d0   : > { %v10482_v37 = vmax.f32 %v10481_v43, 0.0  ;;  %v5249_v27 = vmul.f32 %v9624_v26, %v10492_v48  ;;  %v10497_v26 = vmax.f32 %v8973_v62, 0.0  ;;  %v10506_v52 = vmax.f32 %v10505_v63, 0.0  ;;  %v10507_v48 = vld [vmem:[#allocation47_spill] sm:$0xff]  ;;  %v10523_v63 = vld [vmem:[#allocation45_spill] sm:$0xff] }
 0x6d3   : > { %5479 = vrot.lane.b32.xlu1 %v5420_v35, %s6637_s23  ;;  %v10483_v35 = vld [vmem:[#allocation8_spill] sm:$0xff] }
 0x6d4   : > { %v10484_v19 = vmax.f32 %v10483_v35, 0.0  ;;  %v10495_v35 = vld [vmem:[#allocation41_spill] sm:$0xff] }
 0x6d7   : > { %5483 = vrot.lane.b32.xlu1 %v5428_v22, %s6637_s23  ;;  %v10485_v22 = vld [vmem:[#allocation12_spill] sm:$0xff] }
 0x6d8   : > { %v10486_v41 = vmax.f32 %v10485_v22, 0.0 }
 0x6db   : > { %5487 = vrot.lane.b32.xlu1 %v5436_v3, %s6637_s23  ;;  %v10487_v3 = vld [vmem:[#allocation17_spill] sm:$0xff] }
 0x6dc   : > { %v10488_v56 = vmax.f32 %v10487_v3, 0.0 }
 0x6df   : > { %5491 = vrot.lane.b32.xlu1 %v5444_v57, %s6637_s23 }
 0x72d   : > { %v5464_v39 = vpop.permute.xlu1 %5463  ;;  %v5462_v29 = vpop.permute.xlu0 %5461 }
 0x72e   : > { %v5511_v18 = vmul.f32 %v5464_v39, %v10482_v37  ;;  %v5512_v28 = vmul.f32 %v5464_v39, %v10484_v19  ;;  %v5509_v50 = vmul.f32 %v5462_v29, %v10486_v41  ;;  %v5510_v61 = vmul.f32 %v5462_v29, %v10488_v56  ;;  %v10493_v29 = vld [vmem:[#allocation31_spill] sm:$0xff]  ;;  %v10501_v41 = vld [vmem:[#allocation32_spill] sm:$0xff] }
 0x72f   : > { %v10494_v43 = vmax.f32 %v10493_v29, 0.0  ;;  %v10496_v19 = vmax.f32 %v10495_v35, 0.0 }
 0x730   : > { %v5543_v45 = vadd.f32 %v5511_v18, %v5246_v14  ;;  %v5544_v57 = vadd.f32 %v5512_v28, %v5247_v31  ;;  %v5541_v53 = vadd.f32 %v5509_v50, %v5244_v38  ;;  %v5542_v10 = vadd.f32 %v5510_v61, %v5245_v44  ;;  %v10498_v44 = vld [vmem:[#allocation25_spill] sm:$0xff] }
 0x731   : > { %v5466_v39 = vpop.permute.xlu1 %5465  ;;  %v5256_v37 = vmul.f32 %v9627_v13, %v10494_v43  ;;  %v5257_v14 = vmul.f32 %v9627_v13, %v10496_v19  ;;  %v5474_v31 = vpop.permute.xlu0 %5473  ;;  %v10499_v18 = vmax.f32 %v10498_v44, 0.0  ;;  %v10500_v13 = vmax.f32 %v9092_v6, 0.0  ;;  %v10509_v43 = vld [vmem:[#allocation50_spill] sm:$0xff] }
 0x732   : > { %5575 = vst.msk [vmem:[%s9803_s29 + $0x10] sm:$0xff] %vm1127_vm2, %v5543_v45  ;;  %5576 = vst.msk [vmem:[%s9803_s29 + $0x18] sm:$0xff] %vm1127_vm2, %v5544_v57  ;;  %v5513_v38 = vmul.f32 %v5466_v39, %v10497_v26  ;;  %v10502_v50 = vmax.f32 %v10501_v41, 0.0  ;;  %v10508_v6 = vmax.f32 %v10507_v48, 0.0  ;;  %v10510_v35 = vmax.f32 %v10509_v43, 0.0 }
 0x733   : > { %5573 = vst.msk [vmem:[%s9803_s29] sm:$0xff] %vm1127_vm2, %v5541_v53  ;;  %5574 = vst.msk [vmem:[%s9803_s29 + $0x8] sm:$0xff] %vm1127_vm2, %v5542_v10  ;;  %v5514_v28 = vmul.f32 %v5466_v39, %v10499_v18  ;;  %v5521_v22 = vmul.f32 %v5474_v31, %v10500_v13  ;;  %v10503_v10 = vld [vmem:[#allocation7_spill] sm:$0xff]  ;;  %v5251_v39 = vmul.f32 %v9630_v33, %v10506_v52  ;;  %v10517_v18 = vld [vmem:[#allocation30_spill] sm:$0xff]  ;;  %v10524_v52 = vmax.f32 %v10523_v63, 0.0 }
 0x734   : > { %v5522_v3 = vmul.f32 %v5474_v31, %v10502_v50  ;;  %v5545_v56 = vadd.f32 %v5513_v38, %v5248_v12  ;;  %v10504_v62 = vmax.f32 %v10503_v10, 0.0  ;;  %v5260_v29 = vmul.f32 %v9645_v55, %v10508_v6  ;;  %v10515_v38 = vld [vmem:[#allocation27_spill] sm:$0xff]  ;;  %v10521_v10 = vld [vmem:[#allocation26_spill] sm:$0xff]  ;;  %v10525_v6 = vld [vmem:[#allocation4_spill] sm:$0xff] }
 0x735   : > { %v5546_v61 = vadd.f32 %v5514_v28, %v5249_v27  ;;  %v5553_v45 = vadd.f32 %v5521_v22, %v5256_v37  ;;  %v5468_v53 = vpop.permute.xlu1 %5467  ;;  %v5261_v12 = vmul.f32 %v9645_v55, %v10510_v35  ;;  %v5478_v27 = vpop.permute.xlu0 %5477  ;;  %v10511_v37 = vld [vmem:[#allocation52_spill] sm:$0xff]  ;;  %v10516_v55 = vmax.f32 %v10515_v38, 0.0 }
 0x736   : > { %v5554_v57 = vadd.f32 %v5522_v3, %v5257_v14  ;;  %v5250_v30 = vmul.f32 %v9630_v33, %v10504_v62  ;;  %5577 = vst.msk [vmem:[%s9803_s29 + $0x20] sm:$0xff] %vm1127_vm2, %v5545_v56  ;;  %v10512_v33 = vmax.f32 %v10511_v37, 0.0  ;;  %v10513_v14 = vld [vmem:[#allocation15_spill] sm:$0xff]  ;;  %v10518_v28 = vmax.f32 %v10517_v18, 0.0 }
 0x737   : > { %5578 = vst.msk [vmem:[%s9803_s29 + $0x28] sm:$0xff] %vm1127_vm2, %v5546_v61  ;;  %5585 = vst.msk [vmem:[%s9803_s29 + $0x60] sm:$0xff] %vm1127_vm2, %v5553_v45  ;;  %v10514_v31 = vmax.f32 %v10513_v14, 0.0  ;;  %v5525_v44 = vmul.f32 %v5478_v27, %v10516_v55  ;;  %v10519_v61 = vld [vmem:[#allocation21_spill] sm:$0xff]  ;;  %v10522_v62 = vmax.f32 %v10521_v10, 0.0  ;;  %v5264_v48 = vmul.f32 %v9653_v11, %v10524_v52  ;;  %v10533_v14 = vld [vmem:[#allocation56_spill] sm:$0xff] }
 0x738   : > { %5586 = vst.msk [vmem:[%s9803_s29 + $0x68] sm:$0xff] %vm1127_vm2, %v5554_v57  ;;  %v5515_v19 = vmul.f32 %v5468_v53, %v10512_v33  ;;  %v5526_v13 = vmul.f32 %v5478_v27, %v10518_v28  ;;  %v10520_v45 = vmax.f32 %v10519_v61, 0.0  ;;  %v10526_v43 = vmax.f32 %v10525_v6, 0.0  ;;  %v10531_v33 = vld [vmem:[#allocation18_spill] sm:$0xff]  ;;  %v10539_v61 = vld [vmem:[#allocation16_spill] sm:$0xff]  ;;  %v10545_v6 = vld [vmem:[#allocation11_spill] sm:$0xff] }
 0x739   : > { %v5516_v26 = vmul.f32 %v5468_v53, %v10514_v31  ;;  %v5557_v50 = vadd.f32 %v5525_v44, %v5260_v29  ;;  %v5470_v56 = vpop.permute.xlu1 %5469  ;;  %v5253_v53 = vmul.f32 %v9634_v42, %v10522_v62  ;;  %v10527_v29 = vld [vmem:[#allocation54_spill] sm:$0xff]  ;;  %v10534_v31 = vmax.f32 %v10533_v14, 0.0 }
 0x73a   : > { %v5547_v22 = vadd.f32 %v5515_v19, %v5250_v30  ;;  %v5558_v3 = vadd.f32 %v5526_v13, %v5261_v12  ;;  %v5252_v57 = vmul.f32 %v9634_v42, %v10520_v45  ;;  %v5265_v30 = vmul.f32 %v9653_v11, %v10526_v43  ;;  %v10529_v12 = vld [vmem:[#allocation23_spill] sm:$0xff]  ;;  %v10535_v13 = vld [vmem:[#allocation28_spill] sm:$0xff]  ;;  %v10541_v62 = vld [vmem:[#allocation6_spill] sm:$0xff] }
 0x73b   : > { %v5548_v41 = vadd.f32 %v5516_v26, %v5251_v39  ;;  %v5482_v39 = vpop.permute.xlu0 %5481  ;;  %5589 = vst.msk [vmem:[%s9803_s29 + $0x80] sm:$0xff] %vm1127_vm2, %v5557_v50  ;;  %v10528_v42 = vmax.f32 %v10527_v29, 0.0  ;;  %v10530_v27 = vmax.f32 %v10529_v12, 0.0  ;;  %v10532_v11 = vmax.f32 %v10531_v33, 0.0  ;;  %v10537_v50 = vld [vmem:[#allocation33_spill] sm:$0xff]  ;;  %v10543_v52 = vld [vmem:[#allocation10_spill] sm:$0xff] }
 0x73c   : > { %5579 = vst.msk [vmem:[%s9803_s29 + $0x30] sm:$0xff] %vm1127_vm2, %v5547_v22  ;;  %5590 = vst.msk [vmem:[%s9803_s29 + $0x88] sm:$0xff] %vm1127_vm2, %v5558_v3  ;;  %v5530_v26 = vmul.f32 %v5482_v39, %v10534_v31  ;;  %v10536_v22 = vmax.f32 %v10535_v13, 0.0  ;;  %v10538_v3 = vmax.f32 %v10537_v50, 0.0  ;;  %v10540_v45 = vmax.f32 %v10539_v61, 0.0 }
 0x73d   : > { %5580 = vst.msk [vmem:[%s9803_s29 + $0x38] sm:$0xff] %vm1127_vm2, %v5548_v41  ;;  %v5517_v35 = vmul.f32 %v5470_v56, %v10528_v42  ;;  %v5518_v37 = vmul.f32 %v5470_v56, %v10530_v27  ;;  %v5529_v19 = vmul.f32 %v5482_v39, %v10532_v11  ;;  %v5472_v28 = vpop.permute.xlu1 %5471  ;;  %v10542_v63 = vmax.f32 %v10541_v62, 0.0 }
 0x73e   : > { %v5562_v18 = vadd.f32 %v5530_v26, %v5265_v30  ;;  %v5254_v41 = vmul.f32 %v9709_v16, %v10536_v22  ;;  %v5255_v56 = vmul.f32 %v9709_v16, %v10538_v3  ;;  %v5268_v10 = vmul.f32 %v9712_v4, %v10540_v45  ;;  %v10551_v26 = vld [vmem:[#allocation53_spill] sm:$0xff] }
 0x73f   : > { %v5549_v38 = vadd.f32 %v5517_v35, %v5252_v57  ;;  %v5550_v55 = vadd.f32 %v5518_v37, %v5253_v53  ;;  %v5561_v44 = vadd.f32 %v5529_v19, %v5264_v48  ;;  %v5269_v57 = vmul.f32 %v9712_v4, %v10542_v63  ;;  %v5486_v53 = vpop.permute.xlu0 %5485  ;;  %v10547_v37 = vld [vmem:[#allocation43_spill] sm:$0xff]  ;;  %v10549_v19 = vld [vmem:[#allocation40_spill] sm:$0xff] }
 0x740   : > { %5594 = vst.msk [vmem:[%s9803_s29 + $0xa8] sm:$0xff] %vm1127_vm2, %v5562_v18  ;;  %v10544_v16 = vmax.f32 %v10543_v52, 0.0  ;;  %v10546_v43 = vmax.f32 %v10545_v6, 0.0  ;;  %v5533_v4 = vmul.f32 %v5486_v53, %v4209_v20  ;;  %v5534_v39 = vmul.f32 %v5486_v53, %v4210_v7  ;;  %v10556_v18 = vld [vmem:[#allocation9_spill] sm:$0xff] }
 0x741   : > { %5581 = vst.msk [vmem:[%s9803_s29 + $0x40] sm:$0xff] %vm1127_vm2, %v5549_v38  ;;  %5582 = vst.msk [vmem:[%s9803_s29 + $0x48] sm:$0xff] %vm1127_vm2, %v5550_v55  ;;  %v5476_v27 = vpop.permute.xlu1 %5475  ;;  %v10548_v33 = vmax.f32 %v10547_v37, 0.0  ;;  %v10550_v14 = vmax.f32 %v10549_v19, 0.0  ;;  %v10552_v54 = vmax.f32 %v10551_v26, 0.0  ;;  %v5273_v7 = vmul.f32 %v9728_v51, %v10553_v15 }
 0x742   : > { %5593 = vst.msk [vmem:[%s9803_s29 + $0xa0] sm:$0xff] %vm1127_vm2, %v5561_v44  ;;  %v5519_v48 = vmul.f32 %v5472_v28, %v10544_v16  ;;  %v5520_v30 = vmul.f32 %v5472_v28, %v10546_v43  ;;  %v5565_v35 = vadd.f32 %v5533_v4, %v5268_v10  ;;  %v5566_v12 = vadd.f32 %v5534_v39, %v5269_v57  ;;  %v10562_v10 = vld [vmem:[#allocation22_spill] sm:$0xff]  ;;  %v10564_v57 = vld [vmem:[#allocation29_spill] sm:$0xff] }
 0x743   : > { %v5258_v11 = vmul.f32 %v9715_v8, %v10548_v33  ;;  %v5259_v31 = vmul.f32 %v9715_v8, %v10550_v14  ;;  %v5272_v20 = vmul.f32 %v9728_v51, %v10552_v54  ;;  %v5490_v38 = vpop.permute.xlu0 %5489  ;;  %v10554_v8 = vld [vmem:[#allocation13_spill] sm:$0xff]  ;;  %v10557_v60 = vmax.f32 %v10556_v18, 0.0  ;;  %v10566_v43 = vld [vmem:[#allocation2_spill] sm:$0xff] }
 0x744   : > { %v5551_v29 = vadd.f32 %v5519_v48, %v5254_v41  ;;  %v5552_v42 = vadd.f32 %v5520_v30, %v5255_v56  ;;  %5597 = vst.msk [vmem:[%s9803_s29 + $0xc0] sm:$0xff] %vm1127_vm2, %v5565_v35  ;;  %5598 = vst.msk [vmem:[%s9803_s29 + $0xc8] sm:$0xff] %vm1127_vm2, %v5566_v12  ;;  %v10555_v55 = vmax.f32 %v10554_v8, 0.0  ;;  %v5537_v51 = vmul.f32 %v5490_v38, %v4213_v58  ;;  %v10568_v39 = vld [vmem:[#allocation49_spill] sm:$0xff] }
 0x745   : > { %v5524_v28 = vmul.f32 %v5476_v27, %v10557_v60  ;;  %v5538_v13 = vmul.f32 %v5490_v38, %v4214_v2  ;;  %v5480_v56 = vpop.permute.xlu1 %5479  ;;  %v10559_v58 = vmax.f32 %v10558_v32, 0.0  ;;  %v10560_v2 = vld [vmem:[#allocation42_spill] sm:$0xff]  ;;  %v10563_v62 = vmax.f32 %v10562_v10, 0.0 }
 0x746   : > { %5583 = vst.msk [vmem:[%s9803_s29 + $0x50] sm:$0xff] %vm1127_vm2, %v5551_v29  ;;  %5584 = vst.msk [vmem:[%s9803_s29 + $0x58] sm:$0xff] %vm1127_vm2, %v5552_v42  ;;  %v5523_v44 = vmul.f32 %v5476_v27, %v10555_v55  ;;  %v5569_v50 = vadd.f32 %v5537_v51, %v5272_v20  ;;  %v10561_v61 = vmax.f32 %v10560_v2, 0.0  ;;  %v10565_v53 = vmax.f32 %v10564_v57, 0.0  ;;  %v10570_v42 = vld [vmem:[#allocation20_spill] sm:$0xff]  ;;  %v10572_v27 = vld [vmem:[#allocation55_spill] sm:$0xff] }
 0x747   : > { %v5556_v41 = vadd.f32 %v5524_v28, %v5259_v31  ;;  %v5570_v3 = vadd.f32 %v5538_v13, %v5273_v7  ;;  %v5262_v21 = vmul.f32 %v9731_v36, %v10559_v58  ;;  %v5527_v63 = vmul.f32 %v5480_v56, %v10563_v62  ;;  %v10574_v31 = vld [vmem:[#allocation46_spill] sm:$0xff] }
 0x748   : > { %v5555_v22 = vadd.f32 %v5523_v44, %v5258_v11  ;;  %5601 = vst.msk [vmem:[%s9803_s29 + $0xe0] sm:$0xff] %vm1127_vm2, %v5569_v50  ;;  %v5263_v45 = vmul.f32 %v9731_v36, %v10561_v61  ;;  %v5528_v52 = vmul.f32 %v5480_v56, %v10565_v53  ;;  %v10567_v30 = vmax.f32 %v10566_v43, 0.0 }
 0x749   : > { %5588 = vst.msk [vmem:[%s9803_s29 + $0x78] sm:$0xff] %vm1127_vm2, %v5556_v41  ;;  %5602 = vst.msk [vmem:[%s9803_s29 + $0xe8] sm:$0xff] %vm1127_vm2, %v5570_v3  ;;  %v5559_v16 = vadd.f32 %v5527_v63, %v5262_v21  ;;  %v5484_v6 = vpop.permute.xlu1 %5483  ;;  %v10569_v36 = vmax.f32 %v10568_v39, 0.0  ;;  %v10571_v35 = vmax.f32 %v10570_v42, 0.0  ;;  %v10573_v37 = vmax.f32 %v10572_v27, 0.0 }
 0x74a   : > { %5587 = vst.msk [vmem:[%s9803_s29 + $0x70] sm:$0xff] %vm1127_vm2, %v5555_v22  ;;  %v5560_v48 = vadd.f32 %v5528_v52, %v5263_v45  ;;  %v5266_v4 = vmul.f32 %v9736_v34, %v10567_v30  ;;  %v10575_v26 = vmax.f32 %v10574_v31, 0.0  ;;  %v5274_v18 = vmul.f32 %v9751_v17, %v3033_v0 }
 0x74b   : > { %5591 = vst.msk [vmem:[%s9803_s29 + $0x90] sm:$0xff] %vm1127_vm2, %v5559_v16  ;;  %v5267_v29 = vmul.f32 %v9736_v34, %v10569_v36  ;;  %v5531_v12 = vmul.f32 %v5484_v6, %v10571_v35  ;;  %v5532_v33 = vmul.f32 %v5484_v6, %v10573_v37  ;;  %v10576_v34 = vld [vmem:[#allocation51_spill] sm:$0xff] }
 0x74c   : > { %5592 = vst.msk [vmem:[%s9803_s29 + $0x98] sm:$0xff] %vm1127_vm2, %v5560_v48  ;;  %v5270_v54 = vmul.f32 %v9739_v46, %v10575_v26  ;;  %v10577_v20 = vmax.f32 %v10576_v34, 0.0 }
 0x74d   : > { %v5563_v11 = vadd.f32 %v5531_v12, %v5266_v4  ;;  %v5564_v19 = vadd.f32 %v5532_v33, %v5267_v29  ;;  %v5488_v14 = vpop.permute.xlu1 %5487 }
 0x74e   : > { %v5271_v15 = vmul.f32 %v9739_v46, %v10577_v20  ;;  %v5535_v7 = vmul.f32 %v5488_v14, %v4211_v24  ;;  %v5536_v38 = vmul.f32 %v5488_v14, %v4212_v47  ;;  %v5275_v46 = vmul.f32 %v9751_v17, %v3034_v1 }
 0x74f   : > { %5595 = vst.msk [vmem:[%s9803_s29 + $0xb0] sm:$0xff] %vm1127_vm2, %v5563_v11  ;;  %5596 = vst.msk [vmem:[%s9803_s29 + $0xb8] sm:$0xff] %vm1127_vm2, %v5564_v19 }
 0x750   : > { %v5567_v8 = vadd.f32 %v5535_v7, %v5270_v54  ;;  %v5568_v55 = vadd.f32 %v5536_v38, %v5271_v15 }
 0x751   : > { %v5492_v44 = vpop.permute.xlu1 %5491 }
 0x752   : > { %5599 = vst.msk [vmem:[%s9803_s29 + $0xd0] sm:$0xff] %vm1127_vm2, %v5567_v8  ;;  %5600 = vst.msk [vmem:[%s9803_s29 + $0xd8] sm:$0xff] %vm1127_vm2, %v5568_v55  ;;  %v5539_v23 = vmul.f32 %v5492_v44, %v4215_v40  ;;  %v5540_v24 = vmul.f32 %v5492_v44, %v10578_v59 }
 0x754   : > { %v5571_v47 = vadd.f32 %v5539_v23, %v5274_v18  ;;  %v5572_v60 = vadd.f32 %v5540_v24, %v5275_v46 }
 0x756   : > { %5603 = vst.msk [vmem:[%s9803_s29 + $0xf0] sm:$0xff] %vm1127_vm2, %v5571_v47  ;;  %5604 = vst.msk [vmem:[%s9803_s29 + $0xf8] sm:$0xff] %vm1127_vm2, %v5572_v60 }
 0x757 PF: > { %s22_s21 = sadd.s32 1, %s6635_s21  }
 0x758   : > { %p19_p4 = scmp.ge.s32.totalorder %s22_s21, 4  }
 0x75a   :  { %21 = sbr.rel (!%p19_p4) target bundleno = 1 (0x1), region = 98 }

</bundles_post_ra>
